<compile_context>
chip_gen: v6e
topology: v6e:2x2x1
jax: 0.10.0
libtpu: 0.0.40
codegen_flags: <defaults>
</compile_context>

<pallas_src>
import functools

import jax
import jax.numpy as jnp
from jax.experimental import pallas as pl
from jax.experimental.pallas import tpu as pltpu

GN_EPS = 1e-5     # nn.GroupNorm default eps
LN_EPS = 1e-5     # nn.LayerNorm default eps
NUM_GROUPS = 32   # normalization() -> GroupNorm32(32, channels)

# Rows of the packed (N_VEC, inner) f32 vector table.
(_B_IN, _LN1G, _LN1B, _BO1, _LN2G, _LN2B, _BO2,
 _LN3G, _LN3B, _BFF2) = range(10)
_N_VEC = 10
# Columns of the packed (C, 3) channel table.
_GN_G, _GN_B, _B_OUT = range(3)


def _gelu_tanh(x):
    # tanh-approximate GELU; deviates ~1e-3 from PyTorch's exact F.gelu, well
    # inside the bf16-matmul tolerance.  tanh runs on the EUP, a slot that is
    # otherwise idle in this (VALU/MXU-bound) epilogue.
    c = 0.7978845608028654  # sqrt(2/pi)
    return 0.5 * x * (1.0 + jnp.tanh(c * (x + 0.044715 * x * x * x)))


# ---------------------------------------------------------------------------
# One fused kernel invocation per batch element:
#   GroupNorm32 -> proj_in -> [attn1, attn2, GEGLU FF] -> proj_out -> +x_in
# ---------------------------------------------------------------------------
def _spatial_transformer_kernel(
        x_ref, ctx_ref, chan_ref, gmat_ref, vec_ref, win_ref,
        wq1_ref, wk1_ref, wv1_ref, wo1_ref,
        wq2_ref, wk2_ref, wv2_ref, wo2_ref,
        wff1_ref, bff1_ref, wff2_ref, wout_t_ref,
        o_ref, attn_scratch, *, heads, dim_head):
    f32 = jnp.float32
    bf16 = jnp.bfloat16

    def vrow(i):
        return vec_ref[i:i + 1, :]                       # (1, inner) static slice

    # ---- GroupNorm32 on the channel-major (C, HW) input block --------------
    x_chw = x_ref[...].astype(f32)                       # (C, HW)
    c_dim, hw = x_chw.shape
    cpg = c_dim // NUM_GROUPS
    inv_n = 1.0 / float(hw * cpg)
    s1 = jnp.sum(x_chw, axis=1, keepdims=True)           # (C, 1)  sum x
    s2 = jnp.sum(x_chw * x_chw, axis=1, keepdims=True)   # (C, 1)  sum x^2
    gm = gmat_ref[...]                                    # (C, C) 0/1 same-group
    # Per-group reduction as a tiny MXU matmul; the result is already broadcast
    # back to per-channel (C, 1) columns (no cross-sublane shuffles needed).
    mean = jnp.dot(gm, s1, preferred_element_type=f32) * inv_n
    ex2 = jnp.dot(gm, s2, preferred_element_type=f32) * inv_n
    # One-pass variance; clamp guards the E[x^2]-E[x]^2 cancellation corner.
    var = jnp.maximum(ex2 - mean * mean, 0.0)
    rstd = jax.lax.rsqrt(var + GN_EPS)
    aff_a = chan_ref[:, _GN_G:_GN_G + 1] * rstd           # gamma/beta folded into
    aff_b = chan_ref[:, _GN_B:_GN_B + 1] - mean * aff_a   # one per-channel affine
    xn = (x_chw * aff_a + aff_b).astype(bf16)             # (C, HW)

    # proj_in (1x1 conv): contract the channel (sublane) axis directly
    # (transposed-LHS matmul) -> token-major (HW, inner); no explicit transpose.
    x = jax.lax.dot_general(xn, win_ref[...], (((0,), (0,)), ((), ())),
                            preferred_element_type=f32) + vrow(_B_IN)

    ctx = ctx_ref[...]                                     # (M, Dc) bf16

    def layer_norm(z, gi, bi):
        m = jnp.mean(z, axis=-1, keepdims=True)
        v = jnp.mean((z - m) ** 2, axis=-1, keepdims=True)
        return (z - m) * jax.lax.rsqrt(v + LN_EPS) * vrow(gi) + vrow(bi)

    def attention(z, c_, wq_ref, wk_ref, wv_ref, wo_ref, bo_idx):
        zb = z.astype(bf16)
        cb = c_.astype(bf16)
        # Head-fused lane-dense projections (bf16 MXU, f32 acc); the 1/sqrt(dh)
        # scale is already folded into wq by the wrapper.
        q = jnp.dot(zb, wq_ref[...], preferred_element_type=f32).astype(bf16)
        k = jnp.dot(cb, wk_ref[...], preferred_element_type=f32).astype(bf16)
        v = jnp.dot(cb, wv_ref[...], preferred_element_type=f32).astype(bf16)
        for h in range(heads):                  # static loop; only the per-head
            lo = h * dim_head                   # sim and p@v stay per head
            qh = q[:, lo:lo + dim_head]         # (N, dh)
            kh = k[:, lo:lo + dim_head]         # (M, dh)
            vh = v[:, lo:lo + dim_head]         # (M, dh)
            sim = jax.lax.dot_general(qh, kh, (((1,), (1,)), ((), ())),
                                      preferred_element_type=f32)   # (N, M)
            sim = sim - jnp.max(sim, axis=-1, keepdims=True)
            p = jnp.exp(sim)
            p = p * pl.reciprocal(jnp.sum(p, axis=-1, keepdims=True), approx=True)
            # Head output goes straight into its VMEM scratch slot -- no
            # lane-concatenate relayout before the fused output projection.
            attn_scratch[:, lo:lo + dim_head] = jnp.dot(
                p.astype(bf16), vh, preferred_element_type=f32)
        o = attn_scratch[...].astype(bf16)                  # (N, inner)
        return jnp.dot(o, wo_ref[...], preferred_element_type=f32) + vrow(bo_idx)

    # attn1: self-attention + residual
    h1 = layer_norm(x, _LN1G, _LN1B)
    x = attention(h1, h1, wq1_ref, wk1_ref, wv1_ref, wo1_ref, _BO1) + x
    # attn2: cross-attention + residual
    h2 = layer_norm(x, _LN2G, _LN2B)
    x = attention(h2, ctx, wq2_ref, wk2_ref, wv2_ref, wo2_ref, _BO2) + x
    # GEGLU feed-forward + residual
    h3 = layer_norm(x, _LN3G, _LN3B).astype(bf16)
    proj = jnp.dot(h3, wff1_ref[...], preferred_element_type=f32) + bff1_ref[...]
    half = proj.shape[-1] // 2
    ff = (proj[:, :half] * _gelu_tanh(proj[:, half:])).astype(bf16)
    x = jnp.dot(ff, wff2_ref[...], preferred_element_type=f32) + vrow(_BFF2) + x

    # proj_out emitted directly in (C, HW) layout (lane-dense along HW):
    #   out[c, hw] = sum_d w_out[d, c] * x[hw, d]     (wout_t is (C, D)).
    out_chw = jax.lax.dot_general(wout_t_ref[...], x.astype(bf16),
                                  (((1,), (1,)), ((), ())),
                                  preferred_element_type=f32)
    # Residual with the original input, re-read from the still-resident input
    # block instead of holding it live across the whole kernel.
    o_ref[...] = out_chw + chan_ref[:, _B_OUT:_B_OUT + 1] + x_ref[...].astype(f32)


# ---------------------------------------------------------------------------
# Wrapper: free NCHW <-> (B, C, HW) reshapes + one pallas_call with grid=(B,).
# ---------------------------------------------------------------------------
def spatial_transformer_forward(x, context, p, n_heads, d_head):
    B, C, H, W = x.shape
    HW = H * W
    inner = n_heads * d_head
    M, Dc = context.shape[1], context.shape[2]
    ff2 = p['wff1'].shape[1]       # 2 * ff_inner
    ffi = p['wff2'].shape[0]       # ff_inner
    cpg = C // NUM_GROUPS

    f32, bf16 = jnp.float32, jnp.bfloat16

    # NCHW -> (B, C, HW) is a pure reshape (no XLA transpose pass over HBM);
    # the kernel consumes and produces the channel-major layout directly.
    x_chw = x.reshape(B, C, HW).astype(f32)
    ctx = context.astype(bf16)                 # only ever a bf16 MXU input

    # 0/1 same-group mask so the GroupNorm group reduction runs on the MXU.
    gid = jnp.arange(C, dtype=jnp.int32) // cpg
    gmat = (gid[:, None] == gid[None, :]).astype(f32)

    # Packed small parameter tables (one DMA each instead of ~14 padded tiles).
    chan = jnp.concatenate([p['gn_g'].reshape(C, 1), p['gn_b'].reshape(C, 1),
                            p['b_out'].reshape(C, 1)], axis=1)              # (C, 3)
    vec = jnp.concatenate([p['b_in'], p['ln1_g'], p['ln1_b'], p['bo1'],
                           p['ln2_g'], p['ln2_b'], p['bo2'],
                           p['ln3_g'], p['ln3_b'], p['bff2']], axis=0)      # (10, inner)

    # Matmul weights in bf16 (halved HBM/VMEM traffic, 2x MXU rate); biases and
    # norm parameters stay f32.  1/sqrt(d_head) folded into wq; proj_out weight
    # pre-transposed so the kernel consumes it as an A @ B^T matmul.
    scale = float(d_head) ** -0.5
    wb = {
        'w_in': p['w_in'],
        'wq1': p['wq1'] * scale, 'wk1': p['wk1'], 'wv1': p['wv1'], 'wo1': p['wo1'],
        'wq2': p['wq2'] * scale, 'wk2': p['wk2'], 'wv2': p['wv2'], 'wo2': p['wo2'],
        'wff1': p['wff1'], 'wff2': p['wff2'],
        'w_out_t': p['w_out'].T,                                           # (C, D)
    }
    wb = {k: v.astype(bf16) for k, v in wb.items()}

    kern = functools.partial(_spatial_transformer_kernel,
                             heads=n_heads, dim_head=d_head)

    def run(const_mode):
        def const(shape):
            n = len(shape)
            if const_mode is None:
                return pl.BlockSpec(shape, lambda i: (0,) * n)
            return pl.BlockSpec(shape, lambda i: (0,) * n, pipeline_mode=const_mode)

        return pl.pallas_call(
            kern,
            grid=(B,),
            in_specs=[
                pl.BlockSpec((None, C, HW), lambda i: (i, 0, 0)),   # x (per step)
                pl.BlockSpec((None, M, Dc), lambda i: (i, 0, 0)),   # ctx (per step)
                const((C, 3)), const((C, C)), const((_N_VEC, inner)),
                const((C, inner)),
                const((inner, inner)), const((inner, inner)),
                const((inner, inner)), const((inner, inner)),
                const((inner, inner)), const((Dc, inner)),
                const((Dc, inner)), const((inner, inner)),
                const((inner, ff2)), const((1, ff2)), const((ffi, inner)),
                const((C, inner)),
            ],
            out_specs=pl.BlockSpec((None, C, HW), lambda i: (i, 0, 0)),
            out_shape=jax.ShapeDtypeStruct((B, C, HW), f32),
            scratch_shapes=[pltpu.VMEM((HW, inner), f32)],   # per-head attn outs
            compiler_params=pltpu.CompilerParams(
                dimension_semantics=("parallel",),
                vmem_limit_bytes=48 * 1024 * 1024),
        )(x_chw, ctx, chan, gmat, vec, wb['w_in'],
          wb['wq1'], wb['wk1'], wb['wv1'], wb['wo1'],
          wb['wq2'], wb['wk2'], wb['wv2'], wb['wo2'],
          wb['wff1'], p['bff1'], wb['wff2'], wb['w_out_t'])

    try:
        # Single-buffer every constant operand: its block index never changes
        # across the grid, so double-buffering only wastes VMEM + bookkeeping.
        out_chw = run(pl.Buffered(1))
    except Exception:   # pragma: no cover - fallback if Buffered(1) unsupported
        out_chw = run(None)

    return out_chw.reshape(B, C, H, W).astype(x.dtype)


# ---------------------------------------------------------------------------
# Pure-JAX f32 reference (mirrors the PyTorch forward) for validation.
# ---------------------------------------------------------------------------
def reference_forward(x, context, p, n_heads, d_head):
    B, C, H, W = x.shape
    HW = H * W
    xt = jnp.transpose(x, (0, 2, 3, 1)).reshape(B, HW, C).astype(jnp.float32)
    # GroupNorm32
    xg = xt.reshape(B, HW, NUM_GROUPS, C // NUM_GROUPS)
    mean = jnp.mean(xg, axis=(1, 3), keepdims=True)
    var = jnp.mean((xg - mean) ** 2, axis=(1, 3), keepdims=True)
    xn = ((xg - mean) / jnp.sqrt(var + GN_EPS)).reshape(B, HW, C)
    xn = xn * p['gn_g'] + p['gn_b']
    y = xn @ p['w_in'] + p['b_in']

    def ln(z, g, b):
        m = z.mean(-1, keepdims=True)
        v = ((z - m) ** 2).mean(-1, keepdims=True)
        return (z - m) / jnp.sqrt(v + LN_EPS) * g + b

    def attn(z, c, wq, wk, wv, wo, bo):
        q, k, v = z @ wq, c @ wk, c @ wv
        B_, N, _ = q.shape
        M_ = k.shape[1]
        qh = q.reshape(B_, N, n_heads, d_head).transpose(0, 2, 1, 3)
        kh = k.reshape(B_, M_, n_heads, d_head).transpose(0, 2, 1, 3)
        vh = v.reshape(B_, M_, n_heads, d_head).transpose(0, 2, 1, 3)
        sim = jnp.einsum('bhnd,bhmd->bhnm', qh, kh) * (d_head ** -0.5)
        pr = jax.nn.softmax(sim, axis=-1)
        o = jnp.einsum('bhnm,bhmd->bhnd', pr, vh)
        o = o.transpose(0, 2, 1, 3).reshape(B_, N, n_heads * d_head)
        return o @ wo + bo

    h1 = ln(y, p['ln1_g'], p['ln1_b'])
    y = attn(h1, h1, p['wq1'], p['wk1'], p['wv1'], p['wo1'], p['bo1']) + y
    h2 = ln(y, p['ln2_g'], p['ln2_b'])
    y = attn(h2, context.astype(jnp.float32),
             p['wq2'], p['wk2'], p['wv2'], p['wo2'], p['bo2']) + y
    h3 = ln(y, p['ln3_g'], p['ln3_b'])
    proj = h3 @ p['wff1'] + p['bff1']
    half = proj.shape[-1] // 2
    ff = proj[..., :half] * jax.nn.gelu(proj[..., half:], approximate=False)
    y = ff @ p['wff2'] + p['bff2'] + y
    out_tok = y @ p['w_out'] + p['b_out'] + xt
    return out_tok.reshape(B, H, W, C).transpose(0, 3, 1, 2)


if __name__ == "__main__":
    # Small shapes consistent with SpatialTransformer:
    #   in_channels=64 (GroupNorm: 32 groups, 2 channels/group), n_heads=4,
    #   d_head=8 -> inner_dim=32, H=W=8 -> 64 tokens; context (B, 8, 16); depth=1.
    B, C, H, W = 2, 64, 8, 8
    n_heads, d_head = 4, 8
    inner = n_heads * d_head
    ff_inner = inner * 4
    ctx_len, ctx_dim = 8, 16

    keys = iter(jax.random.split(jax.random.PRNGKey(0), 32))

    def w(shape, fan_in):
        return jax.random.normal(next(keys), shape, jnp.float32) / jnp.sqrt(float(fan_in))

    params = {
        # norm layers: PyTorch default init (gamma=1, beta=0)
        'gn_g': jnp.ones((1, C), jnp.float32), 'gn_b': jnp.zeros((1, C), jnp.float32),
        # proj_in: Conv2d(C, inner, 1) as (C, inner) matmul + bias
        'w_in': w((C, inner), C), 'b_in': w((1, inner), C),
        'ln1_g': jnp.ones((1, inner), jnp.float32), 'ln1_b': jnp.zeros((1, inner), jnp.float32),
        'wq1': w((inner, inner), inner), 'wk1': w((inner, inner), inner),
        'wv1': w((inner, inner), inner),
        'wo1': w((inner, inner), inner), 'bo1': w((1, inner), inner),
        'ln2_g': jnp.ones((1, inner), jnp.float32), 'ln2_b': jnp.zeros((1, inner), jnp.float32),
        'wq2': w((inner, inner), inner), 'wk2': w((ctx_dim, inner), ctx_dim),
        'wv2': w((ctx_dim, inner), ctx_dim),
        'wo2': w((inner, inner), inner), 'bo2': w((1, inner), inner),
        'ln3_g': jnp.ones((1, inner), jnp.float32), 'ln3_b': jnp.zeros((1, inner), jnp.float32),
        # GEGLU: Linear(inner, 2*ff_inner) then Linear(ff_inner, inner)
        'wff1': w((inner, 2 * ff_inner), inner), 'bff1': w((1, 2 * ff_inner), inner),
        'wff2': w((ff_inner, inner), ff_inner), 'bff2': w((1, inner), ff_inner),
        # NOTE: PyTorch zero-inits proj_out (zero_module); nonzero init here so
        # the full compute path is numerically exercised in this synthetic test.
        'w_out': w((inner, C), inner), 'b_out': w((1, C), inner),
    }

    x = jax.random.normal(next(keys), (B, C, H, W), jnp.float32)
    context = jax.random.normal(next(keys), (B, ctx_len, ctx_dim), jnp.float32)

    out = spatial_transformer_forward(x, context, params, n_heads, d_head)
    out = jax.block_until_ready(out)

    ref = reference_forward(x, context, params, n_heads, d_head)
    assert out.shape == x.shape and out.dtype == x.dtype
    max_err = float(jnp.max(jnp.abs(out - ref)))
    ref_scale = float(jnp.max(jnp.abs(ref)))
    rel_err = max_err / max(ref_scale, 1.0)
    # Kernel feeds the MXU bf16 inputs with f32 accumulation (plus tanh-GELU /
    # approx-reciprocal softmax); ~1e-2 relative deviation from the pure-f32
    # exact reference is expected at this depth.
    assert rel_err < 3e-2, f"relative error too large: {rel_err} (abs {max_err})"
    print("KERNEL_OK")
</pallas_src>

<mosaic_0001>
module attributes {stable_mosaic.version = 11 : i64} {
  func.func @_spatial_transformer_kernel(%arg0: i32, %arg1: memref<1x64x64xf32, #tpu.memory_space<vmem>>, %arg2: memref<1x8x16xbf16, #tpu.memory_space<vmem>>, %arg3: memref<64x3xf32, #tpu.memory_space<vmem>>, %arg4: memref<64x64xf32, #tpu.memory_space<vmem>>, %arg5: memref<10x32xf32, #tpu.memory_space<vmem>>, %arg6: memref<64x32xbf16, #tpu.memory_space<vmem>>, %arg7: memref<32x32xbf16, #tpu.memory_space<vmem>>, %arg8: memref<32x32xbf16, #tpu.memory_space<vmem>>, %arg9: memref<32x32xbf16, #tpu.memory_space<vmem>>, %arg10: memref<32x32xbf16, #tpu.memory_space<vmem>>, %arg11: memref<32x32xbf16, #tpu.memory_space<vmem>>, %arg12: memref<16x32xbf16, #tpu.memory_space<vmem>>, %arg13: memref<16x32xbf16, #tpu.memory_space<vmem>>, %arg14: memref<32x32xbf16, #tpu.memory_space<vmem>>, %arg15: memref<32x256xbf16, #tpu.memory_space<vmem>>, %arg16: memref<1x256xf32, #tpu.memory_space<vmem>>, %arg17: memref<128x32xbf16, #tpu.memory_space<vmem>>, %arg18: memref<64x32xbf16, #tpu.memory_space<vmem>>, %arg19: memref<1x64x64xf32, #tpu.memory_space<vmem>>, %arg20: memref<64x32xf32, #tpu.memory_space<vmem>>) attributes {dimension_semantics = [#tpu.dimension_semantics<parallel>], iteration_bounds = array<i64: 2>, scalar_prefetch = 0 : i64, scratch_operands = 1 : i64, tpu.core_type = #tpu.core_type<tc>, window_params = [{transform_indices = @transform_0, window_bounds = array<i64: 1, 64, 64>}, {transform_indices = @transform_1, window_bounds = array<i64: 1, 8, 16>}, {pipeline_mode = #tpu.pipeline_mode<synchronous>, transform_indices = @transform_2, window_bounds = array<i64: 64, 3>}, {pipeline_mode = #tpu.pipeline_mode<synchronous>, transform_indices = @transform_3, window_bounds = array<i64: 64, 64>}, {pipeline_mode = #tpu.pipeline_mode<synchronous>, transform_indices = @transform_4, window_bounds = array<i64: 10, 32>}, {pipeline_mode = #tpu.pipeline_mode<synchronous>, transform_indices = @transform_5, window_bounds = array<i64: 64, 32>}, {pipeline_mode = #tpu.pipeline_mode<synchronous>, transform_indices = @transform_6, window_bounds = array<i64: 32, 32>}, {pipeline_mode = #tpu.pipeline_mode<synchronous>, transform_indices = @transform_7, window_bounds = array<i64: 32, 32>}, {pipeline_mode = #tpu.pipeline_mode<synchronous>, transform_indices = @transform_8, window_bounds = array<i64: 32, 32>}, {pipeline_mode = #tpu.pipeline_mode<synchronous>, transform_indices = @transform_9, window_bounds = array<i64: 32, 32>}, {pipeline_mode = #tpu.pipeline_mode<synchronous>, transform_indices = @transform_10, window_bounds = array<i64: 32, 32>}, {pipeline_mode = #tpu.pipeline_mode<synchronous>, transform_indices = @transform_11, window_bounds = array<i64: 16, 32>}, {pipeline_mode = #tpu.pipeline_mode<synchronous>, transform_indices = @transform_12, window_bounds = array<i64: 16, 32>}, {pipeline_mode = #tpu.pipeline_mode<synchronous>, transform_indices = @transform_13, window_bounds = array<i64: 32, 32>}, {pipeline_mode = #tpu.pipeline_mode<synchronous>, transform_indices = @transform_14, window_bounds = array<i64: 32, 256>}, {pipeline_mode = #tpu.pipeline_mode<synchronous>, transform_indices = @transform_15, window_bounds = array<i64: 1, 256>}, {pipeline_mode = #tpu.pipeline_mode<synchronous>, transform_indices = @transform_16, window_bounds = array<i64: 128, 32>}, {pipeline_mode = #tpu.pipeline_mode<synchronous>, transform_indices = @transform_17, window_bounds = array<i64: 64, 32>}, {transform_indices = @transform_18, window_bounds = array<i64: 1, 64, 64>}]} {
    %c0 = arith.constant 0 : index
    %c0_0 = arith.constant 0 : index
    %c0_1 = arith.constant 0 : index
    %0 = vector.load %arg1[%c0, %c0_0, %c0_1] : memref<1x64x64xf32, #tpu.memory_space<vmem>>, vector<1x64x64xf32>
    %1 = vector.shape_cast %0 : vector<1x64x64xf32> to vector<64x64xf32>
    %cst = arith.constant dense<0.000000e+00> : vector<64xf32>
    %2 = vector.multi_reduction <add>, %1, %cst [1] : vector<64x64xf32> to vector<64xf32>
    %3 = vector.shape_cast %2 : vector<64xf32> to vector<64x1xf32>
    %4 = arith.mulf %1, %1 : vector<64x64xf32>
    %cst_2 = arith.constant dense<0.000000e+00> : vector<64xf32>
    %5 = vector.multi_reduction <add>, %4, %cst_2 [1] : vector<64x64xf32> to vector<64xf32>
    %6 = vector.shape_cast %5 : vector<64xf32> to vector<64x1xf32>
    %c0_3 = arith.constant 0 : index
    %c0_4 = arith.constant 0 : index
    %7 = vector.load %arg4[%c0_3, %c0_4] : memref<64x64xf32, #tpu.memory_space<vmem>>, vector<64x64xf32>
    %cst_5 = arith.constant dense<0.000000e+00> : vector<64x1xf32>
    %8 = tpu.matmul %7, %3, %cst_5 {dimension_numbers = #tpu.dot_dimension_numbers<[1], [0], [0], [1], [0, 0, 1, 1], [], []>} : vector<64x64xf32>, vector<64x1xf32>, vector<64x1xf32> -> vector<64x1xf32>
    %cst_6 = arith.constant 7.812500e-03 : f32
    %9 = vector.broadcast %cst_6 : f32 to vector<64x1xf32>
    %10 = arith.mulf %8, %9 : vector<64x1xf32>
    %cst_7 = arith.constant dense<0.000000e+00> : vector<64x1xf32>
    %11 = tpu.matmul %7, %6, %cst_7 {dimension_numbers = #tpu.dot_dimension_numbers<[1], [0], [0], [1], [0, 0, 1, 1], [], []>} : vector<64x64xf32>, vector<64x1xf32>, vector<64x1xf32> -> vector<64x1xf32>
    %cst_8 = arith.constant 7.812500e-03 : f32
    %12 = vector.broadcast %cst_8 : f32 to vector<64x1xf32>
    %13 = arith.mulf %11, %12 : vector<64x1xf32>
    %14 = arith.mulf %10, %10 : vector<64x1xf32>
    %15 = arith.subf %13, %14 : vector<64x1xf32>
    %cst_9 = arith.constant 0.000000e+00 : f32
    %16 = vector.broadcast %cst_9 : f32 to vector<64x1xf32>
    %17 = arith.maximumf %15, %16 : vector<64x1xf32>
    %cst_10 = arith.constant 9.99999974E-6 : f32
    %18 = vector.broadcast %cst_10 : f32 to vector<64x1xf32>
    %19 = arith.addf %17, %18 : vector<64x1xf32>
    %20 = math.rsqrt %19 : vector<64x1xf32>
    %c0_11 = arith.constant 0 : index
    %c0_12 = arith.constant 0 : index
    %21 = vector.load %arg3[%c0_11, %c0_12] : memref<64x3xf32, #tpu.memory_space<vmem>>, vector<64x1xf32>
    %22 = arith.mulf %21, %20 : vector<64x1xf32>
    %c0_13 = arith.constant 0 : index
    %c1 = arith.constant 1 : index
    %23 = vector.load %arg3[%c0_13, %c1] : memref<64x3xf32, #tpu.memory_space<vmem>>, vector<64x1xf32>
    %24 = arith.mulf %10, %22 : vector<64x1xf32>
    %25 = arith.subf %23, %24 : vector<64x1xf32>
    %26 = vector.broadcast %22 : vector<64x1xf32> to vector<64x64xf32>
    %27 = arith.mulf %1, %26 : vector<64x64xf32>
    %28 = vector.broadcast %25 : vector<64x1xf32> to vector<64x64xf32>
    %29 = arith.addf %27, %28 : vector<64x64xf32>
    %30 = arith.truncf %29 : vector<64x64xf32> to vector<64x64xbf16>
    %c0_14 = arith.constant 0 : index
    %c0_15 = arith.constant 0 : index
    %31 = vector.load %arg6[%c0_14, %c0_15] : memref<64x32xbf16, #tpu.memory_space<vmem>>, vector<64x32xbf16>
    %cst_16 = arith.constant dense<0.000000e+00> : vector<64x32xf32>
    %32 = tpu.matmul %30, %31, %cst_16 {dimension_numbers = #tpu.dot_dimension_numbers<[0], [0], [1], [1], [0, 1, 1, 1], [], []>} : vector<64x64xbf16>, vector<64x32xbf16>, vector<64x32xf32> -> vector<64x32xf32>
    %c0_17 = arith.constant 0 : index
    %c0_18 = arith.constant 0 : index
    %33 = vector.load %arg5[%c0_17, %c0_18] : memref<10x32xf32, #tpu.memory_space<vmem>>, vector<1x32xf32>
    %34 = vector.broadcast %33 : vector<1x32xf32> to vector<64x32xf32>
    %35 = arith.addf %32, %34 : vector<64x32xf32>
    %c0_19 = arith.constant 0 : index
    %c0_20 = arith.constant 0 : index
    %c0_21 = arith.constant 0 : index
    %36 = vector.load %arg2[%c0_19, %c0_20, %c0_21] : memref<1x8x16xbf16, #tpu.memory_space<vmem>>, vector<1x8x16xbf16>
    %37 = vector.shape_cast %36 : vector<1x8x16xbf16> to vector<8x16xbf16>
    %cst_22 = arith.constant dense<0.000000e+00> : vector<64xf32>
    %38 = vector.multi_reduction <add>, %35, %cst_22 [1] : vector<64x32xf32> to vector<64xf32>
    %39 = vector.shape_cast %38 : vector<64xf32> to vector<64x1xf32>
    %cst_23 = arith.constant 3.200000e+01 : f32
    %40 = vector.broadcast %cst_23 : f32 to vector<64x1xf32>
    %41 = arith.divf %39, %40 : vector<64x1xf32>
    %42 = vector.broadcast %41 : vector<64x1xf32> to vector<64x32xf32>
    %43 = arith.subf %35, %42 : vector<64x32xf32>
    %44 = arith.mulf %43, %43 : vector<64x32xf32>
    %cst_24 = arith.constant dense<0.000000e+00> : vector<64xf32>
    %45 = vector.multi_reduction <add>, %44, %cst_24 [1] : vector<64x32xf32> to vector<64xf32>
    %46 = vector.shape_cast %45 : vector<64xf32> to vector<64x1xf32>
    %cst_25 = arith.constant 3.200000e+01 : f32
    %47 = vector.broadcast %cst_25 : f32 to vector<64x1xf32>
    %48 = arith.divf %46, %47 : vector<64x1xf32>
    %49 = vector.broadcast %41 : vector<64x1xf32> to vector<64x32xf32>
    %50 = arith.subf %35, %49 : vector<64x32xf32>
    %cst_26 = arith.constant 9.99999974E-6 : f32
    %51 = vector.broadcast %cst_26 : f32 to vector<64x1xf32>
    %52 = arith.addf %48, %51 : vector<64x1xf32>
    %53 = math.rsqrt %52 : vector<64x1xf32>
    %54 = vector.broadcast %53 : vector<64x1xf32> to vector<64x32xf32>
    %55 = arith.mulf %50, %54 : vector<64x32xf32>
    %c1_27 = arith.constant 1 : index
    %c0_28 = arith.constant 0 : index
    %56 = vector.load %arg5[%c1_27, %c0_28] : memref<10x32xf32, #tpu.memory_space<vmem>>, vector<1x32xf32>
    %57 = vector.broadcast %56 : vector<1x32xf32> to vector<64x32xf32>
    %58 = arith.mulf %55, %57 : vector<64x32xf32>
    %c2 = arith.constant 2 : index
    %c0_29 = arith.constant 0 : index
    %59 = vector.load %arg5[%c2, %c0_29] : memref<10x32xf32, #tpu.memory_space<vmem>>, vector<1x32xf32>
    %60 = vector.broadcast %59 : vector<1x32xf32> to vector<64x32xf32>
    %61 = arith.addf %58, %60 : vector<64x32xf32>
    %62 = arith.truncf %61 : vector<64x32xf32> to vector<64x32xbf16>
    %63 = arith.truncf %61 : vector<64x32xf32> to vector<64x32xbf16>
    %c0_30 = arith.constant 0 : index
    %c0_31 = arith.constant 0 : index
    %64 = vector.load %arg7[%c0_30, %c0_31] : memref<32x32xbf16, #tpu.memory_space<vmem>>, vector<32x32xbf16>
    %cst_32 = arith.constant dense<0.000000e+00> : vector<64x32xf32>
    %65 = tpu.matmul %62, %64, %cst_32 {dimension_numbers = #tpu.dot_dimension_numbers<[1], [0], [0], [1], [0, 0, 1, 1], [], []>} : vector<64x32xbf16>, vector<32x32xbf16>, vector<64x32xf32> -> vector<64x32xf32>
    %66 = arith.truncf %65 : vector<64x32xf32> to vector<64x32xbf16>
    %c0_33 = arith.constant 0 : index
    %c0_34 = arith.constant 0 : index
    %67 = vector.load %arg8[%c0_33, %c0_34] : memref<32x32xbf16, #tpu.memory_space<vmem>>, vector<32x32xbf16>
    %cst_35 = arith.constant dense<0.000000e+00> : vector<64x32xf32>
    %68 = tpu.matmul %63, %67, %cst_35 {dimension_numbers = #tpu.dot_dimension_numbers<[1], [0], [0], [1], [0, 0, 1, 1], [], []>} : vector<64x32xbf16>, vector<32x32xbf16>, vector<64x32xf32> -> vector<64x32xf32>
    %69 = arith.truncf %68 : vector<64x32xf32> to vector<64x32xbf16>
    %c0_36 = arith.constant 0 : index
    %c0_37 = arith.constant 0 : index
    %70 = vector.load %arg9[%c0_36, %c0_37] : memref<32x32xbf16, #tpu.memory_space<vmem>>, vector<32x32xbf16>
    %cst_38 = arith.constant dense<0.000000e+00> : vector<64x32xf32>
    %71 = tpu.matmul %63, %70, %cst_38 {dimension_numbers = #tpu.dot_dimension_numbers<[1], [0], [0], [1], [0, 0, 1, 1], [], []>} : vector<64x32xbf16>, vector<32x32xbf16>, vector<64x32xf32> -> vector<64x32xf32>
    %72 = arith.truncf %71 : vector<64x32xf32> to vector<64x32xbf16>
    %73 = vector.extract_strided_slice %66 {offsets = [0, 0], sizes = [64, 8], strides = [1, 1]} : vector<64x32xbf16> to vector<64x8xbf16>
    %74 = vector.extract_strided_slice %69 {offsets = [0, 0], sizes = [64, 8], strides = [1, 1]} : vector<64x32xbf16> to vector<64x8xbf16>
    %75 = vector.extract_strided_slice %72 {offsets = [0, 0], sizes = [64, 8], strides = [1, 1]} : vector<64x32xbf16> to vector<64x8xbf16>
    %cst_39 = arith.constant dense<0.000000e+00> : vector<64x64xf32>
    %76 = tpu.matmul %73, %74, %cst_39 {dimension_numbers = #tpu.dot_dimension_numbers<[1], [1], [0], [0], [0, 0, 1, 0], [], []>} : vector<64x8xbf16>, vector<64x8xbf16>, vector<64x64xf32> -> vector<64x64xf32>
    %cst_40 = arith.constant dense<0xFF800000> : vector<64xf32>
    %77 = vector.multi_reduction <maximumf>, %76, %cst_40 [1] : vector<64x64xf32> to vector<64xf32>
    %78 = vector.shape_cast %77 : vector<64xf32> to vector<64x1xf32>
    %79 = vector.broadcast %78 : vector<64x1xf32> to vector<64x64xf32>
    %80 = arith.subf %76, %79 : vector<64x64xf32>
    %81 = math.exp %80 : vector<64x64xf32>
    %cst_41 = arith.constant dense<0.000000e+00> : vector<64xf32>
    %82 = vector.multi_reduction <add>, %81, %cst_41 [1] : vector<64x64xf32> to vector<64xf32>
    %83 = vector.shape_cast %82 : vector<64xf32> to vector<64x1xf32>
    %84 = tpu.reciprocal %83 {approx = true} : vector<64x1xf32> -> vector<64x1xf32>
    %85 = vector.broadcast %84 : vector<64x1xf32> to vector<64x64xf32>
    %86 = arith.mulf %81, %85 : vector<64x64xf32>
    %87 = arith.truncf %86 : vector<64x64xf32> to vector<64x64xbf16>
    %cst_42 = arith.constant dense<0.000000e+00> : vector<64x8xf32>
    %88 = tpu.matmul %87, %75, %cst_42 {dimension_numbers = #tpu.dot_dimension_numbers<[1], [0], [0], [1], [0, 0, 1, 1], [], []>} : vector<64x64xbf16>, vector<64x8xbf16>, vector<64x8xf32> -> vector<64x8xf32>
    %c0_43 = arith.constant 0 : index
    %c0_44 = arith.constant 0 : index
    %89 = vector.load %arg20[%c0_43, %c0_44] : memref<64x32xf32, #tpu.memory_space<vmem>>, vector<64x8xf32>
    tpu.vector_store %arg20[%c0_43, %c0_44], %88 {strides = array<i32>} : memref<64x32xf32, #tpu.memory_space<vmem>>, vector<64x8xf32>,
    %90 = vector.extract_strided_slice %66 {offsets = [0, 8], sizes = [64, 8], strides = [1, 1]} : vector<64x32xbf16> to vector<64x8xbf16>
    %91 = vector.extract_strided_slice %69 {offsets = [0, 8], sizes = [64, 8], strides = [1, 1]} : vector<64x32xbf16> to vector<64x8xbf16>
    %92 = vector.extract_strided_slice %72 {offsets = [0, 8], sizes = [64, 8], strides = [1, 1]} : vector<64x32xbf16> to vector<64x8xbf16>
    %cst_45 = arith.constant dense<0.000000e+00> : vector<64x64xf32>
    %93 = tpu.matmul %90, %91, %cst_45 {dimension_numbers = #tpu.dot_dimension_numbers<[1], [1], [0], [0], [0, 0, 1, 0], [], []>} : vector<64x8xbf16>, vector<64x8xbf16>, vector<64x64xf32> -> vector<64x64xf32>
    %cst_46 = arith.constant dense<0xFF800000> : vector<64xf32>
    %94 = vector.multi_reduction <maximumf>, %93, %cst_46 [1] : vector<64x64xf32> to vector<64xf32>
    %95 = vector.shape_cast %94 : vector<64xf32> to vector<64x1xf32>
    %96 = vector.broadcast %95 : vector<64x1xf32> to vector<64x64xf32>
    %97 = arith.subf %93, %96 : vector<64x64xf32>
    %98 = math.exp %97 : vector<64x64xf32>
    %cst_47 = arith.constant dense<0.000000e+00> : vector<64xf32>
    %99 = vector.multi_reduction <add>, %98, %cst_47 [1] : vector<64x64xf32> to vector<64xf32>
    %100 = vector.shape_cast %99 : vector<64xf32> to vector<64x1xf32>
    %101 = tpu.reciprocal %100 {approx = true} : vector<64x1xf32> -> vector<64x1xf32>
    %102 = vector.broadcast %101 : vector<64x1xf32> to vector<64x64xf32>
    %103 = arith.mulf %98, %102 : vector<64x64xf32>
    %104 = arith.truncf %103 : vector<64x64xf32> to vector<64x64xbf16>
    %cst_48 = arith.constant dense<0.000000e+00> : vector<64x8xf32>
    %105 = tpu.matmul %104, %92, %cst_48 {dimension_numbers = #tpu.dot_dimension_numbers<[1], [0], [0], [1], [0, 0, 1, 1], [], []>} : vector<64x64xbf16>, vector<64x8xbf16>, vector<64x8xf32> -> vector<64x8xf32>
    %c0_49 = arith.constant 0 : index
    %c8 = arith.constant 8 : index
    %106 = vector.load %arg20[%c0_49, %c8] : memref<64x32xf32, #tpu.memory_space<vmem>>, vector<64x8xf32>
    tpu.vector_store %arg20[%c0_49, %c8], %105 {strides = array<i32>} : memref<64x32xf32, #tpu.memory_space<vmem>>, vector<64x8xf32>,
    %107 = vector.extract_strided_slice %66 {offsets = [0, 16], sizes = [64, 8], strides = [1, 1]} : vector<64x32xbf16> to vector<64x8xbf16>
    %108 = vector.extract_strided_slice %69 {offsets = [0, 16], sizes = [64, 8], strides = [1, 1]} : vector<64x32xbf16> to vector<64x8xbf16>
    %109 = vector.extract_strided_slice %72 {offsets = [0, 16], sizes = [64, 8], strides = [1, 1]} : vector<64x32xbf16> to vector<64x8xbf16>
    %cst_50 = arith.constant dense<0.000000e+00> : vector<64x64xf32>
    %110 = tpu.matmul %107, %108, %cst_50 {dimension_numbers = #tpu.dot_dimension_numbers<[1], [1], [0], [0], [0, 0, 1, 0], [], []>} : vector<64x8xbf16>, vector<64x8xbf16>, vector<64x64xf32> -> vector<64x64xf32>
    %cst_51 = arith.constant dense<0xFF800000> : vector<64xf32>
    %111 = vector.multi_reduction <maximumf>, %110, %cst_51 [1] : vector<64x64xf32> to vector<64xf32>
    %112 = vector.shape_cast %111 : vector<64xf32> to vector<64x1xf32>
    %113 = vector.broadcast %112 : vector<64x1xf32> to vector<64x64xf32>
    %114 = arith.subf %110, %113 : vector<64x64xf32>
    %115 = math.exp %114 : vector<64x64xf32>
    %cst_52 = arith.constant dense<0.000000e+00> : vector<64xf32>
    %116 = vector.multi_reduction <add>, %115, %cst_52 [1] : vector<64x64xf32> to vector<64xf32>
    %117 = vector.shape_cast %116 : vector<64xf32> to vector<64x1xf32>
    %118 = tpu.reciprocal %117 {approx = true} : vector<64x1xf32> -> vector<64x1xf32>
    %119 = vector.broadcast %118 : vector<64x1xf32> to vector<64x64xf32>
    %120 = arith.mulf %115, %119 : vector<64x64xf32>
    %121 = arith.truncf %120 : vector<64x64xf32> to vector<64x64xbf16>
    %cst_53 = arith.constant dense<0.000000e+00> : vector<64x8xf32>
    %122 = tpu.matmul %121, %109, %cst_53 {dimension_numbers = #tpu.dot_dimension_numbers<[1], [0], [0], [1], [0, 0, 1, 1], [], []>} : vector<64x64xbf16>, vector<64x8xbf16>, vector<64x8xf32> -> vector<64x8xf32>
    %c0_54 = arith.constant 0 : index
    %c16 = arith.constant 16 : index
    %123 = vector.load %arg20[%c0_54, %c16] : memref<64x32xf32, #tpu.memory_space<vmem>>, vector<64x8xf32>
    tpu.vector_store %arg20[%c0_54, %c16], %122 {strides = array<i32>} : memref<64x32xf32, #tpu.memory_space<vmem>>, vector<64x8xf32>,
    %124 = vector.extract_strided_slice %66 {offsets = [0, 24], sizes = [64, 8], strides = [1, 1]} : vector<64x32xbf16> to vector<64x8xbf16>
    %125 = vector.extract_strided_slice %69 {offsets = [0, 24], sizes = [64, 8], strides = [1, 1]} : vector<64x32xbf16> to vector<64x8xbf16>
    %126 = vector.extract_strided_slice %72 {offsets = [0, 24], sizes = [64, 8], strides = [1, 1]} : vector<64x32xbf16> to vector<64x8xbf16>
    %cst_55 = arith.constant dense<0.000000e+00> : vector<64x64xf32>
    %127 = tpu.matmul %124, %125, %cst_55 {dimension_numbers = #tpu.dot_dimension_numbers<[1], [1], [0], [0], [0, 0, 1, 0], [], []>} : vector<64x8xbf16>, vector<64x8xbf16>, vector<64x64xf32> -> vector<64x64xf32>
    %cst_56 = arith.constant dense<0xFF800000> : vector<64xf32>
    %128 = vector.multi_reduction <maximumf>, %127, %cst_56 [1] : vector<64x64xf32> to vector<64xf32>
    %129 = vector.shape_cast %128 : vector<64xf32> to vector<64x1xf32>
    %130 = vector.broadcast %129 : vector<64x1xf32> to vector<64x64xf32>
    %131 = arith.subf %127, %130 : vector<64x64xf32>
    %132 = math.exp %131 : vector<64x64xf32>
    %cst_57 = arith.constant dense<0.000000e+00> : vector<64xf32>
    %133 = vector.multi_reduction <add>, %132, %cst_57 [1] : vector<64x64xf32> to vector<64xf32>
    %134 = vector.shape_cast %133 : vector<64xf32> to vector<64x1xf32>
    %135 = tpu.reciprocal %134 {approx = true} : vector<64x1xf32> -> vector<64x1xf32>
    %136 = vector.broadcast %135 : vector<64x1xf32> to vector<64x64xf32>
    %137 = arith.mulf %132, %136 : vector<64x64xf32>
    %138 = arith.truncf %137 : vector<64x64xf32> to vector<64x64xbf16>
    %cst_58 = arith.constant dense<0.000000e+00> : vector<64x8xf32>
    %139 = tpu.matmul %138, %126, %cst_58 {dimension_numbers = #tpu.dot_dimension_numbers<[1], [0], [0], [1], [0, 0, 1, 1], [], []>} : vector<64x64xbf16>, vector<64x8xbf16>, vector<64x8xf32> -> vector<64x8xf32>
    %c0_59 = arith.constant 0 : index
    %c24 = arith.constant 24 : index
    %140 = vector.load %arg20[%c0_59, %c24] : memref<64x32xf32, #tpu.memory_space<vmem>>, vector<64x8xf32>
    tpu.vector_store %arg20[%c0_59, %c24], %139 {strides = array<i32>} : memref<64x32xf32, #tpu.memory_space<vmem>>, vector<64x8xf32>,
    %c0_60 = arith.constant 0 : index
    %c0_61 = arith.constant 0 : index
    %141 = vector.load %arg20[%c0_60, %c0_61] : memref<64x32xf32, #tpu.memory_space<vmem>>, vector<64x32xf32>
    %142 = arith.truncf %141 : vector<64x32xf32> to vector<64x32xbf16>
    %c0_62 = arith.constant 0 : index
    %c0_63 = arith.constant 0 : index
    %143 = vector.load %arg10[%c0_62, %c0_63] : memref<32x32xbf16, #tpu.memory_space<vmem>>, vector<32x32xbf16>
    %cst_64 = arith.constant dense<0.000000e+00> : vector<64x32xf32>
    %144 = tpu.matmul %142, %143, %cst_64 {dimension_numbers = #tpu.dot_dimension_numbers<[1], [0], [0], [1], [0, 0, 1, 1], [], []>} : vector<64x32xbf16>, vector<32x32xbf16>, vector<64x32xf32> -> vector<64x32xf32>
    %c3 = arith.constant 3 : index
    %c0_65 = arith.constant 0 : index
    %145 = vector.load %arg5[%c3, %c0_65] : memref<10x32xf32, #tpu.memory_space<vmem>>, vector<1x32xf32>
    %146 = vector.broadcast %145 : vector<1x32xf32> to vector<64x32xf32>
    %147 = arith.addf %144, %146 : vector<64x32xf32>
    %148 = arith.addf %147, %35 : vector<64x32xf32>
    %cst_66 = arith.constant dense<0.000000e+00> : vector<64xf32>
    %149 = vector.multi_reduction <add>, %148, %cst_66 [1] : vector<64x32xf32> to vector<64xf32>
    %150 = vector.shape_cast %149 : vector<64xf32> to vector<64x1xf32>
    %cst_67 = arith.constant 3.200000e+01 : f32
    %151 = vector.broadcast %cst_67 : f32 to vector<64x1xf32>
    %152 = arith.divf %150, %151 : vector<64x1xf32>
    %153 = vector.broadcast %152 : vector<64x1xf32> to vector<64x32xf32>
    %154 = arith.subf %148, %153 : vector<64x32xf32>
    %155 = arith.mulf %154, %154 : vector<64x32xf32>
    %cst_68 = arith.constant dense<0.000000e+00> : vector<64xf32>
    %156 = vector.multi_reduction <add>, %155, %cst_68 [1] : vector<64x32xf32> to vector<64xf32>
    %157 = vector.shape_cast %156 : vector<64xf32> to vector<64x1xf32>
    %cst_69 = arith.constant 3.200000e+01 : f32
    %158 = vector.broadcast %cst_69 : f32 to vector<64x1xf32>
    %159 = arith.divf %157, %158 : vector<64x1xf32>
    %160 = vector.broadcast %152 : vector<64x1xf32> to vector<64x32xf32>
    %161 = arith.subf %148, %160 : vector<64x32xf32>
    %cst_70 = arith.constant 9.99999974E-6 : f32
    %162 = vector.broadcast %cst_70 : f32 to vector<64x1xf32>
    %163 = arith.addf %159, %162 : vector<64x1xf32>
    %164 = math.rsqrt %163 : vector<64x1xf32>
    %165 = vector.broadcast %164 : vector<64x1xf32> to vector<64x32xf32>
    %166 = arith.mulf %161, %165 : vector<64x32xf32>
    %c4 = arith.constant 4 : index
    %c0_71 = arith.constant 0 : index
    %167 = vector.load %arg5[%c4, %c0_71] : memref<10x32xf32, #tpu.memory_space<vmem>>, vector<1x32xf32>
    %168 = vector.broadcast %167 : vector<1x32xf32> to vector<64x32xf32>
    %169 = arith.mulf %166, %168 : vector<64x32xf32>
    %c5 = arith.constant 5 : index
    %c0_72 = arith.constant 0 : index
    %170 = vector.load %arg5[%c5, %c0_72] : memref<10x32xf32, #tpu.memory_space<vmem>>, vector<1x32xf32>
    %171 = vector.broadcast %170 : vector<1x32xf32> to vector<64x32xf32>
    %172 = arith.addf %169, %171 : vector<64x32xf32>
    %173 = arith.truncf %172 : vector<64x32xf32> to vector<64x32xbf16>
    %c0_73 = arith.constant 0 : index
    %c0_74 = arith.constant 0 : index
    %174 = vector.load %arg11[%c0_73, %c0_74] : memref<32x32xbf16, #tpu.memory_space<vmem>>, vector<32x32xbf16>
    %cst_75 = arith.constant dense<0.000000e+00> : vector<64x32xf32>
    %175 = tpu.matmul %173, %174, %cst_75 {dimension_numbers = #tpu.dot_dimension_numbers<[1], [0], [0], [1], [0, 0, 1, 1], [], []>} : vector<64x32xbf16>, vector<32x32xbf16>, vector<64x32xf32> -> vector<64x32xf32>
    %176 = arith.truncf %175 : vector<64x32xf32> to vector<64x32xbf16>
    %c0_76 = arith.constant 0 : index
    %c0_77 = arith.constant 0 : index
    %177 = vector.load %arg12[%c0_76, %c0_77] : memref<16x32xbf16, #tpu.memory_space<vmem>>, vector<16x32xbf16>
    %cst_78 = arith.constant dense<0.000000e+00> : vector<8x32xf32>
    %178 = tpu.matmul %37, %177, %cst_78 {dimension_numbers = #tpu.dot_dimension_numbers<[1], [0], [0], [1], [0, 0, 1, 1], [], []>} : vector<8x16xbf16>, vector<16x32xbf16>, vector<8x32xf32> -> vector<8x32xf32>
    %179 = arith.truncf %178 : vector<8x32xf32> to vector<8x32xbf16>
    %c0_79 = arith.constant 0 : index
    %c0_80 = arith.constant 0 : index
    %180 = vector.load %arg13[%c0_79, %c0_80] : memref<16x32xbf16, #tpu.memory_space<vmem>>, vector<16x32xbf16>
    %cst_81 = arith.constant dense<0.000000e+00> : vector<8x32xf32>
    %181 = tpu.matmul %37, %180, %cst_81 {dimension_numbers = #tpu.dot_dimension_numbers<[1], [0], [0], [1], [0, 0, 1, 1], [], []>} : vector<8x16xbf16>, vector<16x32xbf16>, vector<8x32xf32> -> vector<8x32xf32>
    %182 = arith.truncf %181 : vector<8x32xf32> to vector<8x32xbf16>
    %183 = vector.extract_strided_slice %176 {offsets = [0, 0], sizes = [64, 8], strides = [1, 1]} : vector<64x32xbf16> to vector<64x8xbf16>
    %184 = vector.extract_strided_slice %179 {offsets = [0, 0], sizes = [8, 8], strides = [1, 1]} : vector<8x32xbf16> to vector<8x8xbf16>
    %185 = vector.extract_strided_slice %182 {offsets = [0, 0], sizes = [8, 8], strides = [1, 1]} : vector<8x32xbf16> to vector<8x8xbf16>
    %cst_82 = arith.constant dense<0.000000e+00> : vector<64x8xf32>
    %186 = tpu.matmul %183, %184, %cst_82 {dimension_numbers = #tpu.dot_dimension_numbers<[1], [1], [0], [0], [0, 0, 1, 0], [], []>} : vector<64x8xbf16>, vector<8x8xbf16>, vector<64x8xf32> -> vector<64x8xf32>
    %cst_83 = arith.constant dense<0xFF800000> : vector<64xf32>
    %187 = vector.multi_reduction <maximumf>, %186, %cst_83 [1] : vector<64x8xf32> to vector<64xf32>
    %188 = vector.shape_cast %187 : vector<64xf32> to vector<64x1xf32>
    %189 = vector.broadcast %188 : vector<64x1xf32> to vector<64x8xf32>
    %190 = arith.subf %186, %189 : vector<64x8xf32>
    %191 = math.exp %190 : vector<64x8xf32>
    %cst_84 = arith.constant dense<0.000000e+00> : vector<64xf32>
    %192 = vector.multi_reduction <add>, %191, %cst_84 [1] : vector<64x8xf32> to vector<64xf32>
    %193 = vector.shape_cast %192 : vector<64xf32> to vector<64x1xf32>
    %194 = tpu.reciprocal %193 {approx = true} : vector<64x1xf32> -> vector<64x1xf32>
    %195 = vector.broadcast %194 : vector<64x1xf32> to vector<64x8xf32>
    %196 = arith.mulf %191, %195 : vector<64x8xf32>
    %197 = arith.truncf %196 : vector<64x8xf32> to vector<64x8xbf16>
    %cst_85 = arith.constant dense<0.000000e+00> : vector<64x8xf32>
    %198 = tpu.matmul %197, %185, %cst_85 {dimension_numbers = #tpu.dot_dimension_numbers<[1], [0], [0], [1], [0, 0, 1, 1], [], []>} : vector<64x8xbf16>, vector<8x8xbf16>, vector<64x8xf32> -> vector<64x8xf32>
    %c0_86 = arith.constant 0 : index
    %c0_87 = arith.constant 0 : index
    %199 = vector.load %arg20[%c0_86, %c0_87] : memref<64x32xf32, #tpu.memory_space<vmem>>, vector<64x8xf32>
    tpu.vector_store %arg20[%c0_86, %c0_87], %198 {strides = array<i32>} : memref<64x32xf32, #tpu.memory_space<vmem>>, vector<64x8xf32>,
    %200 = vector.extract_strided_slice %176 {offsets = [0, 8], sizes = [64, 8], strides = [1, 1]} : vector<64x32xbf16> to vector<64x8xbf16>
    %201 = vector.extract_strided_slice %179 {offsets = [0, 8], sizes = [8, 8], strides = [1, 1]} : vector<8x32xbf16> to vector<8x8xbf16>
    %202 = vector.extract_strided_slice %182 {offsets = [0, 8], sizes = [8, 8], strides = [1, 1]} : vector<8x32xbf16> to vector<8x8xbf16>
    %cst_88 = arith.constant dense<0.000000e+00> : vector<64x8xf32>
    %203 = tpu.matmul %200, %201, %cst_88 {dimension_numbers = #tpu.dot_dimension_numbers<[1], [1], [0], [0], [0, 0, 1, 0], [], []>} : vector<64x8xbf16>, vector<8x8xbf16>, vector<64x8xf32> -> vector<64x8xf32>
    %cst_89 = arith.constant dense<0xFF800000> : vector<64xf32>
    %204 = vector.multi_reduction <maximumf>, %203, %cst_89 [1] : vector<64x8xf32> to vector<64xf32>
    %205 = vector.shape_cast %204 : vector<64xf32> to vector<64x1xf32>
    %206 = vector.broadcast %205 : vector<64x1xf32> to vector<64x8xf32>
    %207 = arith.subf %203, %206 : vector<64x8xf32>
    %208 = math.exp %207 : vector<64x8xf32>
    %cst_90 = arith.constant dense<0.000000e+00> : vector<64xf32>
    %209 = vector.multi_reduction <add>, %208, %cst_90 [1] : vector<64x8xf32> to vector<64xf32>
    %210 = vector.shape_cast %209 : vector<64xf32> to vector<64x1xf32>
    %211 = tpu.reciprocal %210 {approx = true} : vector<64x1xf32> -> vector<64x1xf32>
    %212 = vector.broadcast %211 : vector<64x1xf32> to vector<64x8xf32>
    %213 = arith.mulf %208, %212 : vector<64x8xf32>
    %214 = arith.truncf %213 : vector<64x8xf32> to vector<64x8xbf16>
    %cst_91 = arith.constant dense<0.000000e+00> : vector<64x8xf32>
    %215 = tpu.matmul %214, %202, %cst_91 {dimension_numbers = #tpu.dot_dimension_numbers<[1], [0], [0], [1], [0, 0, 1, 1], [], []>} : vector<64x8xbf16>, vector<8x8xbf16>, vector<64x8xf32> -> vector<64x8xf32>
    %c0_92 = arith.constant 0 : index
    %c8_93 = arith.constant 8 : index
    %216 = vector.load %arg20[%c0_92, %c8_93] : memref<64x32xf32, #tpu.memory_space<vmem>>, vector<64x8xf32>
    tpu.vector_store %arg20[%c0_92, %c8_93], %215 {strides = array<i32>} : memref<64x32xf32, #tpu.memory_space<vmem>>, vector<64x8xf32>,
    %217 = vector.extract_strided_slice %176 {offsets = [0, 16], sizes = [64, 8], strides = [1, 1]} : vector<64x32xbf16> to vector<64x8xbf16>
    %218 = vector.extract_strided_slice %179 {offsets = [0, 16], sizes = [8, 8], strides = [1, 1]} : vector<8x32xbf16> to vector<8x8xbf16>
    %219 = vector.extract_strided_slice %182 {offsets = [0, 16], sizes = [8, 8], strides = [1, 1]} : vector<8x32xbf16> to vector<8x8xbf16>
    %cst_94 = arith.constant dense<0.000000e+00> : vector<64x8xf32>
    %220 = tpu.matmul %217, %218, %cst_94 {dimension_numbers = #tpu.dot_dimension_numbers<[1], [1], [0], [0], [0, 0, 1, 0], [], []>} : vector<64x8xbf16>, vector<8x8xbf16>, vector<64x8xf32> -> vector<64x8xf32>
    %cst_95 = arith.constant dense<0xFF800000> : vector<64xf32>
    %221 = vector.multi_reduction <maximumf>, %220, %cst_95 [1] : vector<64x8xf32> to vector<64xf32>
    %222 = vector.shape_cast %221 : vector<64xf32> to vector<64x1xf32>
    %223 = vector.broadcast %222 : vector<64x1xf32> to vector<64x8xf32>
    %224 = arith.subf %220, %223 : vector<64x8xf32>
    %225 = math.exp %224 : vector<64x8xf32>
    %cst_96 = arith.constant dense<0.000000e+00> : vector<64xf32>
    %226 = vector.multi_reduction <add>, %225, %cst_96 [1] : vector<64x8xf32> to vector<64xf32>
    %227 = vector.shape_cast %226 : vector<64xf32> to vector<64x1xf32>
    %228 = tpu.reciprocal %227 {approx = true} : vector<64x1xf32> -> vector<64x1xf32>
    %229 = vector.broadcast %228 : vector<64x1xf32> to vector<64x8xf32>
    %230 = arith.mulf %225, %229 : vector<64x8xf32>
    %231 = arith.truncf %230 : vector<64x8xf32> to vector<64x8xbf16>
    %cst_97 = arith.constant dense<0.000000e+00> : vector<64x8xf32>
    %232 = tpu.matmul %231, %219, %cst_97 {dimension_numbers = #tpu.dot_dimension_numbers<[1], [0], [0], [1], [0, 0, 1, 1], [], []>} : vector<64x8xbf16>, vector<8x8xbf16>, vector<64x8xf32> -> vector<64x8xf32>
    %c0_98 = arith.constant 0 : index
    %c16_99 = arith.constant 16 : index
    %233 = vector.load %arg20[%c0_98, %c16_99] : memref<64x32xf32, #tpu.memory_space<vmem>>, vector<64x8xf32>
    tpu.vector_store %arg20[%c0_98, %c16_99], %232 {strides = array<i32>} : memref<64x32xf32, #tpu.memory_space<vmem>>, vector<64x8xf32>,
    %234 = vector.extract_strided_slice %176 {offsets = [0, 24], sizes = [64, 8], strides = [1, 1]} : vector<64x32xbf16> to vector<64x8xbf16>
    %235 = vector.extract_strided_slice %179 {offsets = [0, 24], sizes = [8, 8], strides = [1, 1]} : vector<8x32xbf16> to vector<8x8xbf16>
    %236 = vector.extract_strided_slice %182 {offsets = [0, 24], sizes = [8, 8], strides = [1, 1]} : vector<8x32xbf16> to vector<8x8xbf16>
    %cst_100 = arith.constant dense<0.000000e+00> : vector<64x8xf32>
    %237 = tpu.matmul %234, %235, %cst_100 {dimension_numbers = #tpu.dot_dimension_numbers<[1], [1], [0], [0], [0, 0, 1, 0], [], []>} : vector<64x8xbf16>, vector<8x8xbf16>, vector<64x8xf32> -> vector<64x8xf32>
    %cst_101 = arith.constant dense<0xFF800000> : vector<64xf32>
    %238 = vector.multi_reduction <maximumf>, %237, %cst_101 [1] : vector<64x8xf32> to vector<64xf32>
    %239 = vector.shape_cast %238 : vector<64xf32> to vector<64x1xf32>
    %240 = vector.broadcast %239 : vector<64x1xf32> to vector<64x8xf32>
    %241 = arith.subf %237, %240 : vector<64x8xf32>
    %242 = math.exp %241 : vector<64x8xf32>
    %cst_102 = arith.constant dense<0.000000e+00> : vector<64xf32>
    %243 = vector.multi_reduction <add>, %242, %cst_102 [1] : vector<64x8xf32> to vector<64xf32>
    %244 = vector.shape_cast %243 : vector<64xf32> to vector<64x1xf32>
    %245 = tpu.reciprocal %244 {approx = true} : vector<64x1xf32> -> vector<64x1xf32>
    %246 = vector.broadcast %245 : vector<64x1xf32> to vector<64x8xf32>
    %247 = arith.mulf %242, %246 : vector<64x8xf32>
    %248 = arith.truncf %247 : vector<64x8xf32> to vector<64x8xbf16>
    %cst_103 = arith.constant dense<0.000000e+00> : vector<64x8xf32>
    %249 = tpu.matmul %248, %236, %cst_103 {dimension_numbers = #tpu.dot_dimension_numbers<[1], [0], [0], [1], [0, 0, 1, 1], [], []>} : vector<64x8xbf16>, vector<8x8xbf16>, vector<64x8xf32> -> vector<64x8xf32>
    %c0_104 = arith.constant 0 : index
    %c24_105 = arith.constant 24 : index
    %250 = vector.load %arg20[%c0_104, %c24_105] : memref<64x32xf32, #tpu.memory_space<vmem>>, vector<64x8xf32>
    tpu.vector_store %arg20[%c0_104, %c24_105], %249 {strides = array<i32>} : memref<64x32xf32, #tpu.memory_space<vmem>>, vector<64x8xf32>,
    %c0_106 = arith.constant 0 : index
    %c0_107 = arith.constant 0 : index
    %251 = vector.load %arg20[%c0_106, %c0_107] : memref<64x32xf32, #tpu.memory_space<vmem>>, vector<64x32xf32>
    %252 = arith.truncf %251 : vector<64x32xf32> to vector<64x32xbf16>
    %c0_108 = arith.constant 0 : index
    %c0_109 = arith.constant 0 : index
    %253 = vector.load %arg14[%c0_108, %c0_109] : memref<32x32xbf16, #tpu.memory_space<vmem>>, vector<32x32xbf16>
    %cst_110 = arith.constant dense<0.000000e+00> : vector<64x32xf32>
    %254 = tpu.matmul %252, %253, %cst_110 {dimension_numbers = #tpu.dot_dimension_numbers<[1], [0], [0], [1], [0, 0, 1, 1], [], []>} : vector<64x32xbf16>, vector<32x32xbf16>, vector<64x32xf32> -> vector<64x32xf32>
    %c6 = arith.constant 6 : index
    %c0_111 = arith.constant 0 : index
    %255 = vector.load %arg5[%c6, %c0_111] : memref<10x32xf32, #tpu.memory_space<vmem>>, vector<1x32xf32>
    %256 = vector.broadcast %255 : vector<1x32xf32> to vector<64x32xf32>
    %257 = arith.addf %254, %256 : vector<64x32xf32>
    %258 = arith.addf %257, %148 : vector<64x32xf32>
    %cst_112 = arith.constant dense<0.000000e+00> : vector<64xf32>
    %259 = vector.multi_reduction <add>, %258, %cst_112 [1] : vector<64x32xf32> to vector<64xf32>
    %260 = vector.shape_cast %259 : vector<64xf32> to vector<64x1xf32>
    %cst_113 = arith.constant 3.200000e+01 : f32
    %261 = vector.broadcast %cst_113 : f32 to vector<64x1xf32>
    %262 = arith.divf %260, %261 : vector<64x1xf32>
    %263 = vector.broadcast %262 : vector<64x1xf32> to vector<64x32xf32>
    %264 = arith.subf %258, %263 : vector<64x32xf32>
    %265 = arith.mulf %264, %264 : vector<64x32xf32>
    %cst_114 = arith.constant dense<0.000000e+00> : vector<64xf32>
    %266 = vector.multi_reduction <add>, %265, %cst_114 [1] : vector<64x32xf32> to vector<64xf32>
    %267 = vector.shape_cast %266 : vector<64xf32> to vector<64x1xf32>
    %cst_115 = arith.constant 3.200000e+01 : f32
    %268 = vector.broadcast %cst_115 : f32 to vector<64x1xf32>
    %269 = arith.divf %267, %268 : vector<64x1xf32>
    %270 = vector.broadcast %262 : vector<64x1xf32> to vector<64x32xf32>
    %271 = arith.subf %258, %270 : vector<64x32xf32>
    %cst_116 = arith.constant 9.99999974E-6 : f32
    %272 = vector.broadcast %cst_116 : f32 to vector<64x1xf32>
    %273 = arith.addf %269, %272 : vector<64x1xf32>
    %274 = math.rsqrt %273 : vector<64x1xf32>
    %275 = vector.broadcast %274 : vector<64x1xf32> to vector<64x32xf32>
    %276 = arith.mulf %271, %275 : vector<64x32xf32>
    %c7 = arith.constant 7 : index
    %c0_117 = arith.constant 0 : index
    %277 = vector.load %arg5[%c7, %c0_117] : memref<10x32xf32, #tpu.memory_space<vmem>>, vector<1x32xf32>
    %278 = vector.broadcast %277 : vector<1x32xf32> to vector<64x32xf32>
    %279 = arith.mulf %276, %278 : vector<64x32xf32>
    %c8_118 = arith.constant 8 : index
    %c0_119 = arith.constant 0 : index
    %280 = vector.load %arg5[%c8_118, %c0_119] : memref<10x32xf32, #tpu.memory_space<vmem>>, vector<1x32xf32>
    %281 = vector.broadcast %280 : vector<1x32xf32> to vector<64x32xf32>
    %282 = arith.addf %279, %281 : vector<64x32xf32>
    %283 = arith.truncf %282 : vector<64x32xf32> to vector<64x32xbf16>
    %c0_120 = arith.constant 0 : index
    %c0_121 = arith.constant 0 : index
    %284 = vector.load %arg15[%c0_120, %c0_121] : memref<32x256xbf16, #tpu.memory_space<vmem>>, vector<32x256xbf16>
    %cst_122 = arith.constant dense<0.000000e+00> : vector<64x256xf32>
    %285 = tpu.matmul %283, %284, %cst_122 {dimension_numbers = #tpu.dot_dimension_numbers<[1], [0], [0], [1], [0, 0, 1, 1], [], []>} : vector<64x32xbf16>, vector<32x256xbf16>, vector<64x256xf32> -> vector<64x256xf32>
    %c0_123 = arith.constant 0 : index
    %c0_124 = arith.constant 0 : index
    %286 = vector.load %arg16[%c0_123, %c0_124] : memref<1x256xf32, #tpu.memory_space<vmem>>, vector<1x256xf32>
    %287 = vector.broadcast %286 : vector<1x256xf32> to vector<64x256xf32>
    %288 = arith.addf %285, %287 : vector<64x256xf32>
    %289 = vector.extract_strided_slice %288 {offsets = [0, 0], sizes = [64, 128], strides = [1, 1]} : vector<64x256xf32> to vector<64x128xf32>
    %290 = vector.extract_strided_slice %288 {offsets = [0, 128], sizes = [64, 128], strides = [1, 1]} : vector<64x256xf32> to vector<64x128xf32>
    %cst_125 = arith.constant 5.000000e-01 : f32
    %291 = vector.broadcast %cst_125 : f32 to vector<64x128xf32>
    %292 = arith.mulf %291, %290 : vector<64x128xf32>
    %cst_126 = arith.constant 4.471500e-02 : f32
    %293 = vector.broadcast %cst_126 : f32 to vector<64x128xf32>
    %294 = arith.mulf %293, %290 : vector<64x128xf32>
    %295 = arith.mulf %294, %290 : vector<64x128xf32>
    %296 = arith.mulf %295, %290 : vector<64x128xf32>
    %297 = arith.addf %290, %296 : vector<64x128xf32>
    %cst_127 = arith.constant 0.797884583 : f32
    %298 = vector.broadcast %cst_127 : f32 to vector<64x128xf32>
    %299 = arith.mulf %298, %297 : vector<64x128xf32>
    %300 = math.tanh %299 : vector<64x128xf32>
    %cst_128 = arith.constant 1.000000e+00 : f32
    %301 = vector.broadcast %cst_128 : f32 to vector<64x128xf32>
    %302 = arith.addf %301, %300 : vector<64x128xf32>
    %303 = arith.mulf %292, %302 : vector<64x128xf32>
    %304 = arith.mulf %289, %303 : vector<64x128xf32>
    %305 = arith.truncf %304 : vector<64x128xf32> to vector<64x128xbf16>
    %c0_129 = arith.constant 0 : index
    %c0_130 = arith.constant 0 : index
    %306 = vector.load %arg17[%c0_129, %c0_130] : memref<128x32xbf16, #tpu.memory_space<vmem>>, vector<128x32xbf16>
    %cst_131 = arith.constant dense<0.000000e+00> : vector<64x32xf32>
    %307 = tpu.matmul %305, %306, %cst_131 {dimension_numbers = #tpu.dot_dimension_numbers<[1], [0], [0], [1], [0, 0, 1, 1], [], []>} : vector<64x128xbf16>, vector<128x32xbf16>, vector<64x32xf32> -> vector<64x32xf32>
    %c9 = arith.constant 9 : index
    %c0_132 = arith.constant 0 : index
    %308 = vector.load %arg5[%c9, %c0_132] : memref<10x32xf32, #tpu.memory_space<vmem>>, vector<1x32xf32>
    %309 = vector.broadcast %308 : vector<1x32xf32> to vector<64x32xf32>
    %310 = arith.addf %307, %309 : vector<64x32xf32>
    %311 = arith.addf %310, %258 : vector<64x32xf32>
    %c0_133 = arith.constant 0 : index
    %c0_134 = arith.constant 0 : index
    %312 = vector.load %arg18[%c0_133, %c0_134] : memref<64x32xbf16, #tpu.memory_space<vmem>>, vector<64x32xbf16>
    %313 = arith.truncf %311 : vector<64x32xf32> to vector<64x32xbf16>
    %cst_135 = arith.constant dense<0.000000e+00> : vector<64x64xf32>
    %314 = tpu.matmul %312, %313, %cst_135 {dimension_numbers = #tpu.dot_dimension_numbers<[1], [1], [0], [0], [0, 0, 1, 0], [], []>} : vector<64x32xbf16>, vector<64x32xbf16>, vector<64x64xf32> -> vector<64x64xf32>
    %c0_136 = arith.constant 0 : index
    %c2_137 = arith.constant 2 : index
    %315 = vector.load %arg3[%c0_136, %c2_137] : memref<64x3xf32, #tpu.memory_space<vmem>>, vector<64x1xf32>
    %316 = vector.broadcast %315 : vector<64x1xf32> to vector<64x64xf32>
    %317 = arith.addf %314, %316 : vector<64x64xf32>
    %c0_138 = arith.constant 0 : index
    %c0_139 = arith.constant 0 : index
    %c0_140 = arith.constant 0 : index
    %318 = vector.load %arg1[%c0_138, %c0_139, %c0_140] : memref<1x64x64xf32, #tpu.memory_space<vmem>>, vector<1x64x64xf32>
    %319 = vector.shape_cast %318 : vector<1x64x64xf32> to vector<64x64xf32>
    %320 = arith.addf %317, %319 : vector<64x64xf32>
    %c0_141 = arith.constant 0 : index
    %c0_142 = arith.constant 0 : index
    %c0_143 = arith.constant 0 : index
    %321 = vector.load %arg19[%c0_141, %c0_142, %c0_143] : memref<1x64x64xf32, #tpu.memory_space<vmem>>, vector<1x64x64xf32>
    %322 = vector.shape_cast %321 : vector<1x64x64xf32> to vector<64x64xf32>
    %323 = vector.shape_cast %320 : vector<64x64xf32> to vector<1x64x64xf32>
    tpu.vector_store %arg19[%c0_141, %c0_142, %c0_143], %323 {strides = array<i32>} : memref<1x64x64xf32, #tpu.memory_space<vmem>>, vector<1x64x64xf32>,
    return
  }
  func.func @transform_0(%arg0: i32) -> (i32, i32, i32) {
    %c0_i32 = arith.constant 0 : i32
    %c0_i32_0 = arith.constant 0 : i32
    %c0_i32_1 = arith.constant 0 : i32
    return %arg0, %c0_i32, %c0_i32_0 : i32, i32, i32
  }
  func.func @transform_1(%arg0: i32) -> (i32, i32, i32) {
    %c0_i32 = arith.constant 0 : i32
    %c0_i32_0 = arith.constant 0 : i32
    %c0_i32_1 = arith.constant 0 : i32
    return %arg0, %c0_i32, %c0_i32_0 : i32, i32, i32
  }
  func.func @transform_2(%arg0: i32) -> (i32, i32) {
    %c0_i32 = arith.constant 0 : i32
    %c0_i32_0 = arith.constant 0 : i32
    %c0_i32_1 = arith.constant 0 : i32
    return %c0_i32, %c0_i32_0 : i32, i32
  }
  func.func @transform_3(%arg0: i32) -> (i32, i32) {
    %c0_i32 = arith.constant 0 : i32
    %c0_i32_0 = arith.constant 0 : i32
    %c0_i32_1 = arith.constant 0 : i32
    return %c0_i32, %c0_i32_0 : i32, i32
  }
  func.func @transform_4(%arg0: i32) -> (i32, i32) {
    %c0_i32 = arith.constant 0 : i32
    %c0_i32_0 = arith.constant 0 : i32
    %c0_i32_1 = arith.constant 0 : i32
    return %c0_i32, %c0_i32_0 : i32, i32
  }
  func.func @transform_5(%arg0: i32) -> (i32, i32) {
    %c0_i32 = arith.constant 0 : i32
    %c0_i32_0 = arith.constant 0 : i32
    %c0_i32_1 = arith.constant 0 : i32
    return %c0_i32, %c0_i32_0 : i32, i32
  }
  func.func @transform_6(%arg0: i32) -> (i32, i32) {
    %c0_i32 = arith.constant 0 : i32
    %c0_i32_0 = arith.constant 0 : i32
    %c0_i32_1 = arith.constant 0 : i32
    return %c0_i32, %c0_i32_0 : i32, i32
  }
  func.func @transform_7(%arg0: i32) -> (i32, i32) {
    %c0_i32 = arith.constant 0 : i32
    %c0_i32_0 = arith.constant 0 : i32
    %c0_i32_1 = arith.constant 0 : i32
    return %c0_i32, %c0_i32_0 : i32, i32
  }
  func.func @transform_8(%arg0: i32) -> (i32, i32) {
    %c0_i32 = arith.constant 0 : i32
    %c0_i32_0 = arith.constant 0 : i32
    %c0_i32_1 = arith.constant 0 : i32
    return %c0_i32, %c0_i32_0 : i32, i32
  }
  func.func @transform_9(%arg0: i32) -> (i32, i32) {
    %c0_i32 = arith.constant 0 : i32
    %c0_i32_0 = arith.constant 0 : i32
    %c0_i32_1 = arith.constant 0 : i32
    return %c0_i32, %c0_i32_0 : i32, i32
  }
  func.func @transform_10(%arg0: i32) -> (i32, i32) {
    %c0_i32 = arith.constant 0 : i32
    %c0_i32_0 = arith.constant 0 : i32
    %c0_i32_1 = arith.constant 0 : i32
    return %c0_i32, %c0_i32_0 : i32, i32
  }
  func.func @transform_11(%arg0: i32) -> (i32, i32) {
    %c0_i32 = arith.constant 0 : i32
    %c0_i32_0 = arith.constant 0 : i32
    %c0_i32_1 = arith.constant 0 : i32
    return %c0_i32, %c0_i32_0 : i32, i32
  }
  func.func @transform_12(%arg0: i32) -> (i32, i32) {
    %c0_i32 = arith.constant 0 : i32
    %c0_i32_0 = arith.constant 0 : i32
    %c0_i32_1 = arith.constant 0 : i32
    return %c0_i32, %c0_i32_0 : i32, i32
  }
  func.func @transform_13(%arg0: i32) -> (i32, i32) {
    %c0_i32 = arith.constant 0 : i32
    %c0_i32_0 = arith.constant 0 : i32
    %c0_i32_1 = arith.constant 0 : i32
    return %c0_i32, %c0_i32_0 : i32, i32
  }
  func.func @transform_14(%arg0: i32) -> (i32, i32) {
    %c0_i32 = arith.constant 0 : i32
    %c0_i32_0 = arith.constant 0 : i32
    %c0_i32_1 = arith.constant 0 : i32
    return %c0_i32, %c0_i32_0 : i32, i32
  }
  func.func @transform_15(%arg0: i32) -> (i32, i32) {
    %c0_i32 = arith.constant 0 : i32
    %c0_i32_0 = arith.constant 0 : i32
    %c0_i32_1 = arith.constant 0 : i32
    return %c0_i32, %c0_i32_0 : i32, i32
  }
  func.func @transform_16(%arg0: i32) -> (i32, i32) {
    %c0_i32 = arith.constant 0 : i32
    %c0_i32_0 = arith.constant 0 : i32
    %c0_i32_1 = arith.constant 0 : i32
    return %c0_i32, %c0_i32_0 : i32, i32
  }
  func.func @transform_17(%arg0: i32) -> (i32, i32) {
    %c0_i32 = arith.constant 0 : i32
    %c0_i32_0 = arith.constant 0 : i32
    %c0_i32_1 = arith.constant 0 : i32
    return %c0_i32, %c0_i32_0 : i32, i32
  }
  func.func @transform_18(%arg0: i32) -> (i32, i32, i32) {
    %c0_i32 = arith.constant 0 : i32
    %c0_i32_0 = arith.constant 0 : i32
    %c0_i32_1 = arith.constant 0 : i32
    return %arg0, %c0_i32, %c0_i32_0 : i32, i32, i32
  }
}

module attributes {stable_mosaic.version = 11 : i64} {
  func.func @_spatial_transformer_kernel(%arg0: i32, %arg1: memref<1x64x64xf32, #tpu.memory_space<vmem>>, %arg2: memref<1x8x16xbf16, #tpu.memory_space<vmem>>, %arg3: memref<64x3xf32, #tpu.memory_space<vmem>>, %arg4: memref<64x64xf32, #tpu.memory_space<vmem>>, %arg5: memref<10x32xf32, #tpu.memory_space<vmem>>, %arg6: memref<64x32xbf16, #tpu.memory_space<vmem>>, %arg7: memref<32x32xbf16, #tpu.memory_space<vmem>>, %arg8: memref<32x32xbf16, #tpu.memory_space<vmem>>, %arg9: memref<32x32xbf16, #tpu.memory_space<vmem>>, %arg10: memref<32x32xbf16, #tpu.memory_space<vmem>>, %arg11: memref<32x32xbf16, #tpu.memory_space<vmem>>, %arg12: memref<16x32xbf16, #tpu.memory_space<vmem>>, %arg13: memref<16x32xbf16, #tpu.memory_space<vmem>>, %arg14: memref<32x32xbf16, #tpu.memory_space<vmem>>, %arg15: memref<32x256xbf16, #tpu.memory_space<vmem>>, %arg16: memref<1x256xf32, #tpu.memory_space<vmem>>, %arg17: memref<128x32xbf16, #tpu.memory_space<vmem>>, %arg18: memref<64x32xbf16, #tpu.memory_space<vmem>>, %arg19: memref<1x64x64xf32, #tpu.memory_space<vmem>>, %arg20: memref<64x32xf32, #tpu.memory_space<vmem>>) attributes {dimension_semantics = [#tpu.dimension_semantics<parallel>], iteration_bounds = array<i64: 2>, scalar_prefetch = 0 : i64, scratch_operands = 1 : i64, tpu.core_type = #tpu.core_type<tc>, window_params = [{transform_indices = @transform_0, window_bounds = array<i64: 1, 64, 64>}, {transform_indices = @transform_1, window_bounds = array<i64: 1, 8, 16>}, {pipeline_mode = #tpu.pipeline_mode<synchronous>, transform_indices = @transform_2, window_bounds = array<i64: 64, 3>}, {pipeline_mode = #tpu.pipeline_mode<synchronous>, transform_indices = @transform_3, window_bounds = array<i64: 64, 64>}, {pipeline_mode = #tpu.pipeline_mode<synchronous>, transform_indices = @transform_4, window_bounds = array<i64: 10, 32>}, {pipeline_mode = #tpu.pipeline_mode<synchronous>, transform_indices = @transform_5, window_bounds = array<i64: 64, 32>}, {pipeline_mode = #tpu.pipeline_mode<synchronous>, transform_indices = @transform_6, window_bounds = array<i64: 32, 32>}, {pipeline_mode = #tpu.pipeline_mode<synchronous>, transform_indices = @transform_7, window_bounds = array<i64: 32, 32>}, {pipeline_mode = #tpu.pipeline_mode<synchronous>, transform_indices = @transform_8, window_bounds = array<i64: 32, 32>}, {pipeline_mode = #tpu.pipeline_mode<synchronous>, transform_indices = @transform_9, window_bounds = array<i64: 32, 32>}, {pipeline_mode = #tpu.pipeline_mode<synchronous>, transform_indices = @transform_10, window_bounds = array<i64: 32, 32>}, {pipeline_mode = #tpu.pipeline_mode<synchronous>, transform_indices = @transform_11, window_bounds = array<i64: 16, 32>}, {pipeline_mode = #tpu.pipeline_mode<synchronous>, transform_indices = @transform_12, window_bounds = array<i64: 16, 32>}, {pipeline_mode = #tpu.pipeline_mode<synchronous>, transform_indices = @transform_13, window_bounds = array<i64: 32, 32>}, {pipeline_mode = #tpu.pipeline_mode<synchronous>, transform_indices = @transform_14, window_bounds = array<i64: 32, 256>}, {pipeline_mode = #tpu.pipeline_mode<synchronous>, transform_indices = @transform_15, window_bounds = array<i64: 1, 256>}, {pipeline_mode = #tpu.pipeline_mode<synchronous>, transform_indices = @transform_16, window_bounds = array<i64: 128, 32>}, {pipeline_mode = #tpu.pipeline_mode<synchronous>, transform_indices = @transform_17, window_bounds = array<i64: 64, 32>}, {transform_indices = @transform_18, window_bounds = array<i64: 1, 64, 64>}]} {
    %c0 = arith.constant 0 : index
    %c0_0 = arith.constant 0 : index
    %c0_1 = arith.constant 0 : index
    %0 = vector.load %arg1[%c0, %c0_0, %c0_1] : memref<1x64x64xf32, #tpu.memory_space<vmem>>, vector<1x64x64xf32>
    %1 = vector.shape_cast %0 : vector<1x64x64xf32> to vector<64x64xf32>
    %cst = arith.constant dense<0.000000e+00> : vector<64xf32>
    %2 = vector.multi_reduction <add>, %1, %cst [1] : vector<64x64xf32> to vector<64xf32>
    %3 = vector.shape_cast %2 : vector<64xf32> to vector<64x1xf32>
    %4 = arith.mulf %1, %1 : vector<64x64xf32>
    %cst_2 = arith.constant dense<0.000000e+00> : vector<64xf32>
    %5 = vector.multi_reduction <add>, %4, %cst_2 [1] : vector<64x64xf32> to vector<64xf32>
    %6 = vector.shape_cast %5 : vector<64xf32> to vector<64x1xf32>
    %c0_3 = arith.constant 0 : index
    %c0_4 = arith.constant 0 : index
    %7 = vector.load %arg4[%c0_3, %c0_4] : memref<64x64xf32, #tpu.memory_space<vmem>>, vector<64x64xf32>
    %cst_5 = arith.constant dense<0.000000e+00> : vector<64x1xf32>
    %8 = tpu.matmul %7, %3, %cst_5 {dimension_numbers = #tpu.dot_dimension_numbers<[1], [0], [0], [1], [0, 0, 1, 1], [], []>} : vector<64x64xf32>, vector<64x1xf32>, vector<64x1xf32> -> vector<64x1xf32>
    %cst_6 = arith.constant 7.812500e-03 : f32
    %9 = vector.broadcast %cst_6 : f32 to vector<64x1xf32>
    %10 = arith.mulf %8, %9 : vector<64x1xf32>
    %cst_7 = arith.constant dense<0.000000e+00> : vector<64x1xf32>
    %11 = tpu.matmul %7, %6, %cst_7 {dimension_numbers = #tpu.dot_dimension_numbers<[1], [0], [0], [1], [0, 0, 1, 1], [], []>} : vector<64x64xf32>, vector<64x1xf32>, vector<64x1xf32> -> vector<64x1xf32>
    %cst_8 = arith.constant 7.812500e-03 : f32
    %12 = vector.broadcast %cst_8 : f32 to vector<64x1xf32>
    %13 = arith.mulf %11, %12 : vector<64x1xf32>
    %14 = arith.mulf %10, %10 : vector<64x1xf32>
    %15 = arith.subf %13, %14 : vector<64x1xf32>
    %cst_9 = arith.constant 0.000000e+00 : f32
    %16 = vector.broadcast %cst_9 : f32 to vector<64x1xf32>
    %17 = arith.maximumf %15, %16 : vector<64x1xf32>
    %cst_10 = arith.constant 9.99999974E-6 : f32
    %18 = vector.broadcast %cst_10 : f32 to vector<64x1xf32>
    %19 = arith.addf %17, %18 : vector<64x1xf32>
    %20 = math.rsqrt %19 : vector<64x1xf32>
    %c0_11 = arith.constant 0 : index
    %c0_12 = arith.constant 0 : index
    %21 = vector.load %arg3[%c0_11, %c0_12] : memref<64x3xf32, #tpu.memory_space<vmem>>, vector<64x1xf32>
    %22 = arith.mulf %21, %20 : vector<64x1xf32>
    %c0_13 = arith.constant 0 : index
    %c1 = arith.constant 1 : index
    %23 = vector.load %arg3[%c0_13, %c1] : memref<64x3xf32, #tpu.memory_space<vmem>>, vector<64x1xf32>
    %24 = arith.mulf %10, %22 : vector<64x1xf32>
    %25 = arith.subf %23, %24 : vector<64x1xf32>
    %26 = vector.broadcast %22 : vector<64x1xf32> to vector<64x64xf32>
    %27 = arith.mulf %1, %26 : vector<64x64xf32>
    %28 = vector.broadcast %25 : vector<64x1xf32> to vector<64x64xf32>
    %29 = arith.addf %27, %28 : vector<64x64xf32>
    %30 = arith.truncf %29 : vector<64x64xf32> to vector<64x64xbf16>
    %c0_14 = arith.constant 0 : index
    %c0_15 = arith.constant 0 : index
    %31 = vector.load %arg6[%c0_14, %c0_15] : memref<64x32xbf16, #tpu.memory_space<vmem>>, vector<64x32xbf16>
    %cst_16 = arith.constant dense<0.000000e+00> : vector<64x32xf32>
    %32 = tpu.matmul %30, %31, %cst_16 {dimension_numbers = #tpu.dot_dimension_numbers<[0], [0], [1], [1], [0, 1, 1, 1], [], []>} : vector<64x64xbf16>, vector<64x32xbf16>, vector<64x32xf32> -> vector<64x32xf32>
    %c0_17 = arith.constant 0 : index
    %c0_18 = arith.constant 0 : index
    %33 = vector.load %arg5[%c0_17, %c0_18] : memref<10x32xf32, #tpu.memory_space<vmem>>, vector<1x32xf32>
    %34 = vector.broadcast %33 : vector<1x32xf32> to vector<64x32xf32>
    %35 = arith.addf %32, %34 : vector<64x32xf32>
    %c0_19 = arith.constant 0 : index
    %c0_20 = arith.constant 0 : index
    %c0_21 = arith.constant 0 : index
    %36 = vector.load %arg2[%c0_19, %c0_20, %c0_21] : memref<1x8x16xbf16, #tpu.memory_space<vmem>>, vector<1x8x16xbf16>
    %37 = vector.shape_cast %36 : vector<1x8x16xbf16> to vector<8x16xbf16>
    %cst_22 = arith.constant dense<0.000000e+00> : vector<64xf32>
    %38 = vector.multi_reduction <add>, %35, %cst_22 [1] : vector<64x32xf32> to vector<64xf32>
    %39 = vector.shape_cast %38 : vector<64xf32> to vector<64x1xf32>
    %cst_23 = arith.constant 3.200000e+01 : f32
    %40 = vector.broadcast %cst_23 : f32 to vector<64x1xf32>
    %41 = arith.divf %39, %40 : vector<64x1xf32>
    %42 = vector.broadcast %41 : vector<64x1xf32> to vector<64x32xf32>
    %43 = arith.subf %35, %42 : vector<64x32xf32>
    %44 = arith.mulf %43, %43 : vector<64x32xf32>
    %cst_24 = arith.constant dense<0.000000e+00> : vector<64xf32>
    %45 = vector.multi_reduction <add>, %44, %cst_24 [1] : vector<64x32xf32> to vector<64xf32>
    %46 = vector.shape_cast %45 : vector<64xf32> to vector<64x1xf32>
    %cst_25 = arith.constant 3.200000e+01 : f32
    %47 = vector.broadcast %cst_25 : f32 to vector<64x1xf32>
    %48 = arith.divf %46, %47 : vector<64x1xf32>
    %49 = vector.broadcast %41 : vector<64x1xf32> to vector<64x32xf32>
    %50 = arith.subf %35, %49 : vector<64x32xf32>
    %cst_26 = arith.constant 9.99999974E-6 : f32
    %51 = vector.broadcast %cst_26 : f32 to vector<64x1xf32>
    %52 = arith.addf %48, %51 : vector<64x1xf32>
    %53 = math.rsqrt %52 : vector<64x1xf32>
    %54 = vector.broadcast %53 : vector<64x1xf32> to vector<64x32xf32>
    %55 = arith.mulf %50, %54 : vector<64x32xf32>
    %c1_27 = arith.constant 1 : index
    %c0_28 = arith.constant 0 : index
    %56 = vector.load %arg5[%c1_27, %c0_28] : memref<10x32xf32, #tpu.memory_space<vmem>>, vector<1x32xf32>
    %57 = vector.broadcast %56 : vector<1x32xf32> to vector<64x32xf32>
    %58 = arith.mulf %55, %57 : vector<64x32xf32>
    %c2 = arith.constant 2 : index
    %c0_29 = arith.constant 0 : index
    %59 = vector.load %arg5[%c2, %c0_29] : memref<10x32xf32, #tpu.memory_space<vmem>>, vector<1x32xf32>
    %60 = vector.broadcast %59 : vector<1x32xf32> to vector<64x32xf32>
    %61 = arith.addf %58, %60 : vector<64x32xf32>
    %62 = arith.truncf %61 : vector<64x32xf32> to vector<64x32xbf16>
    %63 = arith.truncf %61 : vector<64x32xf32> to vector<64x32xbf16>
    %c0_30 = arith.constant 0 : index
    %c0_31 = arith.constant 0 : index
    %64 = vector.load %arg7[%c0_30, %c0_31] : memref<32x32xbf16, #tpu.memory_space<vmem>>, vector<32x32xbf16>
    %cst_32 = arith.constant dense<0.000000e+00> : vector<64x32xf32>
    %65 = tpu.matmul %62, %64, %cst_32 {dimension_numbers = #tpu.dot_dimension_numbers<[1], [0], [0], [1], [0, 0, 1, 1], [], []>} : vector<64x32xbf16>, vector<32x32xbf16>, vector<64x32xf32> -> vector<64x32xf32>
    %66 = arith.truncf %65 : vector<64x32xf32> to vector<64x32xbf16>
    %c0_33 = arith.constant 0 : index
    %c0_34 = arith.constant 0 : index
    %67 = vector.load %arg8[%c0_33, %c0_34] : memref<32x32xbf16, #tpu.memory_space<vmem>>, vector<32x32xbf16>
    %cst_35 = arith.constant dense<0.000000e+00> : vector<64x32xf32>
    %68 = tpu.matmul %63, %67, %cst_35 {dimension_numbers = #tpu.dot_dimension_numbers<[1], [0], [0], [1], [0, 0, 1, 1], [], []>} : vector<64x32xbf16>, vector<32x32xbf16>, vector<64x32xf32> -> vector<64x32xf32>
    %69 = arith.truncf %68 : vector<64x32xf32> to vector<64x32xbf16>
    %c0_36 = arith.constant 0 : index
    %c0_37 = arith.constant 0 : index
    %70 = vector.load %arg9[%c0_36, %c0_37] : memref<32x32xbf16, #tpu.memory_space<vmem>>, vector<32x32xbf16>
    %cst_38 = arith.constant dense<0.000000e+00> : vector<64x32xf32>
    %71 = tpu.matmul %63, %70, %cst_38 {dimension_numbers = #tpu.dot_dimension_numbers<[1], [0], [0], [1], [0, 0, 1, 1], [], []>} : vector<64x32xbf16>, vector<32x32xbf16>, vector<64x32xf32> -> vector<64x32xf32>
    %72 = arith.truncf %71 : vector<64x32xf32> to vector<64x32xbf16>
    %73 = vector.extract_strided_slice %66 {offsets = [0, 0], sizes = [64, 8], strides = [1, 1]} : vector<64x32xbf16> to vector<64x8xbf16>
    %74 = vector.extract_strided_slice %69 {offsets = [0, 0], sizes = [64, 8], strides = [1, 1]} : vector<64x32xbf16> to vector<64x8xbf16>
    %75 = vector.extract_strided_slice %72 {offsets = [0, 0], sizes = [64, 8], strides = [1, 1]} : vector<64x32xbf16> to vector<64x8xbf16>
    %cst_39 = arith.constant dense<0.000000e+00> : vector<64x64xf32>
    %76 = tpu.matmul %73, %74, %cst_39 {dimension_numbers = #tpu.dot_dimension_numbers<[1], [1], [0], [0], [0, 0, 1, 0], [], []>} : vector<64x8xbf16>, vector<64x8xbf16>, vector<64x64xf32> -> vector<64x64xf32>
    %cst_40 = arith.constant dense<0xFF800000> : vector<64xf32>
    %77 = vector.multi_reduction <maximumf>, %76, %cst_40 [1] : vector<64x64xf32> to vector<64xf32>
    %78 = vector.shape_cast %77 : vector<64xf32> to vector<64x1xf32>
    %79 = vector.broadcast %78 : vector<64x1xf32> to vector<64x64xf32>
    %80 = arith.subf %76, %79 : vector<64x64xf32>
    %81 = math.exp %80 : vector<64x64xf32>
    %cst_41 = arith.constant dense<0.000000e+00> : vector<64xf32>
    %82 = vector.multi_reduction <add>, %81, %cst_41 [1] : vector<64x64xf32> to vector<64xf32>
    %83 = vector.shape_cast %82 : vector<64xf32> to vector<64x1xf32>
    %84 = tpu.reciprocal %83 {approx = true} : vector<64x1xf32> -> vector<64x1xf32>
    %85 = vector.broadcast %84 : vector<64x1xf32> to vector<64x64xf32>
    %86 = arith.mulf %81, %85 : vector<64x64xf32>
    %87 = arith.truncf %86 : vector<64x64xf32> to vector<64x64xbf16>
    %cst_42 = arith.constant dense<0.000000e+00> : vector<64x8xf32>
    %88 = tpu.matmul %87, %75, %cst_42 {dimension_numbers = #tpu.dot_dimension_numbers<[1], [0], [0], [1], [0, 0, 1, 1], [], []>} : vector<64x64xbf16>, vector<64x8xbf16>, vector<64x8xf32> -> vector<64x8xf32>
    %c0_43 = arith.constant 0 : index
    %c0_44 = arith.constant 0 : index
    %89 = vector.load %arg20[%c0_43, %c0_44] : memref<64x32xf32, #tpu.memory_space<vmem>>, vector<64x8xf32>
    tpu.vector_store %arg20[%c0_43, %c0_44], %88 {strides = array<i32>} : memref<64x32xf32, #tpu.memory_space<vmem>>, vector<64x8xf32>,
    %90 = vector.extract_strided_slice %66 {offsets = [0, 8], sizes = [64, 8], strides = [1, 1]} : vector<64x32xbf16> to vector<64x8xbf16>
    %91 = vector.extract_strided_slice %69 {offsets = [0, 8], sizes = [64, 8], strides = [1, 1]} : vector<64x32xbf16> to vector<64x8xbf16>
    %92 = vector.extract_strided_slice %72 {offsets = [0, 8], sizes = [64, 8], strides = [1, 1]} : vector<64x32xbf16> to vector<64x8xbf16>
    %cst_45 = arith.constant dense<0.000000e+00> : vector<64x64xf32>
    %93 = tpu.matmul %90, %91, %cst_45 {dimension_numbers = #tpu.dot_dimension_numbers<[1], [1], [0], [0], [0, 0, 1, 0], [], []>} : vector<64x8xbf16>, vector<64x8xbf16>, vector<64x64xf32> -> vector<64x64xf32>
    %cst_46 = arith.constant dense<0xFF800000> : vector<64xf32>
    %94 = vector.multi_reduction <maximumf>, %93, %cst_46 [1] : vector<64x64xf32> to vector<64xf32>
    %95 = vector.shape_cast %94 : vector<64xf32> to vector<64x1xf32>
    %96 = vector.broadcast %95 : vector<64x1xf32> to vector<64x64xf32>
    %97 = arith.subf %93, %96 : vector<64x64xf32>
    %98 = math.exp %97 : vector<64x64xf32>
    %cst_47 = arith.constant dense<0.000000e+00> : vector<64xf32>
    %99 = vector.multi_reduction <add>, %98, %cst_47 [1] : vector<64x64xf32> to vector<64xf32>
    %100 = vector.shape_cast %99 : vector<64xf32> to vector<64x1xf32>
    %101 = tpu.reciprocal %100 {approx = true} : vector<64x1xf32> -> vector<64x1xf32>
    %102 = vector.broadcast %101 : vector<64x1xf32> to vector<64x64xf32>
    %103 = arith.mulf %98, %102 : vector<64x64xf32>
    %104 = arith.truncf %103 : vector<64x64xf32> to vector<64x64xbf16>
    %cst_48 = arith.constant dense<0.000000e+00> : vector<64x8xf32>
    %105 = tpu.matmul %104, %92, %cst_48 {dimension_numbers = #tpu.dot_dimension_numbers<[1], [0], [0], [1], [0, 0, 1, 1], [], []>} : vector<64x64xbf16>, vector<64x8xbf16>, vector<64x8xf32> -> vector<64x8xf32>
    %c0_49 = arith.constant 0 : index
    %c8 = arith.constant 8 : index
    %106 = vector.load %arg20[%c0_49, %c8] : memref<64x32xf32, #tpu.memory_space<vmem>>, vector<64x8xf32>
    tpu.vector_store %arg20[%c0_49, %c8], %105 {strides = array<i32>} : memref<64x32xf32, #tpu.memory_space<vmem>>, vector<64x8xf32>,
    %107 = vector.extract_strided_slice %66 {offsets = [0, 16], sizes = [64, 8], strides = [1, 1]} : vector<64x32xbf16> to vector<64x8xbf16>
    %108 = vector.extract_strided_slice %69 {offsets = [0, 16], sizes = [64, 8], strides = [1, 1]} : vector<64x32xbf16> to vector<64x8xbf16>
    %109 = vector.extract_strided_slice %72 {offsets = [0, 16], sizes = [64, 8], strides = [1, 1]} : vector<64x32xbf16> to vector<64x8xbf16>
    %cst_50 = arith.constant dense<0.000000e+00> : vector<64x64xf32>
    %110 = tpu.matmul %107, %108, %cst_50 {dimension_numbers = #tpu.dot_dimension_numbers<[1], [1], [0], [0], [0, 0, 1, 0], [], []>} : vector<64x8xbf16>, vector<64x8xbf16>, vector<64x64xf32> -> vector<64x64xf32>
    %cst_51 = arith.constant dense<0xFF800000> : vector<64xf32>
    %111 = vector.multi_reduction <maximumf>, %110, %cst_51 [1] : vector<64x64xf32> to vector<64xf32>
    %112 = vector.shape_cast %111 : vector<64xf32> to vector<64x1xf32>
    %113 = vector.broadcast %112 : vector<64x1xf32> to vector<64x64xf32>
    %114 = arith.subf %110, %113 : vector<64x64xf32>
    %115 = math.exp %114 : vector<64x64xf32>
    %cst_52 = arith.constant dense<0.000000e+00> : vector<64xf32>
    %116 = vector.multi_reduction <add>, %115, %cst_52 [1] : vector<64x64xf32> to vector<64xf32>
    %117 = vector.shape_cast %116 : vector<64xf32> to vector<64x1xf32>
    %118 = tpu.reciprocal %117 {approx = true} : vector<64x1xf32> -> vector<64x1xf32>
    %119 = vector.broadcast %118 : vector<64x1xf32> to vector<64x64xf32>
    %120 = arith.mulf %115, %119 : vector<64x64xf32>
    %121 = arith.truncf %120 : vector<64x64xf32> to vector<64x64xbf16>
    %cst_53 = arith.constant dense<0.000000e+00> : vector<64x8xf32>
    %122 = tpu.matmul %121, %109, %cst_53 {dimension_numbers = #tpu.dot_dimension_numbers<[1], [0], [0], [1], [0, 0, 1, 1], [], []>} : vector<64x64xbf16>, vector<64x8xbf16>, vector<64x8xf32> -> vector<64x8xf32>
    %c0_54 = arith.constant 0 : index
    %c16 = arith.constant 16 : index
    %123 = vector.load %arg20[%c0_54, %c16] : memref<64x32xf32, #tpu.memory_space<vmem>>, vector<64x8xf32>
    tpu.vector_store %arg20[%c0_54, %c16], %122 {strides = array<i32>} : memref<64x32xf32, #tpu.memory_space<vmem>>, vector<64x8xf32>,
    %124 = vector.extract_strided_slice %66 {offsets = [0, 24], sizes = [64, 8], strides = [1, 1]} : vector<64x32xbf16> to vector<64x8xbf16>
    %125 = vector.extract_strided_slice %69 {offsets = [0, 24], sizes = [64, 8], strides = [1, 1]} : vector<64x32xbf16> to vector<64x8xbf16>
    %126 = vector.extract_strided_slice %72 {offsets = [0, 24], sizes = [64, 8], strides = [1, 1]} : vector<64x32xbf16> to vector<64x8xbf16>
    %cst_55 = arith.constant dense<0.000000e+00> : vector<64x64xf32>
    %127 = tpu.matmul %124, %125, %cst_55 {dimension_numbers = #tpu.dot_dimension_numbers<[1], [1], [0], [0], [0, 0, 1, 0], [], []>} : vector<64x8xbf16>, vector<64x8xbf16>, vector<64x64xf32> -> vector<64x64xf32>
    %cst_56 = arith.constant dense<0xFF800000> : vector<64xf32>
    %128 = vector.multi_reduction <maximumf>, %127, %cst_56 [1] : vector<64x64xf32> to vector<64xf32>
    %129 = vector.shape_cast %128 : vector<64xf32> to vector<64x1xf32>
    %130 = vector.broadcast %129 : vector<64x1xf32> to vector<64x64xf32>
    %131 = arith.subf %127, %130 : vector<64x64xf32>
    %132 = math.exp %131 : vector<64x64xf32>
    %cst_57 = arith.constant dense<0.000000e+00> : vector<64xf32>
    %133 = vector.multi_reduction <add>, %132, %cst_57 [1] : vector<64x64xf32> to vector<64xf32>
    %134 = vector.shape_cast %133 : vector<64xf32> to vector<64x1xf32>
    %135 = tpu.reciprocal %134 {approx = true} : vector<64x1xf32> -> vector<64x1xf32>
    %136 = vector.broadcast %135 : vector<64x1xf32> to vector<64x64xf32>
    %137 = arith.mulf %132, %136 : vector<64x64xf32>
    %138 = arith.truncf %137 : vector<64x64xf32> to vector<64x64xbf16>
    %cst_58 = arith.constant dense<0.000000e+00> : vector<64x8xf32>
    %139 = tpu.matmul %138, %126, %cst_58 {dimension_numbers = #tpu.dot_dimension_numbers<[1], [0], [0], [1], [0, 0, 1, 1], [], []>} : vector<64x64xbf16>, vector<64x8xbf16>, vector<64x8xf32> -> vector<64x8xf32>
    %c0_59 = arith.constant 0 : index
    %c24 = arith.constant 24 : index
    %140 = vector.load %arg20[%c0_59, %c24] : memref<64x32xf32, #tpu.memory_space<vmem>>, vector<64x8xf32>
    tpu.vector_store %arg20[%c0_59, %c24], %139 {strides = array<i32>} : memref<64x32xf32, #tpu.memory_space<vmem>>, vector<64x8xf32>,
    %c0_60 = arith.constant 0 : index
    %c0_61 = arith.constant 0 : index
    %141 = vector.load %arg20[%c0_60, %c0_61] : memref<64x32xf32, #tpu.memory_space<vmem>>, vector<64x32xf32>
    %142 = arith.truncf %141 : vector<64x32xf32> to vector<64x32xbf16>
    %c0_62 = arith.constant 0 : index
    %c0_63 = arith.constant 0 : index
    %143 = vector.load %arg10[%c0_62, %c0_63] : memref<32x32xbf16, #tpu.memory_space<vmem>>, vector<32x32xbf16>
    %cst_64 = arith.constant dense<0.000000e+00> : vector<64x32xf32>
    %144 = tpu.matmul %142, %143, %cst_64 {dimension_numbers = #tpu.dot_dimension_numbers<[1], [0], [0], [1], [0, 0, 1, 1], [], []>} : vector<64x32xbf16>, vector<32x32xbf16>, vector<64x32xf32> -> vector<64x32xf32>
    %c3 = arith.constant 3 : index
    %c0_65 = arith.constant 0 : index
    %145 = vector.load %arg5[%c3, %c0_65] : memref<10x32xf32, #tpu.memory_space<vmem>>, vector<1x32xf32>
    %146 = vector.broadcast %145 : vector<1x32xf32> to vector<64x32xf32>
    %147 = arith.addf %144, %146 : vector<64x32xf32>
    %148 = arith.addf %147, %35 : vector<64x32xf32>
    %cst_66 = arith.constant dense<0.000000e+00> : vector<64xf32>
    %149 = vector.multi_reduction <add>, %148, %cst_66 [1] : vector<64x32xf32> to vector<64xf32>
    %150 = vector.shape_cast %149 : vector<64xf32> to vector<64x1xf32>
    %cst_67 = arith.constant 3.200000e+01 : f32
    %151 = vector.broadcast %cst_67 : f32 to vector<64x1xf32>
    %152 = arith.divf %150, %151 : vector<64x1xf32>
    %153 = vector.broadcast %152 : vector<64x1xf32> to vector<64x32xf32>
    %154 = arith.subf %148, %153 : vector<64x32xf32>
    %155 = arith.mulf %154, %154 : vector<64x32xf32>
    %cst_68 = arith.constant dense<0.000000e+00> : vector<64xf32>
    %156 = vector.multi_reduction <add>, %155, %cst_68 [1] : vector<64x32xf32> to vector<64xf32>
    %157 = vector.shape_cast %156 : vector<64xf32> to vector<64x1xf32>
    %cst_69 = arith.constant 3.200000e+01 : f32
    %158 = vector.broadcast %cst_69 : f32 to vector<64x1xf32>
    %159 = arith.divf %157, %158 : vector<64x1xf32>
    %160 = vector.broadcast %152 : vector<64x1xf32> to vector<64x32xf32>
    %161 = arith.subf %148, %160 : vector<64x32xf32>
    %cst_70 = arith.constant 9.99999974E-6 : f32
    %162 = vector.broadcast %cst_70 : f32 to vector<64x1xf32>
    %163 = arith.addf %159, %162 : vector<64x1xf32>
    %164 = math.rsqrt %163 : vector<64x1xf32>
    %165 = vector.broadcast %164 : vector<64x1xf32> to vector<64x32xf32>
    %166 = arith.mulf %161, %165 : vector<64x32xf32>
    %c4 = arith.constant 4 : index
    %c0_71 = arith.constant 0 : index
    %167 = vector.load %arg5[%c4, %c0_71] : memref<10x32xf32, #tpu.memory_space<vmem>>, vector<1x32xf32>
    %168 = vector.broadcast %167 : vector<1x32xf32> to vector<64x32xf32>
    %169 = arith.mulf %166, %168 : vector<64x32xf32>
    %c5 = arith.constant 5 : index
    %c0_72 = arith.constant 0 : index
    %170 = vector.load %arg5[%c5, %c0_72] : memref<10x32xf32, #tpu.memory_space<vmem>>, vector<1x32xf32>
    %171 = vector.broadcast %170 : vector<1x32xf32> to vector<64x32xf32>
    %172 = arith.addf %169, %171 : vector<64x32xf32>
    %173 = arith.truncf %172 : vector<64x32xf32> to vector<64x32xbf16>
    %c0_73 = arith.constant 0 : index
    %c0_74 = arith.constant 0 : index
    %174 = vector.load %arg11[%c0_73, %c0_74] : memref<32x32xbf16, #tpu.memory_space<vmem>>, vector<32x32xbf16>
    %cst_75 = arith.constant dense<0.000000e+00> : vector<64x32xf32>
    %175 = tpu.matmul %173, %174, %cst_75 {dimension_numbers = #tpu.dot_dimension_numbers<[1], [0], [0], [1], [0, 0, 1, 1], [], []>} : vector<64x32xbf16>, vector<32x32xbf16>, vector<64x32xf32> -> vector<64x32xf32>
    %176 = arith.truncf %175 : vector<64x32xf32> to vector<64x32xbf16>
    %c0_76 = arith.constant 0 : index
    %c0_77 = arith.constant 0 : index
    %177 = vector.load %arg12[%c0_76, %c0_77] : memref<16x32xbf16, #tpu.memory_space<vmem>>, vector<16x32xbf16>
    %cst_78 = arith.constant dense<0.000000e+00> : vector<8x32xf32>
    %178 = tpu.matmul %37, %177, %cst_78 {dimension_numbers = #tpu.dot_dimension_numbers<[1], [0], [0], [1], [0, 0, 1, 1], [], []>} : vector<8x16xbf16>, vector<16x32xbf16>, vector<8x32xf32> -> vector<8x32xf32>
    %179 = arith.truncf %178 : vector<8x32xf32> to vector<8x32xbf16>
    %c0_79 = arith.constant 0 : index
    %c0_80 = arith.constant 0 : index
    %180 = vector.load %arg13[%c0_79, %c0_80] : memref<16x32xbf16, #tpu.memory_space<vmem>>, vector<16x32xbf16>
    %cst_81 = arith.constant dense<0.000000e+00> : vector<8x32xf32>
    %181 = tpu.matmul %37, %180, %cst_81 {dimension_numbers = #tpu.dot_dimension_numbers<[1], [0], [0], [1], [0, 0, 1, 1], [], []>} : vector<8x16xbf16>, vector<16x32xbf16>, vector<8x32xf32> -> vector<8x32xf32>
    %182 = arith.truncf %181 : vector<8x32xf32> to vector<8x32xbf16>
    %183 = vector.extract_strided_slice %176 {offsets = [0, 0], sizes = [64, 8], strides = [1, 1]} : vector<64x32xbf16> to vector<64x8xbf16>
    %184 = vector.extract_strided_slice %179 {offsets = [0, 0], sizes = [8, 8], strides = [1, 1]} : vector<8x32xbf16> to vector<8x8xbf16>
    %185 = vector.extract_strided_slice %182 {offsets = [0, 0], sizes = [8, 8], strides = [1, 1]} : vector<8x32xbf16> to vector<8x8xbf16>
    %cst_82 = arith.constant dense<0.000000e+00> : vector<64x8xf32>
    %186 = tpu.matmul %183, %184, %cst_82 {dimension_numbers = #tpu.dot_dimension_numbers<[1], [1], [0], [0], [0, 0, 1, 0], [], []>} : vector<64x8xbf16>, vector<8x8xbf16>, vector<64x8xf32> -> vector<64x8xf32>
    %cst_83 = arith.constant dense<0xFF800000> : vector<64xf32>
    %187 = vector.multi_reduction <maximumf>, %186, %cst_83 [1] : vector<64x8xf32> to vector<64xf32>
    %188 = vector.shape_cast %187 : vector<64xf32> to vector<64x1xf32>
    %189 = vector.broadcast %188 : vector<64x1xf32> to vector<64x8xf32>
    %190 = arith.subf %186, %189 : vector<64x8xf32>
    %191 = math.exp %190 : vector<64x8xf32>
    %cst_84 = arith.constant dense<0.000000e+00> : vector<64xf32>
    %192 = vector.multi_reduction <add>, %191, %cst_84 [1] : vector<64x8xf32> to vector<64xf32>
    %193 = vector.shape_cast %192 : vector<64xf32> to vector<64x1xf32>
    %194 = tpu.reciprocal %193 {approx = true} : vector<64x1xf32> -> vector<64x1xf32>
    %195 = vector.broadcast %194 : vector<64x1xf32> to vector<64x8xf32>
    %196 = arith.mulf %191, %195 : vector<64x8xf32>
    %197 = arith.truncf %196 : vector<64x8xf32> to vector<64x8xbf16>
    %cst_85 = arith.constant dense<0.000000e+00> : vector<64x8xf32>
    %198 = tpu.matmul %197, %185, %cst_85 {dimension_numbers = #tpu.dot_dimension_numbers<[1], [0], [0], [1], [0, 0, 1, 1], [], []>} : vector<64x8xbf16>, vector<8x8xbf16>, vector<64x8xf32> -> vector<64x8xf32>
    %c0_86 = arith.constant 0 : index
    %c0_87 = arith.constant 0 : index
    %199 = vector.load %arg20[%c0_86, %c0_87] : memref<64x32xf32, #tpu.memory_space<vmem>>, vector<64x8xf32>
    tpu.vector_store %arg20[%c0_86, %c0_87], %198 {strides = array<i32>} : memref<64x32xf32, #tpu.memory_space<vmem>>, vector<64x8xf32>,
    %200 = vector.extract_strided_slice %176 {offsets = [0, 8], sizes = [64, 8], strides = [1, 1]} : vector<64x32xbf16> to vector<64x8xbf16>
    %201 = vector.extract_strided_slice %179 {offsets = [0, 8], sizes = [8, 8], strides = [1, 1]} : vector<8x32xbf16> to vector<8x8xbf16>
    %202 = vector.extract_strided_slice %182 {offsets = [0, 8], sizes = [8, 8], strides = [1, 1]} : vector<8x32xbf16> to vector<8x8xbf16>
    %cst_88 = arith.constant dense<0.000000e+00> : vector<64x8xf32>
    %203 = tpu.matmul %200, %201, %cst_88 {dimension_numbers = #tpu.dot_dimension_numbers<[1], [1], [0], [0], [0, 0, 1, 0], [], []>} : vector<64x8xbf16>, vector<8x8xbf16>, vector<64x8xf32> -> vector<64x8xf32>
    %cst_89 = arith.constant dense<0xFF800000> : vector<64xf32>
    %204 = vector.multi_reduction <maximumf>, %203, %cst_89 [1] : vector<64x8xf32> to vector<64xf32>
    %205 = vector.shape_cast %204 : vector<64xf32> to vector<64x1xf32>
    %206 = vector.broadcast %205 : vector<64x1xf32> to vector<64x8xf32>
    %207 = arith.subf %203, %206 : vector<64x8xf32>
    %208 = math.exp %207 : vector<64x8xf32>
    %cst_90 = arith.constant dense<0.000000e+00> : vector<64xf32>
    %209 = vector.multi_reduction <add>, %208, %cst_90 [1] : vector<64x8xf32> to vector<64xf32>
    %210 = vector.shape_cast %209 : vector<64xf32> to vector<64x1xf32>
    %211 = tpu.reciprocal %210 {approx = true} : vector<64x1xf32> -> vector<64x1xf32>
    %212 = vector.broadcast %211 : vector<64x1xf32> to vector<64x8xf32>
    %213 = arith.mulf %208, %212 : vector<64x8xf32>
    %214 = arith.truncf %213 : vector<64x8xf32> to vector<64x8xbf16>
    %cst_91 = arith.constant dense<0.000000e+00> : vector<64x8xf32>
    %215 = tpu.matmul %214, %202, %cst_91 {dimension_numbers = #tpu.dot_dimension_numbers<[1], [0], [0], [1], [0, 0, 1, 1], [], []>} : vector<64x8xbf16>, vector<8x8xbf16>, vector<64x8xf32> -> vector<64x8xf32>
    %c0_92 = arith.constant 0 : index
    %c8_93 = arith.constant 8 : index
    %216 = vector.load %arg20[%c0_92, %c8_93] : memref<64x32xf32, #tpu.memory_space<vmem>>, vector<64x8xf32>
    tpu.vector_store %arg20[%c0_92, %c8_93], %215 {strides = array<i32>} : memref<64x32xf32, #tpu.memory_space<vmem>>, vector<64x8xf32>,
    %217 = vector.extract_strided_slice %176 {offsets = [0, 16], sizes = [64, 8], strides = [1, 1]} : vector<64x32xbf16> to vector<64x8xbf16>
    %218 = vector.extract_strided_slice %179 {offsets = [0, 16], sizes = [8, 8], strides = [1, 1]} : vector<8x32xbf16> to vector<8x8xbf16>
    %219 = vector.extract_strided_slice %182 {offsets = [0, 16], sizes = [8, 8], strides = [1, 1]} : vector<8x32xbf16> to vector<8x8xbf16>
    %cst_94 = arith.constant dense<0.000000e+00> : vector<64x8xf32>
    %220 = tpu.matmul %217, %218, %cst_94 {dimension_numbers = #tpu.dot_dimension_numbers<[1], [1], [0], [0], [0, 0, 1, 0], [], []>} : vector<64x8xbf16>, vector<8x8xbf16>, vector<64x8xf32> -> vector<64x8xf32>
    %cst_95 = arith.constant dense<0xFF800000> : vector<64xf32>
    %221 = vector.multi_reduction <maximumf>, %220, %cst_95 [1] : vector<64x8xf32> to vector<64xf32>
    %222 = vector.shape_cast %221 : vector<64xf32> to vector<64x1xf32>
    %223 = vector.broadcast %222 : vector<64x1xf32> to vector<64x8xf32>
    %224 = arith.subf %220, %223 : vector<64x8xf32>
    %225 = math.exp %224 : vector<64x8xf32>
    %cst_96 = arith.constant dense<0.000000e+00> : vector<64xf32>
    %226 = vector.multi_reduction <add>, %225, %cst_96 [1] : vector<64x8xf32> to vector<64xf32>
    %227 = vector.shape_cast %226 : vector<64xf32> to vector<64x1xf32>
    %228 = tpu.reciprocal %227 {approx = true} : vector<64x1xf32> -> vector<64x1xf32>
    %229 = vector.broadcast %228 : vector<64x1xf32> to vector<64x8xf32>
    %230 = arith.mulf %225, %229 : vector<64x8xf32>
    %231 = arith.truncf %230 : vector<64x8xf32> to vector<64x8xbf16>
    %cst_97 = arith.constant dense<0.000000e+00> : vector<64x8xf32>
    %232 = tpu.matmul %231, %219, %cst_97 {dimension_numbers = #tpu.dot_dimension_numbers<[1], [0], [0], [1], [0, 0, 1, 1], [], []>} : vector<64x8xbf16>, vector<8x8xbf16>, vector<64x8xf32> -> vector<64x8xf32>
    %c0_98 = arith.constant 0 : index
    %c16_99 = arith.constant 16 : index
    %233 = vector.load %arg20[%c0_98, %c16_99] : memref<64x32xf32, #tpu.memory_space<vmem>>, vector<64x8xf32>
    tpu.vector_store %arg20[%c0_98, %c16_99], %232 {strides = array<i32>} : memref<64x32xf32, #tpu.memory_space<vmem>>, vector<64x8xf32>,
    %234 = vector.extract_strided_slice %176 {offsets = [0, 24], sizes = [64, 8], strides = [1, 1]} : vector<64x32xbf16> to vector<64x8xbf16>
    %235 = vector.extract_strided_slice %179 {offsets = [0, 24], sizes = [8, 8], strides = [1, 1]} : vector<8x32xbf16> to vector<8x8xbf16>
    %236 = vector.extract_strided_slice %182 {offsets = [0, 24], sizes = [8, 8], strides = [1, 1]} : vector<8x32xbf16> to vector<8x8xbf16>
    %cst_100 = arith.constant dense<0.000000e+00> : vector<64x8xf32>
    %237 = tpu.matmul %234, %235, %cst_100 {dimension_numbers = #tpu.dot_dimension_numbers<[1], [1], [0], [0], [0, 0, 1, 0], [], []>} : vector<64x8xbf16>, vector<8x8xbf16>, vector<64x8xf32> -> vector<64x8xf32>
    %cst_101 = arith.constant dense<0xFF800000> : vector<64xf32>
    %238 = vector.multi_reduction <maximumf>, %237, %cst_101 [1] : vector<64x8xf32> to vector<64xf32>
    %239 = vector.shape_cast %238 : vector<64xf32> to vector<64x1xf32>
    %240 = vector.broadcast %239 : vector<64x1xf32> to vector<64x8xf32>
    %241 = arith.subf %237, %240 : vector<64x8xf32>
    %242 = math.exp %241 : vector<64x8xf32>
    %cst_102 = arith.constant dense<0.000000e+00> : vector<64xf32>
    %243 = vector.multi_reduction <add>, %242, %cst_102 [1] : vector<64x8xf32> to vector<64xf32>
    %244 = vector.shape_cast %243 : vector<64xf32> to vector<64x1xf32>
    %245 = tpu.reciprocal %244 {approx = true} : vector<64x1xf32> -> vector<64x1xf32>
    %246 = vector.broadcast %245 : vector<64x1xf32> to vector<64x8xf32>
    %247 = arith.mulf %242, %246 : vector<64x8xf32>
    %248 = arith.truncf %247 : vector<64x8xf32> to vector<64x8xbf16>
    %cst_103 = arith.constant dense<0.000000e+00> : vector<64x8xf32>
    %249 = tpu.matmul %248, %236, %cst_103 {dimension_numbers = #tpu.dot_dimension_numbers<[1], [0], [0], [1], [0, 0, 1, 1], [], []>} : vector<64x8xbf16>, vector<8x8xbf16>, vector<64x8xf32> -> vector<64x8xf32>
    %c0_104 = arith.constant 0 : index
    %c24_105 = arith.constant 24 : index
    %250 = vector.load %arg20[%c0_104, %c24_105] : memref<64x32xf32, #tpu.memory_space<vmem>>, vector<64x8xf32>
    tpu.vector_store %arg20[%c0_104, %c24_105], %249 {strides = array<i32>} : memref<64x32xf32, #tpu.memory_space<vmem>>, vector<64x8xf32>,
    %c0_106 = arith.constant 0 : index
    %c0_107 = arith.constant 0 : index
    %251 = vector.load %arg20[%c0_106, %c0_107] : memref<64x32xf32, #tpu.memory_space<vmem>>, vector<64x32xf32>
    %252 = arith.truncf %251 : vector<64x32xf32> to vector<64x32xbf16>
    %c0_108 = arith.constant 0 : index
    %c0_109 = arith.constant 0 : index
    %253 = vector.load %arg14[%c0_108, %c0_109] : memref<32x32xbf16, #tpu.memory_space<vmem>>, vector<32x32xbf16>
    %cst_110 = arith.constant dense<0.000000e+00> : vector<64x32xf32>
    %254 = tpu.matmul %252, %253, %cst_110 {dimension_numbers = #tpu.dot_dimension_numbers<[1], [0], [0], [1], [0, 0, 1, 1], [], []>} : vector<64x32xbf16>, vector<32x32xbf16>, vector<64x32xf32> -> vector<64x32xf32>
    %c6 = arith.constant 6 : index
    %c0_111 = arith.constant 0 : index
    %255 = vector.load %arg5[%c6, %c0_111] : memref<10x32xf32, #tpu.memory_space<vmem>>, vector<1x32xf32>
    %256 = vector.broadcast %255 : vector<1x32xf32> to vector<64x32xf32>
    %257 = arith.addf %254, %256 : vector<64x32xf32>
    %258 = arith.addf %257, %148 : vector<64x32xf32>
    %cst_112 = arith.constant dense<0.000000e+00> : vector<64xf32>
    %259 = vector.multi_reduction <add>, %258, %cst_112 [1] : vector<64x32xf32> to vector<64xf32>
    %260 = vector.shape_cast %259 : vector<64xf32> to vector<64x1xf32>
    %cst_113 = arith.constant 3.200000e+01 : f32
    %261 = vector.broadcast %cst_113 : f32 to vector<64x1xf32>
    %262 = arith.divf %260, %261 : vector<64x1xf32>
    %263 = vector.broadcast %262 : vector<64x1xf32> to vector<64x32xf32>
    %264 = arith.subf %258, %263 : vector<64x32xf32>
    %265 = arith.mulf %264, %264 : vector<64x32xf32>
    %cst_114 = arith.constant dense<0.000000e+00> : vector<64xf32>
    %266 = vector.multi_reduction <add>, %265, %cst_114 [1] : vector<64x32xf32> to vector<64xf32>
    %267 = vector.shape_cast %266 : vector<64xf32> to vector<64x1xf32>
    %cst_115 = arith.constant 3.200000e+01 : f32
    %268 = vector.broadcast %cst_115 : f32 to vector<64x1xf32>
    %269 = arith.divf %267, %268 : vector<64x1xf32>
    %270 = vector.broadcast %262 : vector<64x1xf32> to vector<64x32xf32>
    %271 = arith.subf %258, %270 : vector<64x32xf32>
    %cst_116 = arith.constant 9.99999974E-6 : f32
    %272 = vector.broadcast %cst_116 : f32 to vector<64x1xf32>
    %273 = arith.addf %269, %272 : vector<64x1xf32>
    %274 = math.rsqrt %273 : vector<64x1xf32>
    %275 = vector.broadcast %274 : vector<64x1xf32> to vector<64x32xf32>
    %276 = arith.mulf %271, %275 : vector<64x32xf32>
    %c7 = arith.constant 7 : index
    %c0_117 = arith.constant 0 : index
    %277 = vector.load %arg5[%c7, %c0_117] : memref<10x32xf32, #tpu.memory_space<vmem>>, vector<1x32xf32>
    %278 = vector.broadcast %277 : vector<1x32xf32> to vector<64x32xf32>
    %279 = arith.mulf %276, %278 : vector<64x32xf32>
    %c8_118 = arith.constant 8 : index
    %c0_119 = arith.constant 0 : index
    %280 = vector.load %arg5[%c8_118, %c0_119] : memref<10x32xf32, #tpu.memory_space<vmem>>, vector<1x32xf32>
    %281 = vector.broadcast %280 : vector<1x32xf32> to vector<64x32xf32>
    %282 = arith.addf %279, %281 : vector<64x32xf32>
    %283 = arith.truncf %282 : vector<64x32xf32> to vector<64x32xbf16>
    %c0_120 = arith.constant 0 : index
    %c0_121 = arith.constant 0 : index
    %284 = vector.load %arg15[%c0_120, %c0_121] : memref<32x256xbf16, #tpu.memory_space<vmem>>, vector<32x256xbf16>
    %cst_122 = arith.constant dense<0.000000e+00> : vector<64x256xf32>
    %285 = tpu.matmul %283, %284, %cst_122 {dimension_numbers = #tpu.dot_dimension_numbers<[1], [0], [0], [1], [0, 0, 1, 1], [], []>} : vector<64x32xbf16>, vector<32x256xbf16>, vector<64x256xf32> -> vector<64x256xf32>
    %c0_123 = arith.constant 0 : index
    %c0_124 = arith.constant 0 : index
    %286 = vector.load %arg16[%c0_123, %c0_124] : memref<1x256xf32, #tpu.memory_space<vmem>>, vector<1x256xf32>
    %287 = vector.broadcast %286 : vector<1x256xf32> to vector<64x256xf32>
    %288 = arith.addf %285, %287 : vector<64x256xf32>
    %289 = vector.extract_strided_slice %288 {offsets = [0, 0], sizes = [64, 128], strides = [1, 1]} : vector<64x256xf32> to vector<64x128xf32>
    %290 = vector.extract_strided_slice %288 {offsets = [0, 128], sizes = [64, 128], strides = [1, 1]} : vector<64x256xf32> to vector<64x128xf32>
    %cst_125 = arith.constant 5.000000e-01 : f32
    %291 = vector.broadcast %cst_125 : f32 to vector<64x128xf32>
    %292 = arith.mulf %291, %290 : vector<64x128xf32>
    %cst_126 = arith.constant 4.471500e-02 : f32
    %293 = vector.broadcast %cst_126 : f32 to vector<64x128xf32>
    %294 = arith.mulf %293, %290 : vector<64x128xf32>
    %295 = arith.mulf %294, %290 : vector<64x128xf32>
    %296 = arith.mulf %295, %290 : vector<64x128xf32>
    %297 = arith.addf %290, %296 : vector<64x128xf32>
    %cst_127 = arith.constant 0.797884583 : f32
    %298 = vector.broadcast %cst_127 : f32 to vector<64x128xf32>
    %299 = arith.mulf %298, %297 : vector<64x128xf32>
    %300 = math.tanh %299 : vector<64x128xf32>
    %cst_128 = arith.constant 1.000000e+00 : f32
    %301 = vector.broadcast %cst_128 : f32 to vector<64x128xf32>
    %302 = arith.addf %301, %300 : vector<64x128xf32>
    %303 = arith.mulf %292, %302 : vector<64x128xf32>
    %304 = arith.mulf %289, %303 : vector<64x128xf32>
    %305 = arith.truncf %304 : vector<64x128xf32> to vector<64x128xbf16>
    %c0_129 = arith.constant 0 : index
    %c0_130 = arith.constant 0 : index
    %306 = vector.load %arg17[%c0_129, %c0_130] : memref<128x32xbf16, #tpu.memory_space<vmem>>, vector<128x32xbf16>
    %cst_131 = arith.constant dense<0.000000e+00> : vector<64x32xf32>
    %307 = tpu.matmul %305, %306, %cst_131 {dimension_numbers = #tpu.dot_dimension_numbers<[1], [0], [0], [1], [0, 0, 1, 1], [], []>} : vector<64x128xbf16>, vector<128x32xbf16>, vector<64x32xf32> -> vector<64x32xf32>
    %c9 = arith.constant 9 : index
    %c0_132 = arith.constant 0 : index
    %308 = vector.load %arg5[%c9, %c0_132] : memref<10x32xf32, #tpu.memory_space<vmem>>, vector<1x32xf32>
    %309 = vector.broadcast %308 : vector<1x32xf32> to vector<64x32xf32>
    %310 = arith.addf %307, %309 : vector<64x32xf32>
    %311 = arith.addf %310, %258 : vector<64x32xf32>
    %c0_133 = arith.constant 0 : index
    %c0_134 = arith.constant 0 : index
    %312 = vector.load %arg18[%c0_133, %c0_134] : memref<64x32xbf16, #tpu.memory_space<vmem>>, vector<64x32xbf16>
    %313 = arith.truncf %311 : vector<64x32xf32> to vector<64x32xbf16>
    %cst_135 = arith.constant dense<0.000000e+00> : vector<64x64xf32>
    %314 = tpu.matmul %312, %313, %cst_135 {dimension_numbers = #tpu.dot_dimension_numbers<[1], [1], [0], [0], [0, 0, 1, 0], [], []>} : vector<64x32xbf16>, vector<64x32xbf16>, vector<64x64xf32> -> vector<64x64xf32>
    %c0_136 = arith.constant 0 : index
    %c2_137 = arith.constant 2 : index
    %315 = vector.load %arg3[%c0_136, %c2_137] : memref<64x3xf32, #tpu.memory_space<vmem>>, vector<64x1xf32>
    %316 = vector.broadcast %315 : vector<64x1xf32> to vector<64x64xf32>
    %317 = arith.addf %314, %316 : vector<64x64xf32>
    %c0_138 = arith.constant 0 : index
    %c0_139 = arith.constant 0 : index
    %c0_140 = arith.constant 0 : index
    %318 = vector.load %arg1[%c0_138, %c0_139, %c0_140] : memref<1x64x64xf32, #tpu.memory_space<vmem>>, vector<1x64x64xf32>
    %319 = vector.shape_cast %318 : vector<1x64x64xf32> to vector<64x64xf32>
    %320 = arith.addf %317, %319 : vector<64x64xf32>
    %c0_141 = arith.constant 0 : index
    %c0_142 = arith.constant 0 : index
    %c0_143 = arith.constant 0 : index
    %321 = vector.load %arg19[%c0_141, %c0_142, %c0_143] : memref<1x64x64xf32, #tpu.memory_space<vmem>>, vector<1x64x64xf32>
    %322 = vector.shape_cast %321 : vector<1x64x64xf32> to vector<64x64xf32>
    %323 = vector.shape_cast %320 : vector<64x64xf32> to vector<1x64x64xf32>
    tpu.vector_store %arg19[%c0_141, %c0_142, %c0_143], %323 {strides = array<i32>} : memref<1x64x64xf32, #tpu.memory_space<vmem>>, vector<1x64x64xf32>,
    return
  }
  func.func @transform_0(%arg0: i32) -> (i32, i32, i32) {
    %c0_i32 = arith.constant 0 : i32
    %c0_i32_0 = arith.constant 0 : i32
    %c0_i32_1 = arith.constant 0 : i32
    return %arg0, %c0_i32, %c0_i32_0 : i32, i32, i32
  }
  func.func @transform_1(%arg0: i32) -> (i32, i32, i32) {
    %c0_i32 = arith.constant 0 : i32
    %c0_i32_0 = arith.constant 0 : i32
    %c0_i32_1 = arith.constant 0 : i32
    return %arg0, %c0_i32, %c0_i32_0 : i32, i32, i32
  }
  func.func @transform_2(%arg0: i32) -> (i32, i32) {
    %c0_i32 = arith.constant 0 : i32
    %c0_i32_0 = arith.constant 0 : i32
    %c0_i32_1 = arith.constant 0 : i32
    return %c0_i32, %c0_i32_0 : i32, i32
  }
  func.func @transform_3(%arg0: i32) -> (i32, i32) {
    %c0_i32 = arith.constant 0 : i32
    %c0_i32_0 = arith.constant 0 : i32
    %c0_i32_1 = arith.constant 0 : i32
    return %c0_i32, %c0_i32_0 : i32, i32
  }
  func.func @transform_4(%arg0: i32) -> (i32, i32) {
    %c0_i32 = arith.constant 0 : i32
    %c0_i32_0 = arith.constant 0 : i32
    %c0_i32_1 = arith.constant 0 : i32
    return %c0_i32, %c0_i32_0 : i32, i32
  }
  func.func @transform_5(%arg0: i32) -> (i32, i32) {
    %c0_i32 = arith.constant 0 : i32
    %c0_i32_0 = arith.constant 0 : i32
    %c0_i32_1 = arith.constant 0 : i32
    return %c0_i32, %c0_i32_0 : i32, i32
  }
  func.func @transform_6(%arg0: i32) -> (i32, i32) {
    %c0_i32 = arith.constant 0 : i32
    %c0_i32_0 = arith.constant 0 : i32
    %c0_i32_1 = arith.constant 0 : i32
    return %c0_i32, %c0_i32_0 : i32, i32
  }
  func.func @transform_7(%arg0: i32) -> (i32, i32) {
    %c0_i32 = arith.constant 0 : i32
    %c0_i32_0 = arith.constant 0 : i32
    %c0_i32_1 = arith.constant 0 : i32
    return %c0_i32, %c0_i32_0 : i32, i32
  }
  func.func @transform_8(%arg0: i32) -> (i32, i32) {
    %c0_i32 = arith.constant 0 : i32
    %c0_i32_0 = arith.constant 0 : i32
    %c0_i32_1 = arith.constant 0 : i32
    return %c0_i32, %c0_i32_0 : i32, i32
  }
  func.func @transform_9(%arg0: i32) -> (i32, i32) {
    %c0_i32 = arith.constant 0 : i32
    %c0_i32_0 = arith.constant 0 : i32
    %c0_i32_1 = arith.constant 0 : i32
    return %c0_i32, %c0_i32_0 : i32, i32
  }
  func.func @transform_10(%arg0: i32) -> (i32, i32) {
    %c0_i32 = arith.constant 0 : i32
    %c0_i32_0 = arith.constant 0 : i32
    %c0_i32_1 = arith.constant 0 : i32
    return %c0_i32, %c0_i32_0 : i32, i32
  }
  func.func @transform_11(%arg0: i32) -> (i32, i32) {
    %c0_i32 = arith.constant 0 : i32
    %c0_i32_0 = arith.constant 0 : i32
    %c0_i32_1 = arith.constant 0 : i32
    return %c0_i32, %c0_i32_0 : i32, i32
  }
  func.func @transform_12(%arg0: i32) -> (i32, i32) {
    %c0_i32 = arith.constant 0 : i32
    %c0_i32_0 = arith.constant 0 : i32
    %c0_i32_1 = arith.constant 0 : i32
    return %c0_i32, %c0_i32_0 : i32, i32
  }
  func.func @transform_13(%arg0: i32) -> (i32, i32) {
    %c0_i32 = arith.constant 0 : i32
    %c0_i32_0 = arith.constant 0 : i32
    %c0_i32_1 = arith.constant 0 : i32
    return %c0_i32, %c0_i32_0 : i32, i32
  }
  func.func @transform_14(%arg0: i32) -> (i32, i32) {
    %c0_i32 = arith.constant 0 : i32
    %c0_i32_0 = arith.constant 0 : i32
    %c0_i32_1 = arith.constant 0 : i32
    return %c0_i32, %c0_i32_0 : i32, i32
  }
  func.func @transform_15(%arg0: i32) -> (i32, i32) {
    %c0_i32 = arith.constant 0 : i32
    %c0_i32_0 = arith.constant 0 : i32
    %c0_i32_1 = arith.constant 0 : i32
    return %c0_i32, %c0_i32_0 : i32, i32
  }
  func.func @transform_16(%arg0: i32) -> (i32, i32) {
    %c0_i32 = arith.constant 0 : i32
    %c0_i32_0 = arith.constant 0 : i32
    %c0_i32_1 = arith.constant 0 : i32
    return %c0_i32, %c0_i32_0 : i32, i32
  }
  func.func @transform_17(%arg0: i32) -> (i32, i32) {
    %c0_i32 = arith.constant 0 : i32
    %c0_i32_0 = arith.constant 0 : i32
    %c0_i32_1 = arith.constant 0 : i32
    return %c0_i32, %c0_i32_0 : i32, i32
  }
  func.func @transform_18(%arg0: i32) -> (i32, i32, i32) {
    %c0_i32 = arith.constant 0 : i32
    %c0_i32_0 = arith.constant 0 : i32
    %c0_i32_1 = arith.constant 0 : i32
    return %arg0, %c0_i32, %c0_i32_0 : i32, i32, i32
  }
}

</mosaic_0001>

<bundles_post_ra>
// kernel: tpu_custom_call.1
= control target key start
LH: loop header
LB: loop body
LE: loop exit
PB: predicated region body
PF: predicated region fallthrough
CT: control target
= control target key end

     0   :  { %s9296_s0 = inlined_call_operand.vmem [shape: f32[2,64,64], index: 0, kind: input, shape index: {}]   ;;  %s9297_s1 = inlined_call_operand.hbm [shape: bf16[2,8,16], index: 1, kind: input, shape index: {}]   ;;  %s9298_s2 = inlined_call_operand.vmem [shape: f32[64,3], index: 2, kind: input, shape index: {}]   ;;  %s9299_s3 = inlined_call_operand.vmem [shape: f32[64,64], index: 3, kind: input, shape index: {}]   ;;  %s9300_s4 = inlined_call_operand.hbm [shape: f32[10,32], index: 4, kind: input, shape index: {}]   ;;  %s9301_s5 = inlined_call_operand.vmem [shape: bf16[64,32], index: 5, kind: input, shape index: {}]   ;;  %s9302_s6 = inlined_call_operand.hbm [shape: bf16[32,32], index: 6, kind: input, shape index: {}]   ;;  %s9303_s7 = inlined_call_operand.hbm [shape: bf16[32,32], index: 7, kind: input, shape index: {}]   ;;  %s9304_s8 = inlined_call_operand.hbm [shape: bf16[32,32], index: 8, kind: input, shape index: {}]   ;;  %s9305_s9 = inlined_call_operand.hbm [shape: bf16[32,32], index: 9, kind: input, shape index: {}]   ;;  %s9306_s10 = inlined_call_operand.hbm [shape: bf16[32,32], index: 10, kind: input, shape index: {}]   ;;  %s9307_s11 = inlined_call_operand.hbm [shape: bf16[16,32], index: 11, kind: input, shape index: {}]   ;;  %s9308_s12 = inlined_call_operand.vmem [shape: bf16[16,32], index: 12, kind: input, shape index: {}]   ;;  %s9309_s13 = inlined_call_operand.hbm [shape: bf16[32,32], index: 13, kind: input, shape index: {}]   ;;  %s9310_s14 = inlined_call_operand.vmem [shape: bf16[32,256], index: 14, kind: input, shape index: {}]   ;;  %s9311_s15 = inlined_call_operand.vmem [shape: f32[1,256], index: 15, kind: input, shape index: {}]   ;;  %s9312_s16 = inlined_call_operand.vmem [shape: bf16[128,32], index: 16, kind: input, shape index: {}]   ;;  %s9313_s17 = inlined_call_operand.vmem [shape: bf16[64,32], index: 17, kind: input, shape index: {}]   ;;  %s9314_s18 = inlined_call_operand.hbm [shape: f32[2,64,64], index: 18, kind: output, shape index: {}]  }
   0x1   :  { %9323 = sst [smem:[#allocation25_spill]] %s9296_s0 }
   0x2   :  { %9324 = sst [smem:[#allocation26_spill]] %s9297_s1 }
   0x3   :  { %9325 = sst [smem:[#allocation27_spill]] %s9298_s2 }
   0x4   :  { %9326 = sst [smem:[#allocation28_spill]] %s9300_s4 }
   0x5   :  { %9327 = sst [smem:[#allocation29_spill]] %s9302_s6 }
   0x6   :  { %9328 = sst [smem:[#allocation30_spill]] %s9303_s7 }
   0x7   :  { %9329 = sst [smem:[#allocation31_spill]] %s9304_s8 }
   0x8   :  { %9330 = sst [smem:[#allocation32_spill]] %s9305_s9 }
   0x9   :  { %9331 = sst [smem:[#allocation33_spill]] %s9306_s10 }
   0xa   :  { %9332 = sst [smem:[#allocation34_spill]] %s9307_s11 }
   0xb   :  { %9333 = sst [smem:[#allocation35_spill]] %s9309_s13 }
   0xc   :  { %9334 = sst [smem:[#allocation36_spill]] %s9311_s15 }
   0xd   :  { %9335 = sst [smem:[#allocation37_spill]] %s9313_s17 }
   0xe   :  { %9336 = sst [smem:[#allocation38_spill]] %s9314_s18 }
   0xf   :  { %23 = vsyncpa [#allocation4], 0 }
  0x10   :  { %25 = vsyncpa [#allocation4 + $0x1], 0 }
  0x11   :  { %26 = vsyncpa [#allocation7], 0 }
  0x12   :  { %27 = vsyncpa [#allocation10], 0 }
  0x13   :  { %28 = vsyncpa [#allocation13], 0 }
  0x14   :  { %29 = vsyncpa [#allocation16], 0 }
  0x15   :  { %30 = vsyncpa [#allocation5], 0 }
  0x16   :  { %32 = vsyncpa [#allocation5 + $0x1], 0  ;;  %s7439_s27 = smov 0   ;;  %s7441_s28 = smov 0  }
  0x17   :  { %s7443_s29 = smov 0   ;;  %s7445_s30 = smov 0  }
  0x18 LB: > { %s7317_s0 = smov [#allocation6]   ;;  %s7460_s1 = sadd.s32 4294967295, %s7315_s30   ;;  %s7315_s30 = sphi %s7445_s30, %s9375_s30   ;;  %s7311_s29 = sphi %s7443_s29, %s9374_s29   ;;  %s7307_s28 = sphi %s7441_s28, %s9373_s28   ;;  %s7303_s27 = sphi %s7439_s27, %s9372_s27  }
  0x19   : > { %s475_s19 = sshll.u32 %s7317_s0, 4  ;;  %p5647_p0 = scmp.ge.s32.totalorder %s7315_s30, 1  ;;  %s476_s19 = int_to_ptr.vmem [resolvable:$true] %s475_s19 }
  0x1a   : > { %p9319_p1 = scmp.eq.s32.totalorder %s7460_s1, 0  ;;  %p457_p2 = scmp.lt.s32.totalorder %s7315_s30, 3 }
  0x1b   : > { %s7318_s22 = smov [#allocation9]   ;;  %s7319_s23 = smov [#allocation12]  }
  0x1c   : > { %p7465_p3 = pnand %p5647_p0, %p457_p2  ;;  %s504_s2 = sshll.u32 %s7318_s22, 4  ;;  %s7478_s2 = int_to_ptr.vmem [resolvable:$true] %s504_s2 }
  0x1d   : > { %s7480_s24 = sshll.u32 %s7319_s23, 4  ;;  %s7010_s26 = scalar_lea.vmem %s476_s19, 256  ;;  %s531_s24 = int_to_ptr.vmem [resolvable:$true] %s7480_s24 }
  0x1e   : > { %s9337_s20 = scalar_select %p7465_p3, 1, 0 }
  0x1f   : > { %p6513_p5 = pneg %p7465_p3  ;;  %p7011_p8 = scmp.ne.s32.totalorder %s476_s19, %s7010_s26 }
  0x20   : > { %p7018_p11 = scmp.lt.s32.totalorder %s476_s19, %s476_s19  ;;  %p7019_p12 = scmp.lt.s32.totalorder %s7010_s26, %s7010_s26 }
  0x21   : > { %p7474_p6 = pnand %p6513_p5, %p9319_p1 }
  0x22   : > { %p7020_p13 = por %p7019_p12, %p7018_p11 }
  0x23   : > { %p7484_p7 = pneg %p7474_p6 }
  0x25   : > { %p7013_p9 = pnand %p7011_p8, %p7484_p7 }
  0x27   : > { %p7014_p10 = pneg %p7013_p9 }
  0x29   : > { %p7021_p0 = pnand %p7020_p13, %p7014_p10 }
  0x2b   : > { %7024 = shalt.err (!%p7021_p0)
}
  0x2c   : > { %s7320_s0 = smov 128   ;;  %s7321_s22 = smov 8  }
  0x2d   : > { %s9340_s4 = sld [smem:[#allocation28_spill]]  ;;  %s7036_s17 = scalar_lea.vmem %s7478_s2, 256 }
  0x2e   : > { %p7037_p2 = scmp.ne.s32.totalorder %s7478_s2, %s7036_s17  ;;  %p7044_p9 = scmp.lt.s32.totalorder %s7478_s2, %s7478_s2 }
  0x2f   : > { %p7045_p10 = scmp.lt.s32.totalorder %s7036_s17, %s7036_s17 }
  0x30   : > { %p7039_p5 = pnand %p7037_p2, %p7484_p7 }
  0x31   : > { %p7046_p11 = por %p7045_p10, %p7044_p9 }
  0x32   : > { %p7040_p8 = pneg %p7039_p5 }
  0x33   : > { %6516 = dma.hbm_to_vmem [thread:$0]  (!%p7474_p6), %s9340_s4, 256, %s476_s19, [#allocation7], %s7320_s0, %s7320_s0, %s7321_s22  }
  0x34   : > { %p7047_p12 = pnand %p7046_p11, %p7040_p8 }
  0x36   : > { %7050 = shalt.err (!%p7047_p12)
}
  0x37   : > { %s7322_s26 = smov 64   ;;  %s7323_s15 = smov 4  }
  0x38   : > { %s9341_s7 = sld [smem:[#allocation30_spill]]  ;;  %s7062_s0 = scalar_lea.vmem %s531_s24, 256 }
  0x39   : > { %p7063_p13 = scmp.ne.s32.totalorder %s531_s24, %s7062_s0  ;;  %p7070_p5 = scmp.lt.s32.totalorder %s531_s24, %s531_s24 }
  0x3a   : > { %p7071_p8 = scmp.lt.s32.totalorder %s7062_s0, %s7062_s0 }
  0x3b   : > { %p7065_p0 = pnand %p7063_p13, %p7484_p7 }
  0x3c   : > { %p7072_p9 = por %p7071_p8, %p7070_p5 }
  0x3d   : > { %p7066_p2 = pneg %p7065_p0 }
  0x3e   : > { %6522 = dma.hbm_to_vmem [thread:$0]  (!%p7474_p6), %s9341_s7, 256, %s7478_s2, [#allocation10], %s7322_s26, %s7322_s26, %s7323_s15  }
  0x3f   : > { %p7073_p10 = pnand %p7072_p9, %p7066_p2 }
  0x41   : > { %7076 = shalt.err (!%p7073_p10)
}
  0x42   : > { %s9342_s9 = sld [smem:[#allocation32_spill]]  ;;  %s7324_s2 = smov [#allocation15]  }
  0x43   : > { %s556_s23 = sshll.u32 %s7324_s2, 4  ;;  %s7325_s18 = smov [#allocation8]   ;;  %s557_s23 = int_to_ptr.vmem [resolvable:$true] %s556_s23 }
  0x44   : > { %s491_s19 = sshll.u32 %s7325_s18, 4  ;;  %s7088_s4 = scalar_lea.vmem %s557_s23, 128  ;;  %s492_s19 = int_to_ptr.vmem [resolvable:$true] %s491_s19 }
  0x45   : > { %p7089_p11 = scmp.ne.s32.totalorder %s557_s23, %s7088_s4  ;;  %p7096_p0 = scmp.lt.s32.totalorder %s557_s23, %s557_s23 }
  0x46   : > { %p7097_p2 = scmp.lt.s32.totalorder %s7088_s4, %s7088_s4 }
  0x47   : > { %p7091_p12 = pnand %p7089_p11, %p7484_p7 }
  0x48   : > { %6528 = dma.hbm_to_vmem [thread:$0]  (!%p7474_p6), %s9342_s9, 256, %s531_s24, [#allocation13], %s7322_s26, %s7322_s26, %s7323_s15  }
  0x49   : > { %p7092_p13 = pneg %p7091_p12  ;;  %p7098_p5 = por %p7097_p2, %p7096_p0 }
  0x4b   : > { %p7099_p8 = pnand %p7098_p5, %p7092_p13 }
  0x4d   : > { %7102 = shalt.err (!%p7099_p8)
}
  0x4e   : > { %s9343_s11 = sld [smem:[#allocation34_spill]]  ;;  %s7114_s17 = scalar_lea.vmem %s492_s19, 256 }
  0x4f   : > { %p7115_p9 = scmp.ne.s32.totalorder %s492_s19, %s7114_s17  ;;  %p7122_p12 = scmp.lt.s32.totalorder %s492_s19, %s492_s19 }
  0x50   : > { %p7123_p0 = scmp.lt.s32.totalorder %s7114_s17, %s7114_s17 }
  0x51   : > { %p7117_p10 = pnand %p7115_p9, %p7484_p7 }
  0x52   : > { %p7124_p13 = por %p7123_p0, %p7122_p12 }
  0x53   : > { %p7118_p11 = pneg %p7117_p10 }
  0x54   : > { %6534 = dma.hbm_to_vmem [thread:$0]  (!%p7474_p6), %s9343_s11, 128, %s557_s23, [#allocation16], %s7322_s26, %s7322_s26, %s7323_s15  }
  0x55   : > { %p7125_p2 = pnand %p7124_p13, %p7118_p11 }
  0x57   : > { %7128 = shalt.err (!%p7125_p2)
}
  0x58   : > { %s9344_s6 = sld [smem:[#allocation29_spill]]  ;;  %s7326_s2 = smov [#allocation11]  }
  0x59   : > { %s517_s23 = sshll.u32 %s7326_s2, 4  ;;  %s7327_s18 = smov [#allocation14]   ;;  %s518_s23 = int_to_ptr.vmem [resolvable:$true] %s517_s23 }
  0x5a   : > { %s543_s24 = sshll.u32 %s7327_s18, 4  ;;  %s7140_s0 = scalar_lea.vmem %s518_s23, 256  ;;  %s544_s24 = int_to_ptr.vmem [resolvable:$true] %s543_s24 }
  0x5b   : > { %p7141_p5 = scmp.ne.s32.totalorder %s518_s23, %s7140_s0  ;;  %p7148_p10 = scmp.lt.s32.totalorder %s518_s23, %s518_s23 }
  0x5c   : > { %p7149_p11 = scmp.lt.s32.totalorder %s7140_s0, %s7140_s0 }
  0x5d   : > { %p7143_p8 = pnand %p7141_p5, %p7484_p7 }
  0x5e   : > { %6519 = dma.hbm_to_vmem [thread:$0]  (!%p7474_p6), %s9344_s6, 256, %s492_s19, [#allocation7], %s7322_s26, %s7322_s26, %s7323_s15  }
  0x5f   : > { %p7144_p9 = pneg %p7143_p8  ;;  %p7150_p12 = por %p7149_p11, %p7148_p10 }
  0x61   : > { %p7151_p0 = pnand %p7150_p12, %p7144_p9 }
  0x63   : > { %7154 = shalt.err (!%p7151_p0)
}
  0x64   : > { %s9345_s8 = sld [smem:[#allocation31_spill]]  ;;  %s7166_s4 = scalar_lea.vmem %s544_s24, 256 }
  0x65   : > { %p7167_p13 = scmp.ne.s32.totalorder %s544_s24, %s7166_s4  ;;  %p7174_p8 = scmp.lt.s32.totalorder %s544_s24, %s544_s24 }
  0x66   : > { %p7175_p10 = scmp.lt.s32.totalorder %s7166_s4, %s7166_s4 }
  0x67   : > { %p7169_p2 = pnand %p7167_p13, %p7484_p7 }
  0x68   : > { %p7176_p9 = por %p7175_p10, %p7174_p8 }
  0x69   : > { %p7170_p5 = pneg %p7169_p2 }
  0x6a   : > { %6525 = dma.hbm_to_vmem [thread:$0]  (!%p7474_p6), %s9345_s8, 256, %s518_s23, [#allocation10], %s7322_s26, %s7322_s26, %s7323_s15  }
  0x6b   : > { %p7177_p11 = pnand %p7176_p9, %p7170_p5 }
  0x6d   : > { %7180 = shalt.err (!%p7177_p11)
}
  0x6e   : > { %s9346_s10 = sld [smem:[#allocation33_spill]]  ;;  %s7328_s23 = smov [#allocation17]  }
  0x6f   : > { %s572_s18 = sshll.u32 %s7328_s23, 4  ;;  %s573_s18 = int_to_ptr.vmem [resolvable:$true] %s572_s18 }
  0x70   : > { %s7192_s0 = scalar_lea.vmem %s573_s18, 256  ;;  %p7200_p2 = scmp.lt.s32.totalorder %s573_s18, %s573_s18 }
  0x71   : > { %p7193_p12 = scmp.ne.s32.totalorder %s573_s18, %s7192_s0  ;;  %p7201_p5 = scmp.lt.s32.totalorder %s7192_s0, %s7192_s0 }
  0x73   : > { %p7195_p0 = pnand %p7193_p12, %p7484_p7  ;;  %p7202_p8 = por %p7201_p5, %p7200_p2 }
  0x74   : > { %6531 = dma.hbm_to_vmem [thread:$0]  (!%p7474_p6), %s9346_s10, 256, %s544_s24, [#allocation13], %s7322_s26, %s7322_s26, %s7323_s15  }
  0x75   : > { %p7196_p13 = pneg %p7195_p0 }
  0x77   : > { %p7203_p10 = pnand %p7202_p8, %p7196_p13 }
  0x79   : > { %7206 = shalt.err (!%p7203_p10)
}
  0x7a   : > { %s9347_s13 = sld [smem:[#allocation35_spill]]  ;;  %s5646_s21 = sadd.s32 4294967294, %s7315_s30  }
  0x7b   : > { %s7573_s25 = sadd.s32 1, %s7315_s30   ;;  %s71_s4 = sadd.s32 1, %s7311_s29 }
  0x7c   : > { %s68_s17 = ssub.s32 %s7315_s30, %s7573_s25  ;;  %p78_p9 = scmp.ne.s32.totalorder %s7311_s29, %s7307_s28 }
  0x7d   : > { %p69_p7 = scmp.eq.s32.totalorder %s68_s17, 0  ;;  %p79_p11 = scmp.eq.s32.totalorder %s7315_s30, 0 }
  0x7e   : > { %p84_p12 = scmp.ne.s32.totalorder %s7307_s28, %s7303_s27  ;;  %p444_p13 = scmp.eq.s32.totalorder %s7460_s1, 1 }
  0x7f   : > { %s7584_s22 = scalar_select %p69_p7, %s7311_s29, %s71_s4  }
  0x80   : > { %6537 = dma.hbm_to_vmem [thread:$0]  (!%p7474_p6), %s9347_s13, 256, %s573_s18, [#allocation16], %s7322_s26, %s7322_s26, %s7323_s15  }
  0x81   : > { %p7586_p0 = por %p79_p11, %p78_p9  ;;  %p7592_p6 = por %p9319_p1, %p84_p12 }
  0x82   : > { %p450_p2 = scmp.eq.s32.totalorder %s5646_s21, 1  ;;  %p6554_p5 = scmp.lt.s32.totalorder %s7315_s30, 2 }
  0x83   : > { %s9349_s15 = scalar_select %p7592_p6, 1, 0 }
  0x84   : > { %s606_s26 = sand.u32 1, %s7311_s29   ;;  %p7599_p8 = por %p444_p13, %p78_p9 }
  0x85   : > { %p7603_p10 = por %p450_p2, %p84_p12  ;;  %s5657_s0 = sshll.u32 %s606_s26, 2 }
  0x86   : > { %s9350_s23 = scalar_select %p7599_p8, 1, 0 }
  0x87   : > { %s9351_s18 = scalar_select %p7603_p10, 1, 0 }
  0x88   : > { %s5658_s19 = sshll.u32 %s7315_s30, 6  ;;  %s9352_s4 = sld [smem:[#allocation26_spill]] }
  0x89   : > { %s610_s21 = scalar_lea.vmem [#allocation3], %s5657_s0  ;;  %p7615_p7 = pnand %p6554_p5, %p7586_p0 }
  0x8a   : > { %s617_s7 = sshll.u32 %s610_s21, 4  ;;  %s607_s9 = scalar_lea.sflag [#allocation4], %s606_s26  ;;  %s618_s7 = int_to_ptr.vmem [resolvable:$true] %s617_s7 }
  0x8b   : > { %p7209_p11 = pneg %p7615_p7 }
  0x8e   : > { %s7611_s6 = scalar_lea.hbm %s9352_s4, %s5658_s19  ;;  %s7212_s17 = scalar_lea.hbm %s9352_s4, 128 }
  0x8f   : > { %s7207_s10 = scalar_lea.hbm %s7611_s6, 64  ;;  %p7213_p2 = scmp.lt.s32.totalorder %s7611_s6, %s9352_s4 }
  0x90   : > { %p7208_p9 = scmp.ne.s32.totalorder %s7611_s6, %s7207_s10  ;;  %p7214_p0 = scmp.lt.s32.totalorder %s7212_s17, %s7207_s10 }
  0x92   : > { %p7210_p12 = pnand %p7209_p11, %p7208_p9  ;;  %p7215_p5 = por %p7214_p0, %p7213_p2 }
  0x94   : > { %p7211_p13 = pneg %p7210_p12 }
  0x96   : > { %p7216_p4 = pnand %p7215_p5, %p7211_p13 }
  0x98   : > { %7219 = shalt.err (!%p7216_p4)
}
  0x99   : > { %s7220_s2 = scalar_lea.vmem %s618_s7, 64  ;;  %s7329_s26 = smov [#allocation3]  }
  0x9a   : > { %p7221_p1 = scmp.ne.s32.totalorder %s618_s7, %s7220_s2  ;;  %s7225_s11 = sshll.u32 %s7329_s26, 4  ;;  %s7226_s11 = int_to_ptr.vmem [resolvable:$false] %s7225_s11 }
  0x9b   : > { %s7227_s13 = scalar_lea.vmem %s7226_s11, 128  ;;  %p7228_p9 = scmp.lt.s32.totalorder %s618_s7, %s7226_s11 }
  0x9c   : > { %p7223_p10 = pnand %p7221_p1, %p7209_p11  ;;  %p7229_p12 = scmp.lt.s32.totalorder %s7227_s13, %s7220_s2 }
  0x9e   : > { %p7224_p8 = pneg %p7223_p10  ;;  %p7230_p6 = por %p7229_p12, %p7228_p9 }
  0xa0   : > { %p7231_p3 = pnand %p7230_p6, %p7224_p8 }
  0xa2   : > { %7234 = shalt.err (!%p7231_p3)
}
  0xa3   : > { %6541 = dma.hbm_to_vmem [thread:$0]  (!%p7615_p7), %s7611_s6, 64, %s618_s7, %s607_s9  }
  0xa4   : > { %p9354_p13 = scmp.ne.s32.totalorder %s9337_s20, 0 }
  0xa5   : > { %s7636_s10 = sand.u32 (!%p9354_p13), 1, %s7307_s28   ;;  %p9355_p1 = scmp.ne.s32.totalorder (!%p9354_p13), %s9349_s15, 0 }
  0xa6   : > { %626 = sbr.rel (%p9354_p13) target bundleno = 7291 (0x1c7b), region = 92  ;;  %s5660_s19 = sshll.u32 (!%p9354_p13), %s7636_s10, 2 }
  0xa7   : > { %s629_s24 = scalar_lea.sflag (!%p9354_p13), [#allocation4], %s7636_s10  ;;  %s7640_s11 = scalar_lea.vmem (!%p9354_p13), [#allocation3], %s5660_s19 }
  0xab   : > { %7278 = dma.done.wait (%p9355_p1), %s629_s24, 64  }
  0xac   : > { %7280 = vsyncadd (%p9355_p1), %s629_s24, 4294967232  ;;  %p9356_p3 = scmp.eq.s32.totalorder %s7460_s1, 0 }
  0xae   : > { %7282 = dma.done.wait (%p9356_p3), [#allocation7], 512   ;;  %p9357_p4 = pmov %p9356_p3 }
  0xaf   : > { %p9358_p6 = pmov %p9356_p3 }
  0xb0   : > { %7284 = vsyncadd (%p9357_p4), [#allocation7], 4294966784 }
  0xb1   : > { %7286 = dma.done.wait (%p9358_p6), [#allocation10], 512   ;;  %p9359_p8 = pmov %p9356_p3 }
  0xb2   : > { %p9360_p10 = pmov %p9356_p3 }
  0xb3   : > { %7288 = vsyncadd (%p9359_p8), [#allocation10], 4294966784 }
  0xb4   : > { %7290 = dma.done.wait (%p9360_p10), [#allocation13], 512   ;;  %p9361_p7 = pmov %p9356_p3 }
  0xb5   : > { %p9362_p11 = pmov %p9356_p3 }
  0xb6   : > { %7292 = vsyncadd (%p9361_p7), [#allocation13], 4294966784 }
  0xb7   : > { %7294 = dma.done.wait (%p9362_p11), [#allocation16], 384   ;;  %p9363_p2 = pmov %p9356_p3 }
  0xb8   : > { %p722_p0 = scmp.lt.s32.totalorder %s7460_s1, 1  ;;  %s9364_s13 = sld [smem:[#allocation25_spill]]  ;;  %vm736_vm0 = vcmask 523264   ;;  %v793_v32 = vld [vmem:[%s9299_s3] sm:$0xff]  ;;  %v794_v47 = vld [vmem:[%s9299_s3 + $0x8] sm:$0xff]  ;;  %v795_v48 = vld [vmem:[%s9299_s3 + $0x10] sm:$0xff] }
  0xb9   : > { %7296 = vsyncadd (%p9363_p2), [#allocation16], 4294966912  ;;  %6061 = vmatprep.mubr.msk.f32.mxu0 %vm736_vm0, %v793_v32  ;;  %6089 = vmatprep.mubr.msk.f32.mxu1 %vm736_vm0, %v793_v32  ;;  %v796_v51 = vld [vmem:[%s9299_s3 + $0x18] sm:$0xff]  ;;  %v797_v52 = vld [vmem:[%s9299_s3 + $0x20] sm:$0xff]  ;;  %v7330_v56 = vmov 0   ;;  %s9365_s26 = sld [smem:[#allocation27_spill]] }
  0xba   : > { %s723_s6 = scalar_select %p722_p0, %s7460_s1, 1  ;;  %v798_v53 = vld [vmem:[%s9299_s3 + $0x28] sm:$0xff]  ;;  %v799_v54 = vld [vmem:[%s9299_s3 + $0x30] sm:$0xff]  ;;  %v800_v55 = vld [vmem:[%s9299_s3 + $0x38] sm:$0xff]  ;;  %6621 = vset.pattern.permute.xlu0 %v7330_v56  ;;  %6622 = vset.pattern.permute.xlu1 %v7330_v56  ;;  %vm1386_vm1 = vcmask 261120   ;;  %vm1789_vm2 = vcmask 64512  }
  0xbb   : > { %s7333_s2 = smov 120   ;;  %s7334_s19 = smov 112   ;;  %vm2386_vm3 = vcmask 130112   ;;  %vm2713_vm4 = vcmask 195712   ;;  %vm3040_vm5 = vcmask 261312   ;;  %vm3406_vm6 = vcmask 130048  }
  0xbc   : > { %s5839_s7 = sshll.u32 %s723_s6, 6  ;;  %s7335_s24 = smov 104   ;;  %vm7340_vm7 = vmmov 0   ;;  %vm3684_vm8 = vcmask 1043456  }
  0xbd   : > { %s7336_s6 = smov 8   ;;  %s7338_s8 = smov 24  }
  0xbe   : > { %s7667_s20 = scalar_lea.vmem %s9364_s13, %s5839_s7  ;;  %s7331_s13 = smov 1  }
  0xbf   : > { %v7670_v0 = vld [vmem:[%s7667_s20 + $0x38] sm:$0xff]  ;;  %v7673_v1 = vld [vmem:[%s7667_s20 + $0x28] sm:$0xff]  ;;  %v7676_v2 = vld [vmem:[%s7667_s20 + $0x30] sm:$0xff]  ;;  %s7337_s7 = smov 16   ;;  %s9366_s17 = sld [smem:[#allocation36_spill]] }
  0xc0   : > { %v758_v3 = vsel %vm736_vm0, %v7670_v0, 0.0  ;;  %v752_v4 = vsel %vm736_vm0, %v7673_v1, 0.0  ;;  %v7683_v5 = vld [vmem:[%s7667_s20 + $0x20] sm:$0xff]  ;;  %v767_v6 = vmul.f32 %v7676_v2, %v7676_v2  ;;  %v7688_v7 = vld [vmem:[%s7667_s20 + $0x18] sm:$0xff]  ;;  %v7691_v8 = vld [vmem:[%s7667_s20 + $0x10] sm:$0xff]  ;;  %v755_v9 = vsel %vm736_vm0, %v7676_v2, 0.0 }
  0xc1   : > { %759 = vadd.xlane.f32.xlu0 %v758_v3  ;;  %753 = vadd.xlane.f32.xlu1 %v752_v4  ;;  %v768_v10 = vmul.f32 %v7670_v0, %v7670_v0  ;;  %v766_v11 = vmul.f32 %v7673_v1, %v7673_v1  ;;  %v7700_v12 = vld [vmem:[%s7667_s20 + $0x8] sm:$0xff]  ;;  %v749_v13 = vsel %vm736_vm0, %v7683_v5, 0.0  ;;  %v746_v14 = vsel %vm736_vm0, %v7688_v7, 0.0  ;;  %v7716_v20 = vld [vmem:[%s7667_s20] sm:$0xff]  ;;  %p9369_p9 = scmp.ne.s32.totalorder %s9350_s23, 0 }
  0xc2   : > { %v765_v15 = vmul.f32 %v7683_v5, %v7683_v5  ;;  %v764_v16 = vmul.f32 %v7688_v7, %v7688_v7  ;;  %v787_v17 = vsel %vm736_vm0, %v767_v6, 0.0  ;;  %v743_v18 = vsel %vm736_vm0, %v7691_v8, 0.0 }
  0xc3   : > { %v763_v19 = vmul.f32 %v7691_v8, %v7691_v8  ;;  %v790_v21 = vsel %vm736_vm0, %v768_v10, 0.0  ;;  %v784_v22 = vsel %vm736_vm0, %v766_v11, 0.0  ;;  %v740_v23 = vsel %vm736_vm0, %v7700_v12, 0.0 }
  0xc4   : > { %v781_v24 = vsel %vm736_vm0, %v765_v15, 0.0  ;;  %v778_v25 = vsel %vm736_vm0, %v764_v16, 0.0  ;;  %v737_v27 = vsel %vm736_vm0, %v7716_v20, 0.0  ;;  %v762_v28 = vmul.f32 %v7700_v12, %v7700_v12 }
  0xc5   : > { %756 = vadd.xlane.f32.xlu0 %v755_v9  ;;  %750 = vadd.xlane.f32.xlu1 %v749_v13  ;;  %v775_v26 = vsel %vm736_vm0, %v763_v19, 0.0  ;;  %v761_v29 = vmul.f32 %v7716_v20, %v7716_v20 }
  0xc6   : > { %v772_v30 = vsel %vm736_vm0, %v762_v28, 0.0 }
  0xc7   : > { %v769_v31 = vsel %vm736_vm0, %v761_v29, 0.0 }
  0xc9   : > { %788 = vadd.xlane.f32.xlu0 %v787_v17  ;;  %791 = vadd.xlane.f32.xlu1 %v790_v21 }
  0xcd   : > { %785 = vadd.xlane.f32.xlu0 %v784_v22  ;;  %747 = vadd.xlane.f32.xlu1 %v746_v14 }
  0xd1   : > { %782 = vadd.xlane.f32.xlu0 %v781_v24  ;;  %744 = vadd.xlane.f32.xlu1 %v743_v18 }
  0xd5   : > { %779 = vadd.xlane.f32.xlu0 %v778_v25  ;;  %741 = vadd.xlane.f32.xlu1 %v740_v23 }
  0xd9   : > { %776 = vadd.xlane.f32.xlu0 %v775_v26  ;;  %738 = vadd.xlane.f32.xlu1 %v737_v27 }
  0xdd   : > { %773 = vadd.xlane.f32.xlu0 %v772_v30  ;;  %770 = vadd.xlane.f32.xlu1 %v769_v31 }
 0x14a   : > { %v760_v33 = vpop.xlane.xlu0 %759  ;;  %v754_v34 = vpop.xlane.xlu1 %753 }
 0x14b   : > { %6045 = vmatprep.subr.mxu0 %v760_v33 }
 0x14c   : > { %6046 = vmatpush3.msra.mxu0 %v760_v33 }
 0x14e   : > { %v757_v35 = vpop.xlane.xlu0 %756  ;;  %v751_v36 = vpop.xlane.xlu1 %750 }
 0x14f   : > { %6047 = vmatprep.subr.mxu0 %v757_v35 }
 0x150   : > { %6048 = vmatpush3.msra.mxu0 %v757_v35 }
 0x151   : > { %6049 = vmatprep.subr.mxu0 %v754_v34 }
 0x152   : > { %v789_v37 = vpop.xlane.xlu0 %788  ;;  %6050 = vmatpush3.msra.mxu0 %v754_v34  ;;  %v792_v38 = vpop.xlane.xlu1 %791 }
 0x153   : > { %6051 = vmatprep.subr.mxu0 %v751_v36  ;;  %6073 = vmatprep.subr.mxu1 %v792_v38 }
 0x154   : > { %6052 = vmatpush3.msra.mxu0 %v751_v36  ;;  %6074 = vmatpush3.msra.mxu1 %v792_v38 }
 0x155   : > { %6075 = vmatprep.subr.mxu1 %v789_v37 }
 0x156   : > { %v786_v39 = vpop.xlane.xlu0 %785  ;;  %6076 = vmatpush3.msra.mxu1 %v789_v37  ;;  %v748_v40 = vpop.xlane.xlu1 %747 }
 0x157   : > { %6077 = vmatprep.subr.mxu1 %v786_v39  ;;  %6053 = vmatprep.subr.mxu0 %v748_v40 }
 0x158   : > { %6078 = vmatpush3.msra.mxu1 %v786_v39  ;;  %6054 = vmatpush3.msra.mxu0 %v748_v40 }
 0x15a   : > { %v783_v41 = vpop.xlane.xlu0 %782  ;;  %v745_v42 = vpop.xlane.xlu1 %744 }
 0x15b   : > { %6079 = vmatprep.subr.mxu1 %v783_v41  ;;  %6055 = vmatprep.subr.mxu0 %v745_v42 }
 0x15c   : > { %6080 = vmatpush3.msra.mxu1 %v783_v41  ;;  %6056 = vmatpush3.msra.mxu0 %v745_v42 }
 0x15e   : > { %v780_v43 = vpop.xlane.xlu0 %779  ;;  %v742_v44 = vpop.xlane.xlu1 %741 }
 0x15f   : > { %6081 = vmatprep.subr.mxu1 %v780_v43  ;;  %6057 = vmatprep.subr.mxu0 %v742_v44 }
 0x160   : > { %6082 = vmatpush3.msra.mxu1 %v780_v43  ;;  %6058 = vmatpush3.msra.mxu0 %v742_v44 }
 0x162   : > { %v777_v45 = vpop.xlane.xlu0 %776  ;;  %v739_v46 = vpop.xlane.xlu1 %738 }
 0x163   : > { %6083 = vmatprep.subr.mxu1 %v777_v45  ;;  %6059 = vmatprep.subr.mxu0 %v739_v46 }
 0x164   : > { %6084 = vmatpush3.msra.mxu1 %v777_v45  ;;  %6060 = vmatpush3.msra.mxu0 %v739_v46 }
 0x165   : > { %6062 = vmatmul.mubr.msk.f32.vlgmr.msra.gmra.mxu0 %vm736_vm0, %v794_v47 }
 0x166   : > { %v774_v49 = vpop.xlane.xlu0 %773  ;;  %v771_v50 = vpop.xlane.xlu1 %770  ;;  %6064 = vmatprep.mubr.msk.f32.mxu0 %vm736_vm0, %v795_v48 }
 0x167   : > { %6085 = vmatprep.subr.mxu1 %v774_v49 }
 0x168   : > { %6086 = vmatpush3.msra.mxu1 %v774_v49 }
 0x169   : > { %6087 = vmatprep.subr.mxu1 %v771_v50  ;;  %6065 = vmatmul.mubr.msk.f32.gmra.mxu0 %vm736_vm0, %v796_v51 }
 0x16a   : > { %6088 = vmatpush3.msra.mxu1 %v771_v50  ;;  %6067 = vmatprep.mubr.msk.f32.mxu0 %vm736_vm0, %v797_v52 }
 0x16b   : > { %6090 = vmatmul.mubr.msk.f32.vlgmr.msra.gmra.mxu1 %vm736_vm0, %v794_v47 }
 0x16c   : > { %6092 = vmatprep.mubr.msk.f32.mxu1 %vm736_vm0, %v795_v48 }
 0x16d   : > { %6068 = vmatmul.mubr.msk.f32.gmra.mxu0 %vm736_vm0, %v798_v53 }
 0x16e   : > { %6070 = vmatprep.mubr.msk.f32.mxu0 %vm736_vm0, %v799_v54 }
 0x16f   : > { %6093 = vmatmul.mubr.msk.f32.gmra.mxu1 %vm736_vm0, %v796_v51 }
 0x170   : > { %6095 = vmatprep.mubr.msk.f32.mxu1 %vm736_vm0, %v797_v52 }
 0x171   : > { %6071 = vmatmul.mubr.msk.f32.gmra.mxu0 %vm736_vm0, %v800_v55 }
 0x173   : > { %6096 = vmatmul.mubr.msk.f32.gmra.mxu1 %vm736_vm0, %v798_v53 }
 0x174   : > { %6098 = vmatprep.mubr.msk.f32.mxu1 %vm736_vm0, %v799_v54 }
 0x177   : > { %6099 = vmatmul.mubr.msk.f32.gmra.mxu1 %vm736_vm0, %v800_v55 }
 0x225   : > { %v6063_v57 = vpop.f32.mrf.mxu0 }
 0x226   : > { %v7775_v58 = vmul.f32 0.0078125, %v6063_v57 }
 0x227   : > { %v891_v59 = vpop.f32.mrf.mxu0 }
 0x228   : > { %v1052_v61 = vmul.f32 %v7775_v58, %v7775_v58  ;;  %v7779_v62 = vmul.f32 0.0078125, %v891_v59 }
 0x229   : > { %v6066_v60 = vpop.f32.mrf.mxu0 }
 0x22a   : > { %v7781_v63 = vmul.f32 0.0078125, %v6066_v60  ;;  %v1051_v13 = vmul.f32 %v7779_v62, %v7779_v62 }
 0x22b   : > { %v6091_v3 = vpop.f32.mrf.mxu1  ;;  %v901_v4 = vpop.f32.mrf.mxu0 }
 0x22c   : > { %v1044_v6 = vmul.f32 0.0078125, %v6091_v3  ;;  %v7783_v9 = vmul.f32 0.0078125, %v901_v4  ;;  %v1054_v14 = vmul.f32 %v7781_v63, %v7781_v63 }
 0x22d   : > { %v1004_v10 = vpop.f32.mrf.mxu1  ;;  %v6069_v11 = vpop.f32.mrf.mxu0 }
 0x22e   : > { %v1060_v15 = vsub.f32 %v1044_v6, %v1052_v61  ;;  %v1043_v16 = vmul.f32 0.0078125, %v1004_v10  ;;  %v7789_v17 = vmul.f32 0.0078125, %v6069_v11  ;;  %v1053_v24 = vmul.f32 %v7783_v9, %v7783_v9  ;;  %v1092_v11 = vld [vmem:[%s9365_s26 + $0x8] sm:$0xff] }
 0x22f   : > { %v6094_v18 = vpop.f32.mrf.mxu1  ;;  %v911_v19 = vpop.f32.mrf.mxu0 }
 0x230   : > { %v1068_v21 = vmax.f32 %v1060_v15, 0.0  ;;  %v1059_v22 = vsub.f32 %v1043_v16, %v1051_v13  ;;  %v1046_v23 = vmul.f32 0.0078125, %v6094_v18  ;;  %v7793_v25 = vmul.f32 0.0078125, %v911_v19  ;;  %v1091_v15 = vld [vmem:[%s9365_s26] sm:$0xff]  ;;  %v1094_v19 = vld [vmem:[%s9365_s26 + $0x18] sm:$0xff] }
 0x231   : > { %v1014_v26 = vpop.f32.mrf.mxu1  ;;  %v6072_v27 = vpop.f32.mrf.mxu0  ;;  %v1056_v32 = vmul.f32 %v7789_v17, %v7789_v17 }
 0x232   : > { %v1076_v28 = vadd.f32 1e-05, %v1068_v21  ;;  %v1067_v29 = vmax.f32 %v1059_v22, 0.0  ;;  %v1062_v30 = vsub.f32 %v1046_v23, %v1054_v14  ;;  %v1045_v31 = vmul.f32 0.0078125, %v1014_v26 }
 0x233   : > { %v7797_v33 = vmul.f32 0.0078125, %v6072_v27  ;;  %v6097_v34 = vpop.f32.mrf.mxu1  ;;  %v921_v35 = vpop.f32.mrf.mxu0  ;;  %v1055_v39 = vmul.f32 %v7793_v25, %v7793_v25 }
 0x234   : > { %6663 = vrsqrt.f32 %v1076_v28  ;;  %v1075_v36 = vadd.f32 1e-05, %v1067_v29  ;;  %v1070_v37 = vmax.f32 %v1062_v30, 0.0  ;;  %v1061_v38 = vsub.f32 %v1045_v31, %v1053_v24  ;;  %v1093_v24 = vld [vmem:[%s9365_s26 + $0x10] sm:$0xff]  ;;  %v1096_v31 = vld [vmem:[%s9365_s26 + $0x28] sm:$0xff] }
 0x235   : > { %v1058_v40 = vmul.f32 %v7797_v33, %v7797_v33  ;;  %v1048_v41 = vmul.f32 0.0078125, %v6097_v34  ;;  %v7803_v42 = vmul.f32 0.0078125, %v921_v35  ;;  %v1024_v43 = vpop.f32.mrf.mxu1 }
 0x236   : > { %6665 = vrsqrt.f32 %v1075_v36  ;;  %v1078_v44 = vadd.f32 1e-05, %v1070_v37  ;;  %v1069_v45 = vmax.f32 %v1061_v38, 0.0  ;;  %v1047_v46 = vmul.f32 0.0078125, %v1024_v43  ;;  %v1098_v38 = vld [vmem:[%s9365_s26 + $0x38] sm:$0xff] }
 0x237   : > { %v1064_v47 = vsub.f32 %v1048_v41, %v1056_v32  ;;  %v6100_v48 = vpop.f32.mrf.mxu1  ;;  %v1057_v53 = vmul.f32 %v7803_v42, %v7803_v42 }
 0x238   : > { %6667 = vrsqrt.f32 %v1078_v44  ;;  %v1077_v49 = vadd.f32 1e-05, %v1069_v45  ;;  %v1063_v50 = vsub.f32 %v1047_v46, %v1055_v39  ;;  %v1050_v51 = vmul.f32 0.0078125, %v6100_v48 }
 0x239   : > { %v1072_v52 = vmax.f32 %v1064_v47, 0.0  ;;  %v1034_v54 = vpop.f32.mrf.mxu1 }
 0x23a   : > { %6669 = vrsqrt.f32 %v1077_v49  ;;  %v1071_v55 = vmax.f32 %v1063_v50, 0.0  ;;  %v1066_v57 = vsub.f32 %v1050_v51, %v1058_v40  ;;  %v1049_v59 = vmul.f32 0.0078125, %v1034_v54 }
 0x23b   : > { %v1080_v60 = vadd.f32 1e-05, %v1072_v52 }
 0x23c   : > { %v1079_v61 = vadd.f32 1e-05, %v1071_v55  ;;  %v1074_v3 = vmax.f32 %v1066_v57, 0.0  ;;  %v1065_v4 = vsub.f32 %v1049_v59, %v1057_v53 }
 0x23d   : > { %6671 = vrsqrt.f32 %v1080_v60 }
 0x23e   : > { %6673 = vrsqrt.f32 %v1079_v61  ;;  %v1082_v6 = vadd.f32 1e-05, %v1074_v3  ;;  %v1073_v10 = vmax.f32 %v1065_v4, 0.0  ;;  %v6627_v61 = vld [vmem:[%s9301_s5 + $0x18] sm:$0xff]   ;;  %v6628_v3 = vld [vmem:[%s9301_s5 + $0x10] sm:$0xff]   ;;  %v6629_v4 = vld [vmem:[%s9301_s5 + $0x8] sm:$0xff]  }
 0x23f   : > { %6101 = vmatprep.subr.bf16.mxu0 %v6627_v61 }
 0x240   : > { %6675 = vrsqrt.f32 %v1082_v6  ;;  %v1081_v13 = vadd.f32 1e-05, %v1073_v10  ;;  %6102 = vmatpush3.bf16.msra.mxu0 %v6627_v61 }
 0x241   : > { %v6664_v14 = vpop.eup %6663  ;;  %6103 = vmatprep.subr.bf16.mxu0 %v6628_v3 }
 0x242   : > { %6677 = vrsqrt.f32 %v1081_v13  ;;  %v1100_v16 = vmul.f32 %v6664_v14, %v1092_v11 }
 0x243   : > { %v6666_v18 = vpop.eup %6665 }
 0x244   : > { %v1108_v21 = vmul.f32 %v1100_v16, %v7775_v58  ;;  %v1099_v22 = vmul.f32 %v6666_v18, %v1091_v15  ;;  %v1095_v58 = vld [vmem:[%s9365_s26 + $0x20] sm:$0xff]  ;;  %6104 = vmatpush3.bf16.msra.mxu0 %v6628_v3 }
 0x245   : > { %v6668_v23 = vpop.eup %6667  ;;  %6105 = vmatprep.subr.bf16.mxu0 %v6629_v4 }
 0x246   : > { %1125 = vrot.lane.b32.xlu1 %v1108_v21, %s7331_s13  ;;  %v1107_v26 = vmul.f32 %v1099_v22, %v7779_v62  ;;  %v1102_v27 = vmul.f32 %v6668_v23, %v1094_v19 }
 0x247   : > { %v6670_v28 = vpop.eup %6669 }
 0x248   : > { %1123 = vrot.lane.b32.xlu0 %v1107_v26, %s7331_s13  ;;  %v1110_v29 = vmul.f32 %v1102_v27, %v7781_v63  ;;  %v1101_v30 = vmul.f32 %v6670_v28, %v1093_v24  ;;  %v1097_v63 = vld [vmem:[%s9365_s26 + $0x30] sm:$0xff]  ;;  %6106 = vmatpush3.bf16.msra.mxu0 %v6629_v4 }
 0x24a   : > { %v6672_v32 = vpop.eup %6671  ;;  %1129 = vrot.lane.b32.xlu1 %v1110_v29, %s7331_s13  ;;  %v1109_v35 = vmul.f32 %v1101_v30, %v7783_v9 }
 0x24b   : > { %v6674_v34 = vpop.eup %6673  ;;  %v1104_v36 = vmul.f32 %v6672_v32, %v1096_v31 }
 0x24c   : > { %v1103_v62 = vmul.f32 %v6674_v34, %v1095_v58 }
 0x24d   : > { %v6676_v37 = vpop.eup %6675  ;;  %v1112_v41 = vmul.f32 %v1104_v36, %v7789_v17 }
 0x24e   : > { %1127 = vrot.lane.b32.xlu1 %v1109_v35, %s7331_s13  ;;  %v1111_v39 = vmul.f32 %v1103_v62, %v7793_v25  ;;  %v1106_v9 = vmul.f32 %v6676_v37, %v1098_v38  ;;  %v7332_v25 = vmov 1  }
 0x24f   : > { %v6678_v40 = vpop.eup %6677 }
 0x250   : > { %1131 = vrot.lane.b32.xlu0 %v1111_v39, %s7331_s13  ;;  %v1105_v43 = vmul.f32 %v6678_v40, %v1097_v63  ;;  %v1114_v45 = vmul.f32 %v1106_v9, %v7797_v33 }
 0x252   : > { %1133 = vrot.lane.b32.xlu1 %v1112_v41, %s7331_s13  ;;  %v1113_v44 = vmul.f32 %v1105_v43, %v7803_v42 }
 0x254   : > { %1135 = vrot.lane.b32.xlu0 %v1113_v44, %s7331_s13 }
 0x256   : > { %1137 = vrot.lane.b32.xlu1 %v1114_v45, %s7331_s13  ;;  %s9368_s13 = sld [smem:[#allocation38_spill]] }
 0x258   : > { %1157 = vperm.xlu0 %6621, %v1099_v22  }
 0x25a   : > { %1162 = vperm.xlu1 %6622, %v1100_v16  }
 0x25c   : > { %1172 = vperm.xlu0 %6621, %v1102_v27  }
 0x25e   : > { %1167 = vperm.xlu1 %6622, %v1101_v30  }
 0x260   : > { %1187 = vperm.xlu0 %6621, %v1105_v43  }
 0x262   : > { %1177 = vperm.xlu1 %6622, %v1103_v62  }
 0x264   : > { %6623 = vset.pattern.permute.xlu0 %v7332_v25 }
 0x266   : > { %1182 = vperm.xlu1 %6622, %v1104_v36  }
 0x26a   : > { %1192 = vperm.xlu1 %6622, %v1106_v9  }
 0x26e   : > { %6624 = vset.pattern.permute.xlu1 %v7332_v25 }
 0x2b8   : > { %v1126_v17 = vpop.permute.xlu1 %1125 }
 0x2b9   : > { %v1148_v46 = vsub.f32 %v1092_v11, %v1126_v17  ;;  %v6630_v11 = vld [vmem:[%s9301_s5] sm:$0xff]  }
 0x2ba   : > { %v1124_v47 = vpop.permute.xlu0 %1123  ;;  %6107 = vmatprep.subr.bf16.mxu0 %v6630_v11 }
 0x2bb   : > { %v1147_v48 = vsub.f32 %v1091_v15, %v1124_v47  ;;  %1210 = vperm.xlu0 %6623, %v1148_v46   ;;  %6108 = vmatpush3.bf16.msra.mxu0 %v6630_v11 }
 0x2bc   : > { %v1130_v42 = vpop.permute.xlu1 %1129 }
 0x2bd   : > { %1205 = vperm.xlu1 %6624, %v1147_v48   ;;  %v1150_v33 = vsub.f32 %v1094_v19, %v1130_v42 }
 0x2c0   : > { %v1128_v49 = vpop.permute.xlu1 %1127 }
 0x2c1   : > { %v1149_v50 = vsub.f32 %v1093_v24, %v1128_v49  ;;  %1220 = vperm.xlu1 %6624, %v1150_v33  }
 0x2c2   : > { %v1132_v51 = vpop.permute.xlu0 %1131 }
 0x2c3   : > { %v1151_v52 = vsub.f32 %v1095_v58, %v1132_v51  ;;  %1215 = vperm.xlu0 %6623, %v1149_v50  }
 0x2c4   : > { %v1134_v53 = vpop.permute.xlu1 %1133 }
 0x2c5   : > { %v1152_v54 = vsub.f32 %v1096_v31, %v1134_v53  ;;  %1225 = vperm.xlu1 %6624, %v1151_v52  }
 0x2c6   : > { %v1136_v55 = vpop.permute.xlu0 %1135 }
 0x2c7   : > { %v1153_v57 = vsub.f32 %v1097_v63, %v1136_v55  ;;  %1230 = vperm.xlu0 %6623, %v1152_v54  }
 0x2c8   : > { %v1138_v59 = vpop.permute.xlu1 %1137 }
 0x2c9   : > { %1235 = vperm.xlu1 %6624, %v1153_v57   ;;  %v1154_v60 = vsub.f32 %v1098_v38, %v1138_v59 }
 0x2cd   : > { %1240 = vperm.xlu1 %6624, %v1154_v60  }
 0x2d3   : > { %v1158_v13 = vpop.permute.xlu0 %1157 }
 0x2d4   : > { %v1195_v22 = vmul.f32 %v1158_v13, %v7716_v20 }
 0x2d5   : > { %v1163_v6 = vpop.permute.xlu1 %1162 }
 0x2d6   : > { %v1196_v23 = vmul.f32 %v1163_v6, %v7700_v12 }
 0x2d7   : > { %v1173_v15 = vpop.permute.xlu0 %1172 }
 0x2d8   : > { %v1198_v30 = vmul.f32 %v1173_v15, %v7688_v7 }
 0x2d9   : > { %v1168_v10 = vpop.permute.xlu1 %1167 }
 0x2da   : > { %v1197_v58 = vmul.f32 %v1168_v10, %v7691_v8 }
 0x2db   : > { %v1188_v18 = vpop.permute.xlu0 %1187 }
 0x2dc   : > { %v1201_v7 = vmul.f32 %v1188_v18, %v7676_v2  ;;  %v5688_v2 = vld [vmem:[#allocation6] ss:$0 sm:$0xff] }
 0x2dd   : > { %v1178_v14 = vpop.permute.xlu1 %1177 }
 0x2de   : > { %v1199_v62 = vmul.f32 %v1178_v14, %v7683_v5 }
 0x2e1   : > { %v1183_v16 = vpop.permute.xlu1 %1182 }
 0x2e2   : > { %v1200_v20 = vmul.f32 %v1183_v16, %v7673_v1 }
 0x2e5   : > { %v1193_v19 = vpop.permute.xlu1 %1192 }
 0x2e6   : > { %v1202_v8 = vmul.f32 %v1193_v19, %v7670_v0 }
 0x336   : > { %v1211_v21 = vpop.permute.xlu0 %1210 }
 0x337   : > { %v1244_v26 = vadd.f32 %v1211_v21, %v1196_v23 }
 0x338   : > { %v1206_v24 = vpop.permute.xlu1 %1205 }
 0x339   : > { %v1243_v27 = vadd.f32 %v1206_v24, %v1195_v22 }
 0x33b   : > { %v1251_v28 = vpack.c.bf16 %v1244_v26, %v1243_v27 }
 0x33c   : > { %v1221_v29 = vpop.permute.xlu1 %1220 }
 0x33d   : > { %1268 = vxpose.xlu0.c.b16.start [1/4] (short) (narrow) %v1251_v28, 64  ;;  %v1246_v32 = vadd.f32 %v1221_v29, %v1198_v30 }
 0x33e   : > { %v1216_v31 = vpop.permute.xlu0 %1215 }
 0x33f   : > { %v1245_v34 = vadd.f32 %v1216_v31, %v1197_v58 }
 0x340   : > { %v1226_v35 = vpop.permute.xlu1 %1225 }
 0x341   : > { %v1252_v36 = vpack.c.bf16 %v1246_v32, %v1245_v34  ;;  %v1247_v37 = vadd.f32 %v1226_v35, %v1199_v62 }
 0x342   : > { %v1231_v12 = vpop.permute.xlu0 %1230 }
 0x343   : > { %v1248_v63 = vadd.f32 %v1231_v12, %v1200_v20  ;;  %1269 = vxpose.xlu0.c.b16.cont [2/4] (short) (narrow) %v1252_v36, 64 }
 0x344   : > { %v1236_v38 = vpop.permute.xlu1 %1235 }
 0x345   : > { %v1253_v39 = vpack.c.bf16 %v1248_v63, %v1247_v37  ;;  %v1249_v41 = vadd.f32 %v1236_v38, %v1201_v7 }
 0x347   : > { %1270 = vxpose.xlu0.c.b16.cont [3/4] (short) (narrow) %v1253_v39, 64 }
 0x348   : > { %v1241_v40 = vpop.permute.xlu1 %1240 }
 0x349   : > { %v1250_v43 = vadd.f32 %v1241_v40, %v1202_v8 }
 0x34b   : > { %v1254_v9 = vpack.c.bf16 %v1250_v43, %v1249_v41 }
 0x34d   : > { %1271 = vxpose.xlu0.c.b16.end [4/4] (short) (narrow) %v1254_v9, 64 }
 0x3a3   : > { %v1276_v5 = vpop.trf.xlu0 }
 0x3a4   : > { %6109 = vmatprep.mubr.msk.bf16.mxu0 %vm736_vm0, %v1276_v5 }
 0x3a7   : > { %v1277_v1 = vpop.trf.xlu0 }
 0x3a8   : > { %6110 = vmatmul.mubr.msk.bf16.vlgmr.msra.gmra.mxu0 %vm736_vm0, %v1277_v1 }
 0x3ab   : > { %v1278_v44 = vpop.trf.xlu0 }
 0x3ac   : > { %6113 = vmatprep.mubr.msk.bf16.mxu0 %vm736_vm0, %v1278_v44 }
 0x3af   : > { %v1279_v45 = vpop.trf.xlu0 }
 0x3b0   : > { %6114 = vmatmul.mubr.msk.bf16.gmra.mxu0 %vm736_vm0, %v1279_v45 }
 0x468   : > { %v6111_v0 = vpop.f32.mrf.mxu0 }
 0x469   : > { %v7863_v25 = vadd.f32 %v6111_v0, %v5688_v2 }
 0x46a   : > { %v1354_v17 = vpop.f32.mrf.mxu0 }
 0x46b   : > { %v7865_v46 = vadd.f32 %v5688_v2, %v1354_v17  ;;  %v1393_v47 = vsel %vm1386_vm1, %v7863_v25, 0.0  ;;  %v6631_v17 = vld [vmem:[#allocation8 + $0x8] sm:$0xff]  }
 0x46c   : > { %1394 = vadd.xlane.f32.xlu0 %v1393_v47  ;;  %v6112_v48 = vpop.f32.mrf.mxu0  ;;  %v6632_v47 = vld [vmem:[#allocation9 + $0x8] sm:$0xff]   ;;  %6117 = vmatprep.subr.bf16.mxu1 %v6631_v17 }
 0x46d   : > { %v7869_v42 = vadd.f32 %v6112_v48, %v5688_v2  ;;  %v1387_v33 = vsel %vm1386_vm1, %v7865_v46, 0.0  ;;  %6129 = vmatprep.subr.bf16.mxu0 %v6632_v47  ;;  %6118 = vmatpush3.bf16.msra.mxu1 %v6631_v17  ;;  %v6633_v48 = vld [vmem:[#allocation8] sm:$0xff]  }
 0x46e   : > { %v1357_v49 = vpop.f32.mrf.mxu0  ;;  %1388 = vadd.xlane.f32.xlu1 %v1387_v33  ;;  %6130 = vmatpush3.bf16.msra.mxu0 %v6632_v47  ;;  %v6634_v33 = vld [vmem:[#allocation9] sm:$0xff]  }
 0x46f   : > { %v7873_v51 = vadd.f32 %v5688_v2, %v1357_v49  ;;  %v1396_v53 = vsel %vm1386_vm1, %v7869_v42, 0.0  ;;  %6119 = vmatprep.subr.bf16.mxu1 %v6633_v48  ;;  %6131 = vmatprep.subr.bf16.mxu0 %v6634_v33  ;;  %v7943_v49 = vld [vmem:[#allocation11 + $0x8] sm:$0xff]  }
 0x470   : > { %v6115_v50 = vpop.f32.mrf.mxu0 }
 0x471   : > { %v7875_v52 = vadd.f32 %v6115_v50, %v5688_v2  ;;  %v1390_v60 = vsel %vm1386_vm1, %v7873_v51, 0.0  ;;  %6120 = vmatpush3.bf16.msra.mxu1 %v6633_v48 }
 0x472   : > { %1397 = vadd.xlane.f32.xlu1 %v1396_v53  ;;  %v1370_v54 = vpop.f32.mrf.mxu0  ;;  %6132 = vmatpush3.bf16.msra.mxu0 %v6634_v33 }
 0x473   : > { %v1405_v55 = vsel %vm1386_vm1, %v7875_v52, 0.0  ;;  %v7881_v59 = vadd.f32 %v5688_v2, %v1370_v54  ;;  %6141 = vmatprep.subr.bf16.mxu1 %v7943_v49 }
 0x474   : > { %1406 = vadd.xlane.f32.xlu0 %v1405_v55  ;;  %v6116_v57 = vpop.f32.mrf.mxu0 }
 0x475   : > { %v1399_v4 = vsel %vm1386_vm1, %v7881_v59, 0.0  ;;  %v7889_v6 = vadd.f32 %v6116_v57, %v5688_v2 }
 0x476   : > { %1391 = vadd.xlane.f32.xlu1 %v1390_v60  ;;  %v1373_v61 = vpop.f32.mrf.mxu0 }
 0x477   : > { %v7885_v3 = vadd.f32 %v5688_v2, %v1373_v61  ;;  %v1408_v11 = vsel %vm1386_vm1, %v7889_v6, 0.0 }
 0x479   : > { %v1402_v10 = vsel %vm1386_vm1, %v7885_v3, 0.0 }
 0x47a   : > { %1400 = vadd.xlane.f32.xlu1 %v1399_v4 }
 0x47e   : > { %1403 = vadd.xlane.f32.xlu1 %v1402_v10 }
 0x482   : > { %1409 = vadd.xlane.f32.xlu1 %v1408_v11 }
 0x4f5   : > { %v1395_v13 = vpop.xlane.xlu0 %1394 }
 0x4f6   : > { %v1414_v14 = vmul.f32 0.03125, %v1395_v13 }
 0x4f7   : > { %v1389_v15 = vpop.xlane.xlu1 %1388 }
 0x4f8   : > { %v1412_v16 = vmul.f32 0.03125, %v1389_v15  ;;  %v7896_v18 = vsub.f32 %v7863_v25, %v1414_v14 }
 0x4fa   : > { %v7899_v19 = vsub.f32 %v7865_v46, %v1412_v16  ;;  %v1430_v26 = vmul.f32 %v7896_v18, %v7896_v18 }
 0x4fb   : > { %v1398_v21 = vpop.xlane.xlu1 %1397 }
 0x4fc   : > { %v1428_v22 = vmul.f32 %v7899_v19, %v7899_v19  ;;  %v1415_v23 = vmul.f32 0.03125, %v1398_v21  ;;  %v1442_v32 = vsel %vm1386_vm1, %v1430_v26, 0.0 }
 0x4fd   : > { %v1407_v27 = vpop.xlane.xlu0 %1406 }
 0x4fe   : > { %v1436_v24 = vsel %vm1386_vm1, %v1428_v22, 0.0  ;;  %v7907_v30 = vsub.f32 %v7869_v42, %v1415_v23  ;;  %v1418_v58 = vmul.f32 0.03125, %v1407_v27 }
 0x4ff   : > { %v1392_v28 = vpop.xlane.xlu1 %1391  ;;  %1437 = vadd.xlane.f32.xlu0 %v1436_v24 }
 0x500   : > { %v1413_v29 = vmul.f32 0.03125, %v1392_v28  ;;  %v7916_v20 = vsub.f32 %v7875_v52, %v1418_v58  ;;  %v1431_v37 = vmul.f32 %v7907_v30, %v7907_v30 }
 0x502   : > { %v7910_v31 = vsub.f32 %v7873_v51, %v1413_v29  ;;  %v1445_v8 = vsel %vm1386_vm1, %v1431_v37, 0.0  ;;  %v1434_v41 = vmul.f32 %v7916_v20, %v7916_v20 }
 0x503   : > { %v1401_v34 = vpop.xlane.xlu1 %1400  ;;  %1443 = vadd.xlane.f32.xlu0 %v1442_v32 }
 0x504   : > { %v1416_v35 = vmul.f32 0.03125, %v1401_v34  ;;  %v1429_v62 = vmul.f32 %v7910_v31, %v7910_v31  ;;  %v1454_v45 = vsel %vm1386_vm1, %v1434_v41, 0.0 }
 0x506   : > { %v7919_v36 = vsub.f32 %v7881_v59, %v1416_v35  ;;  %v1439_v12 = vsel %vm1386_vm1, %v1429_v62, 0.0 }
 0x507   : > { %1440 = vadd.xlane.f32.xlu1 %v1439_v12  ;;  %v1404_v63 = vpop.xlane.xlu1 %1403  ;;  %v5697_v12 = vld [vmem:[#allocation6 + $0x1] ss:$0 sm:$0xff] }
 0x508   : > { %v1417_v38 = vmul.f32 0.03125, %v1404_v63  ;;  %v1432_v39 = vmul.f32 %v7919_v36, %v7919_v36 }
 0x50a   : > { %v7927_v7 = vsub.f32 %v7885_v3, %v1417_v38  ;;  %v1448_v40 = vsel %vm1386_vm1, %v1432_v39, 0.0 }
 0x50b   : > { %1446 = vadd.xlane.f32.xlu1 %v1445_v8  ;;  %v1410_v43 = vpop.xlane.xlu1 %1409  ;;  %1449 = vadd.xlane.f32.xlu0 %v1448_v40  ;;  %v5698_v8 = vld [vmem:[#allocation6 + $0x2] ss:$0 sm:$0xff] }
 0x50c   : > { %v1419_v9 = vmul.f32 0.03125, %v1410_v43  ;;  %v1433_v5 = vmul.f32 %v7927_v7, %v7927_v7 }
 0x50e   : > { %v7936_v1 = vsub.f32 %v7889_v6, %v1419_v9  ;;  %v1451_v44 = vsel %vm1386_vm1, %v1433_v5, 0.0 }
 0x50f   : > { %1452 = vadd.xlane.f32.xlu1 %v1451_v44  ;;  %1455 = vadd.xlane.f32.xlu0 %v1454_v45 }
 0x510   : > { %v1435_v2 = vmul.f32 %v7936_v1, %v7936_v1 }
 0x512   : > { %v1457_v0 = vsel %vm1386_vm1, %v1435_v2, 0.0 }
 0x513   : > { %1458 = vadd.xlane.f32.xlu1 %v1457_v0 }
 0x588   : > { %v1438_v50 = vpop.xlane.xlu0 %1437 }
 0x589   : > { %v1460_v53 = vmul.f32 0.03125, %v1438_v50 }
 0x58b   : > { %v1468_v54 = vadd.f32 1e-05, %v1460_v53 }
 0x58c   : > { %v1444_v55 = vpop.xlane.xlu0 %1443 }
 0x58d   : > { %v1462_v57 = vmul.f32 0.03125, %v1444_v55  ;;  %6679 = vrsqrt.f32 %v1468_v54  ;;  %v6636_v54 = vld [vmem:[#allocation11] sm:$0xff]  }
 0x58f   : > { %v1470_v60 = vadd.f32 1e-05, %v1462_v57 }
 0x590   : > { %v1441_v61 = vpop.xlane.xlu1 %1440 }
 0x591   : > { %v1461_v4 = vmul.f32 0.03125, %v1441_v61  ;;  %6681 = vrsqrt.f32 %v1470_v60 }
 0x593   : > { %v1469_v10 = vadd.f32 1e-05, %v1461_v4 }
 0x594   : > { %v1447_v11 = vpop.xlane.xlu1 %1446  ;;  %v1450_v13 = vpop.xlane.xlu0 %1449 }
 0x595   : > { %6683 = vrsqrt.f32 %v1469_v10  ;;  %v1463_v14 = vmul.f32 0.03125, %v1447_v11  ;;  %v1464_v15 = vmul.f32 0.03125, %v1450_v13 }
 0x597   : > { %v1471_v16 = vadd.f32 1e-05, %v1463_v14  ;;  %v1472_v21 = vadd.f32 1e-05, %v1464_v15 }
 0x598   : > { %v1453_v22 = vpop.xlane.xlu1 %1452  ;;  %v1456_v23 = vpop.xlane.xlu0 %1455 }
 0x599   : > { %6685 = vrsqrt.f32 %v1471_v16  ;;  %v1465_v24 = vmul.f32 0.03125, %v1453_v22  ;;  %v1466_v26 = vmul.f32 0.03125, %v1456_v23 }
 0x59a   : > { %6687 = vrsqrt.f32 %v1472_v21  ;;  %v6680_v29 = vpop.eup %6679 }
 0x59b   : > { %v1473_v27 = vadd.f32 1e-05, %v1465_v24  ;;  %v1474_v28 = vadd.f32 1e-05, %v1466_v26  ;;  %v1484_v35 = vmul.f32 %v6680_v29, %v7899_v19 }
 0x59c   : > { %v1459_v58 = vpop.xlane.xlu1 %1458 }
 0x59d   : > { %6689 = vrsqrt.f32 %v1473_v27  ;;  %v1467_v32 = vmul.f32 0.03125, %v1459_v58  ;;  %v1497_v39 = vmul.f32 %v5697_v12, %v1484_v35 }
 0x59e   : > { %6691 = vrsqrt.f32 %v1474_v28  ;;  %v6682_v62 = vpop.eup %6681 }
 0x59f   : > { %v1475_v34 = vadd.f32 1e-05, %v1467_v32  ;;  %v1486_v63 = vmul.f32 %v6682_v62, %v7896_v18  ;;  %v1510_v44 = vadd.f32 %v5698_v8, %v1497_v39 }
 0x5a1   : > { %6693 = vrsqrt.f32 %v1475_v34  ;;  %v1499_v9 = vmul.f32 %v5697_v12, %v1486_v63 }
 0x5a2   : > { %v6684_v37 = vpop.eup %6683 }
 0x5a3   : > { %v1485_v38 = vmul.f32 %v6684_v37, %v7910_v31  ;;  %v1512_v18 = vadd.f32 %v5698_v8, %v1499_v9 }
 0x5a5   : > { %v1498_v40 = vmul.f32 %v5697_v12, %v1485_v38 }
 0x5a6   : > { %v6686_v41 = vpop.eup %6685 }
 0x5a7   : > { %v6688_v43 = vpop.eup %6687  ;;  %v1487_v5 = vmul.f32 %v6686_v41, %v7907_v30  ;;  %v1511_v45 = vadd.f32 %v5698_v8, %v1498_v40 }
 0x5a8   : > { %v1488_v19 = vmul.f32 %v6688_v43, %v7919_v36 }
 0x5a9   : > { %v1500_v2 = vmul.f32 %v5697_v12, %v1487_v5  ;;  %v1518_v0 = vpack.c.bf16 %v1511_v45, %v1510_v44 }
 0x5aa   : > { %v6690_v17 = vpop.eup %6689  ;;  %v1501_v47 = vmul.f32 %v5697_v12, %v1488_v19 }
 0x5ab   : > { %v6692_v48 = vpop.eup %6691  ;;  %6121 = vmatprep.mubr.msk.bf16.mxu1 %vm1386_vm1, %v1518_v0  ;;  %6133 = vmatprep.mubr.msk.bf16.mxu0 %vm1386_vm1, %v1518_v0  ;;  %v1513_v31 = vadd.f32 %v5698_v8, %v1500_v2  ;;  %v1489_v33 = vmul.f32 %v6690_v17, %v7927_v7 }
 0x5ac   : > { %v1490_v50 = vmul.f32 %v6692_v48, %v7916_v20  ;;  %v1514_v36 = vadd.f32 %v5698_v8, %v1501_v47 }
 0x5ad   : > { %v1519_v30 = vpack.c.bf16 %v1513_v31, %v1512_v18  ;;  %v1502_v53 = vmul.f32 %v5697_v12, %v1489_v33 }
 0x5ae   : > { %v6694_v55 = vpop.eup %6693  ;;  %v1503_v61 = vmul.f32 %v5697_v12, %v1490_v50 }
 0x5af   : > { %6122 = vmatmul.mubr.msk.bf16.vlgmr.msra.gmra.mxu1 %vm1386_vm1, %v1519_v30  ;;  %6134 = vmatmul.mubr.msk.bf16.vlgmr.msra.gmra.mxu0 %vm1386_vm1, %v1519_v30  ;;  %v1515_v57 = vadd.f32 %v5698_v8, %v1502_v53  ;;  %v1491_v60 = vmul.f32 %v6694_v55, %v7936_v1 }
 0x5b0   : > { %6142 = vmatpush3.bf16.msra.mxu1 %v7943_v49  ;;  %v1516_v20 = vadd.f32 %v5698_v8, %v1503_v61 }
 0x5b1   : > { %v1520_v4 = vpack.c.bf16 %v1515_v57, %v1514_v36  ;;  %v1504_v10 = vmul.f32 %v5697_v12, %v1491_v60  ;;  %6143 = vmatprep.subr.bf16.mxu1 %v6636_v54 }
 0x5b3   : > { %6125 = vmatprep.mubr.msk.bf16.mxu1 %vm1386_vm1, %v1520_v4  ;;  %6137 = vmatprep.mubr.msk.bf16.mxu0 %vm1386_vm1, %v1520_v4  ;;  %v1517_v7 = vadd.f32 %v5698_v8, %v1504_v10 }
 0x5b4   : > { %6144 = vmatpush3.bf16.msra.mxu1 %v6636_v54 }
 0x5b5   : > { %v1521_v11 = vpack.c.bf16 %v1517_v7, %v1516_v20 }
 0x5b7   : > { %6126 = vmatmul.mubr.msk.bf16.gmra.mxu1 %vm1386_vm1, %v1521_v11  ;;  %6138 = vmatmul.mubr.msk.bf16.gmra.mxu0 %vm1386_vm1, %v1521_v11 }
 0x5b8   : > { %6145 = vmatprep.mubr.msk.bf16.mxu1 %vm1386_vm1, %v1518_v0 }
 0x5bf   : > { %6146 = vmatmul.mubr.msk.bf16.vlgmr.msra.gmra.mxu1 %vm1386_vm1, %v1519_v30 }
 0x5c0   : > { %6149 = vmatprep.mubr.msk.bf16.mxu1 %vm1386_vm1, %v1520_v4 }
 0x5c7   : > { %6150 = vmatmul.mubr.msk.bf16.gmra.mxu1 %vm1386_vm1, %v1521_v11 }
 0x66f   : > { %v6123_v1 = vpop.f32.mrf.mxu1  ;;  %v6135_v49 = vpop.f32.mrf.mxu0 }
 0x671   : > { %v1584_v13 = vpop.f32.mrf.mxu1  ;;  %v1669_v14 = vpop.f32.mrf.mxu0 }
 0x673   : > { %v6124_v15 = vpop.f32.mrf.mxu1  ;;  %v6136_v16 = vpop.f32.mrf.mxu0 }
 0x674   : > { %v7981_v8 = vpack.c.bf16 %v6136_v16, %v6135_v49  ;;  %v8011_v48 = vpack.c.bf16 %v6124_v15, %v6123_v1 }
 0x675   : > { %v1587_v21 = vpop.f32.mrf.mxu1  ;;  %v1672_v22 = vpop.f32.mrf.mxu0 }
 0x676   : > { %v7967_v23 = vpack.c.bf16 %v1587_v21, %v1584_v13  ;;  %v7989_v45 = vpack.c.bf16 %v1672_v22, %v1669_v14  ;;  %v1806_v2 = vsel %vm1789_vm2, %v7981_v8, 0 }
 0x677   : > { %v6127_v24 = vpop.f32.mrf.mxu1  ;;  %v6139_v26 = vpop.f32.mrf.mxu0 }
 0x678   : > { %6161 = vmatprep.mubr.msk.bf16.mxu0 %vm1789_vm2, %v7967_v23  ;;  %v1803_v47 = vsel %vm1789_vm2, %v7989_v45, 0 }
 0x679   : > { %v1600_v27 = vpop.f32.mrf.mxu1  ;;  %v1685_v28 = vpop.f32.mrf.mxu0 }
 0x67b   : > { %v6128_v29 = vpop.f32.mrf.mxu1  ;;  %v6140_v58 = vpop.f32.mrf.mxu0 }
 0x67c   : > { %v7971_v32 = vpack.c.bf16 %v6140_v58, %v6139_v26  ;;  %v8019_v31 = vpack.c.bf16 %v6128_v29, %v6127_v24 }
 0x67d   : > { %v1603_v34 = vpop.f32.mrf.mxu1  ;;  %v1688_v35 = vpop.f32.mrf.mxu0 }
 0x67e   : > { %v7973_v62 = vpack.c.bf16 %v1688_v35, %v1685_v28  ;;  %6449 = vmatprep.subr.msk.bf16.mxu0 %vm1789_vm2, %v7971_v32  ;;  %v1812_v12 = vsel %vm1789_vm2, %v7971_v32, 0  ;;  %v8013_v18 = vpack.c.bf16 %v1603_v34, %v1600_v27 }
 0x67f   : > { %v6147_v37 = vpop.f32.mrf.mxu1  ;;  %6154 = vmatpush3.bf16.xpose.msra.mxu0 %v1812_v12 }
 0x680   : > { %6450 = vmatprep.subr.msk.bf16.mxu0 %vm1789_vm2, %v7973_v62  ;;  %v1809_v40 = vsel %vm1789_vm2, %v7973_v62, 0 }
 0x681   : > { %v1754_v63 = vpop.f32.mrf.mxu1 }
 0x683   : > { %v6148_v38 = vpop.f32.mrf.mxu1 }
 0x684   : > { %v8000_v0 = vpack.c.bf16 %v6148_v38, %v6147_v37 }
 0x685   : > { %v1757_v39 = vpop.f32.mrf.mxu1 }
 0x686   : > { %v8004_v17 = vpack.c.bf16 %v1757_v39, %v1754_v63 }
 0x687   : > { %v6151_v41 = vpop.f32.mrf.mxu1  ;;  %6156 = vmatpush3.bf16.xpose.msra.mxu0 %v1809_v40 }
 0x688   : > { %6451 = vmatprep.subr.msk.bf16.mxu0 %vm1789_vm2, %v7981_v8 }
 0x689   : > { %v1770_v43 = vpop.f32.mrf.mxu1 }
 0x68b   : > { %v6152_v9 = vpop.f32.mrf.mxu1 }
 0x68c   : > { %v7987_v5 = vpack.c.bf16 %v6152_v9, %v6151_v41 }
 0x68d   : > { %v1773_v44 = vpop.f32.mrf.mxu1 }
 0x68e   : > { %v7991_v19 = vpack.c.bf16 %v1773_v44, %v1770_v43  ;;  %6169 = vmatprep.subr.bf16.mxu1 %v7987_v5 }
 0x68f   : > { %6158 = vmatpush3.bf16.xpose.msra.mxu0 %v1806_v2  ;;  %6170 = vmatpush3.bf16.msra.mxu1 %v7987_v5 }
 0x690   : > { %6452 = vmatprep.subr.msk.bf16.mxu0 %vm1789_vm2, %v7989_v45  ;;  %6171 = vmatprep.subr.bf16.mxu1 %v7991_v19 }
 0x693   : > { %6172 = vmatpush3.bf16.msra.mxu1 %v7991_v19 }
 0x694   : > { %6173 = vmatprep.subr.bf16.mxu1 %v8000_v0 }
 0x697   : > { %6160 = vmatpush3.bf16.xpose.msra.mxu0 %v1803_v47  ;;  %6174 = vmatpush3.bf16.msra.mxu1 %v8000_v0 }
 0x698   : > { %6175 = vmatprep.subr.bf16.mxu1 %v8004_v17 }
 0x69b   : > { %6176 = vmatpush3.bf16.msra.mxu1 %v8004_v17 }
 0x69e   : > { %6162 = vmatmul.mubr.msk.bf16.vlgmr.msra.gmra.mxu0 %vm1789_vm2, %v8011_v48 }
 0x69f   : > { %6165 = vmatprep.mubr.msk.bf16.mxu0 %vm1789_vm2, %v8013_v18 }
 0x6a6   : > { %6166 = vmatmul.mubr.msk.bf16.gmra.mxu0 %vm1789_vm2, %v8019_v31 }
 0x75e   : > { %v6163_v33 = vpop.f32.mrf.mxu0 }
 0x75f   : > { %v1885_v55 = vsel %vm736_vm0, %v6163_v33, -inf }
 0x760   : > { %v1848_v50 = vpop.f32.mrf.mxu0 }
 0x761   : > { %v1879_v30 = vsel %vm736_vm0, %v1848_v50, -inf }
 0x762   : > { %1880 = vmax.xlane.f32.xlu0 %v1879_v30  ;;  %v6164_v53 = vpop.f32.mrf.mxu0 }
 0x763   : > { %v1888_v61 = vsel %vm736_vm0, %v6164_v53, -inf }
 0x764   : > { %v1851_v54 = vpop.f32.mrf.mxu0 }
 0x765   : > { %v1882_v36 = vsel %vm736_vm0, %v1851_v54, -inf }
 0x766   : > { %1886 = vmax.xlane.f32.xlu0 %v1885_v55  ;;  %1883 = vmax.xlane.f32.xlu1 %v1882_v36  ;;  %v6167_v57 = vpop.f32.mrf.mxu0 }
 0x767   : > { %v1897_v7 = vsel %vm736_vm0, %v6167_v57, -inf }
 0x768   : > { %v1864_v60 = vpop.f32.mrf.mxu0 }
 0x769   : > { %v1891_v4 = vsel %vm736_vm0, %v1864_v60, -inf }
 0x76a   : > { %1889 = vmax.xlane.f32.xlu1 %v1888_v61  ;;  %1892 = vmax.xlane.f32.xlu0 %v1891_v4  ;;  %v6168_v10 = vpop.f32.mrf.mxu0 }
 0x76b   : > { %v1900_v1 = vsel %vm736_vm0, %v6168_v10, -inf }
 0x76c   : > { %v1867_v20 = vpop.f32.mrf.mxu0 }
 0x76d   : > { %v1894_v11 = vsel %vm736_vm0, %v1867_v20, -inf }
 0x76e   : > { %1898 = vmax.xlane.f32.xlu0 %v1897_v7  ;;  %1895 = vmax.xlane.f32.xlu1 %v1894_v11 }
 0x772   : > { %1901 = vmax.xlane.f32.xlu1 %v1900_v1 }
 0x7eb   : > { %v1881_v49 = vpop.xlane.xlu0 %1880 }
 0x7ec   : > { %v1903_v13 = vsub.f32 %v1848_v50, %v1881_v49 }
 0x7ee   : > { %v1911_v21 = vmul.f32 1.442695, %v1903_v13 }
 0x7ef   : > { %v1887_v14 = vpop.xlane.xlu0 %1886  ;;  %v1884_v15 = vpop.xlane.xlu1 %1883 }
 0x7f0   : > { %v1905_v16 = vsub.f32 %v6163_v33, %v1887_v14  ;;  %v1904_v24 = vsub.f32 %v1851_v54, %v1884_v15 }
 0x7f2   : > { %v1915_v22 = vmul.f32 1.442695, %v1905_v16  ;;  %v1913_v29 = vmul.f32 1.442695, %v1904_v24 }
 0x7f3   : > { %v1890_v26 = vpop.xlane.xlu1 %1889  ;;  %v1893_v27 = vpop.xlane.xlu0 %1892 }
 0x7f4   : > { %6695 = vpow2.f32 %v1915_v22  ;;  %v1906_v28 = vsub.f32 %v6164_v53, %v1890_v26  ;;  %v1907_v34 = vsub.f32 %v1864_v60, %v1893_v27 }
 0x7f5   : > { %6697 = vpow2.f32 %v1911_v21 }
 0x7f6   : > { %v1917_v58 = vmul.f32 1.442695, %v1906_v28  ;;  %v1919_v37 = vmul.f32 1.442695, %v1907_v34 }
 0x7f7   : > { %v1899_v35 = vpop.xlane.xlu0 %1898  ;;  %v1896_v53 = vpop.xlane.xlu1 %1895 }
 0x7f8   : > { %6699 = vpow2.f32 %v1917_v58  ;;  %v1909_v12 = vsub.f32 %v6167_v57, %v1899_v35  ;;  %v1908_v36 = vsub.f32 %v1867_v20, %v1896_v53 }
 0x7f9   : > { %6701 = vpow2.f32 %v1913_v29 }
 0x7fa   : > { %v1923_v63 = vmul.f32 1.442695, %v1909_v12  ;;  %v1921_v60 = vmul.f32 1.442695, %v1908_v36 }
 0x7fb   : > { %v1902_v54 = vpop.xlane.xlu1 %1901 }
 0x7fc   : > { %6703 = vpow2.f32 %v1923_v63  ;;  %v1910_v55 = vsub.f32 %v6168_v10, %v1902_v54 }
 0x7fd   : > { %6705 = vpow2.f32 %v1919_v37 }
 0x7fe   : > { %v1925_v57 = vmul.f32 1.442695, %v1910_v55 }
 0x800   : > { %6707 = vpow2.f32 %v1925_v57 }
 0x801   : > { %v6696_v38 = vpop.eup %6695  ;;  %6709 = vpow2.f32 %v1921_v60 }
 0x802   : > { %v1933_v39 = vsel %vm736_vm0, %v6696_v38, 0.0  ;;  %v6698_v40 = vpop.eup %6697 }
 0x803   : > { %1934 = vadd.xlane.f32.xlu0 %v1933_v39  ;;  %v1927_v43 = vsel %vm736_vm0, %v6698_v40, 0.0 }
 0x805   : > { %v6700_v41 = vpop.eup %6699 }
 0x806   : > { %v1936_v9 = vsel %vm736_vm0, %v6700_v41, 0.0  ;;  %v6702_v44 = vpop.eup %6701 }
 0x807   : > { %1928 = vadd.xlane.f32.xlu0 %v1927_v43  ;;  %1937 = vadd.xlane.f32.xlu1 %v1936_v9  ;;  %v1930_v33 = vsel %vm736_vm0, %v6702_v44, 0.0 }
 0x809   : > { %v8034_v2 = vpop.eup %6703 }
 0x80a   : > { %v1945_v47 = vsel %vm736_vm0, %v8034_v2, 0.0  ;;  %v8039_v50 = vpop.eup %6705 }
 0x80b   : > { %1946 = vadd.xlane.f32.xlu0 %v1945_v47  ;;  %1931 = vadd.xlane.f32.xlu1 %v1930_v33  ;;  %v1939_v30 = vsel %vm736_vm0, %v8039_v50, 0.0 }
 0x80d   : > { %v6708_v61 = vpop.eup %6707 }
 0x80e   : > { %v1948_v4 = vsel %vm736_vm0, %v6708_v61, 0.0  ;;  %v6710_v7 = vpop.eup %6709 }
 0x80f   : > { %1940 = vadd.xlane.f32.xlu0 %v1939_v30  ;;  %v1942_v11 = vsel %vm736_vm0, %v6710_v7, 0.0 }
 0x81c   : > { %2076 = vrot.lane.b32.xlu1 %v7973_v62, %s7333_s2 }
 0x820   : > { %2074 = vrot.lane.b32.xlu1 %v7981_v8, %s7333_s2 }
 0x825   : > { %2078 = vrot.lane.b32.xlu0 %v7971_v32, %s7333_s2 }
 0x829   : > { %2060 = vrot.lane.b32.xlu0 %v7967_v23, %s7333_s2 }
 0x82d   : > { %2064 = vrot.lane.b32.xlu0 %v8013_v18, %s7333_s2 }
 0x844   : > { %1949 = vadd.xlane.f32.xlu1 %v1948_v4 }
 0x848   : > { %1943 = vadd.xlane.f32.xlu1 %v1942_v11 }
 0x859   : > { %2072 = vrot.lane.b32.xlu1 %v7989_v45, %s7333_s2 }
 0x85d   : > { %2062 = vrot.lane.b32.xlu1 %v8011_v48, %s7333_s2 }
 0x861   : > { %2066 = vrot.lane.b32.xlu1 %v8019_v31, %s7333_s2 }
 0x88c   : > { %v1935_v10 = vpop.xlane.xlu0 %1934 }
 0x890   : > { %v1929_v20 = vpop.xlane.xlu0 %1928  ;;  %v1938_v1 = vpop.xlane.xlu1 %1937 }
 0x891   : > { %6711 = vrcp.f32 %v1938_v1 }
 0x892   : > { %6713 = vrcp.f32 %v1929_v20 }
 0x893   : > { %6715 = vrcp.f32 %v1935_v10 }
 0x894   : > { %v1947_v49 = vpop.xlane.xlu0 %1946  ;;  %v1932_v13 = vpop.xlane.xlu1 %1931 }
 0x895   : > { %6717 = vrcp.f32 %v1932_v13 }
 0x898   : > { %v1941_v14 = vpop.xlane.xlu0 %1940  ;;  %v2077_v12 = vpop.permute.xlu1 %2076 }
 0x899   : > { %v2099_v37 = vsel %vm1789_vm2, %v2077_v12, 0 }
 0x89c   : > { %v2079_v15 = vpop.permute.xlu0 %2078  ;;  %v2075_v63 = vpop.permute.xlu1 %2074 }
 0x89d   : > { %6453 = vmatprep.subr.msk.bf16.mxu1 %vm1789_vm2, %v2079_v15  ;;  %v2102_v35 = vsel %vm1789_vm2, %v2079_v15, 0 }
 0x89e   : > { %v6712_v16 = vpop.eup %6711 }
 0x89f   : > { %v6714_v21 = vpop.eup %6713  ;;  %v1962_v26 = vmul.f32 %v6712_v16, %v6700_v41 }
 0x8a0   : > { %v6716_v22 = vpop.eup %6715  ;;  %v1959_v27 = vmul.f32 %v6714_v21, %v6698_v40  ;;  %v2061_v60 = vpop.permute.xlu0 %2060 }
 0x8a1   : > { %v1961_v29 = vmul.f32 %v6716_v22, %v6696_v38  ;;  %v2096_v38 = vsel %vm1789_vm2, %v2075_v63, 0 }
 0x8a2   : > { %v6718_v24 = vpop.eup %6717 }
 0x8a3   : > { %v1960_v28 = vmul.f32 %v6718_v24, %v6702_v44  ;;  %v1968_v34 = vpack.c.bf16 %v1962_v26, %v1961_v29 }
 0x8a4   : > { %v2065_v11 = vpop.permute.xlu0 %2064 }
 0x8a5   : > { %v1967_v58 = vpack.c.bf16 %v1960_v28, %v1959_v27 }
 0x8a7   : > { %6177 = vmatprep.mubr.msk.bf16.mxu1 %vm736_vm0, %v1967_v58 }
 0x8a8   : > { %6178 = vmatmul.mubr.msk.bf16.vlgmr.msra.gmra.mxu1 %vm736_vm0, %v1968_v34 }
 0x8a9   : > { %6186 = vmatpush3.bf16.xpose.msra.mxu1 %v2102_v35 }
 0x8aa   : > { %6454 = vmatprep.subr.msk.bf16.mxu1 %vm1789_vm2, %v2077_v12 }
 0x8b1   : > { %6188 = vmatpush3.bf16.xpose.msra.mxu1 %v2099_v37 }
 0x8b2   : > { %6455 = vmatprep.subr.msk.bf16.mxu1 %vm1789_vm2, %v2075_v63 }
 0x8b9   : > { %6190 = vmatpush3.bf16.xpose.msra.mxu1 %v2096_v38 }
 0x8cd   : > { %v1950_v39 = vpop.xlane.xlu1 %1949 }
 0x8ce   : > { %6719 = vrcp.f32 %v1950_v39 }
 0x8cf   : > { %6721 = vrcp.f32 %v1941_v14 }
 0x8d0   : > { %6723 = vrcp.f32 %v1947_v49 }
 0x8d1   : > { %v1944_v40 = vpop.xlane.xlu1 %1943 }
 0x8d2   : > { %6725 = vrcp.f32 %v1944_v40 }
 0x8d5   : > { %v2073_v41 = vpop.permute.xlu1 %2072 }
 0x8d6   : > { %6456 = vmatprep.subr.msk.bf16.mxu1 %vm1789_vm2, %v2073_v41  ;;  %v2093_v43 = vsel %vm1789_vm2, %v2073_v41, 0 }
 0x8d7   : > { %6192 = vmatpush3.bf16.xpose.msra.mxu1 %v2093_v43 }
 0x8d9   : > { %v2063_v4 = vpop.permute.xlu1 %2062 }
 0x8db   : > { %v6720_v9 = vpop.eup %6719 }
 0x8dc   : > { %v6722_v44 = vpop.eup %6721  ;;  %v1966_v30 = vmul.f32 %v6720_v9, %v6708_v61 }
 0x8dd   : > { %v6724_v47 = vpop.eup %6723  ;;  %v1963_v53 = vmul.f32 %v6722_v44, %v8039_v50  ;;  %v2067_v61 = vpop.permute.xlu1 %2066 }
 0x8de   : > { %v1965_v55 = vmul.f32 %v6724_v47, %v8034_v2 }
 0x8df   : > { %v6726_v33 = vpop.eup %6725 }
 0x8e0   : > { %v1964_v54 = vmul.f32 %v6726_v33, %v6710_v7  ;;  %v1970_v57 = vpack.c.bf16 %v1966_v30, %v1965_v55 }
 0x8e2   : > { %v1969_v36 = vpack.c.bf16 %v1964_v54, %v1963_v53 }
 0x8e4   : > { %6181 = vmatprep.mubr.msk.bf16.mxu1 %vm736_vm0, %v1969_v36 }
 0x8e5   : > { %6182 = vmatmul.mubr.msk.bf16.gmra.mxu1 %vm736_vm0, %v1970_v57 }
 0x8e6   : > { %6193 = vmatprep.mubr.msk.bf16.mxu1 %vm1789_vm2, %v2061_v60 }
 0x8ed   : > { %6194 = vmatmul.mubr.msk.bf16.vlgmr.msra.gmra.mxu1 %vm1789_vm2, %v2063_v4 }
 0x8ee   : > { %6197 = vmatprep.mubr.msk.bf16.mxu1 %vm1789_vm2, %v2065_v11 }
 0x8f5   : > { %6198 = vmatmul.mubr.msk.bf16.gmra.mxu1 %vm1789_vm2, %v2067_v61 }
 0x968   : > { %v6179_v50 = vpop.f32.mrf.mxu1 }
 0x969   : > { %2050 = vst.msk [vmem:[#allocation2 + $0x10] sm:$0xff] %vm1789_vm2, %v6179_v50 }
 0x96a   : > { %v2017_v2 = vpop.f32.mrf.mxu1 }
 0x96b   : > { %2048 = vst.msk [vmem:[#allocation2] sm:$0xff] %vm1789_vm2, %v2017_v2 }
 0x96c   : > { %v6180_v7 = vpop.f32.mrf.mxu1 }
 0x96d   : > { %2051 = vst.msk [vmem:[#allocation2 + $0x18] sm:$0xff] %vm1789_vm2, %v6180_v7 }
 0x96e   : > { %v2020_v10 = vpop.f32.mrf.mxu1 }
 0x96f   : > { %2049 = vst.msk [vmem:[#allocation2 + $0x8] sm:$0xff] %vm1789_vm2, %v2020_v10 }
 0x9a5   : > { %v6183_v20 = vpop.f32.mrf.mxu1 }
 0x9a6   : > { %2054 = vst.msk [vmem:[#allocation2 + $0x30] sm:$0xff] %vm1789_vm2, %v6183_v20 }
 0x9a7   : > { %v2033_v1 = vpop.f32.mrf.mxu1 }
 0x9a8   : > { %2052 = vst.msk [vmem:[#allocation2 + $0x20] sm:$0xff] %vm1789_vm2, %v2033_v1 }
 0x9a9   : > { %v6184_v49 = vpop.f32.mrf.mxu1 }
 0x9aa   : > { %2055 = vst.msk [vmem:[#allocation2 + $0x38] sm:$0xff] %vm1789_vm2, %v6184_v49 }
 0x9ab   : > { %v2036_v13 = vpop.f32.mrf.mxu1 }
 0x9ac   : > { %2053 = vst.msk [vmem:[#allocation2 + $0x28] sm:$0xff] %vm1789_vm2, %v2036_v13 }
 0x9ad   : > { %v6195_v14 = vpop.f32.mrf.mxu1 }
 0x9ae   : > { %v2175_v24 = vsel %vm736_vm0, %v6195_v14, -inf }
 0x9af   : > { %v2138_v15 = vpop.f32.mrf.mxu1 }
 0x9b0   : > { %v2169_v16 = vsel %vm736_vm0, %v2138_v15, -inf }
 0x9b1   : > { %2170 = vmax.xlane.f32.xlu0 %v2169_v16  ;;  %v6196_v21 = vpop.f32.mrf.mxu1 }
 0x9b2   : > { %v2178_v29 = vsel %vm736_vm0, %v6196_v21, -inf }
 0x9b3   : > { %v2141_v22 = vpop.f32.mrf.mxu1 }
 0x9b4   : > { %v2172_v26 = vsel %vm736_vm0, %v2141_v22, -inf }
 0x9b5   : > { %2176 = vmax.xlane.f32.xlu0 %v2175_v24  ;;  %2173 = vmax.xlane.f32.xlu1 %v2172_v26  ;;  %v6199_v27 = vpop.f32.mrf.mxu1 }
 0x9b6   : > { %v2187_v12 = vsel %vm736_vm0, %v6199_v27, -inf }
 0x9b7   : > { %v2154_v28 = vpop.f32.mrf.mxu1 }
 0x9b8   : > { %v2181_v63 = vsel %vm736_vm0, %v2154_v28, -inf }
 0x9b9   : > { %2179 = vmax.xlane.f32.xlu0 %v2178_v29  ;;  %v6200_v58 = vpop.f32.mrf.mxu1 }
 0x9ba   : > { %v2190_v34 = vsel %vm736_vm0, %v6200_v58, -inf }
 0x9bb   : > { %2191 = vmax.xlane.f32.xlu1 %v2190_v34  ;;  %v2157_v35 = vpop.f32.mrf.mxu1 }
 0x9bc   : > { %v2184_v37 = vsel %vm736_vm0, %v2157_v35, -inf }
 0x9bd   : > { %2188 = vmax.xlane.f32.xlu0 %v2187_v12 }
 0x9bf   : > { %2185 = vmax.xlane.f32.xlu1 %v2184_v37 }
 0x9c1   : > { %2182 = vmax.xlane.f32.xlu0 %v2181_v63 }
 0x9d0   : > { %2269 = vrot.lane.b32.xlu1 %v7991_v19, %s7333_s2 }
 0x9d4   : > { %2267 = vrot.lane.b32.xlu1 %v8000_v0, %s7333_s2 }
 0x9d7   : > { %2271 = vrot.lane.b32.xlu0 %v7987_v5, %s7333_s2 }
 0x9d8   : > { %2265 = vrot.lane.b32.xlu1 %v8004_v17, %s7333_s2 }
 0xa3a   : > { %v2171_v38 = vpop.xlane.xlu0 %2170 }
 0xa3b   : > { %v2193_v39 = vsub.f32 %v2138_v15, %v2171_v38 }
 0xa3d   : > { %v2201_v9 = vmul.f32 1.442695, %v2193_v39 }
 0xa3e   : > { %v2177_v40 = vpop.xlane.xlu0 %2176  ;;  %v2174_v41 = vpop.xlane.xlu1 %2173 }
 0xa3f   : > { %v2195_v43 = vsub.f32 %v6195_v14, %v2177_v40  ;;  %v2194_v47 = vsub.f32 %v2141_v22, %v2174_v41 }
 0xa41   : > { %v2205_v44 = vmul.f32 1.442695, %v2195_v43  ;;  %v2203_v54 = vmul.f32 1.442695, %v2194_v47 }
 0xa42   : > { %v2180_v33 = vpop.xlane.xlu0 %2179 }
 0xa43   : > { %6727 = vpow2.f32 %v2205_v44  ;;  %v2196_v30 = vsub.f32 %v6196_v21, %v2180_v33 }
 0xa44   : > { %v2192_v53 = vpop.xlane.xlu1 %2191  ;;  %6729 = vpow2.f32 %v2201_v9 }
 0xa45   : > { %v2207_v55 = vmul.f32 1.442695, %v2196_v30  ;;  %v2200_v36 = vsub.f32 %v6200_v58, %v2192_v53 }
 0xa46   : > { %v2189_v57 = vpop.xlane.xlu0 %2188 }
 0xa47   : > { %6731 = vpow2.f32 %v2207_v55  ;;  %v2199_v60 = vsub.f32 %v6199_v27, %v2189_v57  ;;  %v2215_v11 = vmul.f32 1.442695, %v2200_v36 }
 0xa48   : > { %v2186_v4 = vpop.xlane.xlu1 %2185  ;;  %6733 = vpow2.f32 %v2203_v54 }
 0xa49   : > { %v2213_v61 = vmul.f32 1.442695, %v2199_v60  ;;  %v2198_v50 = vsub.f32 %v2157_v35, %v2186_v4 }
 0xa4a   : > { %v2183_v2 = vpop.xlane.xlu0 %2182 }
 0xa4b   : > { %6735 = vpow2.f32 %v2213_v61  ;;  %v2197_v7 = vsub.f32 %v2154_v28, %v2183_v2  ;;  %v2211_v20 = vmul.f32 1.442695, %v2198_v50 }
 0xa4c   : > { %v2270_v10 = vpop.permute.xlu1 %2269  ;;  %6737 = vpow2.f32 %v2215_v11 }
 0xa4d   : > { %v2209_v1 = vmul.f32 1.442695, %v2197_v7 }
 0xa4e   : > { %v2272_v49 = vpop.permute.xlu0 %2271 }
 0xa4f   : > { %6739 = vpow2.f32 %v2209_v1  ;;  %6201 = vmatprep.subr.bf16.mxu0 %v2272_v49 }
 0xa50   : > { %v8103_v13 = vpop.eup %6727  ;;  %6202 = vmatpush3.bf16.msra.mxu0 %v2272_v49  ;;  %6741 = vpow2.f32 %v2211_v20  ;;  %v2268_v16 = vpop.permute.xlu1 %2267 }
 0xa51   : > { %6203 = vmatprep.subr.bf16.mxu0 %v2270_v10  ;;  %v2223_v14 = vsel %vm736_vm0, %v8103_v13, 0.0  ;;  %v6730_v15 = vpop.eup %6729 }
 0xa52   : > { %2224 = vadd.xlane.f32.xlu0 %v2223_v14  ;;  %v2217_v22 = vsel %vm736_vm0, %v6730_v15, 0.0 }
 0xa54   : > { %v6732_v21 = vpop.eup %6731  ;;  %6204 = vmatpush3.bf16.msra.mxu0 %v2270_v10  ;;  %v2266_v28 = vpop.permute.xlu1 %2265 }
 0xa55   : > { %6205 = vmatprep.subr.bf16.mxu0 %v2268_v16  ;;  %v2226_v24 = vsel %vm736_vm0, %v6732_v21, 0.0  ;;  %v6734_v26 = vpop.eup %6733 }
 0xa56   : > { %2218 = vadd.xlane.f32.xlu0 %v2217_v22  ;;  %2227 = vadd.xlane.f32.xlu1 %v2226_v24  ;;  %v2220_v58 = vsel %vm736_vm0, %v6734_v26, 0.0 }
 0xa58   : > { %v8109_v27 = vpop.eup %6735  ;;  %6206 = vmatpush3.bf16.msra.mxu0 %v2268_v16 }
 0xa59   : > { %6207 = vmatprep.subr.bf16.mxu0 %v2266_v28  ;;  %v2235_v29 = vsel %vm736_vm0, %v8109_v27, 0.0  ;;  %v6738_v34 = vpop.eup %6737 }
 0xa5a   : > { %2236 = vadd.xlane.f32.xlu0 %v2235_v29  ;;  %2221 = vadd.xlane.f32.xlu1 %v2220_v58  ;;  %v2238_v37 = vsel %vm736_vm0, %v6738_v34, 0.0 }
 0xa5c   : > { %v6740_v35 = vpop.eup %6739  ;;  %6208 = vmatpush3.bf16.msra.mxu0 %v2266_v28 }
 0xa5d   : > { %v2229_v12 = vsel %vm736_vm0, %v6740_v35, 0.0  ;;  %v6742_v63 = vpop.eup %6741 }
 0xa5e   : > { %2230 = vadd.xlane.f32.xlu1 %v2229_v12  ;;  %2239 = vadd.xlane.f32.xlu0 %v2238_v37  ;;  %v2232_v38 = vsel %vm736_vm0, %v6742_v63, 0.0 }
 0xa62   : > { %2233 = vadd.xlane.f32.xlu0 %v2232_v38 }
 0xa6f   : > { %2407 = vrot.lane.b32.xlu1 %v7973_v62, %s7334_s19 }
 0xa73   : > { %2405 = vrot.lane.b32.xlu1 %v7981_v8, %s7334_s19 }
 0xa77   : > { %2403 = vrot.lane.b32.xlu1 %v7989_v45, %s7334_s19 }
 0xa78   : > { %2409 = vrot.lane.b32.xlu0 %v7971_v32, %s7334_s19 }
 0xa7b   : > { %2397 = vrot.lane.b32.xlu1 %v8011_v48, %s7334_s19 }
 0xa7c   : > { %2395 = vrot.lane.b32.xlu0 %v7967_v23, %s7334_s19 }
 0xa7f   : > { %2401 = vrot.lane.b32.xlu1 %v8019_v31, %s7334_s19 }
 0xa80   : > { %2399 = vrot.lane.b32.xlu0 %v8013_v18, %s7334_s19 }
 0xadb   : > { %v2225_v39 = vpop.xlane.xlu0 %2224 }
 0xadf   : > { %v2219_v40 = vpop.xlane.xlu0 %2218  ;;  %v2228_v41 = vpop.xlane.xlu1 %2227 }
 0xae0   : > { %6743 = vrcp.f32 %v2228_v41 }
 0xae1   : > { %6745 = vrcp.f32 %v2219_v40 }
 0xae2   : > { %6747 = vrcp.f32 %v2225_v39 }
 0xae3   : > { %v2237_v43 = vpop.xlane.xlu0 %2236  ;;  %v2222_v9 = vpop.xlane.xlu1 %2221 }
 0xae4   : > { %6749 = vrcp.f32 %v2222_v9 }
 0xae7   : > { %v2240_v44 = vpop.xlane.xlu0 %2239  ;;  %v2231_v47 = vpop.xlane.xlu1 %2230 }
 0xae8   : > { %6751 = vrcp.f32 %v2240_v44 }
 0xae9   : > { %6753 = vrcp.f32 %v2231_v47 }
 0xaea   : > { %6755 = vrcp.f32 %v2237_v43 }
 0xaeb   : > { %v2234_v33 = vpop.xlane.xlu0 %2233  ;;  %v2408_v49 = vpop.permute.xlu1 %2407 }
 0xaec   : > { %6757 = vrcp.f32 %v2234_v33 }
 0xaed   : > { %v6744_v30 = vpop.eup %6743 }
 0xaee   : > { %v6746_v54 = vpop.eup %6745  ;;  %v2252_v57 = vmul.f32 %v6744_v30, %v6732_v21 }
 0xaef   : > { %v2410_v53 = vpop.permute.xlu0 %2409  ;;  %v6748_v55 = vpop.eup %6747  ;;  %v2249_v60 = vmul.f32 %v6746_v54, %v6730_v15 }
 0xaf0   : > { %6457 = vmatprep.subr.msk.bf16.mxu0 %vm1789_vm2, %v2410_v53  ;;  %v2251_v11 = vmul.f32 %v6748_v55, %v8103_v13  ;;  %v2433_v20 = vsel %vm1789_vm2, %v2410_v53, 0  ;;  %v2406_v28 = vpop.permute.xlu1 %2405 }
 0xaf1   : > { %v6750_v36 = vpop.eup %6749  ;;  %v2427_v29 = vsel %vm1789_vm2, %v2406_v28, 0 }
 0xaf2   : > { %v2250_v4 = vmul.f32 %v6750_v36, %v6734_v26  ;;  %v2258_v2 = vpack.c.bf16 %v2252_v57, %v2251_v11  ;;  %v2430_v26 = vsel %vm1789_vm2, %v2408_v49, 0 }
 0xaf3   : > { %v2396_v24 = vpop.permute.xlu0 %2395 }
 0xaf4   : > { %v2257_v61 = vpack.c.bf16 %v2250_v4, %v2249_v60  ;;  %v2404_v58 = vpop.permute.xlu1 %2403 }
 0xaf5   : > { %v6752_v50 = vpop.eup %6751 }
 0xaf6   : > { %v6754_v7 = vpop.eup %6753  ;;  %6209 = vmatprep.mubr.msk.bf16.mxu0 %vm736_vm0, %v2257_v61  ;;  %v2256_v16 = vmul.f32 %v6752_v50, %v6738_v34 }
 0xaf7   : > { %v6756_v10 = vpop.eup %6755  ;;  %6210 = vmatmul.mubr.msk.bf16.vlgmr.msra.gmra.mxu0 %vm736_vm0, %v2258_v2  ;;  %v2253_v14 = vmul.f32 %v6754_v7, %v6740_v35  ;;  %v2400_v35 = vpop.permute.xlu0 %2399 }
 0xaf8   : > { %6218 = vmatpush3.bf16.xpose.msra.mxu0 %v2433_v20  ;;  %v2255_v21 = vmul.f32 %v6756_v10, %v8109_v27  ;;  %v2424_v27 = vsel %vm1789_vm2, %v2404_v58, 0  ;;  %v2398_v34 = vpop.permute.xlu1 %2397 }
 0xaf9   : > { %v6758_v1 = vpop.eup %6757  ;;  %6458 = vmatprep.subr.msk.bf16.mxu0 %vm1789_vm2, %v2408_v49 }
 0xafa   : > { %v2254_v15 = vmul.f32 %v6758_v1, %v6742_v63  ;;  %v2260_v22 = vpack.c.bf16 %v2256_v16, %v2255_v21 }
 0xafc   : > { %v2259_v13 = vpack.c.bf16 %v2254_v15, %v2253_v14  ;;  %v2402_v12 = vpop.permute.xlu1 %2401 }
 0xafe   : > { %6213 = vmatprep.mubr.msk.bf16.mxu0 %vm736_vm0, %v2259_v13 }
 0xaff   : > { %6214 = vmatmul.mubr.msk.bf16.gmra.mxu0 %vm736_vm0, %v2260_v22 }
 0xb00   : > { %6220 = vmatpush3.bf16.xpose.msra.mxu0 %v2430_v26  ;;  %6225 = vmatprep.mubr.msk.bf16.mxu0 %vm1789_vm2, %v2396_v24 }
 0xb01   : > { %6459 = vmatprep.subr.msk.bf16.mxu0 %vm1789_vm2, %v2406_v28 }
 0xb08   : > { %6222 = vmatpush3.bf16.xpose.msra.mxu0 %v2427_v29 }
 0xb09   : > { %6460 = vmatprep.subr.msk.bf16.mxu0 %vm1789_vm2, %v2404_v58 }
 0xb10   : > { %6224 = vmatpush3.bf16.xpose.msra.mxu0 %v2424_v27 }
 0xb17   : > { %6226 = vmatmul.mubr.msk.bf16.vlgmr.msra.gmra.mxu0 %vm1789_vm2, %v2398_v34 }
 0xb18   : > { %6229 = vmatprep.mubr.msk.bf16.mxu0 %vm1789_vm2, %v2400_v35 }
 0xb1f   : > { %6230 = vmatmul.mubr.msk.bf16.gmra.mxu0 %vm1789_vm2, %v2402_v12 }
 0xbb7   : > { %v8151_v37 = vpop.f32.mrf.mxu0 }
 0xbb9   : > { %v8153_v63 = vpop.f32.mrf.mxu0 }
 0xbbb   : > { %v8155_v38 = vpop.f32.mrf.mxu0 }
 0xbbd   : > { %v8157_v39 = vpop.f32.mrf.mxu0 }
 0xbbf   : > { %v8159_v40 = vpop.f32.mrf.mxu0 }
 0xbc1   : > { %v8161_v41 = vpop.f32.mrf.mxu0 }
 0xbc3   : > { %v8163_v43 = vpop.f32.mrf.mxu0 }
 0xbc5   : > { %v8165_v9 = vpop.f32.mrf.mxu0 }
 0xbd7   : > { %v6227_v44 = vpop.f32.mrf.mxu0 }
 0xbd8   : > { %v2506_v54 = vsel %vm736_vm0, %v6227_v44, -inf }
 0xbd9   : > { %v2469_v47 = vpop.f32.mrf.mxu0 }
 0xbda   : > { %v2500_v33 = vsel %vm736_vm0, %v2469_v47, -inf }
 0xbdb   : > { %2501 = vmax.xlane.f32.xlu0 %v2500_v33  ;;  %v6228_v30 = vpop.f32.mrf.mxu0 }
 0xbdc   : > { %v2509_v60 = vsel %vm736_vm0, %v6228_v30, -inf }
 0xbdd   : > { %v2472_v53 = vpop.f32.mrf.mxu0 }
 0xbde   : > { %v2503_v55 = vsel %vm736_vm0, %v2472_v53, -inf }
 0xbdf   : > { %2507 = vmax.xlane.f32.xlu0 %v2506_v54  ;;  %2504 = vmax.xlane.f32.xlu1 %v2503_v55  ;;  %v6231_v36 = vpop.f32.mrf.mxu0 }
 0xbe0   : > { %v2518_v50 = vsel %vm736_vm0, %v6231_v36, -inf }
 0xbe1   : > { %v2485_v57 = vpop.f32.mrf.mxu0 }
 0xbe2   : > { %v2512_v7 = vsel %vm736_vm0, %v2485_v57, -inf }
 0xbe3   : > { %2510 = vmax.xlane.f32.xlu0 %v2509_v60  ;;  %v6232_v4 = vpop.f32.mrf.mxu0 }
 0xbe4   : > { %v2521_v11 = vsel %vm736_vm0, %v6232_v4, -inf }
 0xbe5   : > { %2522 = vmax.xlane.f32.xlu1 %v2521_v11  ;;  %v2488_v61 = vpop.f32.mrf.mxu0 }
 0xbe6   : > { %v2515_v2 = vsel %vm736_vm0, %v2488_v61, -inf }
 0xbe7   : > { %2519 = vmax.xlane.f32.xlu0 %v2518_v50 }
 0xbe9   : > { %2516 = vmax.xlane.f32.xlu1 %v2515_v2 }
 0xbeb   : > { %2513 = vmax.xlane.f32.xlu0 %v2512_v7 }
 0xbfa   : > { %2596 = vrot.lane.b32.xlu1 %v7991_v19, %s7334_s19 }
 0xbfe   : > { %2594 = vrot.lane.b32.xlu1 %v8000_v0, %s7334_s19 }
 0xc01   : > { %2598 = vrot.lane.b32.xlu0 %v7987_v5, %s7334_s19 }
 0xc02   : > { %2592 = vrot.lane.b32.xlu1 %v8004_v17, %s7334_s19 }
 0xc64   : > { %v2502_v10 = vpop.xlane.xlu0 %2501 }
 0xc65   : > { %v2524_v20 = vsub.f32 %v2469_v47, %v2502_v10 }
 0xc67   : > { %v2532_v15 = vmul.f32 1.442695, %v2524_v20 }
 0xc68   : > { %v2508_v1 = vpop.xlane.xlu0 %2507  ;;  %v2505_v49 = vpop.xlane.xlu1 %2504 }
 0xc69   : > { %v2526_v14 = vsub.f32 %v6227_v44, %v2508_v1  ;;  %v2525_v13 = vsub.f32 %v2472_v53, %v2505_v49 }
 0xc6b   : > { %v2536_v16 = vmul.f32 1.442695, %v2526_v14  ;;  %v2534_v26 = vmul.f32 1.442695, %v2525_v13 }
 0xc6c   : > { %v2511_v21 = vpop.xlane.xlu0 %2510 }
 0xc6d   : > { %6759 = vpow2.f32 %v2536_v16  ;;  %v2527_v22 = vsub.f32 %v6228_v30, %v2511_v21 }
 0xc6e   : > { %v2523_v24 = vpop.xlane.xlu1 %2522  ;;  %6761 = vpow2.f32 %v2532_v15 }
 0xc6f   : > { %v2538_v28 = vmul.f32 1.442695, %v2527_v22  ;;  %v2531_v29 = vsub.f32 %v6232_v4, %v2523_v24 }
 0xc70   : > { %v2520_v58 = vpop.xlane.xlu0 %2519 }
 0xc71   : > { %6763 = vpow2.f32 %v2538_v28  ;;  %v2530_v27 = vsub.f32 %v6231_v36, %v2520_v58  ;;  %v2546_v35 = vmul.f32 1.442695, %v2531_v29 }
 0xc72   : > { %v2517_v34 = vpop.xlane.xlu1 %2516  ;;  %6765 = vpow2.f32 %v2534_v26 }
 0xc73   : > { %v2544_v12 = vmul.f32 1.442695, %v2530_v27  ;;  %v2529_v47 = vsub.f32 %v2488_v61, %v2517_v34 }
 0xc74   : > { %v2514_v44 = vpop.xlane.xlu0 %2513 }
 0xc75   : > { %6767 = vpow2.f32 %v2544_v12  ;;  %v2528_v33 = vsub.f32 %v2485_v57, %v2514_v44  ;;  %v2542_v54 = vmul.f32 1.442695, %v2529_v47 }
 0xc76   : > { %v2597_v53 = vpop.permute.xlu1 %2596  ;;  %6769 = vpow2.f32 %v2546_v35 }
 0xc77   : > { %v2540_v30 = vmul.f32 1.442695, %v2528_v33 }
 0xc78   : > { %v2599_v55 = vpop.permute.xlu0 %2598 }
 0xc79   : > { %6771 = vpow2.f32 %v2540_v30  ;;  %6233 = vmatprep.subr.bf16.mxu1 %v2599_v55 }
 0xc7a   : > { %v8183_v60 = vpop.eup %6759  ;;  %6234 = vmatpush3.bf16.msra.mxu1 %v2599_v55  ;;  %6773 = vpow2.f32 %v2542_v54  ;;  %v2595_v11 = vpop.permute.xlu1 %2594 }
 0xc7b   : > { %6235 = vmatprep.subr.bf16.mxu1 %v2597_v53  ;;  %v2554_v36 = vsel %vm736_vm0, %v8183_v60, 0.0  ;;  %v6762_v4 = vpop.eup %6761 }
 0xc7c   : > { %2555 = vadd.xlane.f32.xlu0 %v2554_v36  ;;  %v2548_v57 = vsel %vm736_vm0, %v6762_v4, 0.0 }
 0xc7e   : > { %v6764_v61 = vpop.eup %6763  ;;  %6236 = vmatpush3.bf16.msra.mxu1 %v2597_v53  ;;  %v2593_v10 = vpop.permute.xlu1 %2592 }
 0xc7f   : > { %6237 = vmatprep.subr.bf16.mxu1 %v2595_v11  ;;  %v2557_v50 = vsel %vm736_vm0, %v6764_v61, 0.0  ;;  %v6766_v2 = vpop.eup %6765 }
 0xc80   : > { %2549 = vadd.xlane.f32.xlu0 %v2548_v57  ;;  %2558 = vadd.xlane.f32.xlu1 %v2557_v50  ;;  %v2551_v1 = vsel %vm736_vm0, %v6766_v2, 0.0 }
 0xc82   : > { %v8189_v7 = vpop.eup %6767  ;;  %6238 = vmatpush3.bf16.msra.mxu1 %v2595_v11 }
 0xc83   : > { %6239 = vmatprep.subr.bf16.mxu1 %v2593_v10  ;;  %v2566_v20 = vsel %vm736_vm0, %v8189_v7, 0.0  ;;  %v6770_v49 = vpop.eup %6769 }
 0xc84   : > { %2567 = vadd.xlane.f32.xlu0 %v2566_v20  ;;  %2552 = vadd.xlane.f32.xlu1 %v2551_v1  ;;  %v2569_v16 = vsel %vm736_vm0, %v6770_v49, 0.0 }
 0xc86   : > { %v6772_v14 = vpop.eup %6771  ;;  %6240 = vmatpush3.bf16.msra.mxu1 %v2593_v10 }
 0xc87   : > { %v2560_v15 = vsel %vm736_vm0, %v6772_v14, 0.0  ;;  %v6774_v13 = vpop.eup %6773 }
 0xc88   : > { %2561 = vadd.xlane.f32.xlu1 %v2560_v15  ;;  %2570 = vadd.xlane.f32.xlu0 %v2569_v16  ;;  %v2563_v21 = vsel %vm736_vm0, %v6774_v13, 0.0 }
 0xc8c   : > { %2564 = vadd.xlane.f32.xlu0 %v2563_v21 }
 0xc99   : > { %2734 = vrot.lane.b32.xlu1 %v7973_v62, %s7335_s24 }
 0xc9d   : > { %2732 = vrot.lane.b32.xlu1 %v7981_v8, %s7335_s24 }
 0xca1   : > { %2730 = vrot.lane.b32.xlu1 %v7989_v45, %s7335_s24 }
 0xca2   : > { %2736 = vrot.lane.b32.xlu0 %v7971_v32, %s7335_s24 }
 0xca5   : > { %2724 = vrot.lane.b32.xlu1 %v8011_v48, %s7335_s24 }
 0xca6   : > { %2722 = vrot.lane.b32.xlu0 %v7967_v23, %s7335_s24 }
 0xca9   : > { %2728 = vrot.lane.b32.xlu1 %v8019_v31, %s7335_s24 }
 0xcaa   : > { %2726 = vrot.lane.b32.xlu0 %v8013_v18, %s7335_s24 }
 0xd05   : > { %v2556_v62 = vpop.xlane.xlu0 %2555 }
 0xd09   : > { %v2550_v8 = vpop.xlane.xlu0 %2549  ;;  %v2559_v22 = vpop.xlane.xlu1 %2558 }
 0xd0a   : > { %6775 = vrcp.f32 %v2559_v22 }
 0xd0b   : > { %6777 = vrcp.f32 %v2550_v8 }
 0xd0c   : > { %6779 = vrcp.f32 %v2556_v62 }
 0xd0d   : > { %v2568_v45 = vpop.xlane.xlu0 %2567  ;;  %v2553_v24 = vpop.xlane.xlu1 %2552 }
 0xd0e   : > { %6781 = vrcp.f32 %v2553_v24 }
 0xd11   : > { %v2571_v32 = vpop.xlane.xlu0 %2570  ;;  %v2562_v48 = vpop.xlane.xlu1 %2561 }
 0xd12   : > { %6783 = vrcp.f32 %v2571_v32 }
 0xd13   : > { %6785 = vrcp.f32 %v2562_v48 }
 0xd14   : > { %6787 = vrcp.f32 %v2568_v45 }
 0xd15   : > { %v2565_v23 = vpop.xlane.xlu0 %2564  ;;  %v2735_v55 = vpop.permute.xlu1 %2734 }
 0xd16   : > { %6789 = vrcp.f32 %v2565_v23 }
 0xd17   : > { %v6776_v31 = vpop.eup %6775 }
 0xd18   : > { %v6778_v28 = vpop.eup %6777  ;;  %v2583_v58 = vmul.f32 %v6776_v31, %v6764_v61 }
 0xd19   : > { %v2737_v26 = vpop.permute.xlu0 %2736  ;;  %v6780_v18 = vpop.eup %6779  ;;  %v2580_v27 = vmul.f32 %v6778_v28, %v6762_v4 }
 0xd1a   : > { %6461 = vmatprep.subr.msk.bf16.mxu1 %vm1789_vm2, %v2737_v26  ;;  %v2582_v35 = vmul.f32 %v6780_v18, %v8183_v60  ;;  %v2760_v54 = vsel %vm1789_vm2, %v2737_v26, 0  ;;  %v2733_v10 = vpop.permute.xlu1 %2732 }
 0xd1b   : > { %v6782_v29 = vpop.eup %6781  ;;  %v2754_v20 = vsel %vm1789_vm2, %v2733_v10, 0 }
 0xd1c   : > { %v2581_v34 = vmul.f32 %v6782_v29, %v6766_v2  ;;  %v2589_v44 = vpack.c.bf16 %v2583_v58, %v2582_v35  ;;  %v2757_v2 = vsel %vm1789_vm2, %v2735_v55, 0 }
 0xd1d   : > { %v2723_v50 = vpop.permute.xlu0 %2722 }
 0xd1e   : > { %v2588_v12 = vpack.c.bf16 %v2581_v34, %v2580_v27  ;;  %v2731_v1 = vpop.permute.xlu1 %2730 }
 0xd1f   : > { %v6784_v47 = vpop.eup %6783 }
 0xd20   : > { %v6786_v33 = vpop.eup %6785  ;;  %6241 = vmatprep.mubr.msk.bf16.mxu1 %vm736_vm0, %v2588_v12  ;;  %v2587_v11 = vmul.f32 %v6784_v47, %v6770_v49 }
 0xd21   : > { %v6788_v53 = vpop.eup %6787  ;;  %6242 = vmatmul.mubr.msk.bf16.vlgmr.msra.gmra.mxu1 %vm736_vm0, %v2589_v44  ;;  %v2584_v36 = vmul.f32 %v6786_v33, %v6772_v14  ;;  %v2727_v14 = vpop.permute.xlu0 %2726 }
 0xd22   : > { %6250 = vmatpush3.bf16.xpose.msra.mxu1 %v2760_v54  ;;  %v2586_v61 = vmul.f32 %v6788_v53, %v8189_v7  ;;  %v2751_v7 = vsel %vm1789_vm2, %v2731_v1, 0  ;;  %v2725_v49 = vpop.permute.xlu1 %2724 }
 0xd23   : > { %v6790_v30 = vpop.eup %6789  ;;  %6462 = vmatprep.subr.msk.bf16.mxu1 %vm1789_vm2, %v2735_v55 }
 0xd24   : > { %v2585_v4 = vmul.f32 %v6790_v30, %v6774_v13  ;;  %v2591_v57 = vpack.c.bf16 %v2587_v11, %v2586_v61 }
 0xd26   : > { %v2590_v60 = vpack.c.bf16 %v2585_v4, %v2584_v36  ;;  %v2729_v15 = vpop.permute.xlu1 %2728 }
 0xd28   : > { %6245 = vmatprep.mubr.msk.bf16.mxu1 %vm736_vm0, %v2590_v60 }
 0xd29   : > { %6246 = vmatmul.mubr.msk.bf16.gmra.mxu1 %vm736_vm0, %v2591_v57 }
 0xd2a   : > { %6252 = vmatpush3.bf16.xpose.msra.mxu1 %v2757_v2  ;;  %6257 = vmatprep.mubr.msk.bf16.mxu1 %vm1789_vm2, %v2723_v50 }
 0xd2b   : > { %6463 = vmatprep.subr.msk.bf16.mxu1 %vm1789_vm2, %v2733_v10 }
 0xd32   : > { %6254 = vmatpush3.bf16.xpose.msra.mxu1 %v2754_v20 }
 0xd33   : > { %6464 = vmatprep.subr.msk.bf16.mxu1 %vm1789_vm2, %v2731_v1 }
 0xd3a   : > { %6256 = vmatpush3.bf16.xpose.msra.mxu1 %v2751_v7 }
 0xd41   : > { %6258 = vmatmul.mubr.msk.bf16.vlgmr.msra.gmra.mxu1 %vm1789_vm2, %v2725_v49 }
 0xd42   : > { %6261 = vmatprep.mubr.msk.bf16.mxu1 %vm1789_vm2, %v2727_v14 }
 0xd49   : > { %6262 = vmatmul.mubr.msk.bf16.gmra.mxu1 %vm1789_vm2, %v2729_v15 }
 0xde1   : > { %v8231_v16 = vpop.f32.mrf.mxu1 }
 0xde3   : > { %v8233_v13 = vpop.f32.mrf.mxu1 }
 0xde5   : > { %v8235_v21 = vpop.f32.mrf.mxu1 }
 0xde7   : > { %v8237_v62 = vpop.f32.mrf.mxu1 }
 0xde9   : > { %v8239_v8 = vpop.f32.mrf.mxu1 }
 0xdeb   : > { %v8241_v22 = vpop.f32.mrf.mxu1 }
 0xded   : > { %v8243_v45 = vpop.f32.mrf.mxu1 }
 0xdef   : > { %v8245_v24 = vpop.f32.mrf.mxu1 }
 0xe01   : > { %v6259_v32 = vpop.f32.mrf.mxu1 }
 0xe02   : > { %v2833_v28 = vsel %vm736_vm0, %v6259_v32, -inf }
 0xe03   : > { %v2796_v48 = vpop.f32.mrf.mxu1 }
 0xe04   : > { %v2827_v23 = vsel %vm736_vm0, %v2796_v48, -inf }
 0xe05   : > { %2828 = vmax.xlane.f32.xlu0 %v2827_v23  ;;  %v6260_v31 = vpop.f32.mrf.mxu1 }
 0xe06   : > { %v2836_v27 = vsel %vm736_vm0, %v6260_v31, -inf }
 0xe07   : > { %v2799_v26 = vpop.f32.mrf.mxu1 }
 0xe08   : > { %v2830_v18 = vsel %vm736_vm0, %v2799_v26, -inf }
 0xe09   : > { %2834 = vmax.xlane.f32.xlu0 %v2833_v28  ;;  %2831 = vmax.xlane.f32.xlu1 %v2830_v18  ;;  %v6263_v29 = vpop.f32.mrf.mxu1 }
 0xe0a   : > { %v2845_v44 = vsel %vm736_vm0, %v6263_v29, -inf }
 0xe0b   : > { %v2812_v58 = vpop.f32.mrf.mxu1 }
 0xe0c   : > { %v2839_v12 = vsel %vm736_vm0, %v2812_v58, -inf }
 0xe0d   : > { %2837 = vmax.xlane.f32.xlu0 %v2836_v27  ;;  %v6264_v34 = vpop.f32.mrf.mxu1 }
 0xe0e   : > { %v2848_v33 = vsel %vm736_vm0, %v6264_v34, -inf }
 0xe0f   : > { %v2815_v35 = vpop.f32.mrf.mxu1 }
 0xe10   : > { %v2842_v47 = vsel %vm736_vm0, %v2815_v35, -inf }
 0xe11   : > { %2840 = vmax.xlane.f32.xlu0 %v2839_v12  ;;  %2843 = vmax.xlane.f32.xlu1 %v2842_v47 }
 0xe15   : > { %2846 = vmax.xlane.f32.xlu0 %v2845_v44  ;;  %2849 = vmax.xlane.f32.xlu1 %v2848_v33 }
 0xe8e   : > { %v2829_v53 = vpop.xlane.xlu0 %2828 }
 0xe8f   : > { %v2851_v54 = vsub.f32 %v2796_v48, %v2829_v53 }
 0xe91   : > { %v2859_v4 = vmul.f32 1.442695, %v2851_v54 }
 0xe92   : > { %v2835_v30 = vpop.xlane.xlu0 %2834  ;;  %v2832_v55 = vpop.xlane.xlu1 %2831 }
 0xe93   : > { %v2853_v36 = vsub.f32 %v6259_v32, %v2835_v30  ;;  %v2852_v60 = vsub.f32 %v2799_v26, %v2832_v55 }
 0xe95   : > { %v2863_v11 = vmul.f32 1.442695, %v2853_v36  ;;  %v2861_v50 = vmul.f32 1.442695, %v2852_v60 }
 0xe96   : > { %v2838_v61 = vpop.xlane.xlu0 %2837 }
 0xe97   : > { %6791 = vpow2.f32 %v2863_v11  ;;  %v2854_v57 = vsub.f32 %v6260_v31, %v2838_v61 }
 0xe98   : > { %6793 = vpow2.f32 %v2859_v4 }
 0xe99   : > { %v2865_v2 = vmul.f32 1.442695, %v2854_v57 }
 0xe9a   : > { %v2841_v10 = vpop.xlane.xlu0 %2840  ;;  %v2844_v47 = vpop.xlane.xlu1 %2843 }
 0xe9b   : > { %6795 = vpow2.f32 %v2865_v2  ;;  %v2855_v20 = vsub.f32 %v2812_v58, %v2841_v10  ;;  %v2856_v53 = vsub.f32 %v2815_v35, %v2844_v47 }
 0xe9c   : > { %6797 = vpow2.f32 %v2861_v50 }
 0xe9d   : > { %v2867_v49 = vmul.f32 1.442695, %v2855_v20  ;;  %v2869_v30 = vmul.f32 1.442695, %v2856_v53 }
 0xe9e   : > { %v2847_v1 = vpop.xlane.xlu0 %2846  ;;  %v2850_v44 = vpop.xlane.xlu1 %2849 }
 0xe9f   : > { %v2857_v7 = vsub.f32 %v6263_v29, %v2847_v1  ;;  %v2858_v33 = vsub.f32 %v6264_v34, %v2850_v44 }
 0xea1   : > { %v2871_v14 = vmul.f32 1.442695, %v2857_v7  ;;  %v2873_v54 = vmul.f32 1.442695, %v2858_v33 }
 0xea3   : > { %6799 = vpow2.f32 %v2871_v14 }
 0xea4   : > { %v8255_v15 = vpop.eup %6791  ;;  %6801 = vpow2.f32 %v2867_v49 }
 0xea5   : > { %v2881_v32 = vsel %vm736_vm0, %v8255_v15, 0.0  ;;  %v8259_v48 = vpop.eup %6793  ;;  %6803 = vpow2.f32 %v2873_v54 }
 0xea6   : > { %2882 = vadd.xlane.f32.xlu0 %v2881_v32  ;;  %v2875_v31 = vsel %vm736_vm0, %v8259_v48, 0.0  ;;  %6805 = vpow2.f32 %v2869_v30  ;;  %v6638_v30 = vld [vmem:[#allocation12] sm:$0xff]  }
 0xea8   : > { %v8261_v23 = vpop.eup %6795 }
 0xea9   : > { %v2884_v26 = vsel %vm736_vm0, %v8261_v23, 0.0  ;;  %v6798_v28 = vpop.eup %6797 }
 0xeaa   : > { %2876 = vadd.xlane.f32.xlu0 %v2875_v31  ;;  %2885 = vadd.xlane.f32.xlu1 %v2884_v26  ;;  %v2878_v18 = vsel %vm736_vm0, %v6798_v28, 0.0 }
 0xeae   : > { %2879 = vadd.xlane.f32.xlu1 %v2878_v18 }
 0xeb0   : > { %v8268_v29 = vpop.eup %6799 }
 0xeb1   : > { %v2893_v58 = vsel %vm736_vm0, %v8268_v29, 0.0  ;;  %v8272_v27 = vpop.eup %6801 }
 0xeb2   : > { %2894 = vadd.xlane.f32.xlu0 %v2893_v58  ;;  %v2887_v12 = vsel %vm736_vm0, %v8272_v27, 0.0 }
 0xeb6   : > { %2888 = vadd.xlane.f32.xlu0 %v2887_v12 }
 0xebf   : > { %2923 = vrot.lane.b32.xlu1 %v7991_v19, %s7335_s24 }
 0xec3   : > { %2921 = vrot.lane.b32.xlu1 %v8000_v0, %s7335_s24 }
 0xecc   : > { %2925 = vrot.lane.b32.xlu0 %v7987_v5, %s7335_s24  ;;  %v8292_v5 = vpop.eup %6803 }
 0xecd   : > { %v2896_v19 = vsel %vm736_vm0, %v8292_v5, 0.0  ;;  %v8298_v0 = vpop.eup %6805 }
 0xed0   : > { %2362 = vrot.lane.b32.xlu0 %v8153_v63, %s7336_s6 }
 0xed4   : > { %2366 = vrot.lane.b32.xlu0 %v8151_v37, %s7336_s6  ;;  %v2890_v37 = vsel %vm736_vm0, %v8298_v0, 0.0 }
 0xed8   : > { %2689 = vrot.lane.b32.xlu0 %v8233_v13, %s7337_s7 }
 0xedc   : > { %2693 = vrot.lane.b32.xlu0 %v8231_v16, %s7337_s7 }
 0xee0   : > { %2370 = vrot.lane.b32.xlu0 %v8161_v41, %s7336_s6 }
 0xee4   : > { %2374 = vrot.lane.b32.xlu0 %v8159_v40, %s7336_s6 }
 0xee7   : > { %2897 = vadd.xlane.f32.xlu1 %v2896_v19 }
 0xee8   : > { %2697 = vrot.lane.b32.xlu0 %v8241_v22, %s7337_s7 }
 0xeeb   : > { %2891 = vadd.xlane.f32.xlu1 %v2890_v37 }
 0xefc   : > { %2919 = vrot.lane.b32.xlu1 %v8004_v17, %s7335_s24 }
 0xf00   : > { %2364 = vrot.lane.b32.xlu1 %v8157_v39, %s7336_s6 }
 0xf04   : > { %2368 = vrot.lane.b32.xlu1 %v8155_v38, %s7336_s6 }
 0xf08   : > { %2691 = vrot.lane.b32.xlu1 %v8237_v62, %s7337_s7 }
 0xf0c   : > { %2695 = vrot.lane.b32.xlu1 %v8235_v21, %s7337_s7 }
 0xf10   : > { %2372 = vrot.lane.b32.xlu1 %v8165_v9, %s7336_s6 }
 0xf14   : > { %2376 = vrot.lane.b32.xlu1 %v8163_v43, %s7336_s6 }
 0xf18   : > { %2699 = vrot.lane.b32.xlu1 %v8245_v24, %s7337_s7 }
 0xf2f   : > { %v2883_v17 = vpop.xlane.xlu0 %2882 }
 0xf33   : > { %v2877_v63 = vpop.xlane.xlu0 %2876  ;;  %v2886_v39 = vpop.xlane.xlu1 %2885 }
 0xf34   : > { %6807 = vrcp.f32 %v2877_v63 }
 0xf37   : > { %v2880_v38 = vpop.xlane.xlu1 %2879 }
 0xf38   : > { %6809 = vrcp.f32 %v2880_v38 }
 0xf39   : > { %6811 = vrcp.f32 %v2886_v39 }
 0xf3a   : > { %6813 = vrcp.f32 %v2883_v17 }
 0xf3b   : > { %v2895_v40 = vpop.xlane.xlu0 %2894  ;;  %v2924_v13 = vpop.permute.xlu1 %2923 }
 0xf3f   : > { %v2889_v41 = vpop.xlane.xlu0 %2888  ;;  %v2922_v34 = vpop.permute.xlu1 %2921 }
 0xf41   : > { %v6808_v16 = vpop.eup %6807 }
 0xf42   : > { %v2907_v43 = vmul.f32 %v6808_v16, %v8259_v48 }
 0xf43   : > { %v2926_v21 = vpop.permute.xlu0 %2925 }
 0xf44   : > { %6265 = vmatprep.subr.bf16.mxu0 %v2926_v21 }
 0xf45   : > { %v6810_v62 = vpop.eup %6809  ;;  %6266 = vmatpush3.bf16.msra.mxu0 %v2926_v21 }
 0xf46   : > { %6267 = vmatprep.subr.bf16.mxu0 %v2924_v13  ;;  %v2908_v9 = vmul.f32 %v6810_v62, %v6798_v28  ;;  %v6812_v57 = vpop.eup %6811 }
 0xf47   : > { %v2363_v22 = vpop.permute.xlu0 %2362  ;;  %v6814_v2 = vpop.eup %6813  ;;  %v2910_v10 = vmul.f32 %v6812_v57, %v8261_v23 }
 0xf48   : > { %2387 = vst.msk [vmem:[#allocation2] sm:$0xff] %vm2386_vm3, %v2363_v22  ;;  %v2915_v24 = vpack.c.bf16 %v2908_v9, %v2907_v43  ;;  %v2909_v1 = vmul.f32 %v6814_v2, %v8255_v15  ;;  %v5749_v2 = vld [vmem:[#allocation6 + $0x3] ss:$0 sm:$0xff] }
 0xf49   : > { %6268 = vmatpush3.bf16.msra.mxu0 %v2924_v13 }
 0xf4a   : > { %6269 = vmatprep.subr.bf16.mxu0 %v2922_v34  ;;  %6273 = vmatprep.mubr.msk.bf16.mxu0 %vm736_vm0, %v2915_v24  ;;  %v2916_v7 = vpack.c.bf16 %v2910_v10, %v2909_v1 }
 0xf4b   : > { %v2367_v35 = vpop.permute.xlu0 %2366 }
 0xf4c   : > { %2389 = vst.msk [vmem:[#allocation2 + $0x10] sm:$0xff] %vm2386_vm3, %v2367_v35 }
 0xf4d   : > { %6270 = vmatpush3.bf16.msra.mxu0 %v2922_v34 }
 0xf4f   : > { %v2690_v55 = vpop.permute.xlu0 %2689 }
 0xf50   : > { %2714 = vst.msk [vmem:[#allocation2] sm:$0xff] %vm2713_vm4, %v2690_v55 }
 0xf53   : > { %v2694_v36 = vpop.permute.xlu0 %2693 }
 0xf54   : > { %2716 = vst.msk [vmem:[#allocation2 + $0x10] sm:$0xff] %vm2713_vm4, %v2694_v36 }
 0xf57   : > { %v2371_v4 = vpop.permute.xlu0 %2370 }
 0xf58   : > { %2391 = vst.msk [vmem:[#allocation2 + $0x20] sm:$0xff] %vm2386_vm3, %v2371_v4 }
 0xf5b   : > { %v2375_v11 = vpop.permute.xlu0 %2374 }
 0xf5c   : > { %2393 = vst.msk [vmem:[#allocation2 + $0x30] sm:$0xff] %vm2386_vm3, %v2375_v11 }
 0xf5f   : > { %v2698_v60 = vpop.permute.xlu0 %2697 }
 0xf60   : > { %2718 = vst.msk [vmem:[#allocation2 + $0x20] sm:$0xff] %vm2713_vm4, %v2698_v60 }
 0xf70   : > { %v2898_v61 = vpop.xlane.xlu1 %2897 }
 0xf71   : > { %6815 = vrcp.f32 %v2898_v61 }
 0xf72   : > { %6817 = vrcp.f32 %v2889_v41 }
 0xf73   : > { %6819 = vrcp.f32 %v2895_v40 }
 0xf74   : > { %v2892_v50 = vpop.xlane.xlu1 %2891 }
 0xf75   : > { %6821 = vrcp.f32 %v2892_v50 }
 0xf78   : > { %v2920_v20 = vpop.permute.xlu1 %2919 }
 0xf79   : > { %6271 = vmatprep.subr.bf16.mxu0 %v2920_v20 }
 0xf7a   : > { %6272 = vmatpush3.bf16.msra.mxu0 %v2920_v20 }
 0xf7c   : > { %v2365_v49 = vpop.permute.xlu1 %2364 }
 0xf7d   : > { %2388 = vst.msk [vmem:[#allocation2 + $0x8] sm:$0xff] %vm2386_vm3, %v2365_v49  ;;  %6274 = vmatmul.mubr.msk.bf16.vlgmr.msra.gmra.mxu0 %vm736_vm0, %v2916_v7 }
 0xf7e   : > { %v6816_v14 = vpop.eup %6815 }
 0xf7f   : > { %v6818_v32 = vpop.eup %6817  ;;  %v2914_v23 = vmul.f32 %v6816_v14, %v8292_v5 }
 0xf80   : > { %v2369_v48 = vpop.permute.xlu1 %2368  ;;  %v6820_v31 = vpop.eup %6819  ;;  %v2911_v28 = vmul.f32 %v6818_v32, %v8272_v27 }
 0xf81   : > { %2390 = vst.msk [vmem:[#allocation2 + $0x18] sm:$0xff] %vm2386_vm3, %v2369_v48  ;;  %v2913_v58 = vmul.f32 %v6820_v31, %v8268_v29  ;;  %v6637_v29 = vld [vmem:[#allocation12 + $0x8] sm:$0xff]  }
 0xf82   : > { %v6822_v26 = vpop.eup %6821  ;;  %6281 = vmatprep.subr.bf16.mxu0 %v6637_v29 }
 0xf83   : > { %v2912_v15 = vmul.f32 %v6822_v26, %v8298_v0  ;;  %v2918_v47 = vpack.c.bf16 %v2914_v23, %v2913_v58  ;;  %6282 = vmatpush3.bf16.msra.mxu0 %v6637_v29 }
 0xf84   : > { %v2692_v18 = vpop.permute.xlu1 %2691  ;;  %6283 = vmatprep.subr.bf16.mxu0 %v6638_v30 }
 0xf85   : > { %2715 = vst.msk [vmem:[#allocation2 + $0x8] sm:$0xff] %vm2713_vm4, %v2692_v18  ;;  %v2917_v12 = vpack.c.bf16 %v2912_v15, %v2911_v28 }
 0xf87   : > { %6277 = vmatprep.mubr.msk.bf16.mxu0 %vm736_vm0, %v2917_v12  ;;  %6284 = vmatpush3.bf16.msra.mxu0 %v6638_v30 }
 0xf88   : > { %6278 = vmatmul.mubr.msk.bf16.gmra.mxu0 %vm736_vm0, %v2918_v47  ;;  %v2696_v44 = vpop.permute.xlu1 %2695 }
 0xf89   : > { %2717 = vst.msk [vmem:[#allocation2 + $0x18] sm:$0xff] %vm2713_vm4, %v2696_v44 }
 0xf8c   : > { %v2373_v33 = vpop.permute.xlu1 %2372 }
 0xf8d   : > { %2392 = vst.msk [vmem:[#allocation2 + $0x28] sm:$0xff] %vm2386_vm3, %v2373_v33 }
 0xf90   : > { %v2377_v27 = vpop.permute.xlu1 %2376 }
 0xf91   : > { %2394 = vst.msk [vmem:[#allocation2 + $0x38] sm:$0xff] %vm2386_vm3, %v2377_v27 }
 0xf94   : > { %v2700_v53 = vpop.permute.xlu1 %2699 }
 0xf95   : > { %2719 = vst.msk [vmem:[#allocation2 + $0x28] sm:$0xff] %vm2713_vm4, %v2700_v53 }
0x103d   : > { %v6275_v54 = vpop.f32.mrf.mxu0 }
0x103e   : > { %3020 = vrot.lane.b32.xlu0 %v6275_v54, %s7338_s8 }
0x103f   : > { %v2977_v5 = vpop.f32.mrf.mxu0 }
0x1041   : > { %v6276_v19 = vpop.f32.mrf.mxu0 }
0x1042   : > { %3016 = vrot.lane.b32.xlu0 %v2977_v5, %s7338_s8  ;;  %3022 = vrot.lane.b32.xlu1 %v6276_v19, %s7338_s8 }
0x1043   : > { %v2980_v0 = vpop.f32.mrf.mxu0 }
0x1046   : > { %2701 = vrot.lane.b32.xlu0 %v8239_v8, %s7337_s7  ;;  %3018 = vrot.lane.b32.xlu1 %v2980_v0, %s7338_s8 }
0x1048   : > { %v6279_v37 = vpop.f32.mrf.mxu0 }
0x104a   : > { %2703 = vrot.lane.b32.xlu1 %v8243_v45, %s7337_s7  ;;  %v2993_v17 = vpop.f32.mrf.mxu0 }
0x104b   : > { %3024 = vrot.lane.b32.xlu0 %v2993_v17, %s7338_s8 }
0x104c   : > { %v6280_v63 = vpop.f32.mrf.mxu0 }
0x104e   : > { %v2996_v39 = vpop.f32.mrf.mxu0 }
0x104f   : > { %3028 = vrot.lane.b32.xlu0 %v6279_v37, %s7338_s8  ;;  %3026 = vrot.lane.b32.xlu1 %v2996_v39, %s7338_s8 }
0x1053   : > { %3030 = vrot.lane.b32.xlu1 %v6280_v63, %s7338_s8 }
0x10b0   : > { %v3021_v38 = vpop.permute.xlu0 %3020 }
0x10b1   : > { %3043 = vst.msk [vmem:[#allocation2 + $0x10] sm:$0xff] %vm3040_vm5, %v3021_v38 }
0x10b4   : > { %v3017_v8 = vpop.permute.xlu0 %3016  ;;  %v3023_v40 = vpop.permute.xlu1 %3022 }
0x10b5   : > { %3041 = vst.msk [vmem:[#allocation2] sm:$0xff] %vm3040_vm5, %v3017_v8  ;;  %3044 = vst.msk [vmem:[#allocation2 + $0x18] sm:$0xff] %vm3040_vm5, %v3023_v40 }
0x10b8   : > { %v2702_v45 = vpop.permute.xlu0 %2701  ;;  %v3019_v41 = vpop.permute.xlu1 %3018  ;;  %v3051_v34 = vld [vmem:[#allocation2 + $0x10] sm:$0xff] }
0x10b9   : > { %2720 = vst.msk [vmem:[#allocation2 + $0x30] sm:$0xff] %vm2713_vm4, %v2702_v45 }
0x10ba   : > { %3042 = vst.msk [vmem:[#allocation2 + $0x8] sm:$0xff] %vm3040_vm5, %v3019_v41 }
0x10bc   : > { %v2704_v16 = vpop.permute.xlu1 %2703  ;;  %v3052_v21 = vld [vmem:[#allocation2 + $0x18] sm:$0xff]  ;;  %v3049_v62 = vld [vmem:[#allocation2] sm:$0xff] }
0x10bd   : > { %2721 = vst.msk [vmem:[#allocation2 + $0x38] sm:$0xff] %vm2713_vm4, %v2704_v16  ;;  %v3025_v13 = vpop.permute.xlu0 %3024  ;;  %v3058_v35 = vpack.c.bf16 %v3052_v21, %v3051_v34 }
0x10be   : > { %3045 = vst.msk [vmem:[#allocation2 + $0x20] sm:$0xff] %vm3040_vm5, %v3025_v13 }
0x10c1   : > { %v3050_v43 = vld [vmem:[#allocation2 + $0x8] sm:$0xff]  ;;  %v3029_v9 = vpop.permute.xlu0 %3028  ;;  %v3027_v22 = vpop.permute.xlu1 %3026 }
0x10c2   : > { %v3057_v24 = vpack.c.bf16 %v3050_v43, %v3049_v62  ;;  %3047 = vst.msk [vmem:[#allocation2 + $0x30] sm:$0xff] %vm3040_vm5, %v3029_v9  ;;  %3046 = vst.msk [vmem:[#allocation2 + $0x28] sm:$0xff] %vm3040_vm5, %v3027_v22 }
0x10c4   : > { %6285 = vmatprep.mubr.msk.bf16.mxu0 %vm1386_vm1, %v3057_v24 }
0x10c5   : > { %6286 = vmatmul.mubr.msk.bf16.vlgmr.msra.gmra.mxu0 %vm1386_vm1, %v3058_v35  ;;  %v3031_v55 = vpop.permute.xlu1 %3030  ;;  %v3053_v36 = vld [vmem:[#allocation2 + $0x20] sm:$0xff] }
0x10c6   : > { %3048 = vst.msk [vmem:[#allocation2 + $0x38] sm:$0xff] %vm3040_vm5, %v3031_v55 }
0x10c9   : > { %v3054_v4 = vld [vmem:[#allocation2 + $0x28] sm:$0xff]  ;;  %v3055_v60 = vld [vmem:[#allocation2 + $0x30] sm:$0xff] }
0x10ca   : > { %v3059_v11 = vpack.c.bf16 %v3054_v4, %v3053_v36 }
0x10cc   : > { %6289 = vmatprep.mubr.msk.bf16.mxu0 %vm1386_vm1, %v3059_v11 }
0x10cd   : > { %v3056_v61 = vld [vmem:[#allocation2 + $0x38] sm:$0xff] }
0x10ce   : > { %v3060_v57 = vpack.c.bf16 %v3056_v61, %v3055_v60 }
0x10d0   : > { %6290 = vmatmul.mubr.msk.bf16.gmra.mxu0 %vm1386_vm1, %v3060_v57 }
0x1185   : > { %v6287_v50 = vpop.f32.mrf.mxu0 }
0x1186   : > { %v3137_v20 = vadd.f32 %v6287_v50, %v5749_v2 }
0x1187   : > { %v3128_v10 = vpop.f32.mrf.mxu0 }
0x1188   : > { %v3129_v1 = vadd.f32 %v5749_v2, %v3128_v10  ;;  %v8375_v32 = vadd.f32 %v3137_v20, %v7863_v25 }
0x1189   : > { %v6288_v7 = vpop.f32.mrf.mxu0 }
0x118a   : > { %v8372_v49 = vadd.f32 %v3129_v1, %v7865_v46  ;;  %v3140_v48 = vadd.f32 %v6288_v7, %v5749_v2  ;;  %v3173_v15 = vsel %vm1386_vm1, %v8375_v32, 0.0 }
0x118b   : > { %v3131_v14 = vpop.f32.mrf.mxu0 }
0x118c   : > { %v3132_v31 = vadd.f32 %v5749_v2, %v3131_v14  ;;  %v3167_v26 = vsel %vm1386_vm1, %v8372_v49, 0.0  ;;  %v8383_v28 = vadd.f32 %v3140_v48, %v7869_v42 }
0x118d   : > { %3168 = vadd.xlane.f32.xlu0 %v3167_v26 }
0x118e   : > { %v8380_v23 = vadd.f32 %v3132_v31, %v7873_v51  ;;  %v3176_v47 = vsel %vm1386_vm1, %v8383_v28, 0.0 }
0x1190   : > { %v3170_v46 = vsel %vm1386_vm1, %v8380_v23, 0.0  ;;  %v6291_v25 = vpop.f32.mrf.mxu0 }
0x1191   : > { %3171 = vadd.xlane.f32.xlu1 %v3170_v46  ;;  %3174 = vadd.xlane.f32.xlu0 %v3173_v15  ;;  %v3153_v58 = vadd.f32 %v6291_v25, %v5749_v2  ;;  %v6639_v46 = vld [vmem:[#allocation14 + $0x8] sm:$0xff]   ;;  %v6640_v15 = vld [vmem:[#allocation14] sm:$0xff]   ;;  %v7339_v25 = vmov 0.0  }
0x1192   : > { %v3144_v18 = vpop.f32.mrf.mxu0  ;;  %6293 = vmatprep.subr.bf16.mxu1 %v6639_v46  ;;  %6305 = vmatprep.subr.bf16.mxu0 %v7339_v25 }
0x1193   : > { %v3145_v12 = vadd.f32 %v5749_v2, %v3144_v18  ;;  %v8395_v33 = vadd.f32 %v3153_v58, %v7875_v52  ;;  %6294 = vmatpush3.bf16.msra.mxu1 %v6639_v46  ;;  %v6641_v18 = vld [vmem:[#allocation15] sm:$0xff]   ;;  %v8461_v58 = vld [vmem:[%s7640_s11] sm:$0xf]  ;;  %6307 = vmatprep.mubr.msk.bf16.mxu0 %vm7340_vm7, %v7339_v25 }
0x1194   : > { %v6292_v51 = vpop.f32.mrf.mxu0  ;;  %6295 = vmatprep.subr.bf16.mxu1 %v6640_v15  ;;  %6306 = vmatpush3.bf16.msra.mxu0 %v6641_v18 }
0x1195   : > { %3177 = vadd.xlane.f32.xlu0 %v3176_v47  ;;  %v8392_v42 = vadd.f32 %v3145_v12, %v7881_v59  ;;  %v3156_v27 = vadd.f32 %v6292_v51, %v5749_v2  ;;  %v3185_v5 = vsel %vm1386_vm1, %v8395_v33, 0.0 }
0x1196   : > { %v3147_v44 = vpop.f32.mrf.mxu0 }
0x1197   : > { %v3148_v53 = vadd.f32 %v5749_v2, %v3147_v44  ;;  %v3179_v29 = vsel %vm1386_vm1, %v8392_v42, 0.0  ;;  %v8403_v30 = vadd.f32 %v3156_v27, %v7889_v6  ;;  %6296 = vmatpush3.bf16.msra.mxu1 %v6640_v15  ;;  %6308 = vmatmul.mubr.msk.bf16.vlgmr.msra.gmra.mxu0 %vm3406_vm6, %v8461_v58 }
0x1198   : > { %6311 = vmatprep.subr.bf16.mxu1 %v7339_v25 }
0x1199   : > { %3180 = vadd.xlane.f32.xlu0 %v3179_v29  ;;  %v8400_v54 = vadd.f32 %v3148_v53, %v7885_v3  ;;  %v3188_v52 = vsel %vm1386_vm1, %v8403_v30, 0.0 }
0x119b   : > { %v3182_v59 = vsel %vm1386_vm1, %v8400_v54, 0.0 }
0x119c   : > { %3183 = vadd.xlane.f32.xlu1 %v3182_v59 }
0x119d   : > { %3186 = vadd.xlane.f32.xlu0 %v3185_v5 }
0x11a0   : > { %3189 = vadd.xlane.f32.xlu1 %v3188_v52 }
0x1216   : > { %v3169_v19 = vpop.xlane.xlu0 %3168 }
0x1217   : > { %v3191_v0 = vmul.f32 0.03125, %v3169_v19 }
0x1219   : > { %v8412_v3 = vsub.f32 %v8372_v49, %v3191_v0 }
0x121a   : > { %v3175_v37 = vpop.xlane.xlu0 %3174  ;;  %v3172_v6 = vpop.xlane.xlu1 %3171 }
0x121b   : > { %v3193_v17 = vmul.f32 0.03125, %v3175_v37  ;;  %v3192_v63 = vmul.f32 0.03125, %v3172_v6  ;;  %v3207_v39 = vmul.f32 %v8412_v3, %v8412_v3 }
0x121d   : > { %v8417_v38 = vsub.f32 %v8375_v32, %v3193_v17  ;;  %v8420_v8 = vsub.f32 %v8380_v23, %v3192_v63  ;;  %v3215_v40 = vsel %vm1386_vm1, %v3207_v39, 0.0 }
0x121e   : > { %v3178_v45 = vpop.xlane.xlu0 %3177  ;;  %3216 = vadd.xlane.f32.xlu0 %v3215_v40 }
0x121f   : > { %v3194_v41 = vmul.f32 0.03125, %v3178_v45  ;;  %v3209_v16 = vmul.f32 %v8417_v38, %v8417_v38  ;;  %v3208_v13 = vmul.f32 %v8420_v8, %v8420_v8 }
0x1221   : > { %v8428_v21 = vsub.f32 %v8383_v28, %v3194_v41  ;;  %v3221_v62 = vsel %vm1386_vm1, %v3209_v16, 0.0  ;;  %v3218_v43 = vsel %vm1386_vm1, %v3208_v13, 0.0 }
0x1222   : > { %3222 = vadd.xlane.f32.xlu0 %v3221_v62  ;;  %v3181_v9 = vpop.xlane.xlu0 %3180  ;;  %3219 = vadd.xlane.f32.xlu1 %v3218_v43 }
0x1223   : > { %v3195_v22 = vmul.f32 0.03125, %v3181_v9  ;;  %v3210_v24 = vmul.f32 %v8428_v21, %v8428_v21  ;;  %v5756_v9 = vld [vmem:[#allocation6 + $0x4] ss:$0 sm:$0xff] }
0x1225   : > { %v8435_v34 = vsub.f32 %v8392_v42, %v3195_v22  ;;  %v3224_v35 = vsel %vm1386_vm1, %v3210_v24, 0.0  ;;  %v3184_v36 = vpop.xlane.xlu1 %3183 }
0x1226   : > { %v3187_v55 = vpop.xlane.xlu0 %3186  ;;  %3225 = vadd.xlane.f32.xlu1 %v3224_v35  ;;  %v3196_v11 = vmul.f32 0.03125, %v3184_v36 }
0x1227   : > { %v3197_v4 = vmul.f32 0.03125, %v3187_v55  ;;  %v3211_v60 = vmul.f32 %v8435_v34, %v8435_v34 }
0x1228   : > { %v8444_v57 = vsub.f32 %v8400_v54, %v3196_v11 }
0x1229   : > { %v8441_v61 = vsub.f32 %v8395_v33, %v3197_v4  ;;  %v3227_v50 = vsel %vm1386_vm1, %v3211_v60, 0.0  ;;  %v3190_v2 = vpop.xlane.xlu1 %3189  ;;  %v5757_v60 = vld [vmem:[#allocation6 + $0x5] ss:$0 sm:$0xff] }
0x122a   : > { %3228 = vadd.xlane.f32.xlu0 %v3227_v50  ;;  %v3198_v10 = vmul.f32 0.03125, %v3190_v2  ;;  %v3212_v1 = vmul.f32 %v8444_v57, %v8444_v57 }
0x122b   : > { %v3213_v20 = vmul.f32 %v8441_v61, %v8441_v61 }
0x122c   : > { %v8452_v7 = vsub.f32 %v8403_v30, %v3198_v10  ;;  %v3230_v48 = vsel %vm1386_vm1, %v3212_v1, 0.0 }
0x122d   : > { %v3233_v14 = vsel %vm1386_vm1, %v3213_v20, 0.0  ;;  %3231 = vadd.xlane.f32.xlu1 %v3230_v48 }
0x122e   : > { %3234 = vadd.xlane.f32.xlu0 %v3233_v14  ;;  %v3214_v31 = vmul.f32 %v8452_v7, %v8452_v7 }
0x1230   : > { %v3236_v26 = vsel %vm1386_vm1, %v3214_v31, 0.0 }
0x1231   : > { %3237 = vadd.xlane.f32.xlu1 %v3236_v26 }
0x12a7   : > { %v3217_v12 = vpop.xlane.xlu0 %3216 }
0x12a8   : > { %v3239_v47 = vmul.f32 0.03125, %v3217_v12 }
0x12aa   : > { %v3247_v51 = vadd.f32 1e-05, %v3239_v47 }
0x12ab   : > { %v3223_v44 = vpop.xlane.xlu0 %3222  ;;  %v3220_v27 = vpop.xlane.xlu1 %3219 }
0x12ac   : > { %6823 = vrsqrt.f32 %v3247_v51  ;;  %v3241_v53 = vmul.f32 0.03125, %v3223_v44  ;;  %v3240_v29 = vmul.f32 0.03125, %v3220_v27 }
0x12ae   : > { %v3249_v59 = vadd.f32 1e-05, %v3241_v53  ;;  %v3248_v5 = vadd.f32 1e-05, %v3240_v29 }
0x12af   : > { %v3226_v52 = vpop.xlane.xlu1 %3225 }
0x12b0   : > { %6825 = vrsqrt.f32 %v3249_v59  ;;  %v3242_v19 = vmul.f32 0.03125, %v3226_v52 }
0x12b1   : > { %6827 = vrsqrt.f32 %v3248_v5 }
0x12b2   : > { %v3250_v0 = vadd.f32 1e-05, %v3242_v19 }
0x12b3   : > { %v3229_v37 = vpop.xlane.xlu0 %3228 }
0x12b4   : > { %6829 = vrsqrt.f32 %v3250_v0  ;;  %v3243_v6 = vmul.f32 0.03125, %v3229_v37 }
0x12b6   : > { %v3251_v17 = vadd.f32 1e-05, %v3243_v6  ;;  %v3232_v39 = vpop.xlane.xlu1 %3231 }
0x12b7   : > { %v3235_v63 = vpop.xlane.xlu0 %3234  ;;  %v3244_v45 = vmul.f32 0.03125, %v3232_v39 }
0x12b8   : > { %6831 = vrsqrt.f32 %v3251_v17  ;;  %v3245_v40 = vmul.f32 0.03125, %v3235_v63 }
0x12b9   : > { %v6824_v41 = vpop.eup %6823  ;;  %v3252_v13 = vadd.f32 1e-05, %v3244_v45 }
0x12ba   : > { %v3253_v16 = vadd.f32 1e-05, %v3245_v40  ;;  %v3238_v62 = vpop.xlane.xlu1 %3237  ;;  %v3263_v43 = vmul.f32 %v6824_v41, %v8412_v3 }
0x12bb   : > { %v3246_v22 = vmul.f32 0.03125, %v3238_v62 }
0x12bc   : > { %6833 = vrsqrt.f32 %v3253_v16  ;;  %v3276_v11 = vmul.f32 %v5756_v9, %v3263_v43 }
0x12bd   : > { %v6826_v24 = vpop.eup %6825  ;;  %6835 = vrsqrt.f32 %v3252_v13  ;;  %v3254_v36 = vadd.f32 1e-05, %v3246_v22 }
0x12be   : > { %v6828_v35 = vpop.eup %6827  ;;  %v3265_v55 = vmul.f32 %v6826_v24, %v8417_v38  ;;  %v3289_v3 = vadd.f32 %v5757_v60, %v3276_v11 }
0x12bf   : > { %v3264_v4 = vmul.f32 %v6828_v35, %v8420_v8  ;;  %6837 = vrsqrt.f32 %v3254_v36 }
0x12c0   : > { %v3278_v10 = vmul.f32 %v5756_v9, %v3265_v55  ;;  %v6642_v55 = vld [vmem:[%s9308_s12] sm:$0xff]  }
0x12c1   : > { %v6830_v50 = vpop.eup %6829  ;;  %v3277_v2 = vmul.f32 %v5756_v9, %v3264_v4 }
0x12c2   : > { %v3266_v20 = vmul.f32 %v6830_v50, %v8428_v21  ;;  %v3291_v26 = vadd.f32 %v5757_v60, %v3278_v10 }
0x12c3   : > { %v3290_v1 = vadd.f32 %v5757_v60, %v3277_v2 }
0x12c4   : > { %v3279_v14 = vmul.f32 %v5756_v9, %v3266_v20 }
0x12c5   : > { %v6832_v48 = vpop.eup %6831  ;;  %v3297_v31 = vpack.c.bf16 %v3290_v1, %v3289_v3 }
0x12c6   : > { %v3292_v46 = vadd.f32 %v5757_v60, %v3279_v14  ;;  %v3267_v38 = vmul.f32 %v6832_v48, %v8435_v34 }
0x12c7   : > { %6297 = vmatprep.mubr.msk.bf16.mxu1 %vm1386_vm1, %v3297_v31 }
0x12c8   : > { %v3298_v8 = vpack.c.bf16 %v3292_v46, %v3291_v26  ;;  %v3280_v47 = vmul.f32 %v5756_v9, %v3267_v38 }
0x12c9   : > { %v6834_v15 = vpop.eup %6833 }
0x12ca   : > { %v6836_v18 = vpop.eup %6835  ;;  %6298 = vmatmul.mubr.msk.bf16.vlgmr.msra.gmra.mxu1 %vm1386_vm1, %v3298_v8  ;;  %v3269_v12 = vmul.f32 %v6834_v15, %v8441_v61  ;;  %v3293_v29 = vadd.f32 %v5757_v60, %v3280_v47  ;;  %v3444_v61 = vpop.f32.mrf.mxu0 }
0x12cb   : > { %v3268_v21 = vmul.f32 %v6836_v18, %v8444_v57  ;;  %v3450_v57 = vpack.c.bf16 %v3444_v61, %v3444_v61  ;;  %6312 = vmatpush3.bf16.msra.mxu1 %v6642_v55 }
0x12cc   : > { %v6838_v51 = vpop.eup %6837  ;;  %v3282_v53 = vmul.f32 %v5756_v9, %v3269_v12  ;;  %v6309_v37 = vpop.f32.mrf.mxu0 }
0x12cd   : > { %v3281_v44 = vmul.f32 %v5756_v9, %v3268_v21  ;;  %v3270_v27 = vmul.f32 %v6838_v51, %v8452_v7  ;;  %6465 = vmatprep.subr.msk.bf16.mxu0 %vm1789_vm2, %v3450_v57  ;;  %v3513_v7 = vsel %vm1789_vm2, %v3450_v57, 0  ;;  %3774 = vrot.lane.b32.xlu0 %v3450_v57, %s7333_s2 }
0x12ce   : > { %v3295_v34 = vadd.f32 %v5757_v60, %v3282_v53  ;;  %6318 = vmatpush3.bf16.xpose.msra.mxu0 %v3513_v7  ;;  %v3447_v6 = vpop.f32.mrf.mxu0 }
0x12cf   : > { %v3294_v59 = vadd.f32 %v5757_v60, %v3281_v44  ;;  %v3283_v5 = vmul.f32 %v5756_v9, %v3270_v27 }
0x12d0   : > { %v6310_v17 = vpop.f32.mrf.mxu0 }
0x12d1   : > { %v3299_v52 = vpack.c.bf16 %v3294_v59, %v3293_v29  ;;  %v3296_v19 = vadd.f32 %v5757_v60, %v3283_v5 }
0x12d3   : > { %6301 = vmatprep.mubr.msk.bf16.mxu1 %vm1386_vm1, %v3299_v52  ;;  %v3300_v0 = vpack.c.bf16 %v3296_v19, %v3295_v34 }
0x12d5   : > { %6302 = vmatmul.mubr.msk.bf16.gmra.mxu1 %vm1386_vm1, %v3300_v0 }
0x12d6   : > { %6313 = vmatprep.mubr.msk.bf16.mxu1 %vm7340_vm7, %v7339_v25 }
0x12dd   : > { %6314 = vmatmul.mubr.msk.bf16.vlgmr.msra.gmra.mxu1 %vm3406_vm6, %v8461_v58 }
0x133f   : > { %v3775_v63 = vpop.permute.xlu0 %3774 }
0x1340   : > { %6467 = vmatprep.subr.msk.bf16.mxu0 %vm1789_vm2, %v3775_v63  ;;  %v3789_v13 = vsel %vm1789_vm2, %v3775_v63, 0 }
0x138a   : > { %v6299_v39 = vpop.f32.mrf.mxu1 }
0x138c   : > { %v3363_v40 = vpop.f32.mrf.mxu1 }
0x138e   : > { %v6300_v45 = vpop.f32.mrf.mxu1 }
0x138f   : > { %v3395_v16 = vpack.c.bf16 %v6300_v45, %v6299_v39 }
0x1390   : > { %v3366_v41 = vpop.f32.mrf.mxu1 }
0x1391   : > { %v3394_v25 = vpack.c.bf16 %v3366_v41, %v3363_v40 }
0x1393   : > { %3765 = vrot.lane.b32.xlu1 %v3394_v25, %s7333_s2  ;;  %6319 = vmatprep.mubr.msk.bf16.mxu0 %vm1789_vm2, %v3394_v25 }
0x1394   : > { %6320 = vmatmul.mubr.msk.bf16.vlgmr.msra.gmra.mxu0 %vm1789_vm2, %v3395_v16 }
0x1395   : > { %6338 = vmatpush3.bf16.xpose.msra.mxu0 %v3789_v13  ;;  %v6303_v62 = vpop.f32.mrf.mxu1 }
0x1397   : > { %3767 = vrot.lane.b32.xlu1 %v3395_v16, %s7333_s2  ;;  %v3379_v43 = vpop.f32.mrf.mxu1 }
0x1399   : > { %v6304_v9 = vpop.f32.mrf.mxu1 }
0x139a   : > { %v3397_v22 = vpack.c.bf16 %v6304_v9, %v6303_v62 }
0x139b   : > { %v3382_v24 = vpop.f32.mrf.mxu1 }
0x139c   : > { %v3396_v35 = vpack.c.bf16 %v3382_v24, %v3379_v43  ;;  %3771 = vrot.lane.b32.xlu0 %v3397_v22, %s7333_s2 }
0x139d   : > { %v3493_v19 = vpop.f32.mrf.mxu1 }
0x139e   : > { %3769 = vrot.lane.b32.xlu1 %v3396_v35, %s7333_s2  ;;  %6323 = vmatprep.mubr.msk.bf16.mxu0 %vm1789_vm2, %v3396_v35  ;;  %v8558_v61 = vpack.c.bf16 %v3493_v19, %v3493_v19 }
0x139f   : > { %6324 = vmatmul.mubr.msk.bf16.gmra.mxu0 %vm1789_vm2, %v3397_v22  ;;  %v6315_v0 = vpop.f32.mrf.mxu1 }
0x13a0   : > { %4071 = vrot.lane.b32.xlu0 %v3394_v25, %s7334_s19  ;;  %6466 = vmatprep.subr.msk.bf16.mxu1 %vm3684_vm8, %v8558_v61  ;;  %v3686_v7 = vsel %vm3684_vm8, %v8558_v61, 0 }
0x13a1   : > { %6328 = vmatpush3.bf16.msra.mxu1 %v3686_v7 }
0x13a2   : > { %4079 = vrot.lane.b32.xlu1 %v3450_v57, %s7334_s19 }
0x13a4   : > { %4075 = vrot.lane.b32.xlu0 %v3396_v35, %s7334_s19 }
0x13a6   : > { %4073 = vrot.lane.b32.xlu1 %v3395_v16, %s7334_s19 }
0x13a8   : > { %4383 = vrot.lane.b32.xlu0 %v3450_v57, %s7335_s24  ;;  %v3496_v57 = vpop.f32.mrf.mxu1 }
0x13aa   : > { %4077 = vrot.lane.b32.xlu1 %v3397_v22, %s7334_s19  ;;  %v6316_v37 = vpop.f32.mrf.mxu1 }
0x13ac   : > { %4377 = vrot.lane.b32.xlu0 %v3395_v16, %s7335_s24 }
0x13ae   : > { %4375 = vrot.lane.b32.xlu1 %v3394_v25, %s7335_s24 }
0x13b0   : > { %4381 = vrot.lane.b32.xlu0 %v3397_v22, %s7335_s24 }
0x13b2   : > { %4379 = vrot.lane.b32.xlu1 %v3396_v35, %s7335_s24 }
0x1405   : > { %v3766_v36 = vpop.permute.xlu1 %3765 }
0x1406   : > { %6339 = vmatprep.mubr.msk.bf16.mxu0 %vm1789_vm2, %v3766_v36 }
0x1409   : > { %v3768_v4 = vpop.permute.xlu1 %3767 }
0x140a   : > { %6340 = vmatmul.mubr.msk.bf16.vlgmr.msra.gmra.mxu0 %vm1789_vm2, %v3768_v4 }
0x140e   : > { %v3772_v11 = vpop.permute.xlu0 %3771 }
0x1410   : > { %v3770_v60 = vpop.permute.xlu1 %3769 }
0x1411   : > { %6343 = vmatprep.mubr.msk.bf16.mxu0 %vm1789_vm2, %v3770_v60 }
0x1412   : > { %v4072_v50 = vpop.permute.xlu0 %4071  ;;  %6344 = vmatmul.mubr.msk.bf16.gmra.mxu0 %vm1789_vm2, %v3772_v11 }
0x1413   : > { %6359 = vmatprep.mubr.msk.bf16.mxu0 %vm1789_vm2, %v4072_v50 }
0x1414   : > { %v4080_v2 = vpop.permute.xlu1 %4079 }
0x1415   : > { %6469 = vmatprep.subr.msk.bf16.mxu0 %vm1789_vm2, %v4080_v2  ;;  %v4094_v58 = vsel %vm1789_vm2, %v4080_v2, 0 }
0x1416   : > { %v4076_v10 = vpop.permute.xlu0 %4075  ;;  %6358 = vmatpush3.bf16.xpose.msra.mxu0 %v4094_v58 }
0x1418   : > { %v4074_v20 = vpop.permute.xlu1 %4073 }
0x141a   : > { %v4384_v3 = vpop.permute.xlu0 %4383 }
0x141b   : > { %6471 = vmatprep.subr.msk.bf16.mxu0 %vm1789_vm2, %v4384_v3  ;;  %v4398_v1 = vsel %vm1789_vm2, %v4384_v3, 0 }
0x141c   : > { %v4078_v14 = vpop.permute.xlu1 %4077 }
0x141d   : > { %6360 = vmatmul.mubr.msk.bf16.vlgmr.msra.gmra.mxu0 %vm1789_vm2, %v4074_v20 }
0x141e   : > { %6363 = vmatprep.mubr.msk.bf16.mxu0 %vm1789_vm2, %v4076_v10  ;;  %6378 = vmatpush3.bf16.xpose.msra.mxu0 %v4398_v1  ;;  %v4378_v31 = vpop.permute.xlu0 %4377 }
0x1420   : > { %v4376_v48 = vpop.permute.xlu1 %4375 }
0x1422   : > { %v4382_v46 = vpop.permute.xlu0 %4381 }
0x1424   : > { %v4380_v26 = vpop.permute.xlu1 %4379 }
0x1425   : > { %6364 = vmatmul.mubr.msk.bf16.gmra.mxu0 %vm1789_vm2, %v4078_v14 }
0x1426   : > { %6379 = vmatprep.mubr.msk.bf16.mxu0 %vm1789_vm2, %v4376_v48 }
0x142d   : > { %6380 = vmatmul.mubr.msk.bf16.vlgmr.msra.gmra.mxu0 %vm1789_vm2, %v4378_v31 }
0x142e   : > { %6383 = vmatprep.mubr.msk.bf16.mxu0 %vm1789_vm2, %v4380_v26 }
0x1435   : > { %6384 = vmatmul.mubr.msk.bf16.gmra.mxu0 %vm1789_vm2, %v4382_v46 }
0x1454   : > { %v8526_v38 = vpop.f32.mrf.mxu0 }
0x1455   : > { %v3586_v8 = vsel %vm1789_vm2, %v8526_v38, -inf }
0x1456   : > { %v8530_v15 = vpop.f32.mrf.mxu0  ;;  %3587 = vmax.xlane.f32.xlu0 %v3586_v8 }
0x1457   : > { %v3580_v18 = vsel %vm1789_vm2, %v8530_v15, -inf }
0x1458   : > { %v8534_v12 = vpop.f32.mrf.mxu0  ;;  %3581 = vmax.xlane.f32.xlu1 %v3580_v18 }
0x1459   : > { %v3589_v51 = vsel %vm1789_vm2, %v8534_v12, -inf }
0x145a   : > { %v8536_v21 = vpop.f32.mrf.mxu0 }
0x145b   : > { %v3583_v47 = vsel %vm1789_vm2, %v8536_v21, -inf }
0x145c   : > { %3584 = vmax.xlane.f32.xlu0 %v3583_v47 }
0x145f   : > { %v8542_v44 = vpop.f32.mrf.mxu0 }
0x1460   : > { %3590 = vmax.xlane.f32.xlu0 %v3589_v51  ;;  %v3598_v27 = vsel %vm1789_vm2, %v8542_v44, -inf }
0x1461   : > { %3599 = vmax.xlane.f32.xlu1 %v3598_v27  ;;  %v8546_v53 = vpop.f32.mrf.mxu0 }
0x1462   : > { %v3592_v59 = vsel %vm1789_vm2, %v8546_v53, -inf }
0x1463   : > { %v8548_v29 = vpop.f32.mrf.mxu0 }
0x1464   : > { %v3601_v34 = vsel %vm1789_vm2, %v8548_v29, -inf }
0x1465   : > { %3593 = vmax.xlane.f32.xlu1 %v3592_v59  ;;  %v8552_v5 = vpop.f32.mrf.mxu0 }
0x1466   : > { %v3595_v52 = vsel %vm1789_vm2, %v8552_v5, -inf }
0x1467   : > { %3596 = vmax.xlane.f32.xlu0 %v3595_v52 }
0x146b   : > { %3602 = vmax.xlane.f32.xlu0 %v3601_v34 }
0x14ca   : > { %v8564_v6 = vpop.f32.mrf.mxu0 }
0x14cb   : > { %v3862_v17 = vsel %vm1789_vm2, %v8564_v6, -inf }
0x14cc   : > { %3863 = vmax.xlane.f32.xlu1 %v3862_v17  ;;  %v8568_v63 = vpop.f32.mrf.mxu0 }
0x14cd   : > { %v3856_v40 = vsel %vm1789_vm2, %v8568_v63, -inf }
0x14ce   : > { %v8570_v39 = vpop.f32.mrf.mxu0 }
0x14cf   : > { %v3865_v62 = vsel %vm1789_vm2, %v8570_v39, -inf }
0x14d0   : > { %3857 = vmax.xlane.f32.xlu1 %v3856_v40  ;;  %v8574_v45 = vpop.f32.mrf.mxu0 }
0x14d1   : > { %v3859_v41 = vsel %vm1789_vm2, %v8574_v45, -inf }
0x14d2   : > { %3860 = vmax.xlane.f32.xlu0 %v3859_v41  ;;  %v8578_v25 = vpop.f32.mrf.mxu0 }
0x14d3   : > { %v3874_v16 = vsel %vm1789_vm2, %v8578_v25, -inf }
0x14d4   : > { %3875 = vmax.xlane.f32.xlu1 %v3874_v16  ;;  %v8582_v13 = vpop.f32.mrf.mxu0 }
0x14d5   : > { %v3868_v9 = vsel %vm1789_vm2, %v8582_v13, -inf }
0x14d6   : > { %3866 = vmax.xlane.f32.xlu0 %v3865_v62  ;;  %v8586_v43 = vpop.f32.mrf.mxu0 }
0x14d7   : > { %v3877_v55 = vsel %vm1789_vm2, %v8586_v43, -inf }
0x14d8   : > { %3869 = vmax.xlane.f32.xlu1 %v3868_v9  ;;  %v8590_v22 = vpop.f32.mrf.mxu0 }
0x14d9   : > { %v3871_v24 = vsel %vm1789_vm2, %v8590_v22, -inf }
0x14da   : > { %3872 = vmax.xlane.f32.xlu0 %v3871_v24 }
0x14dd   : > { %v8594_v35 = vpop.f32.mrf.mxu0 }
0x14de   : > { %3878 = vmax.xlane.f32.xlu0 %v3877_v55  ;;  %v4167_v36 = vsel %vm1789_vm2, %v8594_v35, -inf }
0x14df   : > { %4168 = vmax.xlane.f32.xlu1 %v4167_v36  ;;  %v8600_v4 = vpop.f32.mrf.mxu0  ;;  %v8602_v11 = vpop.xlane.xlu0 %3587 }
0x14e0   : > { %v4161_v50 = vsel %vm1789_vm2, %v8600_v4, -inf }
0x14e1   : > { %v8604_v60 = vpop.f32.mrf.mxu0 }
0x14e2   : > { %v4170_v14 = vsel %vm1789_vm2, %v8604_v60, -inf }
0x14e3   : > { %4162 = vmax.xlane.f32.xlu1 %v4161_v50  ;;  %v8608_v2 = vpop.f32.mrf.mxu0 }
0x14e4   : > { %v4164_v10 = vsel %vm1789_vm2, %v8608_v2, -inf }
0x14e5   : > { %v3585_v58 = vpop.xlane.xlu0 %3584  ;;  %4165 = vmax.xlane.f32.xlu0 %v4164_v10  ;;  %v8612_v20 = vpop.f32.mrf.mxu0 }
0x14e6   : > { %v4179_v3 = vsel %vm1789_vm2, %v8612_v20, -inf  ;;  %v3605_v59 = vsub.f32 %v8536_v21, %v3585_v58 }
0x14e7   : > { %4180 = vmax.xlane.f32.xlu1 %v4179_v3  ;;  %v8616_v1 = vpop.f32.mrf.mxu0 }
0x14e8   : > { %v4173_v26 = vsel %vm1789_vm2, %v8616_v1, -inf  ;;  %v3614_v37 = vmul.f32 1.442695, %v3605_v59 }
0x14e9   : > { %v3591_v48 = vpop.xlane.xlu0 %3590  ;;  %4171 = vmax.xlane.f32.xlu0 %v4170_v14  ;;  %v8620_v31 = vpop.f32.mrf.mxu0 }
0x14ea   : > { %v3607_v8 = vsub.f32 %v8534_v12, %v3591_v48  ;;  %v4182_v19 = vsel %vm1789_vm2, %v8620_v31, -inf }
0x14eb   : > { %4174 = vmax.xlane.f32.xlu1 %v4173_v26  ;;  %v8624_v46 = vpop.f32.mrf.mxu0 }
0x14ec   : > { %v4176_v18 = vsel %vm1789_vm2, %v8624_v46, -inf  ;;  %v3618_v52 = vmul.f32 1.442695, %v3607_v8 }
0x14ed   : > { %4177 = vmax.xlane.f32.xlu0 %v4176_v18  ;;  %v8629_v47 = vpop.f32.mrf.mxu0  ;;  %v3582_v18 = vpop.xlane.xlu1 %3581 }
0x14ee   : > { %v4471_v51 = vsel %vm1789_vm2, %v8629_v47, -inf  ;;  %6839 = vpow2.f32 %v3618_v52 }
0x14ef   : > { %4472 = vmax.xlane.f32.xlu1 %v4471_v51  ;;  %v8633_v27 = vpop.f32.mrf.mxu0  ;;  %6841 = vpow2.f32 %v3614_v37  ;;  %v3606_v51 = vsub.f32 %v8526_v38, %v8602_v11 }
0x14f0   : > { %v3597_v34 = vpop.xlane.xlu0 %3596  ;;  %v4465_v0 = vsel %vm1789_vm2, %v8633_v27, -inf }
0x14f1   : > { %4183 = vmax.xlane.f32.xlu0 %v4182_v19  ;;  %v8638_v12 = vpop.f32.mrf.mxu0  ;;  %v3609_v16 = vsub.f32 %v8552_v5, %v3597_v34  ;;  %v3600_v59 = vpop.xlane.xlu1 %3599  ;;  %v3616_v52 = vmul.f32 1.442695, %v3606_v51  ;;  %v3604_v34 = vsub.f32 %v8530_v15, %v3582_v18 }
0x14f2   : > { %v4474_v9 = vsel %vm1789_vm2, %v8638_v12, -inf }
0x14f3   : > { %4466 = vmax.xlane.f32.xlu1 %v4465_v0  ;;  %v8642_v57 = vpop.f32.mrf.mxu0  ;;  %v3622_v55 = vmul.f32 1.442695, %v3609_v16  ;;  %v3612_v19 = vmul.f32 1.442695, %v3604_v34  ;;  %v3610_v0 = vsub.f32 %v8542_v44, %v3600_v59 }
0x14f4   : > { %v3603_v7 = vpop.xlane.xlu0 %3602  ;;  %v4468_v21 = vsel %vm1789_vm2, %v8642_v57, -inf }
0x14f5   : > { %v3611_v17 = vsub.f32 %v8548_v29, %v3603_v7  ;;  %4469 = vmax.xlane.f32.xlu0 %v4468_v21  ;;  %v8647_v40 = vpop.f32.mrf.mxu0  ;;  %v3594_v37 = vpop.xlane.xlu1 %3593  ;;  %v3624_v7 = vmul.f32 1.442695, %v3610_v0 }
0x14f6   : > { %v3608_v21 = vsub.f32 %v8546_v53, %v3594_v37  ;;  %v4483_v16 = vsel %vm1789_vm2, %v8647_v40, -inf }
0x14f7   : > { %v8649_v41 = vpop.f32.mrf.mxu0  ;;  %v3626_v62 = vmul.f32 1.442695, %v3611_v17 }
0x14f8   : > { %v3620_v17 = vmul.f32 1.442695, %v3608_v21  ;;  %v4477_v38 = vsel %vm1789_vm2, %v8649_v41, -inf }
0x14f9   : > { %4475 = vmax.xlane.f32.xlu0 %v4474_v9  ;;  %v8654_v24 = vpop.f32.mrf.mxu0  ;;  %6843 = vpow2.f32 %v3626_v62 }
0x14fa   : > { %v4486_v29 = vsel %vm1789_vm2, %v8654_v24, -inf  ;;  %6845 = vpow2.f32 %v3622_v55 }
0x14fb   : > { %v8658_v36 = vpop.f32.mrf.mxu0  ;;  %v8662_v5 = vpop.eup %6839  ;;  %6847 = vpow2.f32 %v3616_v52 }
0x14fc   : > { %v4480_v50 = vsel %vm1789_vm2, %v8658_v36, -inf  ;;  %v3637_v58 = vsel %vm1789_vm2, %v8662_v5, 0.0  ;;  %v8668_v10 = vpop.eup %6841  ;;  %6849 = vpow2.f32 %v3612_v19 }
0x14fd   : > { %4487 = vmax.xlane.f32.xlu0 %v4486_v29  ;;  %v3631_v3 = vsel %vm1789_vm2, %v8668_v10, 0.0  ;;  %6851 = vpow2.f32 %v3624_v7 }
0x14fe   : > { %6853 = vpow2.f32 %v3620_v17 }
0x1501   : > { %4481 = vmax.xlane.f32.xlu0 %v4480_v50 }
0x1504   : > { %3949 = vrot.lane.b32.xlu1 %v8558_v61, %s7333_s2  ;;  %s9367_s2 = sld [smem:[#allocation37_spill]] }
0x1505   : > { %3638 = vadd.xlane.f32.xlu0 %v3637_v58 }
0x1506   : > { %v8672_v14 = vpop.eup %6843 }
0x1507   : > { %v3649_v48 = vsel %vm1789_vm2, %v8672_v14, 0.0  ;;  %v8676_v26 = vpop.eup %6845 }
0x1508   : > { %v3643_v8 = vsel %vm1789_vm2, %v8676_v26, 0.0  ;;  %v8689_v15 = vpop.eup %6847 }
0x1509   : > { %3632 = vadd.xlane.f32.xlu0 %v3631_v3  ;;  %v3634_v44 = vsel %vm1789_vm2, %v8689_v15, 0.0  ;;  %v8693_v11 = vpop.eup %6849 }
0x150a   : > { %v3628_v53 = vsel %vm1789_vm2, %v8693_v11, 0.0  ;;  %v8697_v62 = vpop.eup %6851 }
0x150b   : > { %v3646_v9 = vsel %vm1789_vm2, %v8697_v62, 0.0  ;;  %v8701_v55 = vpop.eup %6853 }
0x150c   : > { %v3640_v29 = vsel %vm1789_vm2, %v8701_v55, 0.0 }
0x150d   : > { %3650 = vadd.xlane.f32.xlu0 %v3649_v48 }
0x1511   : > { %3644 = vadd.xlane.f32.xlu0 %v3643_v8 }
0x1528   : > { %4484 = vmax.xlane.f32.xlu1 %v4483_v16 }
0x152c   : > { %4478 = vmax.xlane.f32.xlu1 %v4477_v38 }
0x1530   : > { %3635 = vadd.xlane.f32.xlu1 %v3634_v44 }
0x1534   : > { %3629 = vadd.xlane.f32.xlu1 %v3628_v53 }
0x1538   : > { %3647 = vadd.xlane.f32.xlu1 %v3646_v9 }
0x153c   : > { %3641 = vadd.xlane.f32.xlu1 %v3640_v29 }
0x1555   : > { %v3864_v50 = vpop.xlane.xlu1 %3863 }
0x1556   : > { %v3882_v58 = vsub.f32 %v8564_v6, %v3864_v50 }
0x1558   : > { %v3892_v3 = vmul.f32 1.442695, %v3882_v58 }
0x1559   : > { %v3858_v48 = vpop.xlane.xlu1 %3857 }
0x155a   : > { %6855 = vpow2.f32 %v3892_v3  ;;  %v3880_v8 = vsub.f32 %v8568_v63, %v3858_v48 }
0x155b   : > { %v3861_v18 = vpop.xlane.xlu0 %3860 }
0x155c   : > { %v3888_v51 = vmul.f32 1.442695, %v3880_v8  ;;  %v3881_v59 = vsub.f32 %v8574_v45, %v3861_v18 }
0x155d   : > { %v3876_v52 = vpop.xlane.xlu1 %3875 }
0x155e   : > { %6857 = vpow2.f32 %v3888_v51  ;;  %v3886_v34 = vsub.f32 %v8578_v25, %v3876_v52  ;;  %v3890_v7 = vmul.f32 1.442695, %v3881_v59 }
0x155f   : > { %v3867_v19 = vpop.xlane.xlu0 %3866 }
0x1560   : > { %v3883_v0 = vsub.f32 %v8570_v39, %v3867_v19  ;;  %v3900_v37 = vmul.f32 1.442695, %v3886_v34 }
0x1561   : > { %v3870_v6 = vpop.xlane.xlu1 %3869 }
0x1562   : > { %v3894_v21 = vmul.f32 1.442695, %v3883_v0  ;;  %6859 = vpow2.f32 %v3900_v37  ;;  %v3884_v17 = vsub.f32 %v8582_v13, %v3870_v6 }
0x1563   : > { %v3873_v63 = vpop.xlane.xlu0 %3872 }
0x1564   : > { %6861 = vpow2.f32 %v3894_v21  ;;  %v3896_v16 = vmul.f32 1.442695, %v3884_v17  ;;  %v3885_v45 = vsub.f32 %v8590_v22, %v3873_v63 }
0x1565   : > { %6863 = vpow2.f32 %v3890_v7 }
0x1566   : > { %6865 = vpow2.f32 %v3896_v16  ;;  %v3898_v29 = vmul.f32 1.442695, %v3885_v45 }
0x1567   : > { %v8711_v38 = vpop.eup %6855  ;;  %v3879_v25 = vpop.xlane.xlu0 %3878 }
0x1568   : > { %v3910_v39 = vsel %vm1789_vm2, %v8711_v38, 0.0  ;;  %v3887_v44 = vsub.f32 %v8586_v43, %v3879_v25  ;;  %v4169_v53 = vpop.xlane.xlu1 %4168 }
0x1569   : > { %3911 = vadd.xlane.f32.xlu1 %v3910_v39  ;;  %v4187_v9 = vsub.f32 %v8594_v35, %v4169_v53 }
0x156a   : > { %v3902_v50 = vmul.f32 1.442695, %v3887_v44 }
0x156b   : > { %v8718_v13 = vpop.eup %6857  ;;  %v4197_v58 = vmul.f32 1.442695, %v4187_v9 }
0x156c   : > { %v3904_v3 = vsel %vm1789_vm2, %v8718_v13, 0.0  ;;  %6867 = vpow2.f32 %v3902_v50  ;;  %v4163_v22 = vpop.xlane.xlu1 %4162 }
0x156d   : > { %3905 = vadd.xlane.f32.xlu1 %v3904_v3  ;;  %6869 = vpow2.f32 %v4197_v58  ;;  %v4185_v48 = vsub.f32 %v8600_v4, %v4163_v22 }
0x156e   : > { %6871 = vpow2.f32 %v3898_v29  ;;  %v4166_v43 = vpop.xlane.xlu0 %4165 }
0x156f   : > { %v8723_v8 = vpop.eup %6859  ;;  %v4193_v18 = vmul.f32 1.442695, %v4185_v48  ;;  %v4186_v51 = vsub.f32 %v8608_v2, %v4166_v43 }
0x1570   : > { %v4181_v59 = vpop.xlane.xlu1 %4180  ;;  %v3922_v52 = vsel %vm1789_vm2, %v8723_v8, 0.0 }
0x1571   : > { %v8725_v35 = vpop.eup %6861  ;;  %6873 = vpow2.f32 %v4193_v18  ;;  %v4191_v34 = vsub.f32 %v8612_v20, %v4181_v59  ;;  %3923 = vadd.xlane.f32.xlu1 %v3922_v52  ;;  %v4195_v21 = vmul.f32 1.442695, %v4186_v51 }
0x1572   : > { %v3913_v4 = vsel %vm1789_vm2, %v8725_v35, 0.0  ;;  %v8733_v19 = vpop.eup %6863  ;;  %v4172_v0 = vpop.xlane.xlu0 %4171 }
0x1573   : > { %3914 = vadd.xlane.f32.xlu0 %v3913_v4  ;;  %v8735_v37 = vpop.eup %6865  ;;  %v4205_v7 = vmul.f32 1.442695, %v4191_v34  ;;  %v4188_v2 = vsub.f32 %v8604_v60, %v4172_v0  ;;  %v3907_v16 = vsel %vm1789_vm2, %v8733_v19, 0.0 }
0x1574   : > { %v4175_v6 = vpop.xlane.xlu1 %4174  ;;  %v3916_v17 = vsel %vm1789_vm2, %v8735_v37, 0.0 }
0x1575   : > { %6875 = vpow2.f32 %v4205_v7  ;;  %v4199_v20 = vmul.f32 1.442695, %v4188_v2  ;;  %v4189_v63 = vsub.f32 %v8616_v1, %v4175_v6  ;;  %3917 = vadd.xlane.f32.xlu1 %v3916_v17 }
0x1576   : > { %v4178_v45 = vpop.xlane.xlu0 %4177 }
0x1577   : > { %3908 = vadd.xlane.f32.xlu0 %v3907_v16  ;;  %6877 = vpow2.f32 %v4199_v20  ;;  %v4201_v25 = vmul.f32 1.442695, %v4189_v63  ;;  %v4190_v44 = vsub.f32 %v8624_v46, %v4178_v45 }
0x1578   : > { %6879 = vpow2.f32 %v4195_v21  ;;  %v4473_v39 = vpop.xlane.xlu1 %4472 }
0x1579   : > { %v8743_v60 = vpop.eup %6867  ;;  %6881 = vpow2.f32 %v4201_v25  ;;  %v4203_v22 = vmul.f32 1.442695, %v4190_v44  ;;  %v4491_v48 = vsub.f32 %v8629_v47, %v4473_v39 }
0x157a   : > { %v8746_v53 = vpop.eup %6869  ;;  %v4184_v9 = vpop.xlane.xlu0 %4183  ;;  %v3925_v1 = vsel %vm1789_vm2, %v8743_v60, 0.0 }
0x157b   : > { %v8750_v29 = vpop.eup %6871  ;;  %v4192_v50 = vsub.f32 %v8620_v31, %v4184_v9  ;;  %3926 = vadd.xlane.f32.xlu0 %v3925_v1  ;;  %v4215_v58 = vsel %vm1789_vm2, %v8746_v53, 0.0  ;;  %v4501_v52 = vmul.f32 1.442695, %v4491_v48 }
0x157c   : > { %4216 = vadd.xlane.f32.xlu1 %v4215_v58  ;;  %v4467_v3 = vpop.xlane.xlu1 %4466  ;;  %v3919_v51 = vsel %vm1789_vm2, %v8750_v29, 0.0 }
0x157d   : > { %v4207_v46 = vmul.f32 1.442695, %v4192_v50  ;;  %v4489_v34 = vsub.f32 %v8633_v27, %v4467_v3 }
0x157e   : > { %v8756_v43 = vpop.eup %6873  ;;  %v4470_v18 = vpop.xlane.xlu0 %4469 }
0x157f   : > { %6883 = vpow2.f32 %v4207_v46  ;;  %3920 = vadd.xlane.f32.xlu0 %v3919_v51  ;;  %v4209_v31 = vsel %vm1789_vm2, %v8756_v43, 0.0  ;;  %v4497_v21 = vmul.f32 1.442695, %v4489_v34  ;;  %v4490_v63 = vsub.f32 %v8642_v57, %v4470_v18 }
0x1580   : > { %4210 = vadd.xlane.f32.xlu1 %v4209_v31  ;;  %v8762_v59 = vpop.permute.xlu1 %3949  ;;  %6885 = vpow2.f32 %v4203_v22 }
0x1581   : > { %6468 = vmatprep.subr.msk.bf16.mxu1 %vm3684_vm8, %v8762_v59  ;;  %6887 = vpow2.f32 %v4501_v52 }
0x1582   : > { %v8767_v47 = vpop.eup %6875  ;;  %v4476_v4 = vpop.xlane.xlu0 %4475  ;;  %6889 = vpow2.f32 %v4497_v21 }
0x1583   : > { %v4227_v0 = vsel %vm1789_vm2, %v8767_v47, 0.0  ;;  %v4492_v6 = vsub.f32 %v8638_v12, %v4476_v4  ;;  %v4499_v12 = vmul.f32 1.442695, %v4490_v63 }
0x1584   : > { %v8771_v7 = vpop.eup %6877  ;;  %4228 = vadd.xlane.f32.xlu1 %v4227_v0 }
0x1585   : > { %v8773_v2 = vpop.eup %6879  ;;  %v4218_v27 = vsel %vm1789_vm2, %v8771_v7, 0.0  ;;  %v4503_v16 = vmul.f32 1.442695, %v4492_v6 }
0x1586   : > { %v8778_v17 = vpop.eup %6881  ;;  %4219 = vadd.xlane.f32.xlu0 %v4218_v27  ;;  %v4212_v45 = vsel %vm1789_vm2, %v8773_v2, 0.0  ;;  %v4488_v22 = vpop.xlane.xlu0 %4487 }
0x1587   : > { %v4221_v20 = vsel %vm1789_vm2, %v8778_v17, 0.0  ;;  %6891 = vpow2.f32 %v4503_v16 }
0x1588   : > { %4222 = vadd.xlane.f32.xlu1 %v4221_v20  ;;  %6893 = vpow2.f32 %v4499_v12  ;;  %v4496_v20 = vsub.f32 %v8654_v24, %v4488_v22 }
0x158a   : > { %4213 = vadd.xlane.f32.xlu0 %v4212_v45  ;;  %v4482_v18 = vpop.xlane.xlu0 %4481 }
0x158b   : > { %v4494_v31 = vsub.f32 %v8658_v36, %v4482_v18 }
0x158c   : > { %v8785_v25 = vpop.eup %6883 }
0x158d   : > { %v4230_v39 = vsel %vm1789_vm2, %v8785_v25, 0.0  ;;  %v8789_v44 = vpop.eup %6885  ;;  %v4507_v52 = vmul.f32 1.442695, %v4494_v31 }
0x158e   : > { %4231 = vadd.xlane.f32.xlu0 %v4230_v39  ;;  %v4224_v9 = vsel %vm1789_vm2, %v8789_v44, 0.0  ;;  %v8793_v57 = vpop.eup %6887  ;;  %v3639_v34 = vpop.xlane.xlu0 %3638  ;;  %v4511_v39 = vmul.f32 1.442695, %v4496_v20 }
0x158f   : > { %v4519_v1 = vsel %vm1789_vm2, %v8793_v57, 0.0  ;;  %v8797_v50 = vpop.eup %6889  ;;  %6895 = vpow2.f32 %v4507_v52 }
0x1590   : > { %v4513_v58 = vsel %vm1789_vm2, %v8797_v50, 0.0 }
0x1592   : > { %4225 = vadd.xlane.f32.xlu0 %v4224_v9  ;;  %v3633_v21 = vpop.xlane.xlu0 %3632 }
0x1593   : > { %6897 = vrcp.f32 %v3633_v21 }
0x1594   : > { %v8803_v3 = vpop.eup %6891 }
0x1595   : > { %v4522_v48 = vsel %vm1789_vm2, %v8803_v3, 0.0  ;;  %v8807_v46 = vpop.eup %6893 }
0x1596   : > { %4520 = vadd.xlane.f32.xlu0 %v4519_v1  ;;  %v4516_v51 = vsel %vm1789_vm2, %v8807_v46, 0.0  ;;  %v3651_v36 = vpop.xlane.xlu0 %3650 }
0x1599   : > { %4253 = vrot.lane.b32.xlu1 %v8558_v61, %s7334_s19  ;;  %s5669_s19 = sshll.u32 %s7636_s10, 6 }
0x159a   : > { %4514 = vadd.xlane.f32.xlu0 %v4513_v58 }
0x159c   : > { %v8815_v45 = vpop.eup %6895 }
0x159e   : > { %4523 = vadd.xlane.f32.xlu0 %v4522_v48 }
0x15a0   : > { %v6898_v58 = vpop.eup %6897 }
0x15a1   : > { %v3661_v21 = vmul.f32 %v6898_v58, %v8668_v10 }
0x15a2   : > { %4517 = vadd.xlane.f32.xlu0 %v4516_v51 }
0x15b1   : > { %v4485_v4 = vpop.xlane.xlu1 %4484 }
0x15b2   : > { %v4495_v0 = vsub.f32 %v8647_v40, %v4485_v4  ;;  %v4528_v40 = vsel %vm1789_vm2, %v8815_v45, 0.0 }
0x15b4   : > { %v4509_v63 = vmul.f32 1.442695, %v4495_v0 }
0x15b5   : > { %v4479_v6 = vpop.xlane.xlu1 %4478 }
0x15b6   : > { %v4493_v27 = vsub.f32 %v8649_v41, %v4479_v6  ;;  %v3645_v41 = vpop.xlane.xlu0 %3644 }
0x15b8   : > { %v4505_v16 = vmul.f32 1.442695, %v4493_v27 }
0x15b9   : > { %v3636_v12 = vpop.xlane.xlu1 %3635 }
0x15ba   : > { %6899 = vpow2.f32 %v4505_v16 }
0x15bb   : > { %6901 = vrcp.f32 %v3636_v12 }
0x15bc   : > { %6903 = vpow2.f32 %v4509_v63 }
0x15bd   : > { %6905 = vrcp.f32 %v3639_v34  ;;  %4529 = vadd.xlane.f32.xlu1 %v4528_v40  ;;  %v3630_v9 = vpop.xlane.xlu1 %3629 }
0x15be   : > { %6907 = vrcp.f32 %v3630_v9 }
0x15bf   : > { %6909 = vpow2.f32 %v4511_v39 }
0x15c1   : > { %v3648_v24 = vpop.xlane.xlu1 %3647 }
0x15c2   : > { %6911 = vrcp.f32 %v3648_v24 }
0x15c3   : > { %6913 = vrcp.f32 %v3645_v41 }
0x15c4   : > { %6915 = vrcp.f32 %v3651_v36  ;;  %v3964_v36 = vsel %vm3684_vm8, %v8762_v59, 0 }
0x15c5   : > { %v3642_v1 = vpop.xlane.xlu1 %3641 }
0x15c6   : > { %6917 = vrcp.f32 %v3642_v1 }
0x15c7   : > { %v8819_v22 = vpop.eup %6899 }
0x15c8   : > { %v6902_v48 = vpop.eup %6901  ;;  %v4525_v18 = vsel %vm1789_vm2, %v8819_v22, 0.0 }
0x15c9   : > { %v8823_v51 = vpop.eup %6903  ;;  %4526 = vadd.xlane.f32.xlu0 %v4525_v18  ;;  %v3662_v34 = vmul.f32 %v6902_v48, %v8689_v15 }
0x15ca   : > { %v6906_v31 = vpop.eup %6905  ;;  %v4531_v4 = vsel %vm1789_vm2, %v8823_v51, 0.0 }
0x15cb   : > { %v6908_v52 = vpop.eup %6907  ;;  %v3663_v27 = vmul.f32 %v6906_v31, %v8662_v5 }
0x15cc   : > { %v3660_v0 = vmul.f32 %v6908_v52, %v8693_v11  ;;  %v8830_v6 = vpop.eup %6909 }
0x15cd   : > { %4532 = vadd.xlane.f32.xlu0 %v4531_v4  ;;  %v3669_v63 = vpack.c.bf16 %v3663_v27, %v3662_v34  ;;  %v4534_v15 = vsel %vm1789_vm2, %v8830_v6, 0.0 }
0x15ce   : > { %v3668_v20 = vpack.c.bf16 %v3661_v21, %v3660_v0 }
0x15cf   : > { %v6912_v16 = vpop.eup %6911 }
0x15d0   : > { %6329 = vmatprep.mubr.msk.bf16.mxu1 %vm1789_vm2, %v3668_v20  ;;  %v6914_v12 = vpop.eup %6913  ;;  %v3666_v5 = vmul.f32 %v6912_v16, %v8697_v62 }
0x15d1   : > { %4535 = vadd.xlane.f32.xlu0 %v4534_v15  ;;  %6330 = vmatmul.mubr.msk.bf16.vlgmr.msra.gmra.mxu1 %vm1789_vm2, %v3669_v63  ;;  %v6916_v10 = vpop.eup %6915  ;;  %v3665_v40 = vmul.f32 %v6914_v12, %v8676_v26 }
0x15d2   : > { %6348 = vmatpush3.bf16.msra.mxu1 %v3964_v36  ;;  %v3667_v9 = vmul.f32 %v6916_v10, %v8672_v14 }
0x15d3   : > { %v6918_v11 = vpop.eup %6917 }
0x15d4   : > { %v3664_v39 = vmul.f32 %v6918_v11, %v8701_v55  ;;  %v3671_v24 = vpack.c.bf16 %v3667_v9, %v3666_v5 }
0x15d6   : > { %v3670_v41 = vpack.c.bf16 %v3665_v40, %v3664_v39 }
0x15d8   : > { %6333 = vmatprep.mubr.msk.bf16.mxu1 %vm1789_vm2, %v3670_v41 }
0x15d9   : > { %6334 = vmatmul.mubr.msk.bf16.gmra.mxu1 %vm1789_vm2, %v3671_v24 }
0x15e7   : > { %4557 = vrot.lane.b32.xlu0 %v8558_v61, %s7335_s24  ;;  %s9222_s24 = scalar_lea.vmem [#allocation18], %s5669_s19 }
0x15f2   : > { %v3912_v59 = vpop.xlane.xlu1 %3911 }
0x15f6   : > { %v3906_v1 = vpop.xlane.xlu1 %3905 }
0x15fa   : > { %v3924_v58 = vpop.xlane.xlu1 %3923 }
0x15fc   : > { %v3915_v48 = vpop.xlane.xlu0 %3914 }
0x15fd   : > { %6919 = vrcp.f32 %v3915_v48 }
0x15fe   : > { %6921 = vrcp.f32 %v3906_v1  ;;  %v3918_v26 = vpop.xlane.xlu1 %3917 }
0x15ff   : > { %6923 = vrcp.f32 %v3912_v59 }
0x1600   : > { %v3909_v62 = vpop.xlane.xlu0 %3908 }
0x1601   : > { %6925 = vrcp.f32 %v3909_v62 }
0x1604   : > { %v3927_v14 = vpop.xlane.xlu0 %3926 }
0x1605   : > { %v4217_v55 = vpop.xlane.xlu1 %4216  ;;  %6927 = vrcp.f32 %v3927_v14 }
0x1606   : > { %6929 = vrcp.f32 %v3918_v26 }
0x1607   : > { %6931 = vrcp.f32 %v3924_v58 }
0x1608   : > { %v3921_v18 = vpop.xlane.xlu0 %3920 }
0x1609   : > { %6933 = vrcp.f32 %v3921_v18  ;;  %v4211_v31 = vpop.xlane.xlu1 %4210 }
0x160a   : > { %v6920_v52 = vpop.eup %6919 }
0x160b   : > { %v6922_v61 = vpop.eup %6921  ;;  %v3939_v0 = vmul.f32 %v6920_v52, %v8725_v35 }
0x160c   : > { %v6924_v34 = vpop.eup %6923  ;;  %v3936_v27 = vmul.f32 %v6922_v61, %v8718_v13 }
0x160d   : > { %v4229_v21 = vpop.xlane.xlu1 %4228  ;;  %v3938_v63 = vmul.f32 %v6924_v34, %v8711_v38 }
0x160e   : > { %v6926_v4 = vpop.eup %6925 }
0x160f   : > { %v3937_v20 = vmul.f32 %v6926_v4, %v8733_v19  ;;  %v4220_v16 = vpop.xlane.xlu0 %4219  ;;  %v3945_v12 = vpack.c.bf16 %v3939_v0, %v3938_v63 }
0x1610   : > { %6935 = vrcp.f32 %v4220_v16 }
0x1611   : > { %v3944_v15 = vpack.c.bf16 %v3937_v20, %v3936_v27  ;;  %v4223_v36 = vpop.xlane.xlu1 %4222  ;;  %6937 = vrcp.f32 %v4211_v31 }
0x1612   : > { %v6928_v10 = vpop.eup %6927  ;;  %6939 = vrcp.f32 %v4217_v55 }
0x1613   : > { %6349 = vmatprep.mubr.msk.bf16.mxu1 %vm1789_vm2, %v3944_v15  ;;  %v4214_v11 = vpop.xlane.xlu0 %4213  ;;  %v6930_v35 = vpop.eup %6929  ;;  %v3943_v39 = vmul.f32 %v6928_v10, %v8743_v60 }
0x1614   : > { %6350 = vmatmul.mubr.msk.bf16.vlgmr.msra.gmra.mxu1 %vm1789_vm2, %v3945_v12  ;;  %6941 = vrcp.f32 %v4214_v11  ;;  %v6932_v13 = vpop.eup %6931  ;;  %v3940_v9 = vmul.f32 %v6930_v35, %v8735_v37 }
0x1615   : > { %v4254_v5 = vpop.permute.xlu1 %4253  ;;  %v3942_v24 = vmul.f32 %v6932_v13, %v8723_v8 }
0x1616   : > { %v6934_v19 = vpop.eup %6933  ;;  %v4268_v38 = vsel %vm3684_vm8, %v4254_v5, 0  ;;  %6470 = vmatprep.subr.msk.bf16.mxu1 %vm3684_vm8, %v4254_v5 }
0x1617   : > { %v4232_v40 = vpop.xlane.xlu0 %4231  ;;  %6368 = vmatpush3.bf16.msra.mxu1 %v4268_v38  ;;  %v3941_v41 = vmul.f32 %v6934_v19, %v8750_v29  ;;  %v3947_v1 = vpack.c.bf16 %v3943_v39, %v3942_v24 }
0x1618   : > { %6943 = vrcp.f32 %v4232_v40 }
0x1619   : > { %v3946_v59 = vpack.c.bf16 %v3941_v41, %v3940_v9  ;;  %6945 = vrcp.f32 %v4223_v36 }
0x161a   : > { %6947 = vrcp.f32 %v4229_v21 }
0x161b   : > { %v4226_v58 = vpop.xlane.xlu0 %4225  ;;  %6353 = vmatprep.mubr.msk.bf16.mxu1 %vm1789_vm2, %v3946_v59 }
0x161c   : > { %6949 = vrcp.f32 %v4226_v58  ;;  %6354 = vmatmul.mubr.msk.bf16.gmra.mxu1 %vm1789_vm2, %v3947_v1 }
0x161d   : > { %v6936_v60 = vpop.eup %6935 }
0x161e   : > { %v6938_v48 = vpop.eup %6937  ;;  %v4244_v29 = vmul.f32 %v6936_v60, %v8771_v7 }
0x161f   : > { %v4521_v62 = vpop.xlane.xlu0 %4520  ;;  %v6940_v26 = vpop.eup %6939  ;;  %v4241_v8 = vmul.f32 %v6938_v48, %v8756_v43 }
0x1620   : > { %v4243_v55 = vmul.f32 %v6940_v26, %v8746_v53 }
0x1621   : > { %v6942_v37 = vpop.eup %6941 }
0x1622   : > { %v4242_v14 = vmul.f32 %v6942_v37, %v8773_v2  ;;  %v4250_v52 = vpack.c.bf16 %v4244_v29, %v4243_v55 }
0x1623   : > { %v4515_v18 = vpop.xlane.xlu0 %4514 }
0x1624   : > { %v4249_v31 = vpack.c.bf16 %v4242_v14, %v4241_v8  ;;  %6951 = vrcp.f32 %v4515_v18 }
0x1625   : > { %v6944_v61 = vpop.eup %6943 }
0x1626   : > { %6369 = vmatprep.mubr.msk.bf16.mxu1 %vm1789_vm2, %v4249_v31  ;;  %v6946_v34 = vpop.eup %6945  ;;  %v4248_v7 = vmul.f32 %v6944_v61, %v8785_v25 }
0x1627   : > { %v4524_v4 = vpop.xlane.xlu0 %4523  ;;  %6370 = vmatmul.mubr.msk.bf16.vlgmr.msra.gmra.mxu1 %vm1789_vm2, %v4250_v52  ;;  %v6948_v0 = vpop.eup %6947  ;;  %v4245_v43 = vmul.f32 %v6946_v34, %v8778_v17 }
0x1628   : > { %v4247_v27 = vmul.f32 %v6948_v0, %v8767_v47 }
0x1629   : > { %v6950_v21 = vpop.eup %6949 }
0x162a   : > { %v4246_v2 = vmul.f32 %v6950_v21, %v8789_v44  ;;  %v4252_v63 = vpack.c.bf16 %v4248_v7, %v4247_v27  ;;  %v6644_v27 = vld [vmem:[#allocation17] sm:$0xff]  }
0x162b   : > { %v4518_v53 = vpop.xlane.xlu0 %4517 }
0x162c   : > { %6953 = vrcp.f32 %v4518_v53  ;;  %v4251_v20 = vpack.c.bf16 %v4246_v2, %v4245_v43  ;;  %v6643_v43 = vld [vmem:[#allocation17 + $0x8] sm:$0xff]  }
0x162d   : > { %6955 = vrcp.f32 %v4524_v4  ;;  %6397 = vmatprep.subr.bf16.mxu0 %v6643_v43 }
0x162e   : > { %6373 = vmatprep.mubr.msk.bf16.mxu1 %vm1789_vm2, %v4251_v20  ;;  %6957 = vrcp.f32 %v4521_v62  ;;  %6398 = vmatpush3.bf16.msra.mxu0 %v6643_v43 }
0x162f   : > { %6374 = vmatmul.mubr.msk.bf16.gmra.mxu1 %vm1789_vm2, %v4252_v63  ;;  %6399 = vmatprep.subr.bf16.mxu0 %v6644_v27 }
0x1631   : > { %v6952_v16 = vpop.eup %6951 }
0x1632   : > { %v4545_v12 = vmul.f32 %v6952_v16, %v8797_v50  ;;  %6400 = vmatpush3.bf16.msra.mxu0 %v6644_v27 }
0x1639   : > { %v6954_v15 = vpop.eup %6953 }
0x163a   : > { %v4546_v25 = vmul.f32 %v6954_v15, %v8807_v46  ;;  %v6956_v10 = vpop.eup %6955 }
0x163b   : > { %v6958_v35 = vpop.eup %6957  ;;  %v4548_v13 = vmul.f32 %v6956_v10, %v8803_v3 }
0x163c   : > { %v4553_v36 = vpack.c.bf16 %v4546_v25, %v4545_v12  ;;  %v4547_v46 = vmul.f32 %v6958_v35, %v8793_v57 }
0x163e   : > { %6389 = vmatprep.mubr.msk.bf16.mxu1 %vm1789_vm2, %v4553_v36  ;;  %v4554_v39 = vpack.c.bf16 %v4548_v13, %v4547_v46 }
0x1646   : > { %v4530_v17 = vpop.xlane.xlu1 %4529 }
0x1647   : > { %6959 = vrcp.f32 %v4530_v17 }
0x1652   : > { %v4527_v47 = vpop.xlane.xlu0 %4526 }
0x1653   : > { %6961 = vrcp.f32 %v4527_v47 }
0x1654   : > { %v6960_v50 = vpop.eup %6959 }
0x1655   : > { %v4550_v9 = vmul.f32 %v6960_v50, %v8815_v45 }
0x1656   : > { %v4533_v44 = vpop.xlane.xlu0 %4532 }
0x1657   : > { %6963 = vrcp.f32 %v4533_v44 }
0x165a   : > { %v4536_v11 = vpop.xlane.xlu0 %4535 }
0x165b   : > { %6965 = vrcp.f32 %v4536_v11 }
0x165e   : > { %v4558_v5 = vpop.permute.xlu0 %4557 }
0x165f   : > { %v4572_v19 = vsel %vm3684_vm8, %v4558_v5, 0  ;;  %6472 = vmatprep.subr.msk.bf16.mxu1 %vm3684_vm8, %v4558_v5 }
0x1660   : > { %v6962_v38 = vpop.eup %6961  ;;  %6388 = vmatpush3.bf16.msra.mxu1 %v4572_v19 }
0x1661   : > { %v4549_v40 = vmul.f32 %v6962_v38, %v8819_v22 }
0x1663   : > { %6390 = vmatmul.mubr.msk.bf16.vlgmr.msra.gmra.mxu1 %vm1789_vm2, %v4554_v39  ;;  %v4555_v41 = vpack.c.bf16 %v4550_v9, %v4549_v40 }
0x1664   : > { %v6964_v3 = vpop.eup %6963 }
0x1665   : > { %6393 = vmatprep.mubr.msk.bf16.mxu1 %vm1789_vm2, %v4555_v41  ;;  %v4551_v57 = vmul.f32 %v6964_v3, %v8823_v51 }
0x1668   : > { %v6966_v24 = vpop.eup %6965 }
0x1669   : > { %v4552_v59 = vmul.f32 %v6966_v24, %v8830_v6 }
0x166b   : > { %v4556_v1 = vpack.c.bf16 %v4552_v59, %v4551_v57 }
0x166d   : > { %6394 = vmatmul.mubr.msk.bf16.gmra.mxu1 %vm1789_vm2, %v4556_v1 }
0x166e   : > { %5011 = vmatprep.mubr.bf16.mxu1 %v7330_v56 }
0x1691   : > { %v6331_v58 = vpop.f32.mrf.mxu1 }
0x1692   : > { %3755 = vst.msk [vmem:[#allocation2 + $0x10] sm:$0xff] %vm1789_vm2, %v6331_v58 }
0x1693   : > { %v3722_v45 = vpop.f32.mrf.mxu1 }
0x1694   : > { %3753 = vst.msk [vmem:[#allocation2] sm:$0xff] %vm1789_vm2, %v3722_v45 }
0x1695   : > { %v6332_v22 = vpop.f32.mrf.mxu1 }
0x1696   : > { %3756 = vst.msk [vmem:[#allocation2 + $0x18] sm:$0xff] %vm1789_vm2, %v6332_v22 }
0x1697   : > { %v3725_v60 = vpop.f32.mrf.mxu1 }
0x1698   : > { %3754 = vst.msk [vmem:[#allocation2 + $0x8] sm:$0xff] %vm1789_vm2, %v3725_v60 }
0x1699   : > { %v6335_v51 = vpop.f32.mrf.mxu1 }
0x169a   : > { %3759 = vst.msk [vmem:[#allocation2 + $0x30] sm:$0xff] %vm1789_vm2, %v6335_v51 }
0x169b   : > { %v3738_v6 = vpop.f32.mrf.mxu1 }
0x169c   : > { %3757 = vst.msk [vmem:[#allocation2 + $0x20] sm:$0xff] %vm1789_vm2, %v3738_v6 }
0x169d   : > { %v6336_v48 = vpop.f32.mrf.mxu1 }
0x169e   : > { %3760 = vst.msk [vmem:[#allocation2 + $0x38] sm:$0xff] %vm1789_vm2, %v6336_v48 }
0x169f   : > { %v3741_v62 = vpop.f32.mrf.mxu1 }
0x16a0   : > { %3758 = vst.msk [vmem:[#allocation2 + $0x28] sm:$0xff] %vm1789_vm2, %v3741_v62 }
0x16d4   : > { %v6351_v26 = vpop.f32.mrf.mxu1 }
0x16d5   : > { %4043 = vrot.lane.b32.xlu0 %v6351_v26, %s7336_s6 }
0x16d6   : > { %v4000_v37 = vpop.f32.mrf.mxu1 }
0x16d8   : > { %v6352_v29 = vpop.f32.mrf.mxu1 }
0x16d9   : > { %4039 = vrot.lane.b32.xlu0 %v4000_v37, %s7336_s6 }
0x16da   : > { %v4003_v8 = vpop.f32.mrf.mxu1 }
0x16db   : > { %4041 = vrot.lane.b32.xlu1 %v4003_v8, %s7336_s6 }
0x16dc   : > { %v6355_v14 = vpop.f32.mrf.mxu1 }
0x16dd   : > { %4045 = vrot.lane.b32.xlu0 %v6352_v29, %s7336_s6 }
0x16de   : > { %v4016_v55 = vpop.f32.mrf.mxu1 }
0x16e0   : > { %v6356_v18 = vpop.f32.mrf.mxu1 }
0x16e1   : > { %4047 = vrot.lane.b32.xlu0 %v4016_v55, %s7336_s6 }
0x16e2   : > { %v4019_v31 = vpop.f32.mrf.mxu1 }
0x16e3   : > { %4049 = vrot.lane.b32.xlu1 %v4019_v31, %s7336_s6 }
0x16e7   : > { %v6371_v52 = vpop.f32.mrf.mxu1 }
0x16e8   : > { %4347 = vrot.lane.b32.xlu0 %v6371_v52, %s7337_s7  ;;  %v5800_v52 = vld [vmem:[#allocation6 + $0x6] ss:$0 sm:$0xff] }
0x16e9   : > { %v4304_v61 = vpop.f32.mrf.mxu1 }
0x16eb   : > { %v6372_v34 = vpop.f32.mrf.mxu1 }
0x16ec   : > { %4343 = vrot.lane.b32.xlu0 %v4304_v61, %s7337_s7  ;;  %4349 = vrot.lane.b32.xlu1 %v6372_v34, %s7337_s7 }
0x16ed   : > { %v4307_v4 = vpop.f32.mrf.mxu1 }
0x16ef   : > { %v6375_v0 = vpop.f32.mrf.mxu1 }
0x16f0   : > { %4345 = vrot.lane.b32.xlu0 %v4307_v4, %s7337_s7 }
0x16f1   : > { %v4320_v21 = vpop.f32.mrf.mxu1 }
0x16f3   : > { %v6376_v7 = vpop.f32.mrf.mxu1 }
0x16f5   : > { %v4323_v2 = vpop.f32.mrf.mxu1 }
0x1723   : > { %v6391_v53 = vpop.f32.mrf.mxu1 }
0x1724   : > { %4651 = vrot.lane.b32.xlu0 %v6391_v53, %s7338_s8 }
0x1725   : > { %v4608_v20 = vpop.f32.mrf.mxu1 }
0x1727   : > { %v6392_v63 = vpop.f32.mrf.mxu1 }
0x1728   : > { %4647 = vrot.lane.b32.xlu0 %v4608_v20, %s7338_s8  ;;  %4653 = vrot.lane.b32.xlu1 %v6392_v63, %s7338_s8 }
0x1729   : > { %v4611_v16 = vpop.f32.mrf.mxu1 }
0x172c   : > { %4051 = vrot.lane.b32.xlu0 %v6355_v14, %s7336_s6  ;;  %4649 = vrot.lane.b32.xlu1 %v4611_v16, %s7338_s8 }
0x172d   : > { %v6395_v15 = vpop.f32.mrf.mxu1 }
0x172f   : > { %v4624_v12 = vpop.f32.mrf.mxu1 }
0x1730   : > { %4351 = vrot.lane.b32.xlu0 %v4320_v21, %s7337_s7  ;;  %4053 = vrot.lane.b32.xlu1 %v6356_v18, %s7336_s6 }
0x1731   : > { %v6396_v25 = vpop.f32.mrf.mxu1 }
0x1733   : > { %v4627_v36 = vpop.f32.mrf.mxu1 }
0x1734   : > { %4355 = vrot.lane.b32.xlu0 %v6375_v0, %s7337_s7  ;;  %4353 = vrot.lane.b32.xlu1 %v4323_v2, %s7337_s7 }
0x1738   : > { %4357 = vrot.lane.b32.xlu1 %v6376_v7, %s7337_s7  ;;  %4655 = vrot.lane.b32.xlu0 %v4624_v12, %s7338_s8  ;;  %s5840_s7 = sshll.u32 %s7460_s1, 10  ;;  %s5472_s1 = scalar_lea.sflag [#allocation5], %s7636_s10 }
0x1739   : > { %s9246_s15 = scalar_lea.hbm %s9368_s13, %s5840_s7 }
0x173c   : > { %4659 = vrot.lane.b32.xlu0 %v6395_v15, %s7338_s8  ;;  %4657 = vrot.lane.b32.xlu1 %v4627_v36, %s7338_s8 }
0x1740   : > { %4661 = vrot.lane.b32.xlu1 %v6396_v25, %s7338_s8  ;;  %s5485_s8 = sshll.u32 %s9222_s24, 4  ;;  %s9250_s8 = int_to_ptr.vmem [resolvable:$true] %s5485_s8 }
0x1747   : > { %v4044_v17 = vpop.permute.xlu0 %4043 }
0x1748   : > { %4065 = vst.msk [vmem:[#allocation2 + $0x10] sm:$0xff] %vm2386_vm3, %v4044_v17 }
0x174b   : > { %v4040_v47 = vpop.permute.xlu0 %4039 }
0x174c   : > { %4063 = vst.msk [vmem:[#allocation2] sm:$0xff] %vm2386_vm3, %v4040_v47 }
0x174d   : > { %v4042_v44 = vpop.permute.xlu1 %4041 }
0x174e   : > { %4064 = vst.msk [vmem:[#allocation2 + $0x8] sm:$0xff] %vm2386_vm3, %v4042_v44 }
0x174f   : > { %v4046_v10 = vpop.permute.xlu0 %4045 }
0x1750   : > { %4066 = vst.msk [vmem:[#allocation2 + $0x18] sm:$0xff] %vm2386_vm3, %v4046_v10 }
0x1753   : > { %v4048_v11 = vpop.permute.xlu0 %4047 }
0x1754   : > { %4067 = vst.msk [vmem:[#allocation2 + $0x20] sm:$0xff] %vm2386_vm3, %v4048_v11 }
0x1755   : > { %v4050_v35 = vpop.permute.xlu1 %4049 }
0x1756   : > { %4068 = vst.msk [vmem:[#allocation2 + $0x28] sm:$0xff] %vm2386_vm3, %v4050_v35 }
0x175a   : > { %v4348_v13 = vpop.permute.xlu0 %4347 }
0x175b   : > { %4369 = vst.msk [vmem:[#allocation2 + $0x10] sm:$0xff] %vm2713_vm4, %v4348_v13 }
0x175e   : > { %v4344_v50 = vpop.permute.xlu0 %4343  ;;  %v4350_v5 = vpop.permute.xlu1 %4349 }
0x175f   : > { %4367 = vst.msk [vmem:[#allocation2] sm:$0xff] %vm2713_vm4, %v4344_v50  ;;  %4370 = vst.msk [vmem:[#allocation2 + $0x18] sm:$0xff] %vm2713_vm4, %v4350_v5 }
0x1762   : > { %v4346_v46 = vpop.permute.xlu0 %4345 }
0x1763   : > { %4368 = vst.msk [vmem:[#allocation2 + $0x8] sm:$0xff] %vm2713_vm4, %v4346_v46 }
0x1796   : > { %v4652_v19 = vpop.permute.xlu0 %4651 }
0x1797   : > { %4673 = vst.msk [vmem:[#allocation2 + $0x10] sm:$0xff] %vm3040_vm5, %v4652_v19 }
0x179a   : > { %v4648_v38 = vpop.permute.xlu0 %4647  ;;  %v4654_v39 = vpop.permute.xlu1 %4653 }
0x179b   : > { %4671 = vst.msk [vmem:[#allocation2] sm:$0xff] %vm3040_vm5, %v4648_v38  ;;  %4674 = vst.msk [vmem:[#allocation2 + $0x18] sm:$0xff] %vm3040_vm5, %v4654_v39 }
0x179e   : > { %v4052_v40 = vpop.permute.xlu0 %4051  ;;  %v4650_v9 = vpop.permute.xlu1 %4649  ;;  %v4681_v22 = vld [vmem:[#allocation2 + $0x10] sm:$0xff] }
0x179f   : > { %4069 = vst.msk [vmem:[#allocation2 + $0x30] sm:$0xff] %vm2386_vm3, %v4052_v40 }
0x17a0   : > { %4672 = vst.msk [vmem:[#allocation2 + $0x8] sm:$0xff] %vm3040_vm5, %v4650_v9 }
0x17a2   : > { %v4352_v41 = vpop.permute.xlu0 %4351  ;;  %v4054_v3 = vpop.permute.xlu1 %4053  ;;  %v4682_v24 = vld [vmem:[#allocation2 + $0x18] sm:$0xff]  ;;  %v4679_v1 = vld [vmem:[#allocation2] sm:$0xff] }
0x17a3   : > { %4371 = vst.msk [vmem:[#allocation2 + $0x20] sm:$0xff] %vm2713_vm4, %v4352_v41  ;;  %v4688_v60 = vpack.c.bf16 %v4682_v24, %v4681_v22 }
0x17a4   : > { %4070 = vst.msk [vmem:[#allocation2 + $0x38] sm:$0xff] %vm2386_vm3, %v4054_v3 }
0x17a6   : > { %v4356_v57 = vpop.permute.xlu0 %4355  ;;  %v4354_v59 = vpop.permute.xlu1 %4353 }
0x17a7   : > { %v4680_v58 = vld [vmem:[#allocation2 + $0x8] sm:$0xff]  ;;  %4373 = vst.msk [vmem:[#allocation2 + $0x30] sm:$0xff] %vm2713_vm4, %v4356_v57  ;;  %4372 = vst.msk [vmem:[#allocation2 + $0x28] sm:$0xff] %vm2713_vm4, %v4354_v59 }
0x17a8   : > { %v4687_v45 = vpack.c.bf16 %v4680_v58, %v4679_v1 }
0x17aa   : > { %6401 = vmatprep.mubr.msk.bf16.mxu0 %vm1386_vm1, %v4687_v45  ;;  %v4656_v51 = vpop.permute.xlu0 %4655  ;;  %v4358_v6 = vpop.permute.xlu1 %4357 }
0x17ab   : > { %6402 = vmatmul.mubr.msk.bf16.vlgmr.msra.gmra.mxu0 %vm1386_vm1, %v4688_v60  ;;  %4675 = vst.msk [vmem:[#allocation2 + $0x20] sm:$0xff] %vm3040_vm5, %v4656_v51 }
0x17ac   : > { %4374 = vst.msk [vmem:[#allocation2 + $0x38] sm:$0xff] %vm2713_vm4, %v4358_v6 }
0x17ae   : > { %v4660_v48 = vpop.permute.xlu0 %4659  ;;  %v4658_v62 = vpop.permute.xlu1 %4657 }
0x17af   : > { %4677 = vst.msk [vmem:[#allocation2 + $0x30] sm:$0xff] %vm3040_vm5, %v4660_v48  ;;  %4676 = vst.msk [vmem:[#allocation2 + $0x28] sm:$0xff] %vm3040_vm5, %v4658_v62 }
0x17b2   : > { %v4662_v26 = vpop.permute.xlu1 %4661  ;;  %v4683_v37 = vld [vmem:[#allocation2 + $0x20] sm:$0xff] }
0x17b3   : > { %4678 = vst.msk [vmem:[#allocation2 + $0x38] sm:$0xff] %vm3040_vm5, %v4662_v26 }
0x17b6   : > { %v4684_v29 = vld [vmem:[#allocation2 + $0x28] sm:$0xff]  ;;  %v4685_v14 = vld [vmem:[#allocation2 + $0x30] sm:$0xff] }
0x17b7   : > { %v4689_v8 = vpack.c.bf16 %v4684_v29, %v4683_v37 }
0x17b9   : > { %6405 = vmatprep.mubr.msk.bf16.mxu0 %vm1386_vm1, %v4689_v8 }
0x17ba   : > { %v4686_v55 = vld [vmem:[#allocation2 + $0x38] sm:$0xff] }
0x17bb   : > { %v4690_v18 = vpack.c.bf16 %v4686_v55, %v4685_v14 }
0x17bd   : > { %6406 = vmatmul.mubr.msk.bf16.gmra.mxu0 %vm1386_vm1, %v4690_v18 }
0x186b   : > { %v6403_v31 = vpop.f32.mrf.mxu0 }
0x186c   : > { %v4767_v34 = vadd.f32 %v6403_v31, %v5800_v52 }
0x186d   : > { %v4758_v61 = vpop.f32.mrf.mxu0 }
0x186e   : > { %v4759_v4 = vadd.f32 %v5800_v52, %v4758_v61  ;;  %v8952_v43 = vadd.f32 %v4767_v34, %v8375_v32 }
0x186f   : > { %v6404_v0 = vpop.f32.mrf.mxu0 }
0x1870   : > { %v8949_v21 = vadd.f32 %v4759_v4, %v8372_v49  ;;  %v4770_v2 = vadd.f32 %v6404_v0, %v5800_v52  ;;  %v4803_v16 = vsel %vm1386_vm1, %v8952_v43, 0.0 }
0x1871   : > { %v4761_v7 = vpop.f32.mrf.mxu0 }
0x1872   : > { %v4762_v53 = vadd.f32 %v5800_v52, %v4761_v7  ;;  %v4797_v27 = vsel %vm1386_vm1, %v8949_v21, 0.0  ;;  %v8960_v63 = vadd.f32 %v4770_v2, %v8383_v28 }
0x1873   : > { %4798 = vadd.xlane.f32.xlu0 %v4797_v27 }
0x1874   : > { %v8957_v20 = vadd.f32 %v4762_v53, %v8380_v23  ;;  %v4806_v32 = vsel %vm1386_vm1, %v8960_v63, 0.0 }
0x1876   : > { %v4800_v49 = vsel %vm1386_vm1, %v8957_v20, 0.0 }
0x1877   : > { %4801 = vadd.xlane.f32.xlu1 %v4800_v49  ;;  %4804 = vadd.xlane.f32.xlu0 %v4803_v16  ;;  %v6647_v49 = vld [vmem:[%s9310_s14 + $0x14] ss:$8 sps:$4 sm:$0xff]   ;;  %v6645_v16 = vld [vmem:[%s9310_s14 + $0x10] ss:$8 sps:$4 sm:$0xff]  }
0x1878   : > { %4991 = vmatprep.subr.bf16.mxu1 %v6647_v49 }
0x1879   : > { %4992 = vmatpush1.bf16.msra.mxu1 %v6645_v16 }
0x187b   : > { %4807 = vadd.xlane.f32.xlu0 %v4806_v32  ;;  %v6650_v32 = vld [vmem:[%s9310_s14 + $0x4] ss:$8 sps:$4 sm:$0xff]  }
0x187c   : > { %4993 = vmatprep.subr.bf16.mxu1 %v6650_v32 }
0x187d   : > { %v6407_v15 = vpop.f32.mrf.mxu0 }
0x187e   : > { %v4783_v25 = vadd.f32 %v6407_v15, %v5800_v52  ;;  %v6648_v15 = vld [vmem:[%s9310_s14] ss:$8 sps:$4 sm:$0xff]  }
0x187f   : > { %v4774_v12 = vpop.f32.mrf.mxu0  ;;  %4994 = vmatpush1.bf16.msra.mxu1 %v6648_v15 }
0x1880   : > { %v4775_v23 = vadd.f32 %v5800_v52, %v4774_v12  ;;  %v8972_v47 = vadd.f32 %v4783_v25, %v8395_v33 }
0x1881   : > { %v6408_v36 = vpop.f32.mrf.mxu0 }
0x1882   : > { %v8969_v28 = vadd.f32 %v4775_v23, %v8392_v42  ;;  %v4786_v44 = vadd.f32 %v6408_v36, %v5800_v52  ;;  %v4815_v50 = vsel %vm1386_vm1, %v8972_v47, 0.0 }
0x1883   : > { %v4777_v17 = vpop.f32.mrf.mxu0 }
0x1884   : > { %v4778_v10 = vadd.f32 %v5800_v52, %v4777_v17  ;;  %v4809_v11 = vsel %vm1386_vm1, %v8969_v28, 0.0  ;;  %v8980_v13 = vadd.f32 %v4786_v44, %v8403_v30 }
0x1885   : > { %4810 = vadd.xlane.f32.xlu1 %v4809_v11 }
0x1886   : > { %v8977_v35 = vadd.f32 %v4778_v10, %v8400_v54  ;;  %v4818_v33 = vsel %vm1386_vm1, %v8980_v13, 0.0 }
0x1888   : > { %v4812_v42 = vsel %vm1386_vm1, %v8977_v35, 0.0 }
0x1889   : > { %4813 = vadd.xlane.f32.xlu0 %v4812_v42  ;;  %4816 = vadd.xlane.f32.xlu1 %v4815_v50 }
0x188d   : > { %4819 = vadd.xlane.f32.xlu0 %v4818_v33 }
0x18fc   : > { %v4799_v5 = vpop.xlane.xlu0 %4798 }
0x18fd   : > { %v4821_v46 = vmul.f32 0.03125, %v4799_v5 }
0x18ff   : > { %v8989_v54 = vsub.f32 %v8949_v21, %v4821_v46 }
0x1900   : > { %v4805_v19 = vpop.xlane.xlu0 %4804  ;;  %v4802_v30 = vpop.xlane.xlu1 %4801 }
0x1901   : > { %v4823_v38 = vmul.f32 0.03125, %v4805_v19  ;;  %v4822_v39 = vmul.f32 0.03125, %v4802_v30  ;;  %v4837_v40 = vmul.f32 %v8989_v54, %v8989_v54 }
0x1903   : > { %v8994_v9 = vsub.f32 %v8952_v43, %v4823_v38  ;;  %v8997_v41 = vsub.f32 %v8957_v20, %v4822_v39  ;;  %v4845_v3 = vsel %vm1386_vm1, %v4837_v40, 0.0  ;;  %v5807_v38 = vld [vmem:[#allocation6 + $0x7] ss:$0 sm:$0xff] }
0x1904   : > { %v4808_v24 = vpop.xlane.xlu0 %4807  ;;  %4846 = vadd.xlane.f32.xlu1 %v4845_v3 }
0x1905   : > { %v4824_v57 = vmul.f32 0.03125, %v4808_v24  ;;  %v4839_v59 = vmul.f32 %v8994_v9, %v8994_v9  ;;  %v4838_v1 = vmul.f32 %v8997_v41, %v8997_v41 }
0x1907   : > { %v9005_v58 = vsub.f32 %v8960_v63, %v4824_v57  ;;  %v4851_v45 = vsel %vm1386_vm1, %v4839_v59, 0.0  ;;  %v4848_v22 = vsel %vm1386_vm1, %v4838_v1, 0.0 }
0x1908   : > { %4852 = vadd.xlane.f32.xlu1 %v4851_v45  ;;  %4849 = vadd.xlane.f32.xlu0 %v4848_v22 }
0x1909   : > { %v4840_v60 = vmul.f32 %v9005_v58, %v9005_v58 }
0x190b   : > { %v4854_v51 = vsel %vm1386_vm1, %v4840_v60, 0.0 }
0x190c   : > { %4855 = vadd.xlane.f32.xlu0 %v4854_v51  ;;  %v5808_v51 = vld [vmem:[#allocation6 + $0x8] ss:$0 sm:$0xff] }
0x190e   : > { %v4811_v6 = vpop.xlane.xlu1 %4810 }
0x190f   : > { %v4825_v48 = vmul.f32 0.03125, %v4811_v6 }
0x1911   : > { %v9013_v62 = vsub.f32 %v8969_v28, %v4825_v48 }
0x1912   : > { %v4814_v26 = vpop.xlane.xlu0 %4813  ;;  %v4817_v37 = vpop.xlane.xlu1 %4816 }
0x1913   : > { %v4826_v29 = vmul.f32 0.03125, %v4814_v26  ;;  %v4827_v8 = vmul.f32 0.03125, %v4817_v37  ;;  %v4841_v14 = vmul.f32 %v9013_v62, %v9013_v62 }
0x1915   : > { %v9018_v55 = vsub.f32 %v8977_v35, %v4826_v29  ;;  %v9021_v18 = vsub.f32 %v8972_v47, %v4827_v8  ;;  %v4857_v31 = vsel %vm1386_vm1, %v4841_v14, 0.0 }
0x1916   : > { %v4820_v52 = vpop.xlane.xlu0 %4819  ;;  %4858 = vadd.xlane.f32.xlu1 %v4857_v31 }
0x1917   : > { %v4828_v61 = vmul.f32 0.03125, %v4820_v52  ;;  %v4842_v34 = vmul.f32 %v9018_v55, %v9018_v55  ;;  %v4843_v4 = vmul.f32 %v9021_v18, %v9021_v18 }
0x1919   : > { %v9029_v0 = vsub.f32 %v8980_v13, %v4828_v61  ;;  %v4860_v7 = vsel %vm1386_vm1, %v4842_v34, 0.0  ;;  %v4863_v2 = vsel %vm1386_vm1, %v4843_v4, 0.0 }
0x191a   : > { %4861 = vadd.xlane.f32.xlu0 %v4860_v7  ;;  %4864 = vadd.xlane.f32.xlu1 %v4863_v2 }
0x191b   : > { %v4844_v53 = vmul.f32 %v9029_v0, %v9029_v0 }
0x191d   : > { %v4866_v27 = vsel %vm1386_vm1, %v4844_v53, 0.0 }
0x191e   : > { %4867 = vadd.xlane.f32.xlu0 %v4866_v27 }
0x198d   : > { %v4847_v12 = vpop.xlane.xlu1 %4846 }
0x198e   : > { %v4869_v25 = vmul.f32 0.03125, %v4847_v12 }
0x1990   : > { %v4877_v23 = vadd.f32 1e-05, %v4869_v25 }
0x1991   : > { %v4850_v36 = vpop.xlane.xlu0 %4849  ;;  %v4853_v17 = vpop.xlane.xlu1 %4852 }
0x1992   : > { %6967 = vrsqrt.f32 %v4877_v23  ;;  %v4870_v44 = vmul.f32 0.03125, %v4850_v36  ;;  %v4871_v10 = vmul.f32 0.03125, %v4853_v17 }
0x1994   : > { %v4878_v11 = vadd.f32 1e-05, %v4870_v44  ;;  %v4879_v42 = vadd.f32 1e-05, %v4871_v10 }
0x1995   : > { %v4856_v50 = vpop.xlane.xlu0 %4855 }
0x1996   : > { %6969 = vrsqrt.f32 %v4878_v11  ;;  %v4872_v33 = vmul.f32 0.03125, %v4856_v50  ;;  %v6654_v50 = vld [vmem:[%s9312_s16 + $0x20] sm:$0xff]  }
0x1997   : > { %6971 = vrsqrt.f32 %v4879_v42 }
0x1998   : > { %v4880_v5 = vadd.f32 1e-05, %v4872_v33  ;;  %v6655_v33 = vld [vmem:[%s9312_s16 + $0x18] sm:$0xff]  }
0x199a   : > { %6973 = vrsqrt.f32 %v4880_v5  ;;  %v6656_v5 = vld [vmem:[%s9312_s16 + $0x10] sm:$0xff]  }
0x199f   : > { %v6968_v46 = vpop.eup %6967  ;;  %v4859_v30 = vpop.xlane.xlu1 %4858 }
0x19a0   : > { %v4893_v19 = vmul.f32 %v6968_v46, %v8989_v54  ;;  %v4873_v39 = vmul.f32 0.03125, %v4859_v30  ;;  %v6657_v46 = vld [vmem:[%s9312_s16 + $0x8] sm:$0xff]   ;;  %v4937_v30 = vlaneseq }
0x19a2   : > { %v4881_v3 = vadd.f32 1e-05, %v4873_v39  ;;  %v4906_v24 = vmul.f32 %v5807_v38, %v4893_v19  ;;  %v6658_v19 = vld [vmem:[%s9312_s16] sm:$0xff]  }
0x19a3   : > { %v6970_v40 = vpop.eup %6969  ;;  %v4862_v59 = vpop.xlane.xlu0 %4861 }
0x19a4   : > { %v4894_v57 = vmul.f32 %v6970_v40, %v8997_v41  ;;  %v4865_v1 = vpop.xlane.xlu1 %4864  ;;  %v6972_v45 = vpop.eup %6971  ;;  %6975 = vrsqrt.f32 %v4881_v3  ;;  %v4874_v22 = vmul.f32 0.03125, %v4862_v59  ;;  %v4919_v29 = vadd.f32 %v5808_v51, %v4906_v24  ;;  %v4935_v40 = vld [vmem:[%s9366_s17] sm:$0x3]  ;;  %s7342_s17 = smov [#allocation18]  }
0x19a5   : > { %v4875_v60 = vmul.f32 0.03125, %v4865_v1  ;;  %v4895_v14 = vmul.f32 %v6972_v45, %v8994_v9  ;;  %s7239_s0 = sshll.u32 %s7342_s17, 4  ;;  %s7240_s0 = int_to_ptr.vmem [resolvable:$false] %s7239_s0 }
0x19a6   : > { %v4907_v6 = vmul.f32 %v5807_v38, %v4894_v57  ;;  %v4882_v26 = vadd.f32 1e-05, %v4874_v22  ;;  %s7241_s21 = scalar_lea.vmem %s7240_s0, 2048  ;;  %p7242_p1 = scmp.lt.s32.totalorder %s9250_s8, %s7240_s0 }
0x19a7   : > { %v6974_v48 = vpop.eup %6973  ;;  %v4883_v37 = vadd.f32 1e-05, %v4875_v60  ;;  %v4868_v54 = vpop.xlane.xlu0 %4867  ;;  %v4908_v4 = vmul.f32 %v5807_v38, %v4895_v14 }
0x19a8   : > { %v4920_v8 = vadd.f32 %v5808_v51, %v4907_v6  ;;  %v4896_v31 = vmul.f32 %v6974_v48, %v9005_v58  ;;  %6977 = vrsqrt.f32 %v4882_v26  ;;  %v4876_v41 = vmul.f32 0.03125, %v4868_v54 }
0x19a9   : > { %6979 = vrsqrt.f32 %v4883_v37  ;;  %v4921_v2 = vadd.f32 %v5808_v51, %v4908_v4 }
0x19aa   : > { %v4927_v52 = vpack.c.bf16 %v4920_v8, %v4919_v29  ;;  %v4909_v61 = vmul.f32 %v5807_v38, %v4896_v31  ;;  %v4884_v34 = vadd.f32 1e-05, %v4876_v41 }
0x19ac   : > { %5813 = vmatmul.mubr.msk.bf16.vlgmr.msra.gmra.mxu1 %vm1386_vm1, %v4927_v52  ;;  %6981 = vrsqrt.f32 %v4884_v34  ;;  %v4922_v7 = vadd.f32 %v5808_v51, %v4909_v61 }
0x19ad   : > { %5021 = vmatprep.mubr.bf16.mxu1 %v7330_v56 }
0x19ae   : > { %v4928_v27 = vpack.c.bf16 %v4922_v7, %v4921_v2 }
0x19b1   : > { %v6976_v53 = vpop.eup %6975 }
0x19b2   : > { %v4897_v9 = vmul.f32 %v6976_v53, %v9013_v62 }
0x19b4   : > { %5814 = vmatmul.mubr.msk.bf16.gmra.mxu1 %vm1386_vm1, %v4928_v27  ;;  %v4910_v16 = vmul.f32 %v5807_v38, %v4897_v9 }
0x19b5   : > { %5031 = vmatprep.mubr.bf16.mxu1 %v7330_v56  ;;  %v6978_v58 = vpop.eup %6977 }
0x19b6   : > { %v4898_v49 = vmul.f32 %v6978_v58, %v9018_v55  ;;  %v6980_v32 = vpop.eup %6979  ;;  %v4923_v36 = vadd.f32 %v5808_v51, %v4910_v16 }
0x19b7   : > { %v4899_v25 = vmul.f32 %v6980_v32, %v9021_v18  ;;  %v6651_v18 = vld [vmem:[%s9312_s16 + $0x38] sm:$0xff]  }
0x19b8   : > { %v4911_v15 = vmul.f32 %v5807_v38, %v4898_v49  ;;  %6409 = vmatprep.subr.bf16.mxu0 %v6651_v18 }
0x19b9   : > { %v6982_v12 = vpop.eup %6981  ;;  %v4912_v62 = vmul.f32 %v5807_v38, %v4899_v25  ;;  %6410 = vmatpush3.bf16.msra.mxu0 %v6651_v18 }
0x19ba   : > { %v4900_v23 = vmul.f32 %v6982_v12, %v9029_v0  ;;  %v4924_v17 = vadd.f32 %v5808_v51, %v4911_v15  ;;  %v6652_v0 = vld [vmem:[%s9312_s16 + $0x30] sm:$0xff]  }
0x19bb   : > { %v4925_v42 = vadd.f32 %v5808_v51, %v4912_v62  ;;  %6411 = vmatprep.subr.bf16.mxu0 %v6652_v0 }
0x19bc   : > { %v4929_v44 = vpack.c.bf16 %v4924_v17, %v4923_v36  ;;  %v4913_v10 = vmul.f32 %v5807_v38, %v4900_v23  ;;  %v4938_v38 = vshrl.u32 %v4937_v30, 7 }
0x19bd   : > { %6412 = vmatpush3.bf16.msra.mxu0 %v6652_v0 }
0x19be   : > { %5815 = vmatmul.mubr.msk.bf16.gmra.mxu1 %vm1386_vm1, %v4929_v44  ;;  %v4926_v11 = vadd.f32 %v5808_v51, %v4913_v10  ;;  %v4943_v39 = vsub.s32 1, %v4938_v38 }
0x19bf   : > { %5041 = vmatprep.mubr.bf16.mxu1 %v7330_v56  ;;  %v6653_v56 = vld [vmem:[%s9312_s16 + $0x28] sm:$0xff]  }
0x19c0   : > { %v4930_v55 = vpack.c.bf16 %v4926_v11, %v4925_v42  ;;  %6413 = vmatprep.subr.bf16.mxu0 %v6653_v56  ;;  %v9090_v3 = vrot.slane %v4935_v40, %v4943_v39  ;;  %v4939_v11 = vsub.s32 0, %v4938_v38 }
0x19c1   : > { %6414 = vmatpush3.bf16.msra.mxu0 %v6653_v56 }
0x19c2   : > { %6415 = vmatprep.subr.bf16.mxu0 %v6654_v50 }
0x19c5   : > { %6416 = vmatpush3.bf16.msra.mxu0 %v6654_v50 }
0x19c6   : > { %5816 = vmatmul.mubr.msk.bf16.gmra.mxu1 %vm1386_vm1, %v4930_v55  ;;  %6417 = vmatprep.subr.bf16.mxu0 %v6655_v33 }
0x19c9   : > { %6418 = vmatpush3.bf16.msra.mxu0 %v6655_v33 }
0x19ca   : > { %6419 = vmatprep.subr.bf16.mxu0 %v6656_v5 }
0x19cd   : > { %6420 = vmatpush3.bf16.msra.mxu0 %v6656_v5 }
0x19ce   : > { %6421 = vmatprep.subr.bf16.mxu0 %v6657_v46 }
0x19d1   : > { %6422 = vmatpush3.bf16.msra.mxu0 %v6657_v46 }
0x19d2   : > { %6423 = vmatprep.subr.bf16.mxu0 %v6658_v19 }
0x19d5   : > { %6424 = vmatpush3.bf16.msra.mxu0 %v6658_v19  ;;  %v9135_v19 = vrot.slane %v4935_v40, %v4939_v11 }
0x1a6c   : > { %v9092_v24 = vpop.f32.mrf.mxu1 }
0x1a6d   : > { %v5014_v40 = vadd.f32 %v9092_v24, %v9135_v19 }
0x1a6e   : > { %v5015_v57 = vpop.f32.mrf.mxu1 }
0x1a6f   : > { %v5016_v59 = vadd.f32 %v5015_v57, %v9090_v3 }
0x1a70   : > { %v9095_v1 = vpop.f32.mrf.mxu1 }
0x1a71   : > { %v5060_v45 = vmul.f32 0.044715, %v5016_v59  ;;  %v5052_v38 = vmul.f32 0.5, %v5016_v59 }
0x1a72   : > { %v5019_v22 = vpop.f32.mrf.mxu1 }
0x1a73   : > { %v5068_v60 = vmul.f32 %v5060_v45, %v5016_v59  ;;  %v5020_v51 = vadd.f32 %v5019_v22, %v9090_v3 }
0x1a74   : > { %v9098_v6 = vpop.f32.mrf.mxu1 }
0x1a75   : > { %v5076_v48 = vmul.f32 %v5068_v60, %v5016_v59  ;;  %v5061_v26 = vmul.f32 0.044715, %v5020_v51 }
0x1a76   : > { %v5025_v37 = vpop.f32.mrf.mxu1 }
0x1a77   : > { %v5084_v54 = vadd.f32 %v5076_v48, %v5016_v59  ;;  %v5069_v29 = vmul.f32 %v5061_v26, %v5020_v51  ;;  %v9101_v8 = vadd.f32 %v5025_v37, %v9090_v3  ;;  %v5053_v48 = vmul.f32 0.5, %v5020_v51 }
0x1a78   : > { %v9103_v14 = vpop.f32.mrf.mxu1  ;;  %v5018_v59 = vadd.f32 %v9095_v1, %v9135_v19 }
0x1a79   : > { %v5092_v31 = vmul.f32 0.7978846, %v5084_v54  ;;  %v5077_v41 = vmul.f32 %v5069_v29, %v5020_v51  ;;  %v5062_v52 = vmul.f32 0.044715, %v9101_v8 }
0x1a7a   : > { %v5029_v61 = vpop.f32.mrf.mxu1 }
0x1a7b   : > { %v5085_v34 = vadd.f32 %v5077_v41, %v5020_v51  ;;  %v5070_v4 = vmul.f32 %v5062_v52, %v9101_v8  ;;  %v9108_v7 = vadd.f32 %v5029_v61, %v9090_v3  ;;  %6983 = vtanh.f32 %v5092_v31 }
0x1a7d   : > { %v5093_v2 = vmul.f32 0.7978846, %v5085_v34  ;;  %v5078_v53 = vmul.f32 %v5070_v4, %v9101_v8  ;;  %v5063_v27 = vmul.f32 0.044715, %v9108_v7  ;;  %v5055_v1 = vmul.f32 0.5, %v9108_v7 }
0x1a7e   : > { %v9114_v49 = vpop.f32.mrf.mxu1 }
0x1a7f   : > { %v5086_v9 = vadd.f32 %v5078_v53, %v9101_v8  ;;  %v5071_v58 = vmul.f32 %v5063_v27, %v9108_v7  ;;  %6985 = vtanh.f32 %v5093_v2 }
0x1a80   : > { %v5035_v15 = vpop.f32.mrf.mxu1 }
0x1a81   : > { %v5094_v16 = vmul.f32 0.7978846, %v5086_v9  ;;  %v5079_v32 = vmul.f32 %v5071_v58, %v9108_v7  ;;  %v9118_v12 = vadd.f32 %v5035_v15, %v9090_v3 }
0x1a82   : > { %v9121_v23 = vpop.f32.mrf.mxu1 }
0x1a83   : > { %6987 = vtanh.f32 %v5094_v16  ;;  %v5087_v25 = vadd.f32 %v5079_v32, %v9108_v7  ;;  %v5064_v36 = vmul.f32 0.044715, %v9118_v12  ;;  %v5056_v7 = vmul.f32 0.5, %v9118_v12 }
0x1a84   : > { %v5039_v44 = vpop.f32.mrf.mxu1 }
0x1a85   : > { %v5095_v17 = vmul.f32 0.7978846, %v5087_v25  ;;  %v5072_v10 = vmul.f32 %v5064_v36, %v9118_v12  ;;  %v9126_v62 = vadd.f32 %v5039_v44, %v9090_v3  ;;  %v5028_v44 = vadd.f32 %v9103_v14, %v9135_v19 }
0x1a86   : > { %v9128_v42 = vpop.f32.mrf.mxu1  ;;  %v5038_v14 = vadd.f32 %v9121_v23, %v9135_v19 }
0x1a87   : > { %6989 = vtanh.f32 %v5095_v17  ;;  %v5080_v18 = vmul.f32 %v5072_v10, %v9118_v12  ;;  %v5065_v0 = vmul.f32 0.044715, %v9126_v62  ;;  %v5024_v17 = vadd.f32 %v9098_v6, %v9135_v19 }
0x1a88   : > { %v6984_v55 = vpop.eup %6983  ;;  %v5045_v56 = vpop.f32.mrf.mxu1  ;;  %v5034_v6 = vadd.f32 %v9114_v49, %v9135_v19 }
0x1a89   : > { %v5108_v50 = vadd.f32 1.0, %v6984_v55  ;;  %v5088_v33 = vadd.f32 %v5080_v18, %v9118_v12  ;;  %v5073_v5 = vmul.f32 %v5065_v0, %v9126_v62  ;;  %v5046_v46 = vadd.f32 %v5045_v56, %v9090_v3 }
0x1a8a   : > { %v9137_v30 = vpop.f32.mrf.mxu1 }
0x1a8b   : > { %v5096_v57 = vmul.f32 0.7978846, %v5088_v33  ;;  %v5081_v45 = vmul.f32 %v5073_v5, %v9126_v62  ;;  %v5066_v22 = vmul.f32 0.044715, %v5046_v46  ;;  %v5116_v37 = vmul.f32 %v5108_v50, %v5052_v38 }
0x1a8c   : > { %v6986_v39 = vpop.eup %6985  ;;  %v5049_v60 = vpop.f32.mrf.mxu1  ;;  %v5057_v33 = vmul.f32 0.5, %v9126_v62  ;;  %v5048_v49 = vadd.f32 %v9137_v30, %v9135_v19  ;;  %v5293_v30 = vld [vmem:[%s9365_s26 + $0x18] sm:$0xff] }
0x1a8d   : > { %v5109_v26 = vadd.f32 1.0, %v6986_v39  ;;  %v5089_v54 = vadd.f32 %v5081_v45, %v9126_v62  ;;  %v5074_v29 = vmul.f32 %v5066_v22, %v5046_v46  ;;  %v5050_v31 = vadd.f32 %v5049_v60, %v9090_v3 }
0x1a8e   : > { %6991 = vtanh.f32 %v5096_v57  ;;  %v5124_v2 = vmul.f32 %v5116_v37, %v5014_v40  ;;  %v5054_v3 = vmul.f32 0.5, %v9101_v8 }
0x1a8f   : > { %v5117_v41 = vmul.f32 %v5109_v26, %v5053_v48  ;;  %v5097_v61 = vmul.f32 0.7978846, %v5089_v54  ;;  %v5082_v34 = vmul.f32 %v5074_v29, %v5046_v46  ;;  %v5067_v4 = vmul.f32 0.044715, %v5050_v31 }
0x1a90   : > { %v6988_v52 = vpop.eup %6987  ;;  %v5058_v48 = vmul.f32 0.5, %v5046_v46  ;;  %v5059_v12 = vmul.f32 0.5, %v5050_v31  ;;  %v5044_v29 = vadd.f32 %v9128_v42, %v9135_v19  ;;  %v5291_v42 = vld [vmem:[%s9365_s26 + $0x8] sm:$0xff]  ;;  %v5292_v19 = vld [vmem:[%s9365_s26 + $0x10] sm:$0xff] }
0x1a91   : > { %v5110_v51 = vadd.f32 1.0, %v6988_v52  ;;  %v5125_v53 = vmul.f32 %v5117_v41, %v5018_v59  ;;  %v5090_v27 = vadd.f32 %v5082_v34, %v5046_v46  ;;  %v5075_v9 = vmul.f32 %v5067_v4, %v5050_v31  ;;  %v6659_v46 = vld [vmem:[%s9367_s2] sm:$0xff]   ;;  %v5295_v34 = vld [vmem:[%s9365_s26 + $0x28] sm:$0xff]  ;;  %v5296_v4 = vld [vmem:[%s9365_s26 + $0x30] sm:$0xff] }
0x1a92   : > { %6993 = vtanh.f32 %v5097_v61  ;;  %6441 = vmatprep.mubr.msk.bf16.mxu1 %vm1386_vm1, %v6659_v46  ;;  %v7341_v52 = vmov 2   ;;  %v5294_v61 = vld [vmem:[%s9365_s26 + $0x20] sm:$0xff] }
0x1a93   : > { %v5132_v58 = vpack.c.bf16 %v5125_v53, %v5124_v2  ;;  %v5098_v32 = vmul.f32 0.7978846, %v5090_v27  ;;  %v5083_v24 = vmul.f32 %v5075_v9, %v5050_v31  ;;  %v5118_v15 = vmul.f32 %v5110_v51, %v5054_v3  ;;  %6625 = vset.pattern.permute.xlu1 %v7341_v52  ;;  %6626 = vset.pattern.permute.xlu0 %v7341_v52  ;;  %v5297_v51 = vld [vmem:[%s9365_s26 + $0x38] sm:$0xff] }
0x1a94   : > { %v6990_v16 = vpop.eup %6989  ;;  %5305 = vperm.xlu0 %6626, %v5291_v42  }
0x1a95   : > { %v5111_v25 = vadd.f32 1.0, %v6990_v16  ;;  %6425 = vmatprep.mubr.bf16.mxu0 %v5132_v58  ;;  %6995 = vtanh.f32 %v5098_v32  ;;  %v5091_v36 = vadd.f32 %v5083_v24, %v5050_v31  ;;  %v5126_v8 = vmul.f32 %v5118_v15, %v5024_v17  ;;  %v5290_v31 = vld [vmem:[%s9365_s26] sm:$0xff]  ;;  %v5817_v58 = vld [vmem:[#allocation6 + $0x9] ss:$0 sm:$0xff] }
0x1a96   : > { %5300 = vperm.xlu1 %6625, %v5290_v31   ;;  %v5448_v31 = vld [vmem:[%s7667_s20 + $0x8] sm:$0xff] }
0x1a97   : > { %v5119_v10 = vmul.f32 %v5111_v25, %v5055_v1  ;;  %v5099_v11 = vmul.f32 0.7978846, %v5091_v36 }
0x1a99   : > { %v5127_v55 = vmul.f32 %v5119_v10, %v5028_v44  ;;  %6997 = vtanh.f32 %v5099_v11 }
0x1a9a   : > { %5310 = vperm.xlu1 %6625, %v5292_v19  }
0x1a9b   : > { %v6992_v18 = vpop.eup %6991  ;;  %v5133_v0 = vpack.c.bf16 %v5127_v55, %v5126_v8 }
0x1a9c   : > { %v5112_v56 = vadd.f32 1.0, %v6992_v18 }
0x1a9d   : > { %6426 = vmatmul.mubr.bf16.vlgmr.msra.gmra.mxu0 %v5133_v0 }
0x1a9e   : > { %v5120_v38 = vmul.f32 %v5112_v56, %v5056_v7  ;;  %5315 = vperm.xlu1 %6625, %v5293_v30   ;;  %v5453_v30 = vld [vmem:[%s7667_s20 + $0x30] sm:$0xff] }
0x1a9f   : > { %v6994_v50 = vpop.eup %6993 }
0x1aa0   : > { %v5113_v5 = vadd.f32 1.0, %v6994_v50  ;;  %v5128_v45 = vmul.f32 %v5120_v38, %v5034_v6 }
0x1aa2   : > { %v5121_v39 = vmul.f32 %v5113_v5, %v5057_v33  ;;  %v6996_v57 = vpop.eup %6995  ;;  %5320 = vperm.xlu1 %6625, %v5294_v61  }
0x1aa3   : > { %v5114_v60 = vadd.f32 1.0, %v6996_v57 }
0x1aa4   : > { %v5129_v22 = vmul.f32 %v5121_v39, %v5038_v14 }
0x1aa5   : > { %v5122_v62 = vmul.f32 %v5114_v60, %v5058_v48  ;;  %v5449_v48 = vld [vmem:[%s7667_s20 + $0x10] sm:$0xff] }
0x1aa6   : > { %v5134_v26 = vpack.c.bf16 %v5129_v22, %v5128_v45  ;;  %v6998_v37 = vpop.eup %6997  ;;  %5325 = vperm.xlu1 %6625, %v5295_v34  }
0x1aa7   : > { %v5115_v54 = vadd.f32 1.0, %v6998_v37  ;;  %v5130_v23 = vmul.f32 %v5122_v62, %v5044_v29 }
0x1aa8   : > { %6429 = vmatprep.mubr.bf16.mxu0 %v5134_v26 }
0x1aa9   : > { %v5123_v40 = vmul.f32 %v5115_v54, %v5059_v12  ;;  %v5447_v12 = vld [vmem:[%s7667_s20] sm:$0xff] }
0x1aaa   : > { %5330 = vperm.xlu1 %6625, %v5296_v4  }
0x1aab   : > { %v5131_v59 = vmul.f32 %v5123_v40, %v5048_v49  ;;  %v5450_v49 = vld [vmem:[%s7667_s20 + $0x18] sm:$0xff] }
0x1aad   : > { %v5135_v41 = vpack.c.bf16 %v5131_v59, %v5130_v23 }
0x1aae   : > { %5335 = vperm.xlu1 %6625, %v5297_v51   ;;  %v5451_v51 = vld [vmem:[%s7667_s20 + $0x20] sm:$0xff] }
0x1aaf   : > { %6430 = vmatmul.mubr.bf16.gmra.mxu0 %v5135_v41 }
0x1b0f   : > { %v5306_v40 = vpop.permute.xlu0 %5305 }
0x1b11   : > { %v5301_v14 = vpop.permute.xlu1 %5300 }
0x1b15   : > { %v5311_v39 = vpop.permute.xlu1 %5310 }
0x1b19   : > { %v5316_v57 = vpop.permute.xlu1 %5315 }
0x1b1d   : > { %v5321_v45 = vpop.permute.xlu1 %5320 }
0x1b21   : > { %v5326_v22 = vpop.permute.xlu1 %5325 }
0x1b25   : > { %v5331_v41 = vpop.permute.xlu1 %5330 }
0x1b5d   : > { %v6427_v2 = vpop.f32.mrf.mxu0 }
0x1b5e   : > { %v5248_v56 = vadd.f32 %v6427_v2, %v5817_v58 }
0x1b5f   : > { %v5239_v53 = vpop.f32.mrf.mxu0 }
0x1b61   : > { %v6428_v27 = vpop.f32.mrf.mxu0 }
0x1b62   : > { %v5251_v55 = vadd.f32 %v6428_v27, %v5817_v58  ;;  %v5336_v27 = vpop.permute.xlu1 %5335 }
0x1b63   : > { %v5242_v9 = vpop.f32.mrf.mxu0 }
0x1b64   : > { %v5243_v50 = vadd.f32 %v5817_v58, %v5242_v9 }
0x1b66   : > { %v5271_v33 = vadd.f32 %v5243_v50, %v8957_v20  ;;  %v6662_v20 = vld [vmem:[%s9367_s2 + $0x18] sm:$0xff]  }
0x1b6f   : > { %v6431_v3 = vpop.f32.mrf.mxu0 }
0x1b70   : > { %v5264_v32 = vadd.f32 %v6431_v3, %v5817_v58  ;;  %v5454_v3 = vld [vmem:[%s7667_s20 + $0x38] sm:$0xff] }
0x1b71   : > { %v5255_v16 = vpop.f32.mrf.mxu0 }
0x1b72   : > { %v5256_v15 = vadd.f32 %v5817_v58, %v5255_v16  ;;  %v5276_v36 = vadd.f32 %v5264_v32, %v8972_v47  ;;  %v5273_v47 = vadd.f32 %v5251_v55, %v8960_v63  ;;  %v6660_v63 = vld [vmem:[%s9367_s2 + $0x8] sm:$0xff]  }
0x1b73   : > { %v6432_v24 = vpop.f32.mrf.mxu0 }
0x1b74   : > { %v5267_v1 = vadd.f32 %v6432_v24, %v5817_v58  ;;  %v5274_v10 = vadd.f32 %v5256_v15, %v8969_v28  ;;  %v5452_v24 = vld [vmem:[%s7667_s20 + $0x28] sm:$0xff]  ;;  %s7235_s20 = scalar_lea.vmem %s9250_s8, 1024 }
0x1b75   : > { %v5258_v25 = vpop.f32.mrf.mxu0  ;;  %p7236_p5 = scmp.ne.s32.totalorder %s9250_s8, %s7235_s20  ;;  %p7243_p3 = scmp.lt.s32.totalorder %s7241_s21, %s7235_s20 }
0x1b76   : > { %v5277_v17 = vadd.f32 %v5267_v1, %v8980_v13  ;;  %v5259_v44 = vadd.f32 %v5817_v58, %v5258_v25  ;;  %v5272_v13 = vadd.f32 %v5248_v56, %v8952_v43 }
0x1b77   : > { %p7237_p12 = pnand %p7236_p5, %p9369_p9  ;;  %p7244_p4 = por %p7243_p3, %p7242_p1 }
0x1b78   : > { %v5289_v11 = vpack.c.bf16 %v5277_v17, %v5276_v36  ;;  %v5275_v8 = vadd.f32 %v5259_v44, %v8977_v35  ;;  %v5287_v7 = vpack.c.bf16 %v5273_v47, %v5272_v13  ;;  %v5240_v35 = vadd.f32 %v5817_v58, %v5239_v53 }
0x1b79   : > { %p7238_p13 = pneg %p7237_p12 }
0x1b7a   : > { %v5288_v18 = vpack.c.bf16 %v5275_v8, %v5274_v10  ;;  %6473 = vmatprep.subr.msk.bf16.mxu1 %vm1386_vm1, %v5289_v11  ;;  %v5380_v0 = vsel %vm1386_vm1, %v5289_v11, 0  ;;  %v5270_v5 = vadd.f32 %v5240_v35, %v8949_v21  ;;  %v5374_v6 = vsel %vm1386_vm1, %v5287_v7, 0  ;;  %v6661_v21 = vld [vmem:[%s9367_s2 + $0x10] sm:$0xff]  }
0x1b7b   : > { %6434 = vmatpush3.bf16.xpose.msra.mxu1 %v5380_v0  ;;  %p7245_p6 = pnand %p7244_p4, %p7238_p13 }
0x1b7c   : > { %6474 = vmatprep.subr.msk.bf16.mxu1 %vm1386_vm1, %v5288_v18  ;;  %v5377_v28 = vsel %vm1386_vm1, %v5288_v18, 0  ;;  %v5286_v38 = vpack.c.bf16 %v5271_v33, %v5270_v5 }
0x1b7e   : > { %v5371_v43 = vsel %vm1386_vm1, %v5286_v38, 0 }
0x1b83   : > { %6436 = vmatpush3.bf16.xpose.msra.mxu1 %v5377_v28 }
0x1b84   : > { %6475 = vmatprep.subr.msk.bf16.mxu1 %vm1386_vm1, %v5287_v7 }
0x1b8b   : > { %6438 = vmatpush3.bf16.xpose.msra.mxu1 %v5374_v6 }
0x1b8c   : > { %6476 = vmatprep.subr.msk.bf16.mxu1 %vm1386_vm1, %v5286_v38 }
0x1b93   : > { %6440 = vmatpush3.bf16.xpose.msra.mxu1 %v5371_v43 }
0x1b9a   : > { %6442 = vmatmul.mubr.msk.bf16.vlgmr.msra.gmra.mxu1 %vm1386_vm1, %v6660_v63 }
0x1b9b   : > { %6445 = vmatprep.mubr.msk.bf16.mxu1 %vm1386_vm1, %v6661_v21 }
0x1ba2   : > { %6446 = vmatmul.mubr.msk.bf16.gmra.mxu1 %vm1386_vm1, %v6662_v20 }
0x1c5a   : > { %v6443_v60 = vpop.f32.mrf.mxu1 }
0x1c5b   : > { %v5425_v26 = vadd.f32 %v6443_v60, %v5311_v39 }
0x1c5c   : > { %v5416_v37 = vpop.f32.mrf.mxu1 }
0x1c5d   : > { %v5457_v54 = vadd.f32 %v5449_v48, %v5425_v26  ;;  %v5417_v62 = vadd.f32 %v5416_v37, %v5301_v14 }
0x1c5e   : > { %v6444_v29 = vpop.f32.mrf.mxu1 }
0x1c5f   : > { %5465 = vst.msk [vmem:[%s9222_s24 + $0x10] sm:$0xff] %vm736_vm0, %v5457_v54  ;;  %v5455_v23 = vadd.f32 %v5447_v12, %v5417_v62  ;;  %v5428_v59 = vadd.f32 %v6444_v29, %v5316_v57 }
0x1c60   : > { %v5419_v46 = vpop.f32.mrf.mxu1 }
0x1c61   : > { %5463 = vst.msk [vmem:[%s9222_s24] sm:$0xff] %vm736_vm0, %v5455_v23  ;;  %v5458_v52 = vadd.f32 %v5450_v49, %v5428_v59  ;;  %v5420_v42 = vadd.f32 %v5419_v46, %v5306_v40 }
0x1c62   : > { %v6447_v19 = vpop.f32.mrf.mxu1 }
0x1c63   : > { %5466 = vst.msk [vmem:[%s9222_s24 + $0x18] sm:$0xff] %vm736_vm0, %v5458_v52  ;;  %v5441_v61 = vadd.f32 %v6447_v19, %v5331_v41  ;;  %v5456_v34 = vadd.f32 %v5448_v31, %v5420_v42 }
0x1c64   : > { %v5432_v4 = vpop.f32.mrf.mxu1 }
0x1c65   : > { %v5461_v2 = vadd.f32 %v5453_v30, %v5441_v61  ;;  %v5433_v53 = vadd.f32 %v5432_v4, %v5321_v45  ;;  %5464 = vst.msk [vmem:[%s9222_s24 + $0x8] sm:$0xff] %vm736_vm0, %v5456_v34 }
0x1c66   : > { %v6448_v9 = vpop.f32.mrf.mxu1 }
0x1c67   : > { %5469 = vst.msk [vmem:[%s9222_s24 + $0x30] sm:$0xff] %vm736_vm0, %v5461_v2  ;;  %v5459_v58 = vadd.f32 %v5451_v51, %v5433_v53  ;;  %v5444_v16 = vadd.f32 %v6448_v9, %v5336_v27 }
0x1c68   : > { %v5435_v32 = vpop.f32.mrf.mxu1 }
0x1c69   : > { %5467 = vst.msk [vmem:[%s9222_s24 + $0x20] sm:$0xff] %vm736_vm0, %v5459_v58  ;;  %v5462_v15 = vadd.f32 %v5454_v3, %v5444_v16  ;;  %v5436_v1 = vadd.f32 %v5435_v32, %v5326_v22 }
0x1c6b   : > { %5470 = vst.msk [vmem:[%s9222_s24 + $0x38] sm:$0xff] %vm736_vm0, %v5462_v15  ;;  %v5460_v25 = vadd.f32 %v5452_v24, %v5436_v1 }
0x1c6d   : > { %5468 = vst.msk [vmem:[%s9222_s24 + $0x28] sm:$0xff] %vm736_vm0, %v5460_v25 }
0x1c6e   : > { %7248 = shalt.err (!%p7245_p6)
}
0x1c6f   : > { %s7249_s19 = scalar_lea.hbm %s9246_s15, 1024  ;;  %s7253_s11 = scalar_lea.hbm %s9368_s13, 2048 }
0x1c70   : > { %p7250_p8 = scmp.ne.s32.totalorder %s9246_s15, %s7249_s19  ;;  %p7254_p11 = scmp.lt.s32.totalorder %s9246_s15, %s9368_s13 }
0x1c71   : > { %p7255_p2 = scmp.lt.s32.totalorder %s7253_s11, %s7249_s19 }
0x1c72   : > { %p7251_p10 = pnand %p7250_p8, %p9369_p9 }
0x1c73   : > { %p7256_p0 = por %p7255_p2, %p7254_p11 }
0x1c74   : > { %p7252_p7 = pneg %p7251_p10 }
0x1c76   : > { %p7257_p5 = pnand %p7256_p0, %p7252_p7 }
0x1c78   : > { %7260 = shalt.err (!%p7257_p5)
}
0x1c79   : > { %s7343_s20 = smov 128  }
0x1c7a   : > { %6511 = dma.vmem_to_hbm [thread:$0]  (%p9369_p9), %s9250_s8, 1024, %s9246_s15, %s5472_s1, %s7343_s20, %s7343_s20, %s7336_s6  }
0x1c7b PF: > { %s5500_s0 = sand.u32 1, %s7303_s27   ;;  %p9370_p12 = scmp.ne.s32.totalorder %s9351_s18, 0 }
0x1c7c   : > { %p9371_p13 = scmp.ge.s32.totalorder %s7315_s30, 2  ;;  %s5501_s21 = scalar_lea.sflag [#allocation5], %s5500_s0 }
0x1c7e   : > { %p6543_p1 = pnand %p9371_p13, %p9370_p12 }
0x1c80   : > { %p6544_p3 = pneg %p6543_p1 }
0x1c82   : > { %7298 = dma.done.wait (%p6544_p3), %s5501_s21, 1024  }
0x1c83   : > { %7300 = vsyncadd (%p6544_p3), %s5501_s21, 4294966272  ;;  %p35_p4 = scmp.ge.s32.totalorder %s7573_s25, 4   ;;  %s9372_s27 = smov %s7307_s28 }
0x1c84   : > { %s9373_s28 = smov %s7311_s29  ;;  %s9374_s29 = smov %s7584_s22 }
0x1c85   : > { %s9375_s30 = smov %s7573_s25  ;;  %37 = sbr.rel (!%p35_p4) target bundleno = 24 (0x18), region = 172 }
0x1c8a   :  { %5506 = vsyncpa [#allocation4], 1 }
0x1c8b   :  { %5508 = vsyncpa [#allocation4 + $0x1], 1 }
0x1c8c   :  { %5509 = vsyncpa [#allocation7], 1 }
0x1c8d   :  { %5510 = vsyncpa [#allocation10], 1 }
0x1c8e   :  { %5511 = vsyncpa [#allocation13], 1 }
0x1c8f   :  { %5512 = vsyncpa [#allocation16], 1 }
0x1c90   :  { %5513 = vsyncpa [#allocation5], 1 }
0x1c91   :  { %5515 = vsyncpa [#allocation5 + $0x1], 1 }

// kernel: tpu_custom_call.1
= control target key start
LH: loop header
LB: loop body
LE: loop exit
PB: predicated region body
PF: predicated region fallthrough
CT: control target
= control target key end

     0   :  { %s9296_s0 = inlined_call_operand.vmem [shape: f32[2,64,64], index: 0, kind: input, shape index: {}]   ;;  %s9297_s1 = inlined_call_operand.hbm [shape: bf16[2,8,16], index: 1, kind: input, shape index: {}]   ;;  %s9298_s2 = inlined_call_operand.vmem [shape: f32[64,3], index: 2, kind: input, shape index: {}]   ;;  %s9299_s3 = inlined_call_operand.vmem [shape: f32[64,64], index: 3, kind: input, shape index: {}]   ;;  %s9300_s4 = inlined_call_operand.hbm [shape: f32[10,32], index: 4, kind: input, shape index: {}]   ;;  %s9301_s5 = inlined_call_operand.vmem [shape: bf16[64,32], index: 5, kind: input, shape index: {}]   ;;  %s9302_s6 = inlined_call_operand.hbm [shape: bf16[32,32], index: 6, kind: input, shape index: {}]   ;;  %s9303_s7 = inlined_call_operand.hbm [shape: bf16[32,32], index: 7, kind: input, shape index: {}]   ;;  %s9304_s8 = inlined_call_operand.hbm [shape: bf16[32,32], index: 8, kind: input, shape index: {}]   ;;  %s9305_s9 = inlined_call_operand.hbm [shape: bf16[32,32], index: 9, kind: input, shape index: {}]   ;;  %s9306_s10 = inlined_call_operand.hbm [shape: bf16[32,32], index: 10, kind: input, shape index: {}]   ;;  %s9307_s11 = inlined_call_operand.hbm [shape: bf16[16,32], index: 11, kind: input, shape index: {}]   ;;  %s9308_s12 = inlined_call_operand.vmem [shape: bf16[16,32], index: 12, kind: input, shape index: {}]   ;;  %s9309_s13 = inlined_call_operand.hbm [shape: bf16[32,32], index: 13, kind: input, shape index: {}]   ;;  %s9310_s14 = inlined_call_operand.vmem [shape: bf16[32,256], index: 14, kind: input, shape index: {}]   ;;  %s9311_s15 = inlined_call_operand.vmem [shape: f32[1,256], index: 15, kind: input, shape index: {}]   ;;  %s9312_s16 = inlined_call_operand.vmem [shape: bf16[128,32], index: 16, kind: input, shape index: {}]   ;;  %s9313_s17 = inlined_call_operand.vmem [shape: bf16[64,32], index: 17, kind: input, shape index: {}]   ;;  %s9314_s18 = inlined_call_operand.hbm [shape: f32[2,64,64], index: 18, kind: output, shape index: {}]  }
   0x1   :  { %9323 = sst [smem:[#allocation25_spill]] %s9296_s0 }
   0x2   :  { %9324 = sst [smem:[#allocation26_spill]] %s9297_s1 }
   0x3   :  { %9325 = sst [smem:[#allocation27_spill]] %s9298_s2 }
   0x4   :  { %9326 = sst [smem:[#allocation28_spill]] %s9300_s4 }
   0x5   :  { %9327 = sst [smem:[#allocation29_spill]] %s9302_s6 }
   0x6   :  { %9328 = sst [smem:[#allocation30_spill]] %s9303_s7 }
   0x7   :  { %9329 = sst [smem:[#allocation31_spill]] %s9304_s8 }
   0x8   :  { %9330 = sst [smem:[#allocation32_spill]] %s9305_s9 }
   0x9   :  { %9331 = sst [smem:[#allocation33_spill]] %s9306_s10 }
   0xa   :  { %9332 = sst [smem:[#allocation34_spill]] %s9307_s11 }
   0xb   :  { %9333 = sst [smem:[#allocation35_spill]] %s9309_s13 }
   0xc   :  { %9334 = sst [smem:[#allocation36_spill]] %s9311_s15 }
   0xd   :  { %9335 = sst [smem:[#allocation37_spill]] %s9313_s17 }
   0xe   :  { %9336 = sst [smem:[#allocation38_spill]] %s9314_s18 }
   0xf   :  { %23 = vsyncpa [#allocation4], 0 }
  0x10   :  { %25 = vsyncpa [#allocation4 + $0x1], 0 }
  0x11   :  { %26 = vsyncpa [#allocation7], 0 }
  0x12   :  { %27 = vsyncpa [#allocation10], 0 }
  0x13   :  { %28 = vsyncpa [#allocation13], 0 }
  0x14   :  { %29 = vsyncpa [#allocation16], 0 }
  0x15   :  { %30 = vsyncpa [#allocation5], 0 }
  0x16   :  { %32 = vsyncpa [#allocation5 + $0x1], 0  ;;  %s7439_s27 = smov 0   ;;  %s7441_s28 = smov 0  }
  0x17   :  { %s7443_s29 = smov 0   ;;  %s7445_s30 = smov 0  }
  0x18 LB: > { %s7317_s0 = smov [#allocation6]   ;;  %s7460_s1 = sadd.s32 4294967295, %s7315_s30   ;;  %s7315_s30 = sphi %s7445_s30, %s9375_s30   ;;  %s7311_s29 = sphi %s7443_s29, %s9374_s29   ;;  %s7307_s28 = sphi %s7441_s28, %s9373_s28   ;;  %s7303_s27 = sphi %s7439_s27, %s9372_s27  }
  0x19   : > { %s475_s19 = sshll.u32 %s7317_s0, 4  ;;  %p5647_p0 = scmp.ge.s32.totalorder %s7315_s30, 1  ;;  %s476_s19 = int_to_ptr.vmem [resolvable:$true] %s475_s19 }
  0x1a   : > { %p9319_p1 = scmp.eq.s32.totalorder %s7460_s1, 0  ;;  %p457_p2 = scmp.lt.s32.totalorder %s7315_s30, 3 }
  0x1b   : > { %s7318_s22 = smov [#allocation9]   ;;  %s7319_s23 = smov [#allocation12]  }
  0x1c   : > { %p7465_p3 = pnand %p5647_p0, %p457_p2  ;;  %s504_s2 = sshll.u32 %s7318_s22, 4  ;;  %s7478_s2 = int_to_ptr.vmem [resolvable:$true] %s504_s2 }
  0x1d   : > { %s7480_s24 = sshll.u32 %s7319_s23, 4  ;;  %s7010_s26 = scalar_lea.vmem %s476_s19, 256  ;;  %s531_s24 = int_to_ptr.vmem [resolvable:$true] %s7480_s24 }
  0x1e   : > { %s9337_s20 = scalar_select %p7465_p3, 1, 0 }
  0x1f   : > { %p6513_p5 = pneg %p7465_p3  ;;  %p7011_p8 = scmp.ne.s32.totalorder %s476_s19, %s7010_s26 }
  0x20   : > { %p7018_p11 = scmp.lt.s32.totalorder %s476_s19, %s476_s19  ;;  %p7019_p12 = scmp.lt.s32.totalorder %s7010_s26, %s7010_s26 }
  0x21   : > { %p7474_p6 = pnand %p6513_p5, %p9319_p1 }
  0x22   : > { %p7020_p13 = por %p7019_p12, %p7018_p11 }
  0x23   : > { %p7484_p7 = pneg %p7474_p6 }
  0x25   : > { %p7013_p9 = pnand %p7011_p8, %p7484_p7 }
  0x27   : > { %p7014_p10 = pneg %p7013_p9 }
  0x29   : > { %p7021_p0 = pnand %p7020_p13, %p7014_p10 }
  0x2b   : > { %7024 = shalt.err (!%p7021_p0)
}
  0x2c   : > { %s7320_s0 = smov 128   ;;  %s7321_s22 = smov 8  }
  0x2d   : > { %s9340_s4 = sld [smem:[#allocation28_spill]]  ;;  %s7036_s17 = scalar_lea.vmem %s7478_s2, 256 }
  0x2e   : > { %p7037_p2 = scmp.ne.s32.totalorder %s7478_s2, %s7036_s17  ;;  %p7044_p9 = scmp.lt.s32.totalorder %s7478_s2, %s7478_s2 }
  0x2f   : > { %p7045_p10 = scmp.lt.s32.totalorder %s7036_s17, %s7036_s17 }
  0x30   : > { %p7039_p5 = pnand %p7037_p2, %p7484_p7 }
  0x31   : > { %p7046_p11 = por %p7045_p10, %p7044_p9 }
  0x32   : > { %p7040_p8 = pneg %p7039_p5 }
  0x33   : > { %6516 = dma.hbm_to_vmem [thread:$0]  (!%p7474_p6), %s9340_s4, 256, %s476_s19, [#allocation7], %s7320_s0, %s7320_s0, %s7321_s22  }
  0x34   : > { %p7047_p12 = pnand %p7046_p11, %p7040_p8 }
  0x36   : > { %7050 = shalt.err (!%p7047_p12)
}
  0x37   : > { %s7322_s26 = smov 64   ;;  %s7323_s15 = smov 4  }
  0x38   : > { %s9341_s7 = sld [smem:[#allocation30_spill]]  ;;  %s7062_s0 = scalar_lea.vmem %s531_s24, 256 }
  0x39   : > { %p7063_p13 = scmp.ne.s32.totalorder %s531_s24, %s7062_s0  ;;  %p7070_p5 = scmp.lt.s32.totalorder %s531_s24, %s531_s24 }
  0x3a   : > { %p7071_p8 = scmp.lt.s32.totalorder %s7062_s0, %s7062_s0 }
  0x3b   : > { %p7065_p0 = pnand %p7063_p13, %p7484_p7 }
  0x3c   : > { %p7072_p9 = por %p7071_p8, %p7070_p5 }
  0x3d   : > { %p7066_p2 = pneg %p7065_p0 }
  0x3e   : > { %6522 = dma.hbm_to_vmem [thread:$0]  (!%p7474_p6), %s9341_s7, 256, %s7478_s2, [#allocation10], %s7322_s26, %s7322_s26, %s7323_s15  }
  0x3f   : > { %p7073_p10 = pnand %p7072_p9, %p7066_p2 }
  0x41   : > { %7076 = shalt.err (!%p7073_p10)
}
  0x42   : > { %s9342_s9 = sld [smem:[#allocation32_spill]]  ;;  %s7324_s2 = smov [#allocation15]  }
  0x43   : > { %s556_s23 = sshll.u32 %s7324_s2, 4  ;;  %s7325_s18 = smov [#allocation8]   ;;  %s557_s23 = int_to_ptr.vmem [resolvable:$true] %s556_s23 }
  0x44   : > { %s491_s19 = sshll.u32 %s7325_s18, 4  ;;  %s7088_s4 = scalar_lea.vmem %s557_s23, 128  ;;  %s492_s19 = int_to_ptr.vmem [resolvable:$true] %s491_s19 }
  0x45   : > { %p7089_p11 = scmp.ne.s32.totalorder %s557_s23, %s7088_s4  ;;  %p7096_p0 = scmp.lt.s32.totalorder %s557_s23, %s557_s23 }
  0x46   : > { %p7097_p2 = scmp.lt.s32.totalorder %s7088_s4, %s7088_s4 }
  0x47   : > { %p7091_p12 = pnand %p7089_p11, %p7484_p7 }
  0x48   : > { %6528 = dma.hbm_to_vmem [thread:$0]  (!%p7474_p6), %s9342_s9, 256, %s531_s24, [#allocation13], %s7322_s26, %s7322_s26, %s7323_s15  }
  0x49   : > { %p7092_p13 = pneg %p7091_p12  ;;  %p7098_p5 = por %p7097_p2, %p7096_p0 }
  0x4b   : > { %p7099_p8 = pnand %p7098_p5, %p7092_p13 }
  0x4d   : > { %7102 = shalt.err (!%p7099_p8)
}
  0x4e   : > { %s9343_s11 = sld [smem:[#allocation34_spill]]  ;;  %s7114_s17 = scalar_lea.vmem %s492_s19, 256 }
  0x4f   : > { %p7115_p9 = scmp.ne.s32.totalorder %s492_s19, %s7114_s17  ;;  %p7122_p12 = scmp.lt.s32.totalorder %s492_s19, %s492_s19 }
  0x50   : > { %p7123_p0 = scmp.lt.s32.totalorder %s7114_s17, %s7114_s17 }
  0x51   : > { %p7117_p10 = pnand %p7115_p9, %p7484_p7 }
  0x52   : > { %p7124_p13 = por %p7123_p0, %p7122_p12 }
  0x53   : > { %p7118_p11 = pneg %p7117_p10 }
  0x54   : > { %6534 = dma.hbm_to_vmem [thread:$0]  (!%p7474_p6), %s9343_s11, 128, %s557_s23, [#allocation16], %s7322_s26, %s7322_s26, %s7323_s15  }
  0x55   : > { %p7125_p2 = pnand %p7124_p13, %p7118_p11 }
  0x57   : > { %7128 = shalt.err (!%p7125_p2)
}
  0x58   : > { %s9344_s6 = sld [smem:[#allocation29_spill]]  ;;  %s7326_s2 = smov [#allocation11]  }
  0x59   : > { %s517_s23 = sshll.u32 %s7326_s2, 4  ;;  %s7327_s18 = smov [#allocation14]   ;;  %s518_s23 = int_to_ptr.vmem [resolvable:$true] %s517_s23 }
  0x5a   : > { %s543_s24 = sshll.u32 %s7327_s18, 4  ;;  %s7140_s0 = scalar_lea.vmem %s518_s23, 256  ;;  %s544_s24 = int_to_ptr.vmem [resolvable:$true] %s543_s24 }
  0x5b   : > { %p7141_p5 = scmp.ne.s32.totalorder %s518_s23, %s7140_s0  ;;  %p7148_p10 = scmp.lt.s32.totalorder %s518_s23, %s518_s23 }
  0x5c   : > { %p7149_p11 = scmp.lt.s32.totalorder %s7140_s0, %s7140_s0 }
  0x5d   : > { %p7143_p8 = pnand %p7141_p5, %p7484_p7 }
  0x5e   : > { %6519 = dma.hbm_to_vmem [thread:$0]  (!%p7474_p6), %s9344_s6, 256, %s492_s19, [#allocation7], %s7322_s26, %s7322_s26, %s7323_s15  }
  0x5f   : > { %p7144_p9 = pneg %p7143_p8  ;;  %p7150_p12 = por %p7149_p11, %p7148_p10 }
  0x61   : > { %p7151_p0 = pnand %p7150_p12, %p7144_p9 }
  0x63   : > { %7154 = shalt.err (!%p7151_p0)
}
  0x64   : > { %s9345_s8 = sld [smem:[#allocation31_spill]]  ;;  %s7166_s4 = scalar_lea.vmem %s544_s24, 256 }
  0x65   : > { %p7167_p13 = scmp.ne.s32.totalorder %s544_s24, %s7166_s4  ;;  %p7174_p8 = scmp.lt.s32.totalorder %s544_s24, %s544_s24 }
  0x66   : > { %p7175_p10 = scmp.lt.s32.totalorder %s7166_s4, %s7166_s4 }
  0x67   : > { %p7169_p2 = pnand %p7167_p13, %p7484_p7 }
  0x68   : > { %p7176_p9 = por %p7175_p10, %p7174_p8 }
  0x69   : > { %p7170_p5 = pneg %p7169_p2 }
  0x6a   : > { %6525 = dma.hbm_to_vmem [thread:$0]  (!%p7474_p6), %s9345_s8, 256, %s518_s23, [#allocation10], %s7322_s26, %s7322_s26, %s7323_s15  }
  0x6b   : > { %p7177_p11 = pnand %p7176_p9, %p7170_p5 }
  0x6d   : > { %7180 = shalt.err (!%p7177_p11)
}
  0x6e   : > { %s9346_s10 = sld [smem:[#allocation33_spill]]  ;;  %s7328_s23 = smov [#allocation17]  }
  0x6f   : > { %s572_s18 = sshll.u32 %s7328_s23, 4  ;;  %s573_s18 = int_to_ptr.vmem [resolvable:$true] %s572_s18 }
  0x70   : > { %s7192_s0 = scalar_lea.vmem %s573_s18, 256  ;;  %p7200_p2 = scmp.lt.s32.totalorder %s573_s18, %s573_s18 }
  0x71   : > { %p7193_p12 = scmp.ne.s32.totalorder %s573_s18, %s7192_s0  ;;  %p7201_p5 = scmp.lt.s32.totalorder %s7192_s0, %s7192_s0 }
  0x73   : > { %p7195_p0 = pnand %p7193_p12, %p7484_p7  ;;  %p7202_p8 = por %p7201_p5, %p7200_p2 }
  0x74   : > { %6531 = dma.hbm_to_vmem [thread:$0]  (!%p7474_p6), %s9346_s10, 256, %s544_s24, [#allocation13], %s7322_s26, %s7322_s26, %s7323_s15  }
  0x75   : > { %p7196_p13 = pneg %p7195_p0 }
  0x77   : > { %p7203_p10 = pnand %p7202_p8, %p7196_p13 }
  0x79   : > { %7206 = shalt.err (!%p7203_p10)
}
  0x7a   : > { %s9347_s13 = sld [smem:[#allocation35_spill]]  ;;  %s5646_s21 = sadd.s32 4294967294, %s7315_s30  }
  0x7b   : > { %s7573_s25 = sadd.s32 1, %s7315_s30   ;;  %s71_s4 = sadd.s32 1, %s7311_s29 }
  0x7c   : > { %s68_s17 = ssub.s32 %s7315_s30, %s7573_s25  ;;  %p78_p9 = scmp.ne.s32.totalorder %s7311_s29, %s7307_s28 }
  0x7d   : > { %p69_p7 = scmp.eq.s32.totalorder %s68_s17, 0  ;;  %p79_p11 = scmp.eq.s32.totalorder %s7315_s30, 0 }
  0x7e   : > { %p84_p12 = scmp.ne.s32.totalorder %s7307_s28, %s7303_s27  ;;  %p444_p13 = scmp.eq.s32.totalorder %s7460_s1, 1 }
  0x7f   : > { %s7584_s22 = scalar_select %p69_p7, %s7311_s29, %s71_s4  }
  0x80   : > { %6537 = dma.hbm_to_vmem [thread:$0]  (!%p7474_p6), %s9347_s13, 256, %s573_s18, [#allocation16], %s7322_s26, %s7322_s26, %s7323_s15  }
  0x81   : > { %p7586_p0 = por %p79_p11, %p78_p9  ;;  %p7592_p6 = por %p9319_p1, %p84_p12 }
  0x82   : > { %p450_p2 = scmp.eq.s32.totalorder %s5646_s21, 1  ;;  %p6554_p5 = scmp.lt.s32.totalorder %s7315_s30, 2 }
  0x83   : > { %s9349_s15 = scalar_select %p7592_p6, 1, 0 }
  0x84   : > { %s606_s26 = sand.u32 1, %s7311_s29   ;;  %p7599_p8 = por %p444_p13, %p78_p9 }
  0x85   : > { %p7603_p10 = por %p450_p2, %p84_p12  ;;  %s5657_s0 = sshll.u32 %s606_s26, 2 }
  0x86   : > { %s9350_s23 = scalar_select %p7599_p8, 1, 0 }
  0x87   : > { %s9351_s18 = scalar_select %p7603_p10, 1, 0 }
  0x88   : > { %s5658_s19 = sshll.u32 %s7315_s30, 6  ;;  %s9352_s4 = sld [smem:[#allocation26_spill]] }
  0x89   : > { %s610_s21 = scalar_lea.vmem [#allocation3], %s5657_s0  ;;  %p7615_p7 = pnand %p6554_p5, %p7586_p0 }
  0x8a   : > { %s617_s7 = sshll.u32 %s610_s21, 4  ;;  %s607_s9 = scalar_lea.sflag [#allocation4], %s606_s26  ;;  %s618_s7 = int_to_ptr.vmem [resolvable:$true] %s617_s7 }
  0x8b   : > { %p7209_p11 = pneg %p7615_p7 }
  0x8e   : > { %s7611_s6 = scalar_lea.hbm %s9352_s4, %s5658_s19  ;;  %s7212_s17 = scalar_lea.hbm %s9352_s4, 128 }
  0x8f   : > { %s7207_s10 = scalar_lea.hbm %s7611_s6, 64  ;;  %p7213_p2 = scmp.lt.s32.totalorder %s7611_s6, %s9352_s4 }
  0x90   : > { %p7208_p9 = scmp.ne.s32.totalorder %s7611_s6, %s7207_s10  ;;  %p7214_p0 = scmp.lt.s32.totalorder %s7212_s17, %s7207_s10 }
  0x92   : > { %p7210_p12 = pnand %p7209_p11, %p7208_p9  ;;  %p7215_p5 = por %p7214_p0, %p7213_p2 }
  0x94   : > { %p7211_p13 = pneg %p7210_p12 }
  0x96   : > { %p7216_p4 = pnand %p7215_p5, %p7211_p13 }
  0x98   : > { %7219 = shalt.err (!%p7216_p4)
}
  0x99   : > { %s7220_s2 = scalar_lea.vmem %s618_s7, 64  ;;  %s7329_s26 = smov [#allocation3]  }
  0x9a   : > { %p7221_p1 = scmp.ne.s32.totalorder %s618_s7, %s7220_s2  ;;  %s7225_s11 = sshll.u32 %s7329_s26, 4  ;;  %s7226_s11 = int_to_ptr.vmem [resolvable:$false] %s7225_s11 }
  0x9b   : > { %s7227_s13 = scalar_lea.vmem %s7226_s11, 128  ;;  %p7228_p9 = scmp.lt.s32.totalorder %s618_s7, %s7226_s11 }
  0x9c   : > { %p7223_p10 = pnand %p7221_p1, %p7209_p11  ;;  %p7229_p12 = scmp.lt.s32.totalorder %s7227_s13, %s7220_s2 }
  0x9e   : > { %p7224_p8 = pneg %p7223_p10  ;;  %p7230_p6 = por %p7229_p12, %p7228_p9 }
  0xa0   : > { %p7231_p3 = pnand %p7230_p6, %p7224_p8 }
  0xa2   : > { %7234 = shalt.err (!%p7231_p3)
}
  0xa3   : > { %6541 = dma.hbm_to_vmem [thread:$0]  (!%p7615_p7), %s7611_s6, 64, %s618_s7, %s607_s9  }
  0xa4   : > { %p9354_p13 = scmp.ne.s32.totalorder %s9337_s20, 0 }
  0xa5   : > { %s7636_s10 = sand.u32 (!%p9354_p13), 1, %s7307_s28   ;;  %p9355_p1 = scmp.ne.s32.totalorder (!%p9354_p13), %s9349_s15, 0 }
  0xa6   : > { %626 = sbr.rel (%p9354_p13) target bundleno = 7291 (0x1c7b), region = 92  ;;  %s5660_s19 = sshll.u32 (!%p9354_p13), %s7636_s10, 2 }
  0xa7   : > { %s629_s24 = scalar_lea.sflag (!%p9354_p13), [#allocation4], %s7636_s10  ;;  %s7640_s11 = scalar_lea.vmem (!%p9354_p13), [#allocation3], %s5660_s19 }
  0xab   : > { %7278 = dma.done.wait (%p9355_p1), %s629_s24, 64  }
  0xac   : > { %7280 = vsyncadd (%p9355_p1), %s629_s24, 4294967232  ;;  %p9356_p3 = scmp.eq.s32.totalorder %s7460_s1, 0 }
  0xae   : > { %7282 = dma.done.wait (%p9356_p3), [#allocation7], 512   ;;  %p9357_p4 = pmov %p9356_p3 }
  0xaf   : > { %p9358_p6 = pmov %p9356_p3 }
  0xb0   : > { %7284 = vsyncadd (%p9357_p4), [#allocation7], 4294966784 }
  0xb1   : > { %7286 = dma.done.wait (%p9358_p6), [#allocation10], 512   ;;  %p9359_p8 = pmov %p9356_p3 }
  0xb2   : > { %p9360_p10 = pmov %p9356_p3 }
  0xb3   : > { %7288 = vsyncadd (%p9359_p8), [#allocation10], 4294966784 }
  0xb4   : > { %7290 = dma.done.wait (%p9360_p10), [#allocation13], 512   ;;  %p9361_p7 = pmov %p9356_p3 }
  0xb5   : > { %p9362_p11 = pmov %p9356_p3 }
  0xb6   : > { %7292 = vsyncadd (%p9361_p7), [#allocation13], 4294966784 }
  0xb7   : > { %7294 = dma.done.wait (%p9362_p11), [#allocation16], 384   ;;  %p9363_p2 = pmov %p9356_p3 }
  0xb8   : > { %p722_p0 = scmp.lt.s32.totalorder %s7460_s1, 1  ;;  %s9364_s13 = sld [smem:[#allocation25_spill]]  ;;  %vm736_vm0 = vcmask 523264   ;;  %v793_v32 = vld [vmem:[%s9299_s3] sm:$0xff]  ;;  %v794_v47 = vld [vmem:[%s9299_s3 + $0x8] sm:$0xff]  ;;  %v795_v48 = vld [vmem:[%s9299_s3 + $0x10] sm:$0xff] }
  0xb9   : > { %7296 = vsyncadd (%p9363_p2), [#allocation16], 4294966912  ;;  %6061 = vmatprep.mubr.msk.f32.mxu0 %vm736_vm0, %v793_v32  ;;  %6089 = vmatprep.mubr.msk.f32.mxu1 %vm736_vm0, %v793_v32  ;;  %v796_v51 = vld [vmem:[%s9299_s3 + $0x18] sm:$0xff]  ;;  %v797_v52 = vld [vmem:[%s9299_s3 + $0x20] sm:$0xff]  ;;  %v7330_v56 = vmov 0   ;;  %s9365_s26 = sld [smem:[#allocation27_spill]] }
  0xba   : > { %s723_s6 = scalar_select %p722_p0, %s7460_s1, 1  ;;  %v798_v53 = vld [vmem:[%s9299_s3 + $0x28] sm:$0xff]  ;;  %v799_v54 = vld [vmem:[%s9299_s3 + $0x30] sm:$0xff]  ;;  %v800_v55 = vld [vmem:[%s9299_s3 + $0x38] sm:$0xff]  ;;  %6621 = vset.pattern.permute.xlu0 %v7330_v56  ;;  %6622 = vset.pattern.permute.xlu1 %v7330_v56  ;;  %vm1386_vm1 = vcmask 261120   ;;  %vm1789_vm2 = vcmask 64512  }
  0xbb   : > { %s7333_s2 = smov 120   ;;  %s7334_s19 = smov 112   ;;  %vm2386_vm3 = vcmask 130112   ;;  %vm2713_vm4 = vcmask 195712   ;;  %vm3040_vm5 = vcmask 261312   ;;  %vm3406_vm6 = vcmask 130048  }
  0xbc   : > { %s5839_s7 = sshll.u32 %s723_s6, 6  ;;  %s7335_s24 = smov 104   ;;  %vm7340_vm7 = vmmov 0   ;;  %vm3684_vm8 = vcmask 1043456  }
  0xbd   : > { %s7336_s6 = smov 8   ;;  %s7338_s8 = smov 24  }
  0xbe   : > { %s7667_s20 = scalar_lea.vmem %s9364_s13, %s5839_s7  ;;  %s7331_s13 = smov 1  }
  0xbf   : > { %v7670_v0 = vld [vmem:[%s7667_s20 + $0x38] sm:$0xff]  ;;  %v7673_v1 = vld [vmem:[%s7667_s20 + $0x28] sm:$0xff]  ;;  %v7676_v2 = vld [vmem:[%s7667_s20 + $0x30] sm:$0xff]  ;;  %s7337_s7 = smov 16   ;;  %s9366_s17 = sld [smem:[#allocation36_spill]] }
  0xc0   : > { %v758_v3 = vsel %vm736_vm0, %v7670_v0, 0.0  ;;  %v752_v4 = vsel %vm736_vm0, %v7673_v1, 0.0  ;;  %v7683_v5 = vld [vmem:[%s7667_s20 + $0x20] sm:$0xff]  ;;  %v767_v6 = vmul.f32 %v7676_v2, %v7676_v2  ;;  %v7688_v7 = vld [vmem:[%s7667_s20 + $0x18] sm:$0xff]  ;;  %v7691_v8 = vld [vmem:[%s7667_s20 + $0x10] sm:$0xff]  ;;  %v755_v9 = vsel %vm736_vm0, %v7676_v2, 0.0 }
  0xc1   : > { %759 = vadd.xlane.f32.xlu0 %v758_v3  ;;  %753 = vadd.xlane.f32.xlu1 %v752_v4  ;;  %v768_v10 = vmul.f32 %v7670_v0, %v7670_v0  ;;  %v766_v11 = vmul.f32 %v7673_v1, %v7673_v1  ;;  %v7700_v12 = vld [vmem:[%s7667_s20 + $0x8] sm:$0xff]  ;;  %v749_v13 = vsel %vm736_vm0, %v7683_v5, 0.0  ;;  %v746_v14 = vsel %vm736_vm0, %v7688_v7, 0.0  ;;  %v7716_v20 = vld [vmem:[%s7667_s20] sm:$0xff]  ;;  %p9369_p9 = scmp.ne.s32.totalorder %s9350_s23, 0 }
  0xc2   : > { %v765_v15 = vmul.f32 %v7683_v5, %v7683_v5  ;;  %v764_v16 = vmul.f32 %v7688_v7, %v7688_v7  ;;  %v787_v17 = vsel %vm736_vm0, %v767_v6, 0.0  ;;  %v743_v18 = vsel %vm736_vm0, %v7691_v8, 0.0 }
  0xc3   : > { %v763_v19 = vmul.f32 %v7691_v8, %v7691_v8  ;;  %v790_v21 = vsel %vm736_vm0, %v768_v10, 0.0  ;;  %v784_v22 = vsel %vm736_vm0, %v766_v11, 0.0  ;;  %v740_v23 = vsel %vm736_vm0, %v7700_v12, 0.0 }
  0xc4   : > { %v781_v24 = vsel %vm736_vm0, %v765_v15, 0.0  ;;  %v778_v25 = vsel %vm736_vm0, %v764_v16, 0.0  ;;  %v737_v27 = vsel %vm736_vm0, %v7716_v20, 0.0  ;;  %v762_v28 = vmul.f32 %v7700_v12, %v7700_v12 }
  0xc5   : > { %756 = vadd.xlane.f32.xlu0 %v755_v9  ;;  %750 = vadd.xlane.f32.xlu1 %v749_v13  ;;  %v775_v26 = vsel %vm736_vm0, %v763_v19, 0.0  ;;  %v761_v29 = vmul.f32 %v7716_v20, %v7716_v20 }
  0xc6   : > { %v772_v30 = vsel %vm736_vm0, %v762_v28, 0.0 }
  0xc7   : > { %v769_v31 = vsel %vm736_vm0, %v761_v29, 0.0 }
  0xc9   : > { %788 = vadd.xlane.f32.xlu0 %v787_v17  ;;  %791 = vadd.xlane.f32.xlu1 %v790_v21 }
  0xcd   : > { %785 = vadd.xlane.f32.xlu0 %v784_v22  ;;  %747 = vadd.xlane.f32.xlu1 %v746_v14 }
  0xd1   : > { %782 = vadd.xlane.f32.xlu0 %v781_v24  ;;  %744 = vadd.xlane.f32.xlu1 %v743_v18 }
  0xd5   : > { %779 = vadd.xlane.f32.xlu0 %v778_v25  ;;  %741 = vadd.xlane.f32.xlu1 %v740_v23 }
  0xd9   : > { %776 = vadd.xlane.f32.xlu0 %v775_v26  ;;  %738 = vadd.xlane.f32.xlu1 %v737_v27 }
  0xdd   : > { %773 = vadd.xlane.f32.xlu0 %v772_v30  ;;  %770 = vadd.xlane.f32.xlu1 %v769_v31 }
 0x14a   : > { %v760_v33 = vpop.xlane.xlu0 %759  ;;  %v754_v34 = vpop.xlane.xlu1 %753 }
 0x14b   : > { %6045 = vmatprep.subr.mxu0 %v760_v33 }
 0x14c   : > { %6046 = vmatpush3.msra.mxu0 %v760_v33 }
 0x14e   : > { %v757_v35 = vpop.xlane.xlu0 %756  ;;  %v751_v36 = vpop.xlane.xlu1 %750 }
 0x14f   : > { %6047 = vmatprep.subr.mxu0 %v757_v35 }
 0x150   : > { %6048 = vmatpush3.msra.mxu0 %v757_v35 }
 0x151   : > { %6049 = vmatprep.subr.mxu0 %v754_v34 }
 0x152   : > { %v789_v37 = vpop.xlane.xlu0 %788  ;;  %6050 = vmatpush3.msra.mxu0 %v754_v34  ;;  %v792_v38 = vpop.xlane.xlu1 %791 }
 0x153   : > { %6051 = vmatprep.subr.mxu0 %v751_v36  ;;  %6073 = vmatprep.subr.mxu1 %v792_v38 }
 0x154   : > { %6052 = vmatpush3.msra.mxu0 %v751_v36  ;;  %6074 = vmatpush3.msra.mxu1 %v792_v38 }
 0x155   : > { %6075 = vmatprep.subr.mxu1 %v789_v37 }
 0x156   : > { %v786_v39 = vpop.xlane.xlu0 %785  ;;  %6076 = vmatpush3.msra.mxu1 %v789_v37  ;;  %v748_v40 = vpop.xlane.xlu1 %747 }
 0x157   : > { %6077 = vmatprep.subr.mxu1 %v786_v39  ;;  %6053 = vmatprep.subr.mxu0 %v748_v40 }
 0x158   : > { %6078 = vmatpush3.msra.mxu1 %v786_v39  ;;  %6054 = vmatpush3.msra.mxu0 %v748_v40 }
 0x15a   : > { %v783_v41 = vpop.xlane.xlu0 %782  ;;  %v745_v42 = vpop.xlane.xlu1 %744 }
 0x15b   : > { %6079 = vmatprep.subr.mxu1 %v783_v41  ;;  %6055 = vmatprep.subr.mxu0 %v745_v42 }
 0x15c   : > { %6080 = vmatpush3.msra.mxu1 %v783_v41  ;;  %6056 = vmatpush3.msra.mxu0 %v745_v42 }
 0x15e   : > { %v780_v43 = vpop.xlane.xlu0 %779  ;;  %v742_v44 = vpop.xlane.xlu1 %741 }
 0x15f   : > { %6081 = vmatprep.subr.mxu1 %v780_v43  ;;  %6057 = vmatprep.subr.mxu0 %v742_v44 }
 0x160   : > { %6082 = vmatpush3.msra.mxu1 %v780_v43  ;;  %6058 = vmatpush3.msra.mxu0 %v742_v44 }
 0x162   : > { %v777_v45 = vpop.xlane.xlu0 %776  ;;  %v739_v46 = vpop.xlane.xlu1 %738 }
 0x163   : > { %6083 = vmatprep.subr.mxu1 %v777_v45  ;;  %6059 = vmatprep.subr.mxu0 %v739_v46 }
 0x164   : > { %6084 = vmatpush3.msra.mxu1 %v777_v45  ;;  %6060 = vmatpush3.msra.mxu0 %v739_v46 }
 0x165   : > { %6062 = vmatmul.mubr.msk.f32.vlgmr.msra.gmra.mxu0 %vm736_vm0, %v794_v47 }
 0x166   : > { %v774_v49 = vpop.xlane.xlu0 %773  ;;  %v771_v50 = vpop.xlane.xlu1 %770  ;;  %6064 = vmatprep.mubr.msk.f32.mxu0 %vm736_vm0, %v795_v48 }
 0x167   : > { %6085 = vmatprep.subr.mxu1 %v774_v49 }
 0x168   : > { %6086 = vmatpush3.msra.mxu1 %v774_v49 }
 0x169   : > { %6087 = vmatprep.subr.mxu1 %v771_v50  ;;  %6065 = vmatmul.mubr.msk.f32.gmra.mxu0 %vm736_vm0, %v796_v51 }
 0x16a   : > { %6088 = vmatpush3.msra.mxu1 %v771_v50  ;;  %6067 = vmatprep.mubr.msk.f32.mxu0 %vm736_vm0, %v797_v52 }
 0x16b   : > { %6090 = vmatmul.mubr.msk.f32.vlgmr.msra.gmra.mxu1 %vm736_vm0, %v794_v47 }
 0x16c   : > { %6092 = vmatprep.mubr.msk.f32.mxu1 %vm736_vm0, %v795_v48 }
 0x16d   : > { %6068 = vmatmul.mubr.msk.f32.gmra.mxu0 %vm736_vm0, %v798_v53 }
 0x16e   : > { %6070 = vmatprep.mubr.msk.f32.mxu0 %vm736_vm0, %v799_v54 }
 0x16f   : > { %6093 = vmatmul.mubr.msk.f32.gmra.mxu1 %vm736_vm0, %v796_v51 }
 0x170   : > { %6095 = vmatprep.mubr.msk.f32.mxu1 %vm736_vm0, %v797_v52 }
 0x171   : > { %6071 = vmatmul.mubr.msk.f32.gmra.mxu0 %vm736_vm0, %v800_v55 }
 0x173   : > { %6096 = vmatmul.mubr.msk.f32.gmra.mxu1 %vm736_vm0, %v798_v53 }
 0x174   : > { %6098 = vmatprep.mubr.msk.f32.mxu1 %vm736_vm0, %v799_v54 }
 0x177   : > { %6099 = vmatmul.mubr.msk.f32.gmra.mxu1 %vm736_vm0, %v800_v55 }
 0x225   : > { %v6063_v57 = vpop.f32.mrf.mxu0 }
 0x226   : > { %v7775_v58 = vmul.f32 0.0078125, %v6063_v57 }
 0x227   : > { %v891_v59 = vpop.f32.mrf.mxu0 }
 0x228   : > { %v1052_v61 = vmul.f32 %v7775_v58, %v7775_v58  ;;  %v7779_v62 = vmul.f32 0.0078125, %v891_v59 }
 0x229   : > { %v6066_v60 = vpop.f32.mrf.mxu0 }
 0x22a   : > { %v7781_v63 = vmul.f32 0.0078125, %v6066_v60  ;;  %v1051_v13 = vmul.f32 %v7779_v62, %v7779_v62 }
 0x22b   : > { %v6091_v3 = vpop.f32.mrf.mxu1  ;;  %v901_v4 = vpop.f32.mrf.mxu0 }
 0x22c   : > { %v1044_v6 = vmul.f32 0.0078125, %v6091_v3  ;;  %v7783_v9 = vmul.f32 0.0078125, %v901_v4  ;;  %v1054_v14 = vmul.f32 %v7781_v63, %v7781_v63 }
 0x22d   : > { %v1004_v10 = vpop.f32.mrf.mxu1  ;;  %v6069_v11 = vpop.f32.mrf.mxu0 }
 0x22e   : > { %v1060_v15 = vsub.f32 %v1044_v6, %v1052_v61  ;;  %v1043_v16 = vmul.f32 0.0078125, %v1004_v10  ;;  %v7789_v17 = vmul.f32 0.0078125, %v6069_v11  ;;  %v1053_v24 = vmul.f32 %v7783_v9, %v7783_v9  ;;  %v1092_v11 = vld [vmem:[%s9365_s26 + $0x8] sm:$0xff] }
 0x22f   : > { %v6094_v18 = vpop.f32.mrf.mxu1  ;;  %v911_v19 = vpop.f32.mrf.mxu0 }
 0x230   : > { %v1068_v21 = vmax.f32 %v1060_v15, 0.0  ;;  %v1059_v22 = vsub.f32 %v1043_v16, %v1051_v13  ;;  %v1046_v23 = vmul.f32 0.0078125, %v6094_v18  ;;  %v7793_v25 = vmul.f32 0.0078125, %v911_v19  ;;  %v1091_v15 = vld [vmem:[%s9365_s26] sm:$0xff]  ;;  %v1094_v19 = vld [vmem:[%s9365_s26 + $0x18] sm:$0xff] }
 0x231   : > { %v1014_v26 = vpop.f32.mrf.mxu1  ;;  %v6072_v27 = vpop.f32.mrf.mxu0  ;;  %v1056_v32 = vmul.f32 %v7789_v17, %v7789_v17 }
 0x232   : > { %v1076_v28 = vadd.f32 1e-05, %v1068_v21  ;;  %v1067_v29 = vmax.f32 %v1059_v22, 0.0  ;;  %v1062_v30 = vsub.f32 %v1046_v23, %v1054_v14  ;;  %v1045_v31 = vmul.f32 0.0078125, %v1014_v26 }
 0x233   : > { %v7797_v33 = vmul.f32 0.0078125, %v6072_v27  ;;  %v6097_v34 = vpop.f32.mrf.mxu1  ;;  %v921_v35 = vpop.f32.mrf.mxu0  ;;  %v1055_v39 = vmul.f32 %v7793_v25, %v7793_v25 }
 0x234   : > { %6663 = vrsqrt.f32 %v1076_v28  ;;  %v1075_v36 = vadd.f32 1e-05, %v1067_v29  ;;  %v1070_v37 = vmax.f32 %v1062_v30, 0.0  ;;  %v1061_v38 = vsub.f32 %v1045_v31, %v1053_v24  ;;  %v1093_v24 = vld [vmem:[%s9365_s26 + $0x10] sm:$0xff]  ;;  %v1096_v31 = vld [vmem:[%s9365_s26 + $0x28] sm:$0xff] }
 0x235   : > { %v1058_v40 = vmul.f32 %v7797_v33, %v7797_v33  ;;  %v1048_v41 = vmul.f32 0.0078125, %v6097_v34  ;;  %v7803_v42 = vmul.f32 0.0078125, %v921_v35  ;;  %v1024_v43 = vpop.f32.mrf.mxu1 }
 0x236   : > { %6665 = vrsqrt.f32 %v1075_v36  ;;  %v1078_v44 = vadd.f32 1e-05, %v1070_v37  ;;  %v1069_v45 = vmax.f32 %v1061_v38, 0.0  ;;  %v1047_v46 = vmul.f32 0.0078125, %v1024_v43  ;;  %v1098_v38 = vld [vmem:[%s9365_s26 + $0x38] sm:$0xff] }
 0x237   : > { %v1064_v47 = vsub.f32 %v1048_v41, %v1056_v32  ;;  %v6100_v48 = vpop.f32.mrf.mxu1  ;;  %v1057_v53 = vmul.f32 %v7803_v42, %v7803_v42 }
 0x238   : > { %6667 = vrsqrt.f32 %v1078_v44  ;;  %v1077_v49 = vadd.f32 1e-05, %v1069_v45  ;;  %v1063_v50 = vsub.f32 %v1047_v46, %v1055_v39  ;;  %v1050_v51 = vmul.f32 0.0078125, %v6100_v48 }
 0x239   : > { %v1072_v52 = vmax.f32 %v1064_v47, 0.0  ;;  %v1034_v54 = vpop.f32.mrf.mxu1 }
 0x23a   : > { %6669 = vrsqrt.f32 %v1077_v49  ;;  %v1071_v55 = vmax.f32 %v1063_v50, 0.0  ;;  %v1066_v57 = vsub.f32 %v1050_v51, %v1058_v40  ;;  %v1049_v59 = vmul.f32 0.0078125, %v1034_v54 }
 0x23b   : > { %v1080_v60 = vadd.f32 1e-05, %v1072_v52 }
 0x23c   : > { %v1079_v61 = vadd.f32 1e-05, %v1071_v55  ;;  %v1074_v3 = vmax.f32 %v1066_v57, 0.0  ;;  %v1065_v4 = vsub.f32 %v1049_v59, %v1057_v53 }
 0x23d   : > { %6671 = vrsqrt.f32 %v1080_v60 }
 0x23e   : > { %6673 = vrsqrt.f32 %v1079_v61  ;;  %v1082_v6 = vadd.f32 1e-05, %v1074_v3  ;;  %v1073_v10 = vmax.f32 %v1065_v4, 0.0  ;;  %v6627_v61 = vld [vmem:[%s9301_s5 + $0x18] sm:$0xff]   ;;  %v6628_v3 = vld [vmem:[%s9301_s5 + $0x10] sm:$0xff]   ;;  %v6629_v4 = vld [vmem:[%s9301_s5 + $0x8] sm:$0xff]  }
 0x23f   : > { %6101 = vmatprep.subr.bf16.mxu0 %v6627_v61 }
 0x240   : > { %6675 = vrsqrt.f32 %v1082_v6  ;;  %v1081_v13 = vadd.f32 1e-05, %v1073_v10  ;;  %6102 = vmatpush3.bf16.msra.mxu0 %v6627_v61 }
 0x241   : > { %v6664_v14 = vpop.eup %6663  ;;  %6103 = vmatprep.subr.bf16.mxu0 %v6628_v3 }
 0x242   : > { %6677 = vrsqrt.f32 %v1081_v13  ;;  %v1100_v16 = vmul.f32 %v6664_v14, %v1092_v11 }
 0x243   : > { %v6666_v18 = vpop.eup %6665 }
 0x244   : > { %v1108_v21 = vmul.f32 %v1100_v16, %v7775_v58  ;;  %v1099_v22 = vmul.f32 %v6666_v18, %v1091_v15  ;;  %v1095_v58 = vld [vmem:[%s9365_s26 + $0x20] sm:$0xff]  ;;  %6104 = vmatpush3.bf16.msra.mxu0 %v6628_v3 }
 0x245   : > { %v6668_v23 = vpop.eup %6667  ;;  %6105 = vmatprep.subr.bf16.mxu0 %v6629_v4 }
 0x246   : > { %1125 = vrot.lane.b32.xlu1 %v1108_v21, %s7331_s13  ;;  %v1107_v26 = vmul.f32 %v1099_v22, %v7779_v62  ;;  %v1102_v27 = vmul.f32 %v6668_v23, %v1094_v19 }
 0x247   : > { %v6670_v28 = vpop.eup %6669 }
 0x248   : > { %1123 = vrot.lane.b32.xlu0 %v1107_v26, %s7331_s13  ;;  %v1110_v29 = vmul.f32 %v1102_v27, %v7781_v63  ;;  %v1101_v30 = vmul.f32 %v6670_v28, %v1093_v24  ;;  %v1097_v63 = vld [vmem:[%s9365_s26 + $0x30] sm:$0xff]  ;;  %6106 = vmatpush3.bf16.msra.mxu0 %v6629_v4 }
 0x24a   : > { %v6672_v32 = vpop.eup %6671  ;;  %1129 = vrot.lane.b32.xlu1 %v1110_v29, %s7331_s13  ;;  %v1109_v35 = vmul.f32 %v1101_v30, %v7783_v9 }
 0x24b   : > { %v6674_v34 = vpop.eup %6673  ;;  %v1104_v36 = vmul.f32 %v6672_v32, %v1096_v31 }
 0x24c   : > { %v1103_v62 = vmul.f32 %v6674_v34, %v1095_v58 }
 0x24d   : > { %v6676_v37 = vpop.eup %6675  ;;  %v1112_v41 = vmul.f32 %v1104_v36, %v7789_v17 }
 0x24e   : > { %1127 = vrot.lane.b32.xlu1 %v1109_v35, %s7331_s13  ;;  %v1111_v39 = vmul.f32 %v1103_v62, %v7793_v25  ;;  %v1106_v9 = vmul.f32 %v6676_v37, %v1098_v38  ;;  %v7332_v25 = vmov 1  }
 0x24f   : > { %v6678_v40 = vpop.eup %6677 }
 0x250   : > { %1131 = vrot.lane.b32.xlu0 %v1111_v39, %s7331_s13  ;;  %v1105_v43 = vmul.f32 %v6678_v40, %v1097_v63  ;;  %v1114_v45 = vmul.f32 %v1106_v9, %v7797_v33 }
 0x252   : > { %1133 = vrot.lane.b32.xlu1 %v1112_v41, %s7331_s13  ;;  %v1113_v44 = vmul.f32 %v1105_v43, %v7803_v42 }
 0x254   : > { %1135 = vrot.lane.b32.xlu0 %v1113_v44, %s7331_s13 }
 0x256   : > { %1137 = vrot.lane.b32.xlu1 %v1114_v45, %s7331_s13  ;;  %s9368_s13 = sld [smem:[#allocation38_spill]] }
 0x258   : > { %1157 = vperm.xlu0 %6621, %v1099_v22  }
 0x25a   : > { %1162 = vperm.xlu1 %6622, %v1100_v16  }
 0x25c   : > { %1172 = vperm.xlu0 %6621, %v1102_v27  }
 0x25e   : > { %1167 = vperm.xlu1 %6622, %v1101_v30  }
 0x260   : > { %1187 = vperm.xlu0 %6621, %v1105_v43  }
 0x262   : > { %1177 = vperm.xlu1 %6622, %v1103_v62  }
 0x264   : > { %6623 = vset.pattern.permute.xlu0 %v7332_v25 }
 0x266   : > { %1182 = vperm.xlu1 %6622, %v1104_v36  }
 0x26a   : > { %1192 = vperm.xlu1 %6622, %v1106_v9  }
 0x26e   : > { %6624 = vset.pattern.permute.xlu1 %v7332_v25 }
 0x2b8   : > { %v1126_v17 = vpop.permute.xlu1 %1125 }
 0x2b9   : > { %v1148_v46 = vsub.f32 %v1092_v11, %v1126_v17  ;;  %v6630_v11 = vld [vmem:[%s9301_s5] sm:$0xff]  }
 0x2ba   : > { %v1124_v47 = vpop.permute.xlu0 %1123  ;;  %6107 = vmatprep.subr.bf16.mxu0 %v6630_v11 }
 0x2bb   : > { %v1147_v48 = vsub.f32 %v1091_v15, %v1124_v47  ;;  %1210 = vperm.xlu0 %6623, %v1148_v46   ;;  %6108 = vmatpush3.bf16.msra.mxu0 %v6630_v11 }
 0x2bc   : > { %v1130_v42 = vpop.permute.xlu1 %1129 }
 0x2bd   : > { %1205 = vperm.xlu1 %6624, %v1147_v48   ;;  %v1150_v33 = vsub.f32 %v1094_v19, %v1130_v42 }
 0x2c0   : > { %v1128_v49 = vpop.permute.xlu1 %1127 }
 0x2c1   : > { %v1149_v50 = vsub.f32 %v1093_v24, %v1128_v49  ;;  %1220 = vperm.xlu1 %6624, %v1150_v33  }
 0x2c2   : > { %v1132_v51 = vpop.permute.xlu0 %1131 }
 0x2c3   : > { %v1151_v52 = vsub.f32 %v1095_v58, %v1132_v51  ;;  %1215 = vperm.xlu0 %6623, %v1149_v50  }
 0x2c4   : > { %v1134_v53 = vpop.permute.xlu1 %1133 }
 0x2c5   : > { %v1152_v54 = vsub.f32 %v1096_v31, %v1134_v53  ;;  %1225 = vperm.xlu1 %6624, %v1151_v52  }
 0x2c6   : > { %v1136_v55 = vpop.permute.xlu0 %1135 }
 0x2c7   : > { %v1153_v57 = vsub.f32 %v1097_v63, %v1136_v55  ;;  %1230 = vperm.xlu0 %6623, %v1152_v54  }
 0x2c8   : > { %v1138_v59 = vpop.permute.xlu1 %1137 }
 0x2c9   : > { %1235 = vperm.xlu1 %6624, %v1153_v57   ;;  %v1154_v60 = vsub.f32 %v1098_v38, %v1138_v59 }
 0x2cd   : > { %1240 = vperm.xlu1 %6624, %v1154_v60  }
 0x2d3   : > { %v1158_v13 = vpop.permute.xlu0 %1157 }
 0x2d4   : > { %v1195_v22 = vmul.f32 %v1158_v13, %v7716_v20 }
 0x2d5   : > { %v1163_v6 = vpop.permute.xlu1 %1162 }
 0x2d6   : > { %v1196_v23 = vmul.f32 %v1163_v6, %v7700_v12 }
 0x2d7   : > { %v1173_v15 = vpop.permute.xlu0 %1172 }
 0x2d8   : > { %v1198_v30 = vmul.f32 %v1173_v15, %v7688_v7 }
 0x2d9   : > { %v1168_v10 = vpop.permute.xlu1 %1167 }
 0x2da   : > { %v1197_v58 = vmul.f32 %v1168_v10, %v7691_v8 }
 0x2db   : > { %v1188_v18 = vpop.permute.xlu0 %1187 }
 0x2dc   : > { %v1201_v7 = vmul.f32 %v1188_v18, %v7676_v2  ;;  %v5688_v2 = vld [vmem:[#allocation6] ss:$0 sm:$0xff] }
 0x2dd   : > { %v1178_v14 = vpop.permute.xlu1 %1177 }
 0x2de   : > { %v1199_v62 = vmul.f32 %v1178_v14, %v7683_v5 }
 0x2e1   : > { %v1183_v16 = vpop.permute.xlu1 %1182 }
 0x2e2   : > { %v1200_v20 = vmul.f32 %v1183_v16, %v7673_v1 }
 0x2e5   : > { %v1193_v19 = vpop.permute.xlu1 %1192 }
 0x2e6   : > { %v1202_v8 = vmul.f32 %v1193_v19, %v7670_v0 }
 0x336   : > { %v1211_v21 = vpop.permute.xlu0 %1210 }
 0x337   : > { %v1244_v26 = vadd.f32 %v1211_v21, %v1196_v23 }
 0x338   : > { %v1206_v24 = vpop.permute.xlu1 %1205 }
 0x339   : > { %v1243_v27 = vadd.f32 %v1206_v24, %v1195_v22 }
 0x33b   : > { %v1251_v28 = vpack.c.bf16 %v1244_v26, %v1243_v27 }
 0x33c   : > { %v1221_v29 = vpop.permute.xlu1 %1220 }
 0x33d   : > { %1268 = vxpose.xlu0.c.b16.start [1/4] (short) (narrow) %v1251_v28, 64  ;;  %v1246_v32 = vadd.f32 %v1221_v29, %v1198_v30 }
 0x33e   : > { %v1216_v31 = vpop.permute.xlu0 %1215 }
 0x33f   : > { %v1245_v34 = vadd.f32 %v1216_v31, %v1197_v58 }
 0x340   : > { %v1226_v35 = vpop.permute.xlu1 %1225 }
 0x341   : > { %v1252_v36 = vpack.c.bf16 %v1246_v32, %v1245_v34  ;;  %v1247_v37 = vadd.f32 %v1226_v35, %v1199_v62 }
 0x342   : > { %v1231_v12 = vpop.permute.xlu0 %1230 }
 0x343   : > { %v1248_v63 = vadd.f32 %v1231_v12, %v1200_v20  ;;  %1269 = vxpose.xlu0.c.b16.cont [2/4] (short) (narrow) %v1252_v36, 64 }
 0x344   : > { %v1236_v38 = vpop.permute.xlu1 %1235 }
 0x345   : > { %v1253_v39 = vpack.c.bf16 %v1248_v63, %v1247_v37  ;;  %v1249_v41 = vadd.f32 %v1236_v38, %v1201_v7 }
 0x347   : > { %1270 = vxpose.xlu0.c.b16.cont [3/4] (short) (narrow) %v1253_v39, 64 }
 0x348   : > { %v1241_v40 = vpop.permute.xlu1 %1240 }
 0x349   : > { %v1250_v43 = vadd.f32 %v1241_v40, %v1202_v8 }
 0x34b   : > { %v1254_v9 = vpack.c.bf16 %v1250_v43, %v1249_v41 }
 0x34d   : > { %1271 = vxpose.xlu0.c.b16.end [4/4] (short) (narrow) %v1254_v9, 64 }
 0x3a3   : > { %v1276_v5 = vpop.trf.xlu0 }
 0x3a4   : > { %6109 = vmatprep.mubr.msk.bf16.mxu0 %vm736_vm0, %v1276_v5 }
 0x3a7   : > { %v1277_v1 = vpop.trf.xlu0 }
 0x3a8   : > { %6110 = vmatmul.mubr.msk.bf16.vlgmr.msra.gmra.mxu0 %vm736_vm0, %v1277_v1 }
 0x3ab   : > { %v1278_v44 = vpop.trf.xlu0 }
 0x3ac   : > { %6113 = vmatprep.mubr.msk.bf16.mxu0 %vm736_vm0, %v1278_v44 }
 0x3af   : > { %v1279_v45 = vpop.trf.xlu0 }
 0x3b0   : > { %6114 = vmatmul.mubr.msk.bf16.gmra.mxu0 %vm736_vm0, %v1279_v45 }
 0x468   : > { %v6111_v0 = vpop.f32.mrf.mxu0 }
 0x469   : > { %v7863_v25 = vadd.f32 %v6111_v0, %v5688_v2 }
 0x46a   : > { %v1354_v17 = vpop.f32.mrf.mxu0 }
 0x46b   : > { %v7865_v46 = vadd.f32 %v5688_v2, %v1354_v17  ;;  %v1393_v47 = vsel %vm1386_vm1, %v7863_v25, 0.0  ;;  %v6631_v17 = vld [vmem:[#allocation8 + $0x8] sm:$0xff]  }
 0x46c   : > { %1394 = vadd.xlane.f32.xlu0 %v1393_v47  ;;  %v6112_v48 = vpop.f32.mrf.mxu0  ;;  %v6632_v47 = vld [vmem:[#allocation9 + $0x8] sm:$0xff]   ;;  %6117 = vmatprep.subr.bf16.mxu1 %v6631_v17 }
 0x46d   : > { %v7869_v42 = vadd.f32 %v6112_v48, %v5688_v2  ;;  %v1387_v33 = vsel %vm1386_vm1, %v7865_v46, 0.0  ;;  %6129 = vmatprep.subr.bf16.mxu0 %v6632_v47  ;;  %6118 = vmatpush3.bf16.msra.mxu1 %v6631_v17  ;;  %v6633_v48 = vld [vmem:[#allocation8] sm:$0xff]  }
 0x46e   : > { %v1357_v49 = vpop.f32.mrf.mxu0  ;;  %1388 = vadd.xlane.f32.xlu1 %v1387_v33  ;;  %6130 = vmatpush3.bf16.msra.mxu0 %v6632_v47  ;;  %v6634_v33 = vld [vmem:[#allocation9] sm:$0xff]  }
 0x46f   : > { %v7873_v51 = vadd.f32 %v5688_v2, %v1357_v49  ;;  %v1396_v53 = vsel %vm1386_vm1, %v7869_v42, 0.0  ;;  %6119 = vmatprep.subr.bf16.mxu1 %v6633_v48  ;;  %6131 = vmatprep.subr.bf16.mxu0 %v6634_v33  ;;  %v7943_v49 = vld [vmem:[#allocation11 + $0x8] sm:$0xff]  }
 0x470   : > { %v6115_v50 = vpop.f32.mrf.mxu0 }
 0x471   : > { %v7875_v52 = vadd.f32 %v6115_v50, %v5688_v2  ;;  %v1390_v60 = vsel %vm1386_vm1, %v7873_v51, 0.0  ;;  %6120 = vmatpush3.bf16.msra.mxu1 %v6633_v48 }
 0x472   : > { %1397 = vadd.xlane.f32.xlu1 %v1396_v53  ;;  %v1370_v54 = vpop.f32.mrf.mxu0  ;;  %6132 = vmatpush3.bf16.msra.mxu0 %v6634_v33 }
 0x473   : > { %v1405_v55 = vsel %vm1386_vm1, %v7875_v52, 0.0  ;;  %v7881_v59 = vadd.f32 %v5688_v2, %v1370_v54  ;;  %6141 = vmatprep.subr.bf16.mxu1 %v7943_v49 }
 0x474   : > { %1406 = vadd.xlane.f32.xlu0 %v1405_v55  ;;  %v6116_v57 = vpop.f32.mrf.mxu0 }
 0x475   : > { %v1399_v4 = vsel %vm1386_vm1, %v7881_v59, 0.0  ;;  %v7889_v6 = vadd.f32 %v6116_v57, %v5688_v2 }
 0x476   : > { %1391 = vadd.xlane.f32.xlu1 %v1390_v60  ;;  %v1373_v61 = vpop.f32.mrf.mxu0 }
 0x477   : > { %v7885_v3 = vadd.f32 %v5688_v2, %v1373_v61  ;;  %v1408_v11 = vsel %vm1386_vm1, %v7889_v6, 0.0 }
 0x479   : > { %v1402_v10 = vsel %vm1386_vm1, %v7885_v3, 0.0 }
 0x47a   : > { %1400 = vadd.xlane.f32.xlu1 %v1399_v4 }
 0x47e   : > { %1403 = vadd.xlane.f32.xlu1 %v1402_v10 }
 0x482   : > { %1409 = vadd.xlane.f32.xlu1 %v1408_v11 }
 0x4f5   : > { %v1395_v13 = vpop.xlane.xlu0 %1394 }
 0x4f6   : > { %v1414_v14 = vmul.f32 0.03125, %v1395_v13 }
 0x4f7   : > { %v1389_v15 = vpop.xlane.xlu1 %1388 }
 0x4f8   : > { %v1412_v16 = vmul.f32 0.03125, %v1389_v15  ;;  %v7896_v18 = vsub.f32 %v7863_v25, %v1414_v14 }
 0x4fa   : > { %v7899_v19 = vsub.f32 %v7865_v46, %v1412_v16  ;;  %v1430_v26 = vmul.f32 %v7896_v18, %v7896_v18 }
 0x4fb   : > { %v1398_v21 = vpop.xlane.xlu1 %1397 }
 0x4fc   : > { %v1428_v22 = vmul.f32 %v7899_v19, %v7899_v19  ;;  %v1415_v23 = vmul.f32 0.03125, %v1398_v21  ;;  %v1442_v32 = vsel %vm1386_vm1, %v1430_v26, 0.0 }
 0x4fd   : > { %v1407_v27 = vpop.xlane.xlu0 %1406 }
 0x4fe   : > { %v1436_v24 = vsel %vm1386_vm1, %v1428_v22, 0.0  ;;  %v7907_v30 = vsub.f32 %v7869_v42, %v1415_v23  ;;  %v1418_v58 = vmul.f32 0.03125, %v1407_v27 }
 0x4ff   : > { %v1392_v28 = vpop.xlane.xlu1 %1391  ;;  %1437 = vadd.xlane.f32.xlu0 %v1436_v24 }
 0x500   : > { %v1413_v29 = vmul.f32 0.03125, %v1392_v28  ;;  %v7916_v20 = vsub.f32 %v7875_v52, %v1418_v58  ;;  %v1431_v37 = vmul.f32 %v7907_v30, %v7907_v30 }
 0x502   : > { %v7910_v31 = vsub.f32 %v7873_v51, %v1413_v29  ;;  %v1445_v8 = vsel %vm1386_vm1, %v1431_v37, 0.0  ;;  %v1434_v41 = vmul.f32 %v7916_v20, %v7916_v20 }
 0x503   : > { %v1401_v34 = vpop.xlane.xlu1 %1400  ;;  %1443 = vadd.xlane.f32.xlu0 %v1442_v32 }
 0x504   : > { %v1416_v35 = vmul.f32 0.03125, %v1401_v34  ;;  %v1429_v62 = vmul.f32 %v7910_v31, %v7910_v31  ;;  %v1454_v45 = vsel %vm1386_vm1, %v1434_v41, 0.0 }
 0x506   : > { %v7919_v36 = vsub.f32 %v7881_v59, %v1416_v35  ;;  %v1439_v12 = vsel %vm1386_vm1, %v1429_v62, 0.0 }
 0x507   : > { %1440 = vadd.xlane.f32.xlu1 %v1439_v12  ;;  %v1404_v63 = vpop.xlane.xlu1 %1403  ;;  %v5697_v12 = vld [vmem:[#allocation6 + $0x1] ss:$0 sm:$0xff] }
 0x508   : > { %v1417_v38 = vmul.f32 0.03125, %v1404_v63  ;;  %v1432_v39 = vmul.f32 %v7919_v36, %v7919_v36 }
 0x50a   : > { %v7927_v7 = vsub.f32 %v7885_v3, %v1417_v38  ;;  %v1448_v40 = vsel %vm1386_vm1, %v1432_v39, 0.0 }
 0x50b   : > { %1446 = vadd.xlane.f32.xlu1 %v1445_v8  ;;  %v1410_v43 = vpop.xlane.xlu1 %1409  ;;  %1449 = vadd.xlane.f32.xlu0 %v1448_v40  ;;  %v5698_v8 = vld [vmem:[#allocation6 + $0x2] ss:$0 sm:$0xff] }
 0x50c   : > { %v1419_v9 = vmul.f32 0.03125, %v1410_v43  ;;  %v1433_v5 = vmul.f32 %v7927_v7, %v7927_v7 }
 0x50e   : > { %v7936_v1 = vsub.f32 %v7889_v6, %v1419_v9  ;;  %v1451_v44 = vsel %vm1386_vm1, %v1433_v5, 0.0 }
 0x50f   : > { %1452 = vadd.xlane.f32.xlu1 %v1451_v44  ;;  %1455 = vadd.xlane.f32.xlu0 %v1454_v45 }
 0x510   : > { %v1435_v2 = vmul.f32 %v7936_v1, %v7936_v1 }
 0x512   : > { %v1457_v0 = vsel %vm1386_vm1, %v1435_v2, 0.0 }
 0x513   : > { %1458 = vadd.xlane.f32.xlu1 %v1457_v0 }
 0x588   : > { %v1438_v50 = vpop.xlane.xlu0 %1437 }
 0x589   : > { %v1460_v53 = vmul.f32 0.03125, %v1438_v50 }
 0x58b   : > { %v1468_v54 = vadd.f32 1e-05, %v1460_v53 }
 0x58c   : > { %v1444_v55 = vpop.xlane.xlu0 %1443 }
 0x58d   : > { %v1462_v57 = vmul.f32 0.03125, %v1444_v55  ;;  %6679 = vrsqrt.f32 %v1468_v54  ;;  %v6636_v54 = vld [vmem:[#allocation11] sm:$0xff]  }
 0x58f   : > { %v1470_v60 = vadd.f32 1e-05, %v1462_v57 }
 0x590   : > { %v1441_v61 = vpop.xlane.xlu1 %1440 }
 0x591   : > { %v1461_v4 = vmul.f32 0.03125, %v1441_v61  ;;  %6681 = vrsqrt.f32 %v1470_v60 }
 0x593   : > { %v1469_v10 = vadd.f32 1e-05, %v1461_v4 }
 0x594   : > { %v1447_v11 = vpop.xlane.xlu1 %1446  ;;  %v1450_v13 = vpop.xlane.xlu0 %1449 }
 0x595   : > { %6683 = vrsqrt.f32 %v1469_v10  ;;  %v1463_v14 = vmul.f32 0.03125, %v1447_v11  ;;  %v1464_v15 = vmul.f32 0.03125, %v1450_v13 }
 0x597   : > { %v1471_v16 = vadd.f32 1e-05, %v1463_v14  ;;  %v1472_v21 = vadd.f32 1e-05, %v1464_v15 }
 0x598   : > { %v1453_v22 = vpop.xlane.xlu1 %1452  ;;  %v1456_v23 = vpop.xlane.xlu0 %1455 }
 0x599   : > { %6685 = vrsqrt.f32 %v1471_v16  ;;  %v1465_v24 = vmul.f32 0.03125, %v1453_v22  ;;  %v1466_v26 = vmul.f32 0.03125, %v1456_v23 }
 0x59a   : > { %6687 = vrsqrt.f32 %v1472_v21  ;;  %v6680_v29 = vpop.eup %6679 }
 0x59b   : > { %v1473_v27 = vadd.f32 1e-05, %v1465_v24  ;;  %v1474_v28 = vadd.f32 1e-05, %v1466_v26  ;;  %v1484_v35 = vmul.f32 %v6680_v29, %v7899_v19 }
 0x59c   : > { %v1459_v58 = vpop.xlane.xlu1 %1458 }
 0x59d   : > { %6689 = vrsqrt.f32 %v1473_v27  ;;  %v1467_v32 = vmul.f32 0.03125, %v1459_v58  ;;  %v1497_v39 = vmul.f32 %v5697_v12, %v1484_v35 }
 0x59e   : > { %6691 = vrsqrt.f32 %v1474_v28  ;;  %v6682_v62 = vpop.eup %6681 }
 0x59f   : > { %v1475_v34 = vadd.f32 1e-05, %v1467_v32  ;;  %v1486_v63 = vmul.f32 %v6682_v62, %v7896_v18  ;;  %v1510_v44 = vadd.f32 %v5698_v8, %v1497_v39 }
 0x5a1   : > { %6693 = vrsqrt.f32 %v1475_v34  ;;  %v1499_v9 = vmul.f32 %v5697_v12, %v1486_v63 }
 0x5a2   : > { %v6684_v37 = vpop.eup %6683 }
 0x5a3   : > { %v1485_v38 = vmul.f32 %v6684_v37, %v7910_v31  ;;  %v1512_v18 = vadd.f32 %v5698_v8, %v1499_v9 }
 0x5a5   : > { %v1498_v40 = vmul.f32 %v5697_v12, %v1485_v38 }
 0x5a6   : > { %v6686_v41 = vpop.eup %6685 }
 0x5a7   : > { %v6688_v43 = vpop.eup %6687  ;;  %v1487_v5 = vmul.f32 %v6686_v41, %v7907_v30  ;;  %v1511_v45 = vadd.f32 %v5698_v8, %v1498_v40 }
 0x5a8   : > { %v1488_v19 = vmul.f32 %v6688_v43, %v7919_v36 }
 0x5a9   : > { %v1500_v2 = vmul.f32 %v5697_v12, %v1487_v5  ;;  %v1518_v0 = vpack.c.bf16 %v1511_v45, %v1510_v44 }
 0x5aa   : > { %v6690_v17 = vpop.eup %6689  ;;  %v1501_v47 = vmul.f32 %v5697_v12, %v1488_v19 }
 0x5ab   : > { %v6692_v48 = vpop.eup %6691  ;;  %6121 = vmatprep.mubr.msk.bf16.mxu1 %vm1386_vm1, %v1518_v0  ;;  %6133 = vmatprep.mubr.msk.bf16.mxu0 %vm1386_vm1, %v1518_v0  ;;  %v1513_v31 = vadd.f32 %v5698_v8, %v1500_v2  ;;  %v1489_v33 = vmul.f32 %v6690_v17, %v7927_v7 }
 0x5ac   : > { %v1490_v50 = vmul.f32 %v6692_v48, %v7916_v20  ;;  %v1514_v36 = vadd.f32 %v5698_v8, %v1501_v47 }
 0x5ad   : > { %v1519_v30 = vpack.c.bf16 %v1513_v31, %v1512_v18  ;;  %v1502_v53 = vmul.f32 %v5697_v12, %v1489_v33 }
 0x5ae   : > { %v6694_v55 = vpop.eup %6693  ;;  %v1503_v61 = vmul.f32 %v5697_v12, %v1490_v50 }
 0x5af   : > { %6122 = vmatmul.mubr.msk.bf16.vlgmr.msra.gmra.mxu1 %vm1386_vm1, %v1519_v30  ;;  %6134 = vmatmul.mubr.msk.bf16.vlgmr.msra.gmra.mxu0 %vm1386_vm1, %v1519_v30  ;;  %v1515_v57 = vadd.f32 %v5698_v8, %v1502_v53  ;;  %v1491_v60 = vmul.f32 %v6694_v55, %v7936_v1 }
 0x5b0   : > { %6142 = vmatpush3.bf16.msra.mxu1 %v7943_v49  ;;  %v1516_v20 = vadd.f32 %v5698_v8, %v1503_v61 }
 0x5b1   : > { %v1520_v4 = vpack.c.bf16 %v1515_v57, %v1514_v36  ;;  %v1504_v10 = vmul.f32 %v5697_v12, %v1491_v60  ;;  %6143 = vmatprep.subr.bf16.mxu1 %v6636_v54 }
 0x5b3   : > { %6125 = vmatprep.mubr.msk.bf16.mxu1 %vm1386_vm1, %v1520_v4  ;;  %6137 = vmatprep.mubr.msk.bf16.mxu0 %vm1386_vm1, %v1520_v4  ;;  %v1517_v7 = vadd.f32 %v5698_v8, %v1504_v10 }
 0x5b4   : > { %6144 = vmatpush3.bf16.msra.mxu1 %v6636_v54 }
 0x5b5   : > { %v1521_v11 = vpack.c.bf16 %v1517_v7, %v1516_v20 }
 0x5b7   : > { %6126 = vmatmul.mubr.msk.bf16.gmra.mxu1 %vm1386_vm1, %v1521_v11  ;;  %6138 = vmatmul.mubr.msk.bf16.gmra.mxu0 %vm1386_vm1, %v1521_v11 }
 0x5b8   : > { %6145 = vmatprep.mubr.msk.bf16.mxu1 %vm1386_vm1, %v1518_v0 }
 0x5bf   : > { %6146 = vmatmul.mubr.msk.bf16.vlgmr.msra.gmra.mxu1 %vm1386_vm1, %v1519_v30 }
 0x5c0   : > { %6149 = vmatprep.mubr.msk.bf16.mxu1 %vm1386_vm1, %v1520_v4 }
 0x5c7   : > { %6150 = vmatmul.mubr.msk.bf16.gmra.mxu1 %vm1386_vm1, %v1521_v11 }
 0x66f   : > { %v6123_v1 = vpop.f32.mrf.mxu1  ;;  %v6135_v49 = vpop.f32.mrf.mxu0 }
 0x671   : > { %v1584_v13 = vpop.f32.mrf.mxu1  ;;  %v1669_v14 = vpop.f32.mrf.mxu0 }
 0x673   : > { %v6124_v15 = vpop.f32.mrf.mxu1  ;;  %v6136_v16 = vpop.f32.mrf.mxu0 }
 0x674   : > { %v7981_v8 = vpack.c.bf16 %v6136_v16, %v6135_v49  ;;  %v8011_v48 = vpack.c.bf16 %v6124_v15, %v6123_v1 }
 0x675   : > { %v1587_v21 = vpop.f32.mrf.mxu1  ;;  %v1672_v22 = vpop.f32.mrf.mxu0 }
 0x676   : > { %v7967_v23 = vpack.c.bf16 %v1587_v21, %v1584_v13  ;;  %v7989_v45 = vpack.c.bf16 %v1672_v22, %v1669_v14  ;;  %v1806_v2 = vsel %vm1789_vm2, %v7981_v8, 0 }
 0x677   : > { %v6127_v24 = vpop.f32.mrf.mxu1  ;;  %v6139_v26 = vpop.f32.mrf.mxu0 }
 0x678   : > { %6161 = vmatprep.mubr.msk.bf16.mxu0 %vm1789_vm2, %v7967_v23  ;;  %v1803_v47 = vsel %vm1789_vm2, %v7989_v45, 0 }
 0x679   : > { %v1600_v27 = vpop.f32.mrf.mxu1  ;;  %v1685_v28 = vpop.f32.mrf.mxu0 }
 0x67b   : > { %v6128_v29 = vpop.f32.mrf.mxu1  ;;  %v6140_v58 = vpop.f32.mrf.mxu0 }
 0x67c   : > { %v7971_v32 = vpack.c.bf16 %v6140_v58, %v6139_v26  ;;  %v8019_v31 = vpack.c.bf16 %v6128_v29, %v6127_v24 }
 0x67d   : > { %v1603_v34 = vpop.f32.mrf.mxu1  ;;  %v1688_v35 = vpop.f32.mrf.mxu0 }
 0x67e   : > { %v7973_v62 = vpack.c.bf16 %v1688_v35, %v1685_v28  ;;  %6449 = vmatprep.subr.msk.bf16.mxu0 %vm1789_vm2, %v7971_v32  ;;  %v1812_v12 = vsel %vm1789_vm2, %v7971_v32, 0  ;;  %v8013_v18 = vpack.c.bf16 %v1603_v34, %v1600_v27 }
 0x67f   : > { %v6147_v37 = vpop.f32.mrf.mxu1  ;;  %6154 = vmatpush3.bf16.xpose.msra.mxu0 %v1812_v12 }
 0x680   : > { %6450 = vmatprep.subr.msk.bf16.mxu0 %vm1789_vm2, %v7973_v62  ;;  %v1809_v40 = vsel %vm1789_vm2, %v7973_v62, 0 }
 0x681   : > { %v1754_v63 = vpop.f32.mrf.mxu1 }
 0x683   : > { %v6148_v38 = vpop.f32.mrf.mxu1 }
 0x684   : > { %v8000_v0 = vpack.c.bf16 %v6148_v38, %v6147_v37 }
 0x685   : > { %v1757_v39 = vpop.f32.mrf.mxu1 }
 0x686   : > { %v8004_v17 = vpack.c.bf16 %v1757_v39, %v1754_v63 }
 0x687   : > { %v6151_v41 = vpop.f32.mrf.mxu1  ;;  %6156 = vmatpush3.bf16.xpose.msra.mxu0 %v1809_v40 }
 0x688   : > { %6451 = vmatprep.subr.msk.bf16.mxu0 %vm1789_vm2, %v7981_v8 }
 0x689   : > { %v1770_v43 = vpop.f32.mrf.mxu1 }
 0x68b   : > { %v6152_v9 = vpop.f32.mrf.mxu1 }
 0x68c   : > { %v7987_v5 = vpack.c.bf16 %v6152_v9, %v6151_v41 }
 0x68d   : > { %v1773_v44 = vpop.f32.mrf.mxu1 }
 0x68e   : > { %v7991_v19 = vpack.c.bf16 %v1773_v44, %v1770_v43  ;;  %6169 = vmatprep.subr.bf16.mxu1 %v7987_v5 }
 0x68f   : > { %6158 = vmatpush3.bf16.xpose.msra.mxu0 %v1806_v2  ;;  %6170 = vmatpush3.bf16.msra.mxu1 %v7987_v5 }
 0x690   : > { %6452 = vmatprep.subr.msk.bf16.mxu0 %vm1789_vm2, %v7989_v45  ;;  %6171 = vmatprep.subr.bf16.mxu1 %v7991_v19 }
 0x693   : > { %6172 = vmatpush3.bf16.msra.mxu1 %v7991_v19 }
 0x694   : > { %6173 = vmatprep.subr.bf16.mxu1 %v8000_v0 }
 0x697   : > { %6160 = vmatpush3.bf16.xpose.msra.mxu0 %v1803_v47  ;;  %6174 = vmatpush3.bf16.msra.mxu1 %v8000_v0 }
 0x698   : > { %6175 = vmatprep.subr.bf16.mxu1 %v8004_v17 }
 0x69b   : > { %6176 = vmatpush3.bf16.msra.mxu1 %v8004_v17 }
 0x69e   : > { %6162 = vmatmul.mubr.msk.bf16.vlgmr.msra.gmra.mxu0 %vm1789_vm2, %v8011_v48 }
 0x69f   : > { %6165 = vmatprep.mubr.msk.bf16.mxu0 %vm1789_vm2, %v8013_v18 }
 0x6a6   : > { %6166 = vmatmul.mubr.msk.bf16.gmra.mxu0 %vm1789_vm2, %v8019_v31 }
 0x75e   : > { %v6163_v33 = vpop.f32.mrf.mxu0 }
 0x75f   : > { %v1885_v55 = vsel %vm736_vm0, %v6163_v33, -inf }
 0x760   : > { %v1848_v50 = vpop.f32.mrf.mxu0 }
 0x761   : > { %v1879_v30 = vsel %vm736_vm0, %v1848_v50, -inf }
 0x762   : > { %1880 = vmax.xlane.f32.xlu0 %v1879_v30  ;;  %v6164_v53 = vpop.f32.mrf.mxu0 }
 0x763   : > { %v1888_v61 = vsel %vm736_vm0, %v6164_v53, -inf }
 0x764   : > { %v1851_v54 = vpop.f32.mrf.mxu0 }
 0x765   : > { %v1882_v36 = vsel %vm736_vm0, %v1851_v54, -inf }
 0x766   : > { %1886 = vmax.xlane.f32.xlu0 %v1885_v55  ;;  %1883 = vmax.xlane.f32.xlu1 %v1882_v36  ;;  %v6167_v57 = vpop.f32.mrf.mxu0 }
 0x767   : > { %v1897_v7 = vsel %vm736_vm0, %v6167_v57, -inf }
 0x768   : > { %v1864_v60 = vpop.f32.mrf.mxu0 }
 0x769   : > { %v1891_v4 = vsel %vm736_vm0, %v1864_v60, -inf }
 0x76a   : > { %1889 = vmax.xlane.f32.xlu1 %v1888_v61  ;;  %1892 = vmax.xlane.f32.xlu0 %v1891_v4  ;;  %v6168_v10 = vpop.f32.mrf.mxu0 }
 0x76b   : > { %v1900_v1 = vsel %vm736_vm0, %v6168_v10, -inf }
 0x76c   : > { %v1867_v20 = vpop.f32.mrf.mxu0 }
 0x76d   : > { %v1894_v11 = vsel %vm736_vm0, %v1867_v20, -inf }
 0x76e   : > { %1898 = vmax.xlane.f32.xlu0 %v1897_v7  ;;  %1895 = vmax.xlane.f32.xlu1 %v1894_v11 }
 0x772   : > { %1901 = vmax.xlane.f32.xlu1 %v1900_v1 }
 0x7eb   : > { %v1881_v49 = vpop.xlane.xlu0 %1880 }
 0x7ec   : > { %v1903_v13 = vsub.f32 %v1848_v50, %v1881_v49 }
 0x7ee   : > { %v1911_v21 = vmul.f32 1.442695, %v1903_v13 }
 0x7ef   : > { %v1887_v14 = vpop.xlane.xlu0 %1886  ;;  %v1884_v15 = vpop.xlane.xlu1 %1883 }
 0x7f0   : > { %v1905_v16 = vsub.f32 %v6163_v33, %v1887_v14  ;;  %v1904_v24 = vsub.f32 %v1851_v54, %v1884_v15 }
 0x7f2   : > { %v1915_v22 = vmul.f32 1.442695, %v1905_v16  ;;  %v1913_v29 = vmul.f32 1.442695, %v1904_v24 }
 0x7f3   : > { %v1890_v26 = vpop.xlane.xlu1 %1889  ;;  %v1893_v27 = vpop.xlane.xlu0 %1892 }
 0x7f4   : > { %6695 = vpow2.f32 %v1915_v22  ;;  %v1906_v28 = vsub.f32 %v6164_v53, %v1890_v26  ;;  %v1907_v34 = vsub.f32 %v1864_v60, %v1893_v27 }
 0x7f5   : > { %6697 = vpow2.f32 %v1911_v21 }
 0x7f6   : > { %v1917_v58 = vmul.f32 1.442695, %v1906_v28  ;;  %v1919_v37 = vmul.f32 1.442695, %v1907_v34 }
 0x7f7   : > { %v1899_v35 = vpop.xlane.xlu0 %1898  ;;  %v1896_v53 = vpop.xlane.xlu1 %1895 }
 0x7f8   : > { %6699 = vpow2.f32 %v1917_v58  ;;  %v1909_v12 = vsub.f32 %v6167_v57, %v1899_v35  ;;  %v1908_v36 = vsub.f32 %v1867_v20, %v1896_v53 }
 0x7f9   : > { %6701 = vpow2.f32 %v1913_v29 }
 0x7fa   : > { %v1923_v63 = vmul.f32 1.442695, %v1909_v12  ;;  %v1921_v60 = vmul.f32 1.442695, %v1908_v36 }
 0x7fb   : > { %v1902_v54 = vpop.xlane.xlu1 %1901 }
 0x7fc   : > { %6703 = vpow2.f32 %v1923_v63  ;;  %v1910_v55 = vsub.f32 %v6168_v10, %v1902_v54 }
 0x7fd   : > { %6705 = vpow2.f32 %v1919_v37 }
 0x7fe   : > { %v1925_v57 = vmul.f32 1.442695, %v1910_v55 }
 0x800   : > { %6707 = vpow2.f32 %v1925_v57 }
 0x801   : > { %v6696_v38 = vpop.eup %6695  ;;  %6709 = vpow2.f32 %v1921_v60 }
 0x802   : > { %v1933_v39 = vsel %vm736_vm0, %v6696_v38, 0.0  ;;  %v6698_v40 = vpop.eup %6697 }
 0x803   : > { %1934 = vadd.xlane.f32.xlu0 %v1933_v39  ;;  %v1927_v43 = vsel %vm736_vm0, %v6698_v40, 0.0 }
 0x805   : > { %v6700_v41 = vpop.eup %6699 }
 0x806   : > { %v1936_v9 = vsel %vm736_vm0, %v6700_v41, 0.0  ;;  %v6702_v44 = vpop.eup %6701 }
 0x807   : > { %1928 = vadd.xlane.f32.xlu0 %v1927_v43  ;;  %1937 = vadd.xlane.f32.xlu1 %v1936_v9  ;;  %v1930_v33 = vsel %vm736_vm0, %v6702_v44, 0.0 }
 0x809   : > { %v8034_v2 = vpop.eup %6703 }
 0x80a   : > { %v1945_v47 = vsel %vm736_vm0, %v8034_v2, 0.0  ;;  %v8039_v50 = vpop.eup %6705 }
 0x80b   : > { %1946 = vadd.xlane.f32.xlu0 %v1945_v47  ;;  %1931 = vadd.xlane.f32.xlu1 %v1930_v33  ;;  %v1939_v30 = vsel %vm736_vm0, %v8039_v50, 0.0 }
 0x80d   : > { %v6708_v61 = vpop.eup %6707 }
 0x80e   : > { %v1948_v4 = vsel %vm736_vm0, %v6708_v61, 0.0  ;;  %v6710_v7 = vpop.eup %6709 }
 0x80f   : > { %1940 = vadd.xlane.f32.xlu0 %v1939_v30  ;;  %v1942_v11 = vsel %vm736_vm0, %v6710_v7, 0.0 }
 0x81c   : > { %2076 = vrot.lane.b32.xlu1 %v7973_v62, %s7333_s2 }
 0x820   : > { %2074 = vrot.lane.b32.xlu1 %v7981_v8, %s7333_s2 }
 0x825   : > { %2078 = vrot.lane.b32.xlu0 %v7971_v32, %s7333_s2 }
 0x829   : > { %2060 = vrot.lane.b32.xlu0 %v7967_v23, %s7333_s2 }
 0x82d   : > { %2064 = vrot.lane.b32.xlu0 %v8013_v18, %s7333_s2 }
 0x844   : > { %1949 = vadd.xlane.f32.xlu1 %v1948_v4 }
 0x848   : > { %1943 = vadd.xlane.f32.xlu1 %v1942_v11 }
 0x859   : > { %2072 = vrot.lane.b32.xlu1 %v7989_v45, %s7333_s2 }
 0x85d   : > { %2062 = vrot.lane.b32.xlu1 %v8011_v48, %s7333_s2 }
 0x861   : > { %2066 = vrot.lane.b32.xlu1 %v8019_v31, %s7333_s2 }
 0x88c   : > { %v1935_v10 = vpop.xlane.xlu0 %1934 }
 0x890   : > { %v1929_v20 = vpop.xlane.xlu0 %1928  ;;  %v1938_v1 = vpop.xlane.xlu1 %1937 }
 0x891   : > { %6711 = vrcp.f32 %v1938_v1 }
 0x892   : > { %6713 = vrcp.f32 %v1929_v20 }
 0x893   : > { %6715 = vrcp.f32 %v1935_v10 }
 0x894   : > { %v1947_v49 = vpop.xlane.xlu0 %1946  ;;  %v1932_v13 = vpop.xlane.xlu1 %1931 }
 0x895   : > { %6717 = vrcp.f32 %v1932_v13 }
 0x898   : > { %v1941_v14 = vpop.xlane.xlu0 %1940  ;;  %v2077_v12 = vpop.permute.xlu1 %2076 }
 0x899   : > { %v2099_v37 = vsel %vm1789_vm2, %v2077_v12, 0 }
 0x89c   : > { %v2079_v15 = vpop.permute.xlu0 %2078  ;;  %v2075_v63 = vpop.permute.xlu1 %2074 }
 0x89d   : > { %6453 = vmatprep.subr.msk.bf16.mxu1 %vm1789_vm2, %v2079_v15  ;;  %v2102_v35 = vsel %vm1789_vm2, %v2079_v15, 0 }
 0x89e   : > { %v6712_v16 = vpop.eup %6711 }
 0x89f   : > { %v6714_v21 = vpop.eup %6713  ;;  %v1962_v26 = vmul.f32 %v6712_v16, %v6700_v41 }
 0x8a0   : > { %v6716_v22 = vpop.eup %6715  ;;  %v1959_v27 = vmul.f32 %v6714_v21, %v6698_v40  ;;  %v2061_v60 = vpop.permute.xlu0 %2060 }
 0x8a1   : > { %v1961_v29 = vmul.f32 %v6716_v22, %v6696_v38  ;;  %v2096_v38 = vsel %vm1789_vm2, %v2075_v63, 0 }
 0x8a2   : > { %v6718_v24 = vpop.eup %6717 }
 0x8a3   : > { %v1960_v28 = vmul.f32 %v6718_v24, %v6702_v44  ;;  %v1968_v34 = vpack.c.bf16 %v1962_v26, %v1961_v29 }
 0x8a4   : > { %v2065_v11 = vpop.permute.xlu0 %2064 }
 0x8a5   : > { %v1967_v58 = vpack.c.bf16 %v1960_v28, %v1959_v27 }
 0x8a7   : > { %6177 = vmatprep.mubr.msk.bf16.mxu1 %vm736_vm0, %v1967_v58 }
 0x8a8   : > { %6178 = vmatmul.mubr.msk.bf16.vlgmr.msra.gmra.mxu1 %vm736_vm0, %v1968_v34 }
 0x8a9   : > { %6186 = vmatpush3.bf16.xpose.msra.mxu1 %v2102_v35 }
 0x8aa   : > { %6454 = vmatprep.subr.msk.bf16.mxu1 %vm1789_vm2, %v2077_v12 }
 0x8b1   : > { %6188 = vmatpush3.bf16.xpose.msra.mxu1 %v2099_v37 }
 0x8b2   : > { %6455 = vmatprep.subr.msk.bf16.mxu1 %vm1789_vm2, %v2075_v63 }
 0x8b9   : > { %6190 = vmatpush3.bf16.xpose.msra.mxu1 %v2096_v38 }
 0x8cd   : > { %v1950_v39 = vpop.xlane.xlu1 %1949 }
 0x8ce   : > { %6719 = vrcp.f32 %v1950_v39 }
 0x8cf   : > { %6721 = vrcp.f32 %v1941_v14 }
 0x8d0   : > { %6723 = vrcp.f32 %v1947_v49 }
 0x8d1   : > { %v1944_v40 = vpop.xlane.xlu1 %1943 }
 0x8d2   : > { %6725 = vrcp.f32 %v1944_v40 }
 0x8d5   : > { %v2073_v41 = vpop.permute.xlu1 %2072 }
 0x8d6   : > { %6456 = vmatprep.subr.msk.bf16.mxu1 %vm1789_vm2, %v2073_v41  ;;  %v2093_v43 = vsel %vm1789_vm2, %v2073_v41, 0 }
 0x8d7   : > { %6192 = vmatpush3.bf16.xpose.msra.mxu1 %v2093_v43 }
 0x8d9   : > { %v2063_v4 = vpop.permute.xlu1 %2062 }
 0x8db   : > { %v6720_v9 = vpop.eup %6719 }
 0x8dc   : > { %v6722_v44 = vpop.eup %6721  ;;  %v1966_v30 = vmul.f32 %v6720_v9, %v6708_v61 }
 0x8dd   : > { %v6724_v47 = vpop.eup %6723  ;;  %v1963_v53 = vmul.f32 %v6722_v44, %v8039_v50  ;;  %v2067_v61 = vpop.permute.xlu1 %2066 }
 0x8de   : > { %v1965_v55 = vmul.f32 %v6724_v47, %v8034_v2 }
 0x8df   : > { %v6726_v33 = vpop.eup %6725 }
 0x8e0   : > { %v1964_v54 = vmul.f32 %v6726_v33, %v6710_v7  ;;  %v1970_v57 = vpack.c.bf16 %v1966_v30, %v1965_v55 }
 0x8e2   : > { %v1969_v36 = vpack.c.bf16 %v1964_v54, %v1963_v53 }
 0x8e4   : > { %6181 = vmatprep.mubr.msk.bf16.mxu1 %vm736_vm0, %v1969_v36 }
 0x8e5   : > { %6182 = vmatmul.mubr.msk.bf16.gmra.mxu1 %vm736_vm0, %v1970_v57 }
 0x8e6   : > { %6193 = vmatprep.mubr.msk.bf16.mxu1 %vm1789_vm2, %v2061_v60 }
 0x8ed   : > { %6194 = vmatmul.mubr.msk.bf16.vlgmr.msra.gmra.mxu1 %vm1789_vm2, %v2063_v4 }
 0x8ee   : > { %6197 = vmatprep.mubr.msk.bf16.mxu1 %vm1789_vm2, %v2065_v11 }
 0x8f5   : > { %6198 = vmatmul.mubr.msk.bf16.gmra.mxu1 %vm1789_vm2, %v2067_v61 }
 0x968   : > { %v6179_v50 = vpop.f32.mrf.mxu1 }
 0x969   : > { %2050 = vst.msk [vmem:[#allocation2 + $0x10] sm:$0xff] %vm1789_vm2, %v6179_v50 }
 0x96a   : > { %v2017_v2 = vpop.f32.mrf.mxu1 }
 0x96b   : > { %2048 = vst.msk [vmem:[#allocation2] sm:$0xff] %vm1789_vm2, %v2017_v2 }
 0x96c   : > { %v6180_v7 = vpop.f32.mrf.mxu1 }
 0x96d   : > { %2051 = vst.msk [vmem:[#allocation2 + $0x18] sm:$0xff] %vm1789_vm2, %v6180_v7 }
 0x96e   : > { %v2020_v10 = vpop.f32.mrf.mxu1 }
 0x96f   : > { %2049 = vst.msk [vmem:[#allocation2 + $0x8] sm:$0xff] %vm1789_vm2, %v2020_v10 }
 0x9a5   : > { %v6183_v20 = vpop.f32.mrf.mxu1 }
 0x9a6   : > { %2054 = vst.msk [vmem:[#allocation2 + $0x30] sm:$0xff] %vm1789_vm2, %v6183_v20 }
 0x9a7   : > { %v2033_v1 = vpop.f32.mrf.mxu1 }
 0x9a8   : > { %2052 = vst.msk [vmem:[#allocation2 + $0x20] sm:$0xff] %vm1789_vm2, %v2033_v1 }
 0x9a9   : > { %v6184_v49 = vpop.f32.mrf.mxu1 }
 0x9aa   : > { %2055 = vst.msk [vmem:[#allocation2 + $0x38] sm:$0xff] %vm1789_vm2, %v6184_v49 }
 0x9ab   : > { %v2036_v13 = vpop.f32.mrf.mxu1 }
 0x9ac   : > { %2053 = vst.msk [vmem:[#allocation2 + $0x28] sm:$0xff] %vm1789_vm2, %v2036_v13 }
 0x9ad   : > { %v6195_v14 = vpop.f32.mrf.mxu1 }
 0x9ae   : > { %v2175_v24 = vsel %vm736_vm0, %v6195_v14, -inf }
 0x9af   : > { %v2138_v15 = vpop.f32.mrf.mxu1 }
 0x9b0   : > { %v2169_v16 = vsel %vm736_vm0, %v2138_v15, -inf }
 0x9b1   : > { %2170 = vmax.xlane.f32.xlu0 %v2169_v16  ;;  %v6196_v21 = vpop.f32.mrf.mxu1 }
 0x9b2   : > { %v2178_v29 = vsel %vm736_vm0, %v6196_v21, -inf }
 0x9b3   : > { %v2141_v22 = vpop.f32.mrf.mxu1 }
 0x9b4   : > { %v2172_v26 = vsel %vm736_vm0, %v2141_v22, -inf }
 0x9b5   : > { %2176 = vmax.xlane.f32.xlu0 %v2175_v24  ;;  %2173 = vmax.xlane.f32.xlu1 %v2172_v26  ;;  %v6199_v27 = vpop.f32.mrf.mxu1 }
 0x9b6   : > { %v2187_v12 = vsel %vm736_vm0, %v6199_v27, -inf }
 0x9b7   : > { %v2154_v28 = vpop.f32.mrf.mxu1 }
 0x9b8   : > { %v2181_v63 = vsel %vm736_vm0, %v2154_v28, -inf }
 0x9b9   : > { %2179 = vmax.xlane.f32.xlu0 %v2178_v29  ;;  %v6200_v58 = vpop.f32.mrf.mxu1 }
 0x9ba   : > { %v2190_v34 = vsel %vm736_vm0, %v6200_v58, -inf }
 0x9bb   : > { %2191 = vmax.xlane.f32.xlu1 %v2190_v34  ;;  %v2157_v35 = vpop.f32.mrf.mxu1 }
 0x9bc   : > { %v2184_v37 = vsel %vm736_vm0, %v2157_v35, -inf }
 0x9bd   : > { %2188 = vmax.xlane.f32.xlu0 %v2187_v12 }
 0x9bf   : > { %2185 = vmax.xlane.f32.xlu1 %v2184_v37 }
 0x9c1   : > { %2182 = vmax.xlane.f32.xlu0 %v2181_v63 }
 0x9d0   : > { %2269 = vrot.lane.b32.xlu1 %v7991_v19, %s7333_s2 }
 0x9d4   : > { %2267 = vrot.lane.b32.xlu1 %v8000_v0, %s7333_s2 }
 0x9d7   : > { %2271 = vrot.lane.b32.xlu0 %v7987_v5, %s7333_s2 }
 0x9d8   : > { %2265 = vrot.lane.b32.xlu1 %v8004_v17, %s7333_s2 }
 0xa3a   : > { %v2171_v38 = vpop.xlane.xlu0 %2170 }
 0xa3b   : > { %v2193_v39 = vsub.f32 %v2138_v15, %v2171_v38 }
 0xa3d   : > { %v2201_v9 = vmul.f32 1.442695, %v2193_v39 }
 0xa3e   : > { %v2177_v40 = vpop.xlane.xlu0 %2176  ;;  %v2174_v41 = vpop.xlane.xlu1 %2173 }
 0xa3f   : > { %v2195_v43 = vsub.f32 %v6195_v14, %v2177_v40  ;;  %v2194_v47 = vsub.f32 %v2141_v22, %v2174_v41 }
 0xa41   : > { %v2205_v44 = vmul.f32 1.442695, %v2195_v43  ;;  %v2203_v54 = vmul.f32 1.442695, %v2194_v47 }
 0xa42   : > { %v2180_v33 = vpop.xlane.xlu0 %2179 }
 0xa43   : > { %6727 = vpow2.f32 %v2205_v44  ;;  %v2196_v30 = vsub.f32 %v6196_v21, %v2180_v33 }
 0xa44   : > { %v2192_v53 = vpop.xlane.xlu1 %2191  ;;  %6729 = vpow2.f32 %v2201_v9 }
 0xa45   : > { %v2207_v55 = vmul.f32 1.442695, %v2196_v30  ;;  %v2200_v36 = vsub.f32 %v6200_v58, %v2192_v53 }
 0xa46   : > { %v2189_v57 = vpop.xlane.xlu0 %2188 }
 0xa47   : > { %6731 = vpow2.f32 %v2207_v55  ;;  %v2199_v60 = vsub.f32 %v6199_v27, %v2189_v57  ;;  %v2215_v11 = vmul.f32 1.442695, %v2200_v36 }
 0xa48   : > { %v2186_v4 = vpop.xlane.xlu1 %2185  ;;  %6733 = vpow2.f32 %v2203_v54 }
 0xa49   : > { %v2213_v61 = vmul.f32 1.442695, %v2199_v60  ;;  %v2198_v50 = vsub.f32 %v2157_v35, %v2186_v4 }
 0xa4a   : > { %v2183_v2 = vpop.xlane.xlu0 %2182 }
 0xa4b   : > { %6735 = vpow2.f32 %v2213_v61  ;;  %v2197_v7 = vsub.f32 %v2154_v28, %v2183_v2  ;;  %v2211_v20 = vmul.f32 1.442695, %v2198_v50 }
 0xa4c   : > { %v2270_v10 = vpop.permute.xlu1 %2269  ;;  %6737 = vpow2.f32 %v2215_v11 }
 0xa4d   : > { %v2209_v1 = vmul.f32 1.442695, %v2197_v7 }
 0xa4e   : > { %v2272_v49 = vpop.permute.xlu0 %2271 }
 0xa4f   : > { %6739 = vpow2.f32 %v2209_v1  ;;  %6201 = vmatprep.subr.bf16.mxu0 %v2272_v49 }
 0xa50   : > { %v8103_v13 = vpop.eup %6727  ;;  %6202 = vmatpush3.bf16.msra.mxu0 %v2272_v49  ;;  %6741 = vpow2.f32 %v2211_v20  ;;  %v2268_v16 = vpop.permute.xlu1 %2267 }
 0xa51   : > { %6203 = vmatprep.subr.bf16.mxu0 %v2270_v10  ;;  %v2223_v14 = vsel %vm736_vm0, %v8103_v13, 0.0  ;;  %v6730_v15 = vpop.eup %6729 }
 0xa52   : > { %2224 = vadd.xlane.f32.xlu0 %v2223_v14  ;;  %v2217_v22 = vsel %vm736_vm0, %v6730_v15, 0.0 }
 0xa54   : > { %v6732_v21 = vpop.eup %6731  ;;  %6204 = vmatpush3.bf16.msra.mxu0 %v2270_v10  ;;  %v2266_v28 = vpop.permute.xlu1 %2265 }
 0xa55   : > { %6205 = vmatprep.subr.bf16.mxu0 %v2268_v16  ;;  %v2226_v24 = vsel %vm736_vm0, %v6732_v21, 0.0  ;;  %v6734_v26 = vpop.eup %6733 }
 0xa56   : > { %2218 = vadd.xlane.f32.xlu0 %v2217_v22  ;;  %2227 = vadd.xlane.f32.xlu1 %v2226_v24  ;;  %v2220_v58 = vsel %vm736_vm0, %v6734_v26, 0.0 }
 0xa58   : > { %v8109_v27 = vpop.eup %6735  ;;  %6206 = vmatpush3.bf16.msra.mxu0 %v2268_v16 }
 0xa59   : > { %6207 = vmatprep.subr.bf16.mxu0 %v2266_v28  ;;  %v2235_v29 = vsel %vm736_vm0, %v8109_v27, 0.0  ;;  %v6738_v34 = vpop.eup %6737 }
 0xa5a   : > { %2236 = vadd.xlane.f32.xlu0 %v2235_v29  ;;  %2221 = vadd.xlane.f32.xlu1 %v2220_v58  ;;  %v2238_v37 = vsel %vm736_vm0, %v6738_v34, 0.0 }
 0xa5c   : > { %v6740_v35 = vpop.eup %6739  ;;  %6208 = vmatpush3.bf16.msra.mxu0 %v2266_v28 }
 0xa5d   : > { %v2229_v12 = vsel %vm736_vm0, %v6740_v35, 0.0  ;;  %v6742_v63 = vpop.eup %6741 }
 0xa5e   : > { %2230 = vadd.xlane.f32.xlu1 %v2229_v12  ;;  %2239 = vadd.xlane.f32.xlu0 %v2238_v37  ;;  %v2232_v38 = vsel %vm736_vm0, %v6742_v63, 0.0 }
 0xa62   : > { %2233 = vadd.xlane.f32.xlu0 %v2232_v38 }
 0xa6f   : > { %2407 = vrot.lane.b32.xlu1 %v7973_v62, %s7334_s19 }
 0xa73   : > { %2405 = vrot.lane.b32.xlu1 %v7981_v8, %s7334_s19 }
 0xa77   : > { %2403 = vrot.lane.b32.xlu1 %v7989_v45, %s7334_s19 }
 0xa78   : > { %2409 = vrot.lane.b32.xlu0 %v7971_v32, %s7334_s19 }
 0xa7b   : > { %2397 = vrot.lane.b32.xlu1 %v8011_v48, %s7334_s19 }
 0xa7c   : > { %2395 = vrot.lane.b32.xlu0 %v7967_v23, %s7334_s19 }
 0xa7f   : > { %2401 = vrot.lane.b32.xlu1 %v8019_v31, %s7334_s19 }
 0xa80   : > { %2399 = vrot.lane.b32.xlu0 %v8013_v18, %s7334_s19 }
 0xadb   : > { %v2225_v39 = vpop.xlane.xlu0 %2224 }
 0xadf   : > { %v2219_v40 = vpop.xlane.xlu0 %2218  ;;  %v2228_v41 = vpop.xlane.xlu1 %2227 }
 0xae0   : > { %6743 = vrcp.f32 %v2228_v41 }
 0xae1   : > { %6745 = vrcp.f32 %v2219_v40 }
 0xae2   : > { %6747 = vrcp.f32 %v2225_v39 }
 0xae3   : > { %v2237_v43 = vpop.xlane.xlu0 %2236  ;;  %v2222_v9 = vpop.xlane.xlu1 %2221 }
 0xae4   : > { %6749 = vrcp.f32 %v2222_v9 }
 0xae7   : > { %v2240_v44 = vpop.xlane.xlu0 %2239  ;;  %v2231_v47 = vpop.xlane.xlu1 %2230 }
 0xae8   : > { %6751 = vrcp.f32 %v2240_v44 }
 0xae9   : > { %6753 = vrcp.f32 %v2231_v47 }
 0xaea   : > { %6755 = vrcp.f32 %v2237_v43 }
 0xaeb   : > { %v2234_v33 = vpop.xlane.xlu0 %2233  ;;  %v2408_v49 = vpop.permute.xlu1 %2407 }
 0xaec   : > { %6757 = vrcp.f32 %v2234_v33 }
 0xaed   : > { %v6744_v30 = vpop.eup %6743 }
 0xaee   : > { %v6746_v54 = vpop.eup %6745  ;;  %v2252_v57 = vmul.f32 %v6744_v30, %v6732_v21 }
 0xaef   : > { %v2410_v53 = vpop.permute.xlu0 %2409  ;;  %v6748_v55 = vpop.eup %6747  ;;  %v2249_v60 = vmul.f32 %v6746_v54, %v6730_v15 }
 0xaf0   : > { %6457 = vmatprep.subr.msk.bf16.mxu0 %vm1789_vm2, %v2410_v53  ;;  %v2251_v11 = vmul.f32 %v6748_v55, %v8103_v13  ;;  %v2433_v20 = vsel %vm1789_vm2, %v2410_v53, 0  ;;  %v2406_v28 = vpop.permute.xlu1 %2405 }
 0xaf1   : > { %v6750_v36 = vpop.eup %6749  ;;  %v2427_v29 = vsel %vm1789_vm2, %v2406_v28, 0 }
 0xaf2   : > { %v2250_v4 = vmul.f32 %v6750_v36, %v6734_v26  ;;  %v2258_v2 = vpack.c.bf16 %v2252_v57, %v2251_v11  ;;  %v2430_v26 = vsel %vm1789_vm2, %v2408_v49, 0 }
 0xaf3   : > { %v2396_v24 = vpop.permute.xlu0 %2395 }
 0xaf4   : > { %v2257_v61 = vpack.c.bf16 %v2250_v4, %v2249_v60  ;;  %v2404_v58 = vpop.permute.xlu1 %2403 }
 0xaf5   : > { %v6752_v50 = vpop.eup %6751 }
 0xaf6   : > { %v6754_v7 = vpop.eup %6753  ;;  %6209 = vmatprep.mubr.msk.bf16.mxu0 %vm736_vm0, %v2257_v61  ;;  %v2256_v16 = vmul.f32 %v6752_v50, %v6738_v34 }
 0xaf7   : > { %v6756_v10 = vpop.eup %6755  ;;  %6210 = vmatmul.mubr.msk.bf16.vlgmr.msra.gmra.mxu0 %vm736_vm0, %v2258_v2  ;;  %v2253_v14 = vmul.f32 %v6754_v7, %v6740_v35  ;;  %v2400_v35 = vpop.permute.xlu0 %2399 }
 0xaf8   : > { %6218 = vmatpush3.bf16.xpose.msra.mxu0 %v2433_v20  ;;  %v2255_v21 = vmul.f32 %v6756_v10, %v8109_v27  ;;  %v2424_v27 = vsel %vm1789_vm2, %v2404_v58, 0  ;;  %v2398_v34 = vpop.permute.xlu1 %2397 }
 0xaf9   : > { %v6758_v1 = vpop.eup %6757  ;;  %6458 = vmatprep.subr.msk.bf16.mxu0 %vm1789_vm2, %v2408_v49 }
 0xafa   : > { %v2254_v15 = vmul.f32 %v6758_v1, %v6742_v63  ;;  %v2260_v22 = vpack.c.bf16 %v2256_v16, %v2255_v21 }
 0xafc   : > { %v2259_v13 = vpack.c.bf16 %v2254_v15, %v2253_v14  ;;  %v2402_v12 = vpop.permute.xlu1 %2401 }
 0xafe   : > { %6213 = vmatprep.mubr.msk.bf16.mxu0 %vm736_vm0, %v2259_v13 }
 0xaff   : > { %6214 = vmatmul.mubr.msk.bf16.gmra.mxu0 %vm736_vm0, %v2260_v22 }
 0xb00   : > { %6220 = vmatpush3.bf16.xpose.msra.mxu0 %v2430_v26  ;;  %6225 = vmatprep.mubr.msk.bf16.mxu0 %vm1789_vm2, %v2396_v24 }
 0xb01   : > { %6459 = vmatprep.subr.msk.bf16.mxu0 %vm1789_vm2, %v2406_v28 }
 0xb08   : > { %6222 = vmatpush3.bf16.xpose.msra.mxu0 %v2427_v29 }
 0xb09   : > { %6460 = vmatprep.subr.msk.bf16.mxu0 %vm1789_vm2, %v2404_v58 }
 0xb10   : > { %6224 = vmatpush3.bf16.xpose.msra.mxu0 %v2424_v27 }
 0xb17   : > { %6226 = vmatmul.mubr.msk.bf16.vlgmr.msra.gmra.mxu0 %vm1789_vm2, %v2398_v34 }
 0xb18   : > { %6229 = vmatprep.mubr.msk.bf16.mxu0 %vm1789_vm2, %v2400_v35 }
 0xb1f   : > { %6230 = vmatmul.mubr.msk.bf16.gmra.mxu0 %vm1789_vm2, %v2402_v12 }
 0xbb7   : > { %v8151_v37 = vpop.f32.mrf.mxu0 }
 0xbb9   : > { %v8153_v63 = vpop.f32.mrf.mxu0 }
 0xbbb   : > { %v8155_v38 = vpop.f32.mrf.mxu0 }
 0xbbd   : > { %v8157_v39 = vpop.f32.mrf.mxu0 }
 0xbbf   : > { %v8159_v40 = vpop.f32.mrf.mxu0 }
 0xbc1   : > { %v8161_v41 = vpop.f32.mrf.mxu0 }
 0xbc3   : > { %v8163_v43 = vpop.f32.mrf.mxu0 }
 0xbc5   : > { %v8165_v9 = vpop.f32.mrf.mxu0 }
 0xbd7   : > { %v6227_v44 = vpop.f32.mrf.mxu0 }
 0xbd8   : > { %v2506_v54 = vsel %vm736_vm0, %v6227_v44, -inf }
 0xbd9   : > { %v2469_v47 = vpop.f32.mrf.mxu0 }
 0xbda   : > { %v2500_v33 = vsel %vm736_vm0, %v2469_v47, -inf }
 0xbdb   : > { %2501 = vmax.xlane.f32.xlu0 %v2500_v33  ;;  %v6228_v30 = vpop.f32.mrf.mxu0 }
 0xbdc   : > { %v2509_v60 = vsel %vm736_vm0, %v6228_v30, -inf }
 0xbdd   : > { %v2472_v53 = vpop.f32.mrf.mxu0 }
 0xbde   : > { %v2503_v55 = vsel %vm736_vm0, %v2472_v53, -inf }
 0xbdf   : > { %2507 = vmax.xlane.f32.xlu0 %v2506_v54  ;;  %2504 = vmax.xlane.f32.xlu1 %v2503_v55  ;;  %v6231_v36 = vpop.f32.mrf.mxu0 }
 0xbe0   : > { %v2518_v50 = vsel %vm736_vm0, %v6231_v36, -inf }
 0xbe1   : > { %v2485_v57 = vpop.f32.mrf.mxu0 }
 0xbe2   : > { %v2512_v7 = vsel %vm736_vm0, %v2485_v57, -inf }
 0xbe3   : > { %2510 = vmax.xlane.f32.xlu0 %v2509_v60  ;;  %v6232_v4 = vpop.f32.mrf.mxu0 }
 0xbe4   : > { %v2521_v11 = vsel %vm736_vm0, %v6232_v4, -inf }
 0xbe5   : > { %2522 = vmax.xlane.f32.xlu1 %v2521_v11  ;;  %v2488_v61 = vpop.f32.mrf.mxu0 }
 0xbe6   : > { %v2515_v2 = vsel %vm736_vm0, %v2488_v61, -inf }
 0xbe7   : > { %2519 = vmax.xlane.f32.xlu0 %v2518_v50 }
 0xbe9   : > { %2516 = vmax.xlane.f32.xlu1 %v2515_v2 }
 0xbeb   : > { %2513 = vmax.xlane.f32.xlu0 %v2512_v7 }
 0xbfa   : > { %2596 = vrot.lane.b32.xlu1 %v7991_v19, %s7334_s19 }
 0xbfe   : > { %2594 = vrot.lane.b32.xlu1 %v8000_v0, %s7334_s19 }
 0xc01   : > { %2598 = vrot.lane.b32.xlu0 %v7987_v5, %s7334_s19 }
 0xc02   : > { %2592 = vrot.lane.b32.xlu1 %v8004_v17, %s7334_s19 }
 0xc64   : > { %v2502_v10 = vpop.xlane.xlu0 %2501 }
 0xc65   : > { %v2524_v20 = vsub.f32 %v2469_v47, %v2502_v10 }
 0xc67   : > { %v2532_v15 = vmul.f32 1.442695, %v2524_v20 }
 0xc68   : > { %v2508_v1 = vpop.xlane.xlu0 %2507  ;;  %v2505_v49 = vpop.xlane.xlu1 %2504 }
 0xc69   : > { %v2526_v14 = vsub.f32 %v6227_v44, %v2508_v1  ;;  %v2525_v13 = vsub.f32 %v2472_v53, %v2505_v49 }
 0xc6b   : > { %v2536_v16 = vmul.f32 1.442695, %v2526_v14  ;;  %v2534_v26 = vmul.f32 1.442695, %v2525_v13 }
 0xc6c   : > { %v2511_v21 = vpop.xlane.xlu0 %2510 }
 0xc6d   : > { %6759 = vpow2.f32 %v2536_v16  ;;  %v2527_v22 = vsub.f32 %v6228_v30, %v2511_v21 }
 0xc6e   : > { %v2523_v24 = vpop.xlane.xlu1 %2522  ;;  %6761 = vpow2.f32 %v2532_v15 }
 0xc6f   : > { %v2538_v28 = vmul.f32 1.442695, %v2527_v22  ;;  %v2531_v29 = vsub.f32 %v6232_v4, %v2523_v24 }
 0xc70   : > { %v2520_v58 = vpop.xlane.xlu0 %2519 }
 0xc71   : > { %6763 = vpow2.f32 %v2538_v28  ;;  %v2530_v27 = vsub.f32 %v6231_v36, %v2520_v58  ;;  %v2546_v35 = vmul.f32 1.442695, %v2531_v29 }
 0xc72   : > { %v2517_v34 = vpop.xlane.xlu1 %2516  ;;  %6765 = vpow2.f32 %v2534_v26 }
 0xc73   : > { %v2544_v12 = vmul.f32 1.442695, %v2530_v27  ;;  %v2529_v47 = vsub.f32 %v2488_v61, %v2517_v34 }
 0xc74   : > { %v2514_v44 = vpop.xlane.xlu0 %2513 }
 0xc75   : > { %6767 = vpow2.f32 %v2544_v12  ;;  %v2528_v33 = vsub.f32 %v2485_v57, %v2514_v44  ;;  %v2542_v54 = vmul.f32 1.442695, %v2529_v47 }
 0xc76   : > { %v2597_v53 = vpop.permute.xlu1 %2596  ;;  %6769 = vpow2.f32 %v2546_v35 }
 0xc77   : > { %v2540_v30 = vmul.f32 1.442695, %v2528_v33 }
 0xc78   : > { %v2599_v55 = vpop.permute.xlu0 %2598 }
 0xc79   : > { %6771 = vpow2.f32 %v2540_v30  ;;  %6233 = vmatprep.subr.bf16.mxu1 %v2599_v55 }
 0xc7a   : > { %v8183_v60 = vpop.eup %6759  ;;  %6234 = vmatpush3.bf16.msra.mxu1 %v2599_v55  ;;  %6773 = vpow2.f32 %v2542_v54  ;;  %v2595_v11 = vpop.permute.xlu1 %2594 }
 0xc7b   : > { %6235 = vmatprep.subr.bf16.mxu1 %v2597_v53  ;;  %v2554_v36 = vsel %vm736_vm0, %v8183_v60, 0.0  ;;  %v6762_v4 = vpop.eup %6761 }
 0xc7c   : > { %2555 = vadd.xlane.f32.xlu0 %v2554_v36  ;;  %v2548_v57 = vsel %vm736_vm0, %v6762_v4, 0.0 }
 0xc7e   : > { %v6764_v61 = vpop.eup %6763  ;;  %6236 = vmatpush3.bf16.msra.mxu1 %v2597_v53  ;;  %v2593_v10 = vpop.permute.xlu1 %2592 }
 0xc7f   : > { %6237 = vmatprep.subr.bf16.mxu1 %v2595_v11  ;;  %v2557_v50 = vsel %vm736_vm0, %v6764_v61, 0.0  ;;  %v6766_v2 = vpop.eup %6765 }
 0xc80   : > { %2549 = vadd.xlane.f32.xlu0 %v2548_v57  ;;  %2558 = vadd.xlane.f32.xlu1 %v2557_v50  ;;  %v2551_v1 = vsel %vm736_vm0, %v6766_v2, 0.0 }
 0xc82   : > { %v8189_v7 = vpop.eup %6767  ;;  %6238 = vmatpush3.bf16.msra.mxu1 %v2595_v11 }
 0xc83   : > { %6239 = vmatprep.subr.bf16.mxu1 %v2593_v10  ;;  %v2566_v20 = vsel %vm736_vm0, %v8189_v7, 0.0  ;;  %v6770_v49 = vpop.eup %6769 }
 0xc84   : > { %2567 = vadd.xlane.f32.xlu0 %v2566_v20  ;;  %2552 = vadd.xlane.f32.xlu1 %v2551_v1  ;;  %v2569_v16 = vsel %vm736_vm0, %v6770_v49, 0.0 }
 0xc86   : > { %v6772_v14 = vpop.eup %6771  ;;  %6240 = vmatpush3.bf16.msra.mxu1 %v2593_v10 }
 0xc87   : > { %v2560_v15 = vsel %vm736_vm0, %v6772_v14, 0.0  ;;  %v6774_v13 = vpop.eup %6773 }
 0xc88   : > { %2561 = vadd.xlane.f32.xlu1 %v2560_v15  ;;  %2570 = vadd.xlane.f32.xlu0 %v2569_v16  ;;  %v2563_v21 = vsel %vm736_vm0, %v6774_v13, 0.0 }
 0xc8c   : > { %2564 = vadd.xlane.f32.xlu0 %v2563_v21 }
 0xc99   : > { %2734 = vrot.lane.b32.xlu1 %v7973_v62, %s7335_s24 }
 0xc9d   : > { %2732 = vrot.lane.b32.xlu1 %v7981_v8, %s7335_s24 }
 0xca1   : > { %2730 = vrot.lane.b32.xlu1 %v7989_v45, %s7335_s24 }
 0xca2   : > { %2736 = vrot.lane.b32.xlu0 %v7971_v32, %s7335_s24 }
 0xca5   : > { %2724 = vrot.lane.b32.xlu1 %v8011_v48, %s7335_s24 }
 0xca6   : > { %2722 = vrot.lane.b32.xlu0 %v7967_v23, %s7335_s24 }
 0xca9   : > { %2728 = vrot.lane.b32.xlu1 %v8019_v31, %s7335_s24 }
 0xcaa   : > { %2726 = vrot.lane.b32.xlu0 %v8013_v18, %s7335_s24 }
 0xd05   : > { %v2556_v62 = vpop.xlane.xlu0 %2555 }
 0xd09   : > { %v2550_v8 = vpop.xlane.xlu0 %2549  ;;  %v2559_v22 = vpop.xlane.xlu1 %2558 }
 0xd0a   : > { %6775 = vrcp.f32 %v2559_v22 }
 0xd0b   : > { %6777 = vrcp.f32 %v2550_v8 }
 0xd0c   : > { %6779 = vrcp.f32 %v2556_v62 }
 0xd0d   : > { %v2568_v45 = vpop.xlane.xlu0 %2567  ;;  %v2553_v24 = vpop.xlane.xlu1 %2552 }
 0xd0e   : > { %6781 = vrcp.f32 %v2553_v24 }
 0xd11   : > { %v2571_v32 = vpop.xlane.xlu0 %2570  ;;  %v2562_v48 = vpop.xlane.xlu1 %2561 }
 0xd12   : > { %6783 = vrcp.f32 %v2571_v32 }
 0xd13   : > { %6785 = vrcp.f32 %v2562_v48 }
 0xd14   : > { %6787 = vrcp.f32 %v2568_v45 }
 0xd15   : > { %v2565_v23 = vpop.xlane.xlu0 %2564  ;;  %v2735_v55 = vpop.permute.xlu1 %2734 }
 0xd16   : > { %6789 = vrcp.f32 %v2565_v23 }
 0xd17   : > { %v6776_v31 = vpop.eup %6775 }
 0xd18   : > { %v6778_v28 = vpop.eup %6777  ;;  %v2583_v58 = vmul.f32 %v6776_v31, %v6764_v61 }
 0xd19   : > { %v2737_v26 = vpop.permute.xlu0 %2736  ;;  %v6780_v18 = vpop.eup %6779  ;;  %v2580_v27 = vmul.f32 %v6778_v28, %v6762_v4 }
 0xd1a   : > { %6461 = vmatprep.subr.msk.bf16.mxu1 %vm1789_vm2, %v2737_v26  ;;  %v2582_v35 = vmul.f32 %v6780_v18, %v8183_v60  ;;  %v2760_v54 = vsel %vm1789_vm2, %v2737_v26, 0  ;;  %v2733_v10 = vpop.permute.xlu1 %2732 }
 0xd1b   : > { %v6782_v29 = vpop.eup %6781  ;;  %v2754_v20 = vsel %vm1789_vm2, %v2733_v10, 0 }
 0xd1c   : > { %v2581_v34 = vmul.f32 %v6782_v29, %v6766_v2  ;;  %v2589_v44 = vpack.c.bf16 %v2583_v58, %v2582_v35  ;;  %v2757_v2 = vsel %vm1789_vm2, %v2735_v55, 0 }
 0xd1d   : > { %v2723_v50 = vpop.permute.xlu0 %2722 }
 0xd1e   : > { %v2588_v12 = vpack.c.bf16 %v2581_v34, %v2580_v27  ;;  %v2731_v1 = vpop.permute.xlu1 %2730 }
 0xd1f   : > { %v6784_v47 = vpop.eup %6783 }
 0xd20   : > { %v6786_v33 = vpop.eup %6785  ;;  %6241 = vmatprep.mubr.msk.bf16.mxu1 %vm736_vm0, %v2588_v12  ;;  %v2587_v11 = vmul.f32 %v6784_v47, %v6770_v49 }
 0xd21   : > { %v6788_v53 = vpop.eup %6787  ;;  %6242 = vmatmul.mubr.msk.bf16.vlgmr.msra.gmra.mxu1 %vm736_vm0, %v2589_v44  ;;  %v2584_v36 = vmul.f32 %v6786_v33, %v6772_v14  ;;  %v2727_v14 = vpop.permute.xlu0 %2726 }
 0xd22   : > { %6250 = vmatpush3.bf16.xpose.msra.mxu1 %v2760_v54  ;;  %v2586_v61 = vmul.f32 %v6788_v53, %v8189_v7  ;;  %v2751_v7 = vsel %vm1789_vm2, %v2731_v1, 0  ;;  %v2725_v49 = vpop.permute.xlu1 %2724 }
 0xd23   : > { %v6790_v30 = vpop.eup %6789  ;;  %6462 = vmatprep.subr.msk.bf16.mxu1 %vm1789_vm2, %v2735_v55 }
 0xd24   : > { %v2585_v4 = vmul.f32 %v6790_v30, %v6774_v13  ;;  %v2591_v57 = vpack.c.bf16 %v2587_v11, %v2586_v61 }
 0xd26   : > { %v2590_v60 = vpack.c.bf16 %v2585_v4, %v2584_v36  ;;  %v2729_v15 = vpop.permute.xlu1 %2728 }
 0xd28   : > { %6245 = vmatprep.mubr.msk.bf16.mxu1 %vm736_vm0, %v2590_v60 }
 0xd29   : > { %6246 = vmatmul.mubr.msk.bf16.gmra.mxu1 %vm736_vm0, %v2591_v57 }
 0xd2a   : > { %6252 = vmatpush3.bf16.xpose.msra.mxu1 %v2757_v2  ;;  %6257 = vmatprep.mubr.msk.bf16.mxu1 %vm1789_vm2, %v2723_v50 }
 0xd2b   : > { %6463 = vmatprep.subr.msk.bf16.mxu1 %vm1789_vm2, %v2733_v10 }
 0xd32   : > { %6254 = vmatpush3.bf16.xpose.msra.mxu1 %v2754_v20 }
 0xd33   : > { %6464 = vmatprep.subr.msk.bf16.mxu1 %vm1789_vm2, %v2731_v1 }
 0xd3a   : > { %6256 = vmatpush3.bf16.xpose.msra.mxu1 %v2751_v7 }
 0xd41   : > { %6258 = vmatmul.mubr.msk.bf16.vlgmr.msra.gmra.mxu1 %vm1789_vm2, %v2725_v49 }
 0xd42   : > { %6261 = vmatprep.mubr.msk.bf16.mxu1 %vm1789_vm2, %v2727_v14 }
 0xd49   : > { %6262 = vmatmul.mubr.msk.bf16.gmra.mxu1 %vm1789_vm2, %v2729_v15 }
 0xde1   : > { %v8231_v16 = vpop.f32.mrf.mxu1 }
 0xde3   : > { %v8233_v13 = vpop.f32.mrf.mxu1 }
 0xde5   : > { %v8235_v21 = vpop.f32.mrf.mxu1 }
 0xde7   : > { %v8237_v62 = vpop.f32.mrf.mxu1 }
 0xde9   : > { %v8239_v8 = vpop.f32.mrf.mxu1 }
 0xdeb   : > { %v8241_v22 = vpop.f32.mrf.mxu1 }
 0xded   : > { %v8243_v45 = vpop.f32.mrf.mxu1 }
 0xdef   : > { %v8245_v24 = vpop.f32.mrf.mxu1 }
 0xe01   : > { %v6259_v32 = vpop.f32.mrf.mxu1 }
 0xe02   : > { %v2833_v28 = vsel %vm736_vm0, %v6259_v32, -inf }
 0xe03   : > { %v2796_v48 = vpop.f32.mrf.mxu1 }
 0xe04   : > { %v2827_v23 = vsel %vm736_vm0, %v2796_v48, -inf }
 0xe05   : > { %2828 = vmax.xlane.f32.xlu0 %v2827_v23  ;;  %v6260_v31 = vpop.f32.mrf.mxu1 }
 0xe06   : > { %v2836_v27 = vsel %vm736_vm0, %v6260_v31, -inf }
 0xe07   : > { %v2799_v26 = vpop.f32.mrf.mxu1 }
 0xe08   : > { %v2830_v18 = vsel %vm736_vm0, %v2799_v26, -inf }
 0xe09   : > { %2834 = vmax.xlane.f32.xlu0 %v2833_v28  ;;  %2831 = vmax.xlane.f32.xlu1 %v2830_v18  ;;  %v6263_v29 = vpop.f32.mrf.mxu1 }
 0xe0a   : > { %v2845_v44 = vsel %vm736_vm0, %v6263_v29, -inf }
 0xe0b   : > { %v2812_v58 = vpop.f32.mrf.mxu1 }
 0xe0c   : > { %v2839_v12 = vsel %vm736_vm0, %v2812_v58, -inf }
 0xe0d   : > { %2837 = vmax.xlane.f32.xlu0 %v2836_v27  ;;  %v6264_v34 = vpop.f32.mrf.mxu1 }
 0xe0e   : > { %v2848_v33 = vsel %vm736_vm0, %v6264_v34, -inf }
 0xe0f   : > { %v2815_v35 = vpop.f32.mrf.mxu1 }
 0xe10   : > { %v2842_v47 = vsel %vm736_vm0, %v2815_v35, -inf }
 0xe11   : > { %2840 = vmax.xlane.f32.xlu0 %v2839_v12  ;;  %2843 = vmax.xlane.f32.xlu1 %v2842_v47 }
 0xe15   : > { %2846 = vmax.xlane.f32.xlu0 %v2845_v44  ;;  %2849 = vmax.xlane.f32.xlu1 %v2848_v33 }
 0xe8e   : > { %v2829_v53 = vpop.xlane.xlu0 %2828 }
 0xe8f   : > { %v2851_v54 = vsub.f32 %v2796_v48, %v2829_v53 }
 0xe91   : > { %v2859_v4 = vmul.f32 1.442695, %v2851_v54 }
 0xe92   : > { %v2835_v30 = vpop.xlane.xlu0 %2834  ;;  %v2832_v55 = vpop.xlane.xlu1 %2831 }
 0xe93   : > { %v2853_v36 = vsub.f32 %v6259_v32, %v2835_v30  ;;  %v2852_v60 = vsub.f32 %v2799_v26, %v2832_v55 }
 0xe95   : > { %v2863_v11 = vmul.f32 1.442695, %v2853_v36  ;;  %v2861_v50 = vmul.f32 1.442695, %v2852_v60 }
 0xe96   : > { %v2838_v61 = vpop.xlane.xlu0 %2837 }
 0xe97   : > { %6791 = vpow2.f32 %v2863_v11  ;;  %v2854_v57 = vsub.f32 %v6260_v31, %v2838_v61 }
 0xe98   : > { %6793 = vpow2.f32 %v2859_v4 }
 0xe99   : > { %v2865_v2 = vmul.f32 1.442695, %v2854_v57 }
 0xe9a   : > { %v2841_v10 = vpop.xlane.xlu0 %2840  ;;  %v2844_v47 = vpop.xlane.xlu1 %2843 }
 0xe9b   : > { %6795 = vpow2.f32 %v2865_v2  ;;  %v2855_v20 = vsub.f32 %v2812_v58, %v2841_v10  ;;  %v2856_v53 = vsub.f32 %v2815_v35, %v2844_v47 }
 0xe9c   : > { %6797 = vpow2.f32 %v2861_v50 }
 0xe9d   : > { %v2867_v49 = vmul.f32 1.442695, %v2855_v20  ;;  %v2869_v30 = vmul.f32 1.442695, %v2856_v53 }
 0xe9e   : > { %v2847_v1 = vpop.xlane.xlu0 %2846  ;;  %v2850_v44 = vpop.xlane.xlu1 %2849 }
 0xe9f   : > { %v2857_v7 = vsub.f32 %v6263_v29, %v2847_v1  ;;  %v2858_v33 = vsub.f32 %v6264_v34, %v2850_v44 }
 0xea1   : > { %v2871_v14 = vmul.f32 1.442695, %v2857_v7  ;;  %v2873_v54 = vmul.f32 1.442695, %v2858_v33 }
 0xea3   : > { %6799 = vpow2.f32 %v2871_v14 }
 0xea4   : > { %v8255_v15 = vpop.eup %6791  ;;  %6801 = vpow2.f32 %v2867_v49 }
 0xea5   : > { %v2881_v32 = vsel %vm736_vm0, %v8255_v15, 0.0  ;;  %v8259_v48 = vpop.eup %6793  ;;  %6803 = vpow2.f32 %v2873_v54 }
 0xea6   : > { %2882 = vadd.xlane.f32.xlu0 %v2881_v32  ;;  %v2875_v31 = vsel %vm736_vm0, %v8259_v48, 0.0  ;;  %6805 = vpow2.f32 %v2869_v30  ;;  %v6638_v30 = vld [vmem:[#allocation12] sm:$0xff]  }
 0xea8   : > { %v8261_v23 = vpop.eup %6795 }
 0xea9   : > { %v2884_v26 = vsel %vm736_vm0, %v8261_v23, 0.0  ;;  %v6798_v28 = vpop.eup %6797 }
 0xeaa   : > { %2876 = vadd.xlane.f32.xlu0 %v2875_v31  ;;  %2885 = vadd.xlane.f32.xlu1 %v2884_v26  ;;  %v2878_v18 = vsel %vm736_vm0, %v6798_v28, 0.0 }
 0xeae   : > { %2879 = vadd.xlane.f32.xlu1 %v2878_v18 }
 0xeb0   : > { %v8268_v29 = vpop.eup %6799 }
 0xeb1   : > { %v2893_v58 = vsel %vm736_vm0, %v8268_v29, 0.0  ;;  %v8272_v27 = vpop.eup %6801 }
 0xeb2   : > { %2894 = vadd.xlane.f32.xlu0 %v2893_v58  ;;  %v2887_v12 = vsel %vm736_vm0, %v8272_v27, 0.0 }
 0xeb6   : > { %2888 = vadd.xlane.f32.xlu0 %v2887_v12 }
 0xebf   : > { %2923 = vrot.lane.b32.xlu1 %v7991_v19, %s7335_s24 }
 0xec3   : > { %2921 = vrot.lane.b32.xlu1 %v8000_v0, %s7335_s24 }
 0xecc   : > { %2925 = vrot.lane.b32.xlu0 %v7987_v5, %s7335_s24  ;;  %v8292_v5 = vpop.eup %6803 }
 0xecd   : > { %v2896_v19 = vsel %vm736_vm0, %v8292_v5, 0.0  ;;  %v8298_v0 = vpop.eup %6805 }
 0xed0   : > { %2362 = vrot.lane.b32.xlu0 %v8153_v63, %s7336_s6 }
 0xed4   : > { %2366 = vrot.lane.b32.xlu0 %v8151_v37, %s7336_s6  ;;  %v2890_v37 = vsel %vm736_vm0, %v8298_v0, 0.0 }
 0xed8   : > { %2689 = vrot.lane.b32.xlu0 %v8233_v13, %s7337_s7 }
 0xedc   : > { %2693 = vrot.lane.b32.xlu0 %v8231_v16, %s7337_s7 }
 0xee0   : > { %2370 = vrot.lane.b32.xlu0 %v8161_v41, %s7336_s6 }
 0xee4   : > { %2374 = vrot.lane.b32.xlu0 %v8159_v40, %s7336_s6 }
 0xee7   : > { %2897 = vadd.xlane.f32.xlu1 %v2896_v19 }
 0xee8   : > { %2697 = vrot.lane.b32.xlu0 %v8241_v22, %s7337_s7 }
 0xeeb   : > { %2891 = vadd.xlane.f32.xlu1 %v2890_v37 }
 0xefc   : > { %2919 = vrot.lane.b32.xlu1 %v8004_v17, %s7335_s24 }
 0xf00   : > { %2364 = vrot.lane.b32.xlu1 %v8157_v39, %s7336_s6 }
 0xf04   : > { %2368 = vrot.lane.b32.xlu1 %v8155_v38, %s7336_s6 }
 0xf08   : > { %2691 = vrot.lane.b32.xlu1 %v8237_v62, %s7337_s7 }
 0xf0c   : > { %2695 = vrot.lane.b32.xlu1 %v8235_v21, %s7337_s7 }
 0xf10   : > { %2372 = vrot.lane.b32.xlu1 %v8165_v9, %s7336_s6 }
 0xf14   : > { %2376 = vrot.lane.b32.xlu1 %v8163_v43, %s7336_s6 }
 0xf18   : > { %2699 = vrot.lane.b32.xlu1 %v8245_v24, %s7337_s7 }
 0xf2f   : > { %v2883_v17 = vpop.xlane.xlu0 %2882 }
 0xf33   : > { %v2877_v63 = vpop.xlane.xlu0 %2876  ;;  %v2886_v39 = vpop.xlane.xlu1 %2885 }
 0xf34   : > { %6807 = vrcp.f32 %v2877_v63 }
 0xf37   : > { %v2880_v38 = vpop.xlane.xlu1 %2879 }
 0xf38   : > { %6809 = vrcp.f32 %v2880_v38 }
 0xf39   : > { %6811 = vrcp.f32 %v2886_v39 }
 0xf3a   : > { %6813 = vrcp.f32 %v2883_v17 }
 0xf3b   : > { %v2895_v40 = vpop.xlane.xlu0 %2894  ;;  %v2924_v13 = vpop.permute.xlu1 %2923 }
 0xf3f   : > { %v2889_v41 = vpop.xlane.xlu0 %2888  ;;  %v2922_v34 = vpop.permute.xlu1 %2921 }
 0xf41   : > { %v6808_v16 = vpop.eup %6807 }
 0xf42   : > { %v2907_v43 = vmul.f32 %v6808_v16, %v8259_v48 }
 0xf43   : > { %v2926_v21 = vpop.permute.xlu0 %2925 }
 0xf44   : > { %6265 = vmatprep.subr.bf16.mxu0 %v2926_v21 }
 0xf45   : > { %v6810_v62 = vpop.eup %6809  ;;  %6266 = vmatpush3.bf16.msra.mxu0 %v2926_v21 }
 0xf46   : > { %6267 = vmatprep.subr.bf16.mxu0 %v2924_v13  ;;  %v2908_v9 = vmul.f32 %v6810_v62, %v6798_v28  ;;  %v6812_v57 = vpop.eup %6811 }
 0xf47   : > { %v2363_v22 = vpop.permute.xlu0 %2362  ;;  %v6814_v2 = vpop.eup %6813  ;;  %v2910_v10 = vmul.f32 %v6812_v57, %v8261_v23 }
 0xf48   : > { %2387 = vst.msk [vmem:[#allocation2] sm:$0xff] %vm2386_vm3, %v2363_v22  ;;  %v2915_v24 = vpack.c.bf16 %v2908_v9, %v2907_v43  ;;  %v2909_v1 = vmul.f32 %v6814_v2, %v8255_v15  ;;  %v5749_v2 = vld [vmem:[#allocation6 + $0x3] ss:$0 sm:$0xff] }
 0xf49   : > { %6268 = vmatpush3.bf16.msra.mxu0 %v2924_v13 }
 0xf4a   : > { %6269 = vmatprep.subr.bf16.mxu0 %v2922_v34  ;;  %6273 = vmatprep.mubr.msk.bf16.mxu0 %vm736_vm0, %v2915_v24  ;;  %v2916_v7 = vpack.c.bf16 %v2910_v10, %v2909_v1 }
 0xf4b   : > { %v2367_v35 = vpop.permute.xlu0 %2366 }
 0xf4c   : > { %2389 = vst.msk [vmem:[#allocation2 + $0x10] sm:$0xff] %vm2386_vm3, %v2367_v35 }
 0xf4d   : > { %6270 = vmatpush3.bf16.msra.mxu0 %v2922_v34 }
 0xf4f   : > { %v2690_v55 = vpop.permute.xlu0 %2689 }
 0xf50   : > { %2714 = vst.msk [vmem:[#allocation2] sm:$0xff] %vm2713_vm4, %v2690_v55 }
 0xf53   : > { %v2694_v36 = vpop.permute.xlu0 %2693 }
 0xf54   : > { %2716 = vst.msk [vmem:[#allocation2 + $0x10] sm:$0xff] %vm2713_vm4, %v2694_v36 }
 0xf57   : > { %v2371_v4 = vpop.permute.xlu0 %2370 }
 0xf58   : > { %2391 = vst.msk [vmem:[#allocation2 + $0x20] sm:$0xff] %vm2386_vm3, %v2371_v4 }
 0xf5b   : > { %v2375_v11 = vpop.permute.xlu0 %2374 }
 0xf5c   : > { %2393 = vst.msk [vmem:[#allocation2 + $0x30] sm:$0xff] %vm2386_vm3, %v2375_v11 }
 0xf5f   : > { %v2698_v60 = vpop.permute.xlu0 %2697 }
 0xf60   : > { %2718 = vst.msk [vmem:[#allocation2 + $0x20] sm:$0xff] %vm2713_vm4, %v2698_v60 }
 0xf70   : > { %v2898_v61 = vpop.xlane.xlu1 %2897 }
 0xf71   : > { %6815 = vrcp.f32 %v2898_v61 }
 0xf72   : > { %6817 = vrcp.f32 %v2889_v41 }
 0xf73   : > { %6819 = vrcp.f32 %v2895_v40 }
 0xf74   : > { %v2892_v50 = vpop.xlane.xlu1 %2891 }
 0xf75   : > { %6821 = vrcp.f32 %v2892_v50 }
 0xf78   : > { %v2920_v20 = vpop.permute.xlu1 %2919 }
 0xf79   : > { %6271 = vmatprep.subr.bf16.mxu0 %v2920_v20 }
 0xf7a   : > { %6272 = vmatpush3.bf16.msra.mxu0 %v2920_v20 }
 0xf7c   : > { %v2365_v49 = vpop.permute.xlu1 %2364 }
 0xf7d   : > { %2388 = vst.msk [vmem:[#allocation2 + $0x8] sm:$0xff] %vm2386_vm3, %v2365_v49  ;;  %6274 = vmatmul.mubr.msk.bf16.vlgmr.msra.gmra.mxu0 %vm736_vm0, %v2916_v7 }
 0xf7e   : > { %v6816_v14 = vpop.eup %6815 }
 0xf7f   : > { %v6818_v32 = vpop.eup %6817  ;;  %v2914_v23 = vmul.f32 %v6816_v14, %v8292_v5 }
 0xf80   : > { %v2369_v48 = vpop.permute.xlu1 %2368  ;;  %v6820_v31 = vpop.eup %6819  ;;  %v2911_v28 = vmul.f32 %v6818_v32, %v8272_v27 }
 0xf81   : > { %2390 = vst.msk [vmem:[#allocation2 + $0x18] sm:$0xff] %vm2386_vm3, %v2369_v48  ;;  %v2913_v58 = vmul.f32 %v6820_v31, %v8268_v29  ;;  %v6637_v29 = vld [vmem:[#allocation12 + $0x8] sm:$0xff]  }
 0xf82   : > { %v6822_v26 = vpop.eup %6821  ;;  %6281 = vmatprep.subr.bf16.mxu0 %v6637_v29 }
 0xf83   : > { %v2912_v15 = vmul.f32 %v6822_v26, %v8298_v0  ;;  %v2918_v47 = vpack.c.bf16 %v2914_v23, %v2913_v58  ;;  %6282 = vmatpush3.bf16.msra.mxu0 %v6637_v29 }
 0xf84   : > { %v2692_v18 = vpop.permute.xlu1 %2691  ;;  %6283 = vmatprep.subr.bf16.mxu0 %v6638_v30 }
 0xf85   : > { %2715 = vst.msk [vmem:[#allocation2 + $0x8] sm:$0xff] %vm2713_vm4, %v2692_v18  ;;  %v2917_v12 = vpack.c.bf16 %v2912_v15, %v2911_v28 }
 0xf87   : > { %6277 = vmatprep.mubr.msk.bf16.mxu0 %vm736_vm0, %v2917_v12  ;;  %6284 = vmatpush3.bf16.msra.mxu0 %v6638_v30 }
 0xf88   : > { %6278 = vmatmul.mubr.msk.bf16.gmra.mxu0 %vm736_vm0, %v2918_v47  ;;  %v2696_v44 = vpop.permute.xlu1 %2695 }
 0xf89   : > { %2717 = vst.msk [vmem:[#allocation2 + $0x18] sm:$0xff] %vm2713_vm4, %v2696_v44 }
 0xf8c   : > { %v2373_v33 = vpop.permute.xlu1 %2372 }
 0xf8d   : > { %2392 = vst.msk [vmem:[#allocation2 + $0x28] sm:$0xff] %vm2386_vm3, %v2373_v33 }
 0xf90   : > { %v2377_v27 = vpop.permute.xlu1 %2376 }
 0xf91   : > { %2394 = vst.msk [vmem:[#allocation2 + $0x38] sm:$0xff] %vm2386_vm3, %v2377_v27 }
 0xf94   : > { %v2700_v53 = vpop.permute.xlu1 %2699 }
 0xf95   : > { %2719 = vst.msk [vmem:[#allocation2 + $0x28] sm:$0xff] %vm2713_vm4, %v2700_v53 }
0x103d   : > { %v6275_v54 = vpop.f32.mrf.mxu0 }
0x103e   : > { %3020 = vrot.lane.b32.xlu0 %v6275_v54, %s7338_s8 }
0x103f   : > { %v2977_v5 = vpop.f32.mrf.mxu0 }
0x1041   : > { %v6276_v19 = vpop.f32.mrf.mxu0 }
0x1042   : > { %3016 = vrot.lane.b32.xlu0 %v2977_v5, %s7338_s8  ;;  %3022 = vrot.lane.b32.xlu1 %v6276_v19, %s7338_s8 }
0x1043   : > { %v2980_v0 = vpop.f32.mrf.mxu0 }
0x1046   : > { %2701 = vrot.lane.b32.xlu0 %v8239_v8, %s7337_s7  ;;  %3018 = vrot.lane.b32.xlu1 %v2980_v0, %s7338_s8 }
0x1048   : > { %v6279_v37 = vpop.f32.mrf.mxu0 }
0x104a   : > { %2703 = vrot.lane.b32.xlu1 %v8243_v45, %s7337_s7  ;;  %v2993_v17 = vpop.f32.mrf.mxu0 }
0x104b   : > { %3024 = vrot.lane.b32.xlu0 %v2993_v17, %s7338_s8 }
0x104c   : > { %v6280_v63 = vpop.f32.mrf.mxu0 }
0x104e   : > { %v2996_v39 = vpop.f32.mrf.mxu0 }
0x104f   : > { %3028 = vrot.lane.b32.xlu0 %v6279_v37, %s7338_s8  ;;  %3026 = vrot.lane.b32.xlu1 %v2996_v39, %s7338_s8 }
0x1053   : > { %3030 = vrot.lane.b32.xlu1 %v6280_v63, %s7338_s8 }
0x10b0   : > { %v3021_v38 = vpop.permute.xlu0 %3020 }
0x10b1   : > { %3043 = vst.msk [vmem:[#allocation2 + $0x10] sm:$0xff] %vm3040_vm5, %v3021_v38 }
0x10b4   : > { %v3017_v8 = vpop.permute.xlu0 %3016  ;;  %v3023_v40 = vpop.permute.xlu1 %3022 }
0x10b5   : > { %3041 = vst.msk [vmem:[#allocation2] sm:$0xff] %vm3040_vm5, %v3017_v8  ;;  %3044 = vst.msk [vmem:[#allocation2 + $0x18] sm:$0xff] %vm3040_vm5, %v3023_v40 }
0x10b8   : > { %v2702_v45 = vpop.permute.xlu0 %2701  ;;  %v3019_v41 = vpop.permute.xlu1 %3018  ;;  %v3051_v34 = vld [vmem:[#allocation2 + $0x10] sm:$0xff] }
0x10b9   : > { %2720 = vst.msk [vmem:[#allocation2 + $0x30] sm:$0xff] %vm2713_vm4, %v2702_v45 }
0x10ba   : > { %3042 = vst.msk [vmem:[#allocation2 + $0x8] sm:$0xff] %vm3040_vm5, %v3019_v41 }
0x10bc   : > { %v2704_v16 = vpop.permute.xlu1 %2703  ;;  %v3052_v21 = vld [vmem:[#allocation2 + $0x18] sm:$0xff]  ;;  %v3049_v62 = vld [vmem:[#allocation2] sm:$0xff] }
0x10bd   : > { %2721 = vst.msk [vmem:[#allocation2 + $0x38] sm:$0xff] %vm2713_vm4, %v2704_v16  ;;  %v3025_v13 = vpop.permute.xlu0 %3024  ;;  %v3058_v35 = vpack.c.bf16 %v3052_v21, %v3051_v34 }
0x10be   : > { %3045 = vst.msk [vmem:[#allocation2 + $0x20] sm:$0xff] %vm3040_vm5, %v3025_v13 }
0x10c1   : > { %v3050_v43 = vld [vmem:[#allocation2 + $0x8] sm:$0xff]  ;;  %v3029_v9 = vpop.permute.xlu0 %3028  ;;  %v3027_v22 = vpop.permute.xlu1 %3026 }
0x10c2   : > { %v3057_v24 = vpack.c.bf16 %v3050_v43, %v3049_v62  ;;  %3047 = vst.msk [vmem:[#allocation2 + $0x30] sm:$0xff] %vm3040_vm5, %v3029_v9  ;;  %3046 = vst.msk [vmem:[#allocation2 + $0x28] sm:$0xff] %vm3040_vm5, %v3027_v22 }
0x10c4   : > { %6285 = vmatprep.mubr.msk.bf16.mxu0 %vm1386_vm1, %v3057_v24 }
0x10c5   : > { %6286 = vmatmul.mubr.msk.bf16.vlgmr.msra.gmra.mxu0 %vm1386_vm1, %v3058_v35  ;;  %v3031_v55 = vpop.permute.xlu1 %3030  ;;  %v3053_v36 = vld [vmem:[#allocation2 + $0x20] sm:$0xff] }
0x10c6   : > { %3048 = vst.msk [vmem:[#allocation2 + $0x38] sm:$0xff] %vm3040_vm5, %v3031_v55 }
0x10c9   : > { %v3054_v4 = vld [vmem:[#allocation2 + $0x28] sm:$0xff]  ;;  %v3055_v60 = vld [vmem:[#allocation2 + $0x30] sm:$0xff] }
0x10ca   : > { %v3059_v11 = vpack.c.bf16 %v3054_v4, %v3053_v36 }
0x10cc   : > { %6289 = vmatprep.mubr.msk.bf16.mxu0 %vm1386_vm1, %v3059_v11 }
0x10cd   : > { %v3056_v61 = vld [vmem:[#allocation2 + $0x38] sm:$0xff] }
0x10ce   : > { %v3060_v57 = vpack.c.bf16 %v3056_v61, %v3055_v60 }
0x10d0   : > { %6290 = vmatmul.mubr.msk.bf16.gmra.mxu0 %vm1386_vm1, %v3060_v57 }
0x1185   : > { %v6287_v50 = vpop.f32.mrf.mxu0 }
0x1186   : > { %v3137_v20 = vadd.f32 %v6287_v50, %v5749_v2 }
0x1187   : > { %v3128_v10 = vpop.f32.mrf.mxu0 }
0x1188   : > { %v3129_v1 = vadd.f32 %v5749_v2, %v3128_v10  ;;  %v8375_v32 = vadd.f32 %v3137_v20, %v7863_v25 }
0x1189   : > { %v6288_v7 = vpop.f32.mrf.mxu0 }
0x118a   : > { %v8372_v49 = vadd.f32 %v3129_v1, %v7865_v46  ;;  %v3140_v48 = vadd.f32 %v6288_v7, %v5749_v2  ;;  %v3173_v15 = vsel %vm1386_vm1, %v8375_v32, 0.0 }
0x118b   : > { %v3131_v14 = vpop.f32.mrf.mxu0 }
0x118c   : > { %v3132_v31 = vadd.f32 %v5749_v2, %v3131_v14  ;;  %v3167_v26 = vsel %vm1386_vm1, %v8372_v49, 0.0  ;;  %v8383_v28 = vadd.f32 %v3140_v48, %v7869_v42 }
0x118d   : > { %3168 = vadd.xlane.f32.xlu0 %v3167_v26 }
0x118e   : > { %v8380_v23 = vadd.f32 %v3132_v31, %v7873_v51  ;;  %v3176_v47 = vsel %vm1386_vm1, %v8383_v28, 0.0 }
0x1190   : > { %v3170_v46 = vsel %vm1386_vm1, %v8380_v23, 0.0  ;;  %v6291_v25 = vpop.f32.mrf.mxu0 }
0x1191   : > { %3171 = vadd.xlane.f32.xlu1 %v3170_v46  ;;  %3174 = vadd.xlane.f32.xlu0 %v3173_v15  ;;  %v3153_v58 = vadd.f32 %v6291_v25, %v5749_v2  ;;  %v6639_v46 = vld [vmem:[#allocation14 + $0x8] sm:$0xff]   ;;  %v6640_v15 = vld [vmem:[#allocation14] sm:$0xff]   ;;  %v7339_v25 = vmov 0.0  }
0x1192   : > { %v3144_v18 = vpop.f32.mrf.mxu0  ;;  %6293 = vmatprep.subr.bf16.mxu1 %v6639_v46  ;;  %6305 = vmatprep.subr.bf16.mxu0 %v7339_v25 }
0x1193   : > { %v3145_v12 = vadd.f32 %v5749_v2, %v3144_v18  ;;  %v8395_v33 = vadd.f32 %v3153_v58, %v7875_v52  ;;  %6294 = vmatpush3.bf16.msra.mxu1 %v6639_v46  ;;  %v6641_v18 = vld [vmem:[#allocation15] sm:$0xff]   ;;  %v8461_v58 = vld [vmem:[%s7640_s11] sm:$0xf]  ;;  %6307 = vmatprep.mubr.msk.bf16.mxu0 %vm7340_vm7, %v7339_v25 }
0x1194   : > { %v6292_v51 = vpop.f32.mrf.mxu0  ;;  %6295 = vmatprep.subr.bf16.mxu1 %v6640_v15  ;;  %6306 = vmatpush3.bf16.msra.mxu0 %v6641_v18 }
0x1195   : > { %3177 = vadd.xlane.f32.xlu0 %v3176_v47  ;;  %v8392_v42 = vadd.f32 %v3145_v12, %v7881_v59  ;;  %v3156_v27 = vadd.f32 %v6292_v51, %v5749_v2  ;;  %v3185_v5 = vsel %vm1386_vm1, %v8395_v33, 0.0 }
0x1196   : > { %v3147_v44 = vpop.f32.mrf.mxu0 }
0x1197   : > { %v3148_v53 = vadd.f32 %v5749_v2, %v3147_v44  ;;  %v3179_v29 = vsel %vm1386_vm1, %v8392_v42, 0.0  ;;  %v8403_v30 = vadd.f32 %v3156_v27, %v7889_v6  ;;  %6296 = vmatpush3.bf16.msra.mxu1 %v6640_v15  ;;  %6308 = vmatmul.mubr.msk.bf16.vlgmr.msra.gmra.mxu0 %vm3406_vm6, %v8461_v58 }
0x1198   : > { %6311 = vmatprep.subr.bf16.mxu1 %v7339_v25 }
0x1199   : > { %3180 = vadd.xlane.f32.xlu0 %v3179_v29  ;;  %v8400_v54 = vadd.f32 %v3148_v53, %v7885_v3  ;;  %v3188_v52 = vsel %vm1386_vm1, %v8403_v30, 0.0 }
0x119b   : > { %v3182_v59 = vsel %vm1386_vm1, %v8400_v54, 0.0 }
0x119c   : > { %3183 = vadd.xlane.f32.xlu1 %v3182_v59 }
0x119d   : > { %3186 = vadd.xlane.f32.xlu0 %v3185_v5 }
0x11a0   : > { %3189 = vadd.xlane.f32.xlu1 %v3188_v52 }
0x1216   : > { %v3169_v19 = vpop.xlane.xlu0 %3168 }
0x1217   : > { %v3191_v0 = vmul.f32 0.03125, %v3169_v19 }
0x1219   : > { %v8412_v3 = vsub.f32 %v8372_v49, %v3191_v0 }
0x121a   : > { %v3175_v37 = vpop.xlane.xlu0 %3174  ;;  %v3172_v6 = vpop.xlane.xlu1 %3171 }
0x121b   : > { %v3193_v17 = vmul.f32 0.03125, %v3175_v37  ;;  %v3192_v63 = vmul.f32 0.03125, %v3172_v6  ;;  %v3207_v39 = vmul.f32 %v8412_v3, %v8412_v3 }
0x121d   : > { %v8417_v38 = vsub.f32 %v8375_v32, %v3193_v17  ;;  %v8420_v8 = vsub.f32 %v8380_v23, %v3192_v63  ;;  %v3215_v40 = vsel %vm1386_vm1, %v3207_v39, 0.0 }
0x121e   : > { %v3178_v45 = vpop.xlane.xlu0 %3177  ;;  %3216 = vadd.xlane.f32.xlu0 %v3215_v40 }
0x121f   : > { %v3194_v41 = vmul.f32 0.03125, %v3178_v45  ;;  %v3209_v16 = vmul.f32 %v8417_v38, %v8417_v38  ;;  %v3208_v13 = vmul.f32 %v8420_v8, %v8420_v8 }
0x1221   : > { %v8428_v21 = vsub.f32 %v8383_v28, %v3194_v41  ;;  %v3221_v62 = vsel %vm1386_vm1, %v3209_v16, 0.0  ;;  %v3218_v43 = vsel %vm1386_vm1, %v3208_v13, 0.0 }
0x1222   : > { %3222 = vadd.xlane.f32.xlu0 %v3221_v62  ;;  %v3181_v9 = vpop.xlane.xlu0 %3180  ;;  %3219 = vadd.xlane.f32.xlu1 %v3218_v43 }
0x1223   : > { %v3195_v22 = vmul.f32 0.03125, %v3181_v9  ;;  %v3210_v24 = vmul.f32 %v8428_v21, %v8428_v21  ;;  %v5756_v9 = vld [vmem:[#allocation6 + $0x4] ss:$0 sm:$0xff] }
0x1225   : > { %v8435_v34 = vsub.f32 %v8392_v42, %v3195_v22  ;;  %v3224_v35 = vsel %vm1386_vm1, %v3210_v24, 0.0  ;;  %v3184_v36 = vpop.xlane.xlu1 %3183 }
0x1226   : > { %v3187_v55 = vpop.xlane.xlu0 %3186  ;;  %3225 = vadd.xlane.f32.xlu1 %v3224_v35  ;;  %v3196_v11 = vmul.f32 0.03125, %v3184_v36 }
0x1227   : > { %v3197_v4 = vmul.f32 0.03125, %v3187_v55  ;;  %v3211_v60 = vmul.f32 %v8435_v34, %v8435_v34 }
0x1228   : > { %v8444_v57 = vsub.f32 %v8400_v54, %v3196_v11 }
0x1229   : > { %v8441_v61 = vsub.f32 %v8395_v33, %v3197_v4  ;;  %v3227_v50 = vsel %vm1386_vm1, %v3211_v60, 0.0  ;;  %v3190_v2 = vpop.xlane.xlu1 %3189  ;;  %v5757_v60 = vld [vmem:[#allocation6 + $0x5] ss:$0 sm:$0xff] }
0x122a   : > { %3228 = vadd.xlane.f32.xlu0 %v3227_v50  ;;  %v3198_v10 = vmul.f32 0.03125, %v3190_v2  ;;  %v3212_v1 = vmul.f32 %v8444_v57, %v8444_v57 }
0x122b   : > { %v3213_v20 = vmul.f32 %v8441_v61, %v8441_v61 }
0x122c   : > { %v8452_v7 = vsub.f32 %v8403_v30, %v3198_v10  ;;  %v3230_v48 = vsel %vm1386_vm1, %v3212_v1, 0.0 }
0x122d   : > { %v3233_v14 = vsel %vm1386_vm1, %v3213_v20, 0.0  ;;  %3231 = vadd.xlane.f32.xlu1 %v3230_v48 }
0x122e   : > { %3234 = vadd.xlane.f32.xlu0 %v3233_v14  ;;  %v3214_v31 = vmul.f32 %v8452_v7, %v8452_v7 }
0x1230   : > { %v3236_v26 = vsel %vm1386_vm1, %v3214_v31, 0.0 }
0x1231   : > { %3237 = vadd.xlane.f32.xlu1 %v3236_v26 }
0x12a7   : > { %v3217_v12 = vpop.xlane.xlu0 %3216 }
0x12a8   : > { %v3239_v47 = vmul.f32 0.03125, %v3217_v12 }
0x12aa   : > { %v3247_v51 = vadd.f32 1e-05, %v3239_v47 }
0x12ab   : > { %v3223_v44 = vpop.xlane.xlu0 %3222  ;;  %v3220_v27 = vpop.xlane.xlu1 %3219 }
0x12ac   : > { %6823 = vrsqrt.f32 %v3247_v51  ;;  %v3241_v53 = vmul.f32 0.03125, %v3223_v44  ;;  %v3240_v29 = vmul.f32 0.03125, %v3220_v27 }
0x12ae   : > { %v3249_v59 = vadd.f32 1e-05, %v3241_v53  ;;  %v3248_v5 = vadd.f32 1e-05, %v3240_v29 }
0x12af   : > { %v3226_v52 = vpop.xlane.xlu1 %3225 }
0x12b0   : > { %6825 = vrsqrt.f32 %v3249_v59  ;;  %v3242_v19 = vmul.f32 0.03125, %v3226_v52 }
0x12b1   : > { %6827 = vrsqrt.f32 %v3248_v5 }
0x12b2   : > { %v3250_v0 = vadd.f32 1e-05, %v3242_v19 }
0x12b3   : > { %v3229_v37 = vpop.xlane.xlu0 %3228 }
0x12b4   : > { %6829 = vrsqrt.f32 %v3250_v0  ;;  %v3243_v6 = vmul.f32 0.03125, %v3229_v37 }
0x12b6   : > { %v3251_v17 = vadd.f32 1e-05, %v3243_v6  ;;  %v3232_v39 = vpop.xlane.xlu1 %3231 }
0x12b7   : > { %v3235_v63 = vpop.xlane.xlu0 %3234  ;;  %v3244_v45 = vmul.f32 0.03125, %v3232_v39 }
0x12b8   : > { %6831 = vrsqrt.f32 %v3251_v17  ;;  %v3245_v40 = vmul.f32 0.03125, %v3235_v63 }
0x12b9   : > { %v6824_v41 = vpop.eup %6823  ;;  %v3252_v13 = vadd.f32 1e-05, %v3244_v45 }
0x12ba   : > { %v3253_v16 = vadd.f32 1e-05, %v3245_v40  ;;  %v3238_v62 = vpop.xlane.xlu1 %3237  ;;  %v3263_v43 = vmul.f32 %v6824_v41, %v8412_v3 }
0x12bb   : > { %v3246_v22 = vmul.f32 0.03125, %v3238_v62 }
0x12bc   : > { %6833 = vrsqrt.f32 %v3253_v16  ;;  %v3276_v11 = vmul.f32 %v5756_v9, %v3263_v43 }
0x12bd   : > { %v6826_v24 = vpop.eup %6825  ;;  %6835 = vrsqrt.f32 %v3252_v13  ;;  %v3254_v36 = vadd.f32 1e-05, %v3246_v22 }
0x12be   : > { %v6828_v35 = vpop.eup %6827  ;;  %v3265_v55 = vmul.f32 %v6826_v24, %v8417_v38  ;;  %v3289_v3 = vadd.f32 %v5757_v60, %v3276_v11 }
0x12bf   : > { %v3264_v4 = vmul.f32 %v6828_v35, %v8420_v8  ;;  %6837 = vrsqrt.f32 %v3254_v36 }
0x12c0   : > { %v3278_v10 = vmul.f32 %v5756_v9, %v3265_v55  ;;  %v6642_v55 = vld [vmem:[%s9308_s12] sm:$0xff]  }
0x12c1   : > { %v6830_v50 = vpop.eup %6829  ;;  %v3277_v2 = vmul.f32 %v5756_v9, %v3264_v4 }
0x12c2   : > { %v3266_v20 = vmul.f32 %v6830_v50, %v8428_v21  ;;  %v3291_v26 = vadd.f32 %v5757_v60, %v3278_v10 }
0x12c3   : > { %v3290_v1 = vadd.f32 %v5757_v60, %v3277_v2 }
0x12c4   : > { %v3279_v14 = vmul.f32 %v5756_v9, %v3266_v20 }
0x12c5   : > { %v6832_v48 = vpop.eup %6831  ;;  %v3297_v31 = vpack.c.bf16 %v3290_v1, %v3289_v3 }
0x12c6   : > { %v3292_v46 = vadd.f32 %v5757_v60, %v3279_v14  ;;  %v3267_v38 = vmul.f32 %v6832_v48, %v8435_v34 }
0x12c7   : > { %6297 = vmatprep.mubr.msk.bf16.mxu1 %vm1386_vm1, %v3297_v31 }
0x12c8   : > { %v3298_v8 = vpack.c.bf16 %v3292_v46, %v3291_v26  ;;  %v3280_v47 = vmul.f32 %v5756_v9, %v3267_v38 }
0x12c9   : > { %v6834_v15 = vpop.eup %6833 }
0x12ca   : > { %v6836_v18 = vpop.eup %6835  ;;  %6298 = vmatmul.mubr.msk.bf16.vlgmr.msra.gmra.mxu1 %vm1386_vm1, %v3298_v8  ;;  %v3269_v12 = vmul.f32 %v6834_v15, %v8441_v61  ;;  %v3293_v29 = vadd.f32 %v5757_v60, %v3280_v47  ;;  %v3444_v61 = vpop.f32.mrf.mxu0 }
0x12cb   : > { %v3268_v21 = vmul.f32 %v6836_v18, %v8444_v57  ;;  %v3450_v57 = vpack.c.bf16 %v3444_v61, %v3444_v61  ;;  %6312 = vmatpush3.bf16.msra.mxu1 %v6642_v55 }
0x12cc   : > { %v6838_v51 = vpop.eup %6837  ;;  %v3282_v53 = vmul.f32 %v5756_v9, %v3269_v12  ;;  %v6309_v37 = vpop.f32.mrf.mxu0 }
0x12cd   : > { %v3281_v44 = vmul.f32 %v5756_v9, %v3268_v21  ;;  %v3270_v27 = vmul.f32 %v6838_v51, %v8452_v7  ;;  %6465 = vmatprep.subr.msk.bf16.mxu0 %vm1789_vm2, %v3450_v57  ;;  %v3513_v7 = vsel %vm1789_vm2, %v3450_v57, 0  ;;  %3774 = vrot.lane.b32.xlu0 %v3450_v57, %s7333_s2 }
0x12ce   : > { %v3295_v34 = vadd.f32 %v5757_v60, %v3282_v53  ;;  %6318 = vmatpush3.bf16.xpose.msra.mxu0 %v3513_v7  ;;  %v3447_v6 = vpop.f32.mrf.mxu0 }
0x12cf   : > { %v3294_v59 = vadd.f32 %v5757_v60, %v3281_v44  ;;  %v3283_v5 = vmul.f32 %v5756_v9, %v3270_v27 }
0x12d0   : > { %v6310_v17 = vpop.f32.mrf.mxu0 }
0x12d1   : > { %v3299_v52 = vpack.c.bf16 %v3294_v59, %v3293_v29  ;;  %v3296_v19 = vadd.f32 %v5757_v60, %v3283_v5 }
0x12d3   : > { %6301 = vmatprep.mubr.msk.bf16.mxu1 %vm1386_vm1, %v3299_v52  ;;  %v3300_v0 = vpack.c.bf16 %v3296_v19, %v3295_v34 }
0x12d5   : > { %6302 = vmatmul.mubr.msk.bf16.gmra.mxu1 %vm1386_vm1, %v3300_v0 }
0x12d6   : > { %6313 = vmatprep.mubr.msk.bf16.mxu1 %vm7340_vm7, %v7339_v25 }
0x12dd   : > { %6314 = vmatmul.mubr.msk.bf16.vlgmr.msra.gmra.mxu1 %vm3406_vm6, %v8461_v58 }
0x133f   : > { %v3775_v63 = vpop.permute.xlu0 %3774 }
0x1340   : > { %6467 = vmatprep.subr.msk.bf16.mxu0 %vm1789_vm2, %v3775_v63  ;;  %v3789_v13 = vsel %vm1789_vm2, %v3775_v63, 0 }
0x138a   : > { %v6299_v39 = vpop.f32.mrf.mxu1 }
0x138c   : > { %v3363_v40 = vpop.f32.mrf.mxu1 }
0x138e   : > { %v6300_v45 = vpop.f32.mrf.mxu1 }
0x138f   : > { %v3395_v16 = vpack.c.bf16 %v6300_v45, %v6299_v39 }
0x1390   : > { %v3366_v41 = vpop.f32.mrf.mxu1 }
0x1391   : > { %v3394_v25 = vpack.c.bf16 %v3366_v41, %v3363_v40 }
0x1393   : > { %3765 = vrot.lane.b32.xlu1 %v3394_v25, %s7333_s2  ;;  %6319 = vmatprep.mubr.msk.bf16.mxu0 %vm1789_vm2, %v3394_v25 }
0x1394   : > { %6320 = vmatmul.mubr.msk.bf16.vlgmr.msra.gmra.mxu0 %vm1789_vm2, %v3395_v16 }
0x1395   : > { %6338 = vmatpush3.bf16.xpose.msra.mxu0 %v3789_v13  ;;  %v6303_v62 = vpop.f32.mrf.mxu1 }
0x1397   : > { %3767 = vrot.lane.b32.xlu1 %v3395_v16, %s7333_s2  ;;  %v3379_v43 = vpop.f32.mrf.mxu1 }
0x1399   : > { %v6304_v9 = vpop.f32.mrf.mxu1 }
0x139a   : > { %v3397_v22 = vpack.c.bf16 %v6304_v9, %v6303_v62 }
0x139b   : > { %v3382_v24 = vpop.f32.mrf.mxu1 }
0x139c   : > { %v3396_v35 = vpack.c.bf16 %v3382_v24, %v3379_v43  ;;  %3771 = vrot.lane.b32.xlu0 %v3397_v22, %s7333_s2 }
0x139d   : > { %v3493_v19 = vpop.f32.mrf.mxu1 }
0x139e   : > { %3769 = vrot.lane.b32.xlu1 %v3396_v35, %s7333_s2  ;;  %6323 = vmatprep.mubr.msk.bf16.mxu0 %vm1789_vm2, %v3396_v35  ;;  %v8558_v61 = vpack.c.bf16 %v3493_v19, %v3493_v19 }
0x139f   : > { %6324 = vmatmul.mubr.msk.bf16.gmra.mxu0 %vm1789_vm2, %v3397_v22  ;;  %v6315_v0 = vpop.f32.mrf.mxu1 }
0x13a0   : > { %4071 = vrot.lane.b32.xlu0 %v3394_v25, %s7334_s19  ;;  %6466 = vmatprep.subr.msk.bf16.mxu1 %vm3684_vm8, %v8558_v61  ;;  %v3686_v7 = vsel %vm3684_vm8, %v8558_v61, 0 }
0x13a1   : > { %6328 = vmatpush3.bf16.msra.mxu1 %v3686_v7 }
0x13a2   : > { %4079 = vrot.lane.b32.xlu1 %v3450_v57, %s7334_s19 }
0x13a4   : > { %4075 = vrot.lane.b32.xlu0 %v3396_v35, %s7334_s19 }
0x13a6   : > { %4073 = vrot.lane.b32.xlu1 %v3395_v16, %s7334_s19 }
0x13a8   : > { %4383 = vrot.lane.b32.xlu0 %v3450_v57, %s7335_s24  ;;  %v3496_v57 = vpop.f32.mrf.mxu1 }
0x13aa   : > { %4077 = vrot.lane.b32.xlu1 %v3397_v22, %s7334_s19  ;;  %v6316_v37 = vpop.f32.mrf.mxu1 }
0x13ac   : > { %4377 = vrot.lane.b32.xlu0 %v3395_v16, %s7335_s24 }
0x13ae   : > { %4375 = vrot.lane.b32.xlu1 %v3394_v25, %s7335_s24 }
0x13b0   : > { %4381 = vrot.lane.b32.xlu0 %v3397_v22, %s7335_s24 }
0x13b2   : > { %4379 = vrot.lane.b32.xlu1 %v3396_v35, %s7335_s24 }
0x1405   : > { %v3766_v36 = vpop.permute.xlu1 %3765 }
0x1406   : > { %6339 = vmatprep.mubr.msk.bf16.mxu0 %vm1789_vm2, %v3766_v36 }
0x1409   : > { %v3768_v4 = vpop.permute.xlu1 %3767 }
0x140a   : > { %6340 = vmatmul.mubr.msk.bf16.vlgmr.msra.gmra.mxu0 %vm1789_vm2, %v3768_v4 }
0x140e   : > { %v3772_v11 = vpop.permute.xlu0 %3771 }
0x1410   : > { %v3770_v60 = vpop.permute.xlu1 %3769 }
0x1411   : > { %6343 = vmatprep.mubr.msk.bf16.mxu0 %vm1789_vm2, %v3770_v60 }
0x1412   : > { %v4072_v50 = vpop.permute.xlu0 %4071  ;;  %6344 = vmatmul.mubr.msk.bf16.gmra.mxu0 %vm1789_vm2, %v3772_v11 }
0x1413   : > { %6359 = vmatprep.mubr.msk.bf16.mxu0 %vm1789_vm2, %v4072_v50 }
0x1414   : > { %v4080_v2 = vpop.permute.xlu1 %4079 }
0x1415   : > { %6469 = vmatprep.subr.msk.bf16.mxu0 %vm1789_vm2, %v4080_v2  ;;  %v4094_v58 = vsel %vm1789_vm2, %v4080_v2, 0 }
0x1416   : > { %v4076_v10 = vpop.permute.xlu0 %4075  ;;  %6358 = vmatpush3.bf16.xpose.msra.mxu0 %v4094_v58 }
0x1418   : > { %v4074_v20 = vpop.permute.xlu1 %4073 }
0x141a   : > { %v4384_v3 = vpop.permute.xlu0 %4383 }
0x141b   : > { %6471 = vmatprep.subr.msk.bf16.mxu0 %vm1789_vm2, %v4384_v3  ;;  %v4398_v1 = vsel %vm1789_vm2, %v4384_v3, 0 }
0x141c   : > { %v4078_v14 = vpop.permute.xlu1 %4077 }
0x141d   : > { %6360 = vmatmul.mubr.msk.bf16.vlgmr.msra.gmra.mxu0 %vm1789_vm2, %v4074_v20 }
0x141e   : > { %6363 = vmatprep.mubr.msk.bf16.mxu0 %vm1789_vm2, %v4076_v10  ;;  %6378 = vmatpush3.bf16.xpose.msra.mxu0 %v4398_v1  ;;  %v4378_v31 = vpop.permute.xlu0 %4377 }
0x1420   : > { %v4376_v48 = vpop.permute.xlu1 %4375 }
0x1422   : > { %v4382_v46 = vpop.permute.xlu0 %4381 }
0x1424   : > { %v4380_v26 = vpop.permute.xlu1 %4379 }
0x1425   : > { %6364 = vmatmul.mubr.msk.bf16.gmra.mxu0 %vm1789_vm2, %v4078_v14 }
0x1426   : > { %6379 = vmatprep.mubr.msk.bf16.mxu0 %vm1789_vm2, %v4376_v48 }
0x142d   : > { %6380 = vmatmul.mubr.msk.bf16.vlgmr.msra.gmra.mxu0 %vm1789_vm2, %v4378_v31 }
0x142e   : > { %6383 = vmatprep.mubr.msk.bf16.mxu0 %vm1789_vm2, %v4380_v26 }
0x1435   : > { %6384 = vmatmul.mubr.msk.bf16.gmra.mxu0 %vm1789_vm2, %v4382_v46 }
0x1454   : > { %v8526_v38 = vpop.f32.mrf.mxu0 }
0x1455   : > { %v3586_v8 = vsel %vm1789_vm2, %v8526_v38, -inf }
0x1456   : > { %v8530_v15 = vpop.f32.mrf.mxu0  ;;  %3587 = vmax.xlane.f32.xlu0 %v3586_v8 }
0x1457   : > { %v3580_v18 = vsel %vm1789_vm2, %v8530_v15, -inf }
0x1458   : > { %v8534_v12 = vpop.f32.mrf.mxu0  ;;  %3581 = vmax.xlane.f32.xlu1 %v3580_v18 }
0x1459   : > { %v3589_v51 = vsel %vm1789_vm2, %v8534_v12, -inf }
0x145a   : > { %v8536_v21 = vpop.f32.mrf.mxu0 }
0x145b   : > { %v3583_v47 = vsel %vm1789_vm2, %v8536_v21, -inf }
0x145c   : > { %3584 = vmax.xlane.f32.xlu0 %v3583_v47 }
0x145f   : > { %v8542_v44 = vpop.f32.mrf.mxu0 }
0x1460   : > { %3590 = vmax.xlane.f32.xlu0 %v3589_v51  ;;  %v3598_v27 = vsel %vm1789_vm2, %v8542_v44, -inf }
0x1461   : > { %3599 = vmax.xlane.f32.xlu1 %v3598_v27  ;;  %v8546_v53 = vpop.f32.mrf.mxu0 }
0x1462   : > { %v3592_v59 = vsel %vm1789_vm2, %v8546_v53, -inf }
0x1463   : > { %v8548_v29 = vpop.f32.mrf.mxu0 }
0x1464   : > { %v3601_v34 = vsel %vm1789_vm2, %v8548_v29, -inf }
0x1465   : > { %3593 = vmax.xlane.f32.xlu1 %v3592_v59  ;;  %v8552_v5 = vpop.f32.mrf.mxu0 }
0x1466   : > { %v3595_v52 = vsel %vm1789_vm2, %v8552_v5, -inf }
0x1467   : > { %3596 = vmax.xlane.f32.xlu0 %v3595_v52 }
0x146b   : > { %3602 = vmax.xlane.f32.xlu0 %v3601_v34 }
0x14ca   : > { %v8564_v6 = vpop.f32.mrf.mxu0 }
0x14cb   : > { %v3862_v17 = vsel %vm1789_vm2, %v8564_v6, -inf }
0x14cc   : > { %3863 = vmax.xlane.f32.xlu1 %v3862_v17  ;;  %v8568_v63 = vpop.f32.mrf.mxu0 }
0x14cd   : > { %v3856_v40 = vsel %vm1789_vm2, %v8568_v63, -inf }
0x14ce   : > { %v8570_v39 = vpop.f32.mrf.mxu0 }
0x14cf   : > { %v3865_v62 = vsel %vm1789_vm2, %v8570_v39, -inf }
0x14d0   : > { %3857 = vmax.xlane.f32.xlu1 %v3856_v40  ;;  %v8574_v45 = vpop.f32.mrf.mxu0 }
0x14d1   : > { %v3859_v41 = vsel %vm1789_vm2, %v8574_v45, -inf }
0x14d2   : > { %3860 = vmax.xlane.f32.xlu0 %v3859_v41  ;;  %v8578_v25 = vpop.f32.mrf.mxu0 }
0x14d3   : > { %v3874_v16 = vsel %vm1789_vm2, %v8578_v25, -inf }
0x14d4   : > { %3875 = vmax.xlane.f32.xlu1 %v3874_v16  ;;  %v8582_v13 = vpop.f32.mrf.mxu0 }
0x14d5   : > { %v3868_v9 = vsel %vm1789_vm2, %v8582_v13, -inf }
0x14d6   : > { %3866 = vmax.xlane.f32.xlu0 %v3865_v62  ;;  %v8586_v43 = vpop.f32.mrf.mxu0 }
0x14d7   : > { %v3877_v55 = vsel %vm1789_vm2, %v8586_v43, -inf }
0x14d8   : > { %3869 = vmax.xlane.f32.xlu1 %v3868_v9  ;;  %v8590_v22 = vpop.f32.mrf.mxu0 }
0x14d9   : > { %v3871_v24 = vsel %vm1789_vm2, %v8590_v22, -inf }
0x14da   : > { %3872 = vmax.xlane.f32.xlu0 %v3871_v24 }
0x14dd   : > { %v8594_v35 = vpop.f32.mrf.mxu0 }
0x14de   : > { %3878 = vmax.xlane.f32.xlu0 %v3877_v55  ;;  %v4167_v36 = vsel %vm1789_vm2, %v8594_v35, -inf }
0x14df   : > { %4168 = vmax.xlane.f32.xlu1 %v4167_v36  ;;  %v8600_v4 = vpop.f32.mrf.mxu0  ;;  %v8602_v11 = vpop.xlane.xlu0 %3587 }
0x14e0   : > { %v4161_v50 = vsel %vm1789_vm2, %v8600_v4, -inf }
0x14e1   : > { %v8604_v60 = vpop.f32.mrf.mxu0 }
0x14e2   : > { %v4170_v14 = vsel %vm1789_vm2, %v8604_v60, -inf }
0x14e3   : > { %4162 = vmax.xlane.f32.xlu1 %v4161_v50  ;;  %v8608_v2 = vpop.f32.mrf.mxu0 }
0x14e4   : > { %v4164_v10 = vsel %vm1789_vm2, %v8608_v2, -inf }
0x14e5   : > { %v3585_v58 = vpop.xlane.xlu0 %3584  ;;  %4165 = vmax.xlane.f32.xlu0 %v4164_v10  ;;  %v8612_v20 = vpop.f32.mrf.mxu0 }
0x14e6   : > { %v4179_v3 = vsel %vm1789_vm2, %v8612_v20, -inf  ;;  %v3605_v59 = vsub.f32 %v8536_v21, %v3585_v58 }
0x14e7   : > { %4180 = vmax.xlane.f32.xlu1 %v4179_v3  ;;  %v8616_v1 = vpop.f32.mrf.mxu0 }
0x14e8   : > { %v4173_v26 = vsel %vm1789_vm2, %v8616_v1, -inf  ;;  %v3614_v37 = vmul.f32 1.442695, %v3605_v59 }
0x14e9   : > { %v3591_v48 = vpop.xlane.xlu0 %3590  ;;  %4171 = vmax.xlane.f32.xlu0 %v4170_v14  ;;  %v8620_v31 = vpop.f32.mrf.mxu0 }
0x14ea   : > { %v3607_v8 = vsub.f32 %v8534_v12, %v3591_v48  ;;  %v4182_v19 = vsel %vm1789_vm2, %v8620_v31, -inf }
0x14eb   : > { %4174 = vmax.xlane.f32.xlu1 %v4173_v26  ;;  %v8624_v46 = vpop.f32.mrf.mxu0 }
0x14ec   : > { %v4176_v18 = vsel %vm1789_vm2, %v8624_v46, -inf  ;;  %v3618_v52 = vmul.f32 1.442695, %v3607_v8 }
0x14ed   : > { %4177 = vmax.xlane.f32.xlu0 %v4176_v18  ;;  %v8629_v47 = vpop.f32.mrf.mxu0  ;;  %v3582_v18 = vpop.xlane.xlu1 %3581 }
0x14ee   : > { %v4471_v51 = vsel %vm1789_vm2, %v8629_v47, -inf  ;;  %6839 = vpow2.f32 %v3618_v52 }
0x14ef   : > { %4472 = vmax.xlane.f32.xlu1 %v4471_v51  ;;  %v8633_v27 = vpop.f32.mrf.mxu0  ;;  %6841 = vpow2.f32 %v3614_v37  ;;  %v3606_v51 = vsub.f32 %v8526_v38, %v8602_v11 }
0x14f0   : > { %v3597_v34 = vpop.xlane.xlu0 %3596  ;;  %v4465_v0 = vsel %vm1789_vm2, %v8633_v27, -inf }
0x14f1   : > { %4183 = vmax.xlane.f32.xlu0 %v4182_v19  ;;  %v8638_v12 = vpop.f32.mrf.mxu0  ;;  %v3609_v16 = vsub.f32 %v8552_v5, %v3597_v34  ;;  %v3600_v59 = vpop.xlane.xlu1 %3599  ;;  %v3616_v52 = vmul.f32 1.442695, %v3606_v51  ;;  %v3604_v34 = vsub.f32 %v8530_v15, %v3582_v18 }
0x14f2   : > { %v4474_v9 = vsel %vm1789_vm2, %v8638_v12, -inf }
0x14f3   : > { %4466 = vmax.xlane.f32.xlu1 %v4465_v0  ;;  %v8642_v57 = vpop.f32.mrf.mxu0  ;;  %v3622_v55 = vmul.f32 1.442695, %v3609_v16  ;;  %v3612_v19 = vmul.f32 1.442695, %v3604_v34  ;;  %v3610_v0 = vsub.f32 %v8542_v44, %v3600_v59 }
0x14f4   : > { %v3603_v7 = vpop.xlane.xlu0 %3602  ;;  %v4468_v21 = vsel %vm1789_vm2, %v8642_v57, -inf }
0x14f5   : > { %v3611_v17 = vsub.f32 %v8548_v29, %v3603_v7  ;;  %4469 = vmax.xlane.f32.xlu0 %v4468_v21  ;;  %v8647_v40 = vpop.f32.mrf.mxu0  ;;  %v3594_v37 = vpop.xlane.xlu1 %3593  ;;  %v3624_v7 = vmul.f32 1.442695, %v3610_v0 }
0x14f6   : > { %v3608_v21 = vsub.f32 %v8546_v53, %v3594_v37  ;;  %v4483_v16 = vsel %vm1789_vm2, %v8647_v40, -inf }
0x14f7   : > { %v8649_v41 = vpop.f32.mrf.mxu0  ;;  %v3626_v62 = vmul.f32 1.442695, %v3611_v17 }
0x14f8   : > { %v3620_v17 = vmul.f32 1.442695, %v3608_v21  ;;  %v4477_v38 = vsel %vm1789_vm2, %v8649_v41, -inf }
0x14f9   : > { %4475 = vmax.xlane.f32.xlu0 %v4474_v9  ;;  %v8654_v24 = vpop.f32.mrf.mxu0  ;;  %6843 = vpow2.f32 %v3626_v62 }
0x14fa   : > { %v4486_v29 = vsel %vm1789_vm2, %v8654_v24, -inf  ;;  %6845 = vpow2.f32 %v3622_v55 }
0x14fb   : > { %v8658_v36 = vpop.f32.mrf.mxu0  ;;  %v8662_v5 = vpop.eup %6839  ;;  %6847 = vpow2.f32 %v3616_v52 }
0x14fc   : > { %v4480_v50 = vsel %vm1789_vm2, %v8658_v36, -inf  ;;  %v3637_v58 = vsel %vm1789_vm2, %v8662_v5, 0.0  ;;  %v8668_v10 = vpop.eup %6841  ;;  %6849 = vpow2.f32 %v3612_v19 }
0x14fd   : > { %4487 = vmax.xlane.f32.xlu0 %v4486_v29  ;;  %v3631_v3 = vsel %vm1789_vm2, %v8668_v10, 0.0  ;;  %6851 = vpow2.f32 %v3624_v7 }
0x14fe   : > { %6853 = vpow2.f32 %v3620_v17 }
0x1501   : > { %4481 = vmax.xlane.f32.xlu0 %v4480_v50 }
0x1504   : > { %3949 = vrot.lane.b32.xlu1 %v8558_v61, %s7333_s2  ;;  %s9367_s2 = sld [smem:[#allocation37_spill]] }
0x1505   : > { %3638 = vadd.xlane.f32.xlu0 %v3637_v58 }
0x1506   : > { %v8672_v14 = vpop.eup %6843 }
0x1507   : > { %v3649_v48 = vsel %vm1789_vm2, %v8672_v14, 0.0  ;;  %v8676_v26 = vpop.eup %6845 }
0x1508   : > { %v3643_v8 = vsel %vm1789_vm2, %v8676_v26, 0.0  ;;  %v8689_v15 = vpop.eup %6847 }
0x1509   : > { %3632 = vadd.xlane.f32.xlu0 %v3631_v3  ;;  %v3634_v44 = vsel %vm1789_vm2, %v8689_v15, 0.0  ;;  %v8693_v11 = vpop.eup %6849 }
0x150a   : > { %v3628_v53 = vsel %vm1789_vm2, %v8693_v11, 0.0  ;;  %v8697_v62 = vpop.eup %6851 }
0x150b   : > { %v3646_v9 = vsel %vm1789_vm2, %v8697_v62, 0.0  ;;  %v8701_v55 = vpop.eup %6853 }
0x150c   : > { %v3640_v29 = vsel %vm1789_vm2, %v8701_v55, 0.0 }
0x150d   : > { %3650 = vadd.xlane.f32.xlu0 %v3649_v48 }
0x1511   : > { %3644 = vadd.xlane.f32.xlu0 %v3643_v8 }
0x1528   : > { %4484 = vmax.xlane.f32.xlu1 %v4483_v16 }
0x152c   : > { %4478 = vmax.xlane.f32.xlu1 %v4477_v38 }
0x1530   : > { %3635 = vadd.xlane.f32.xlu1 %v3634_v44 }
0x1534   : > { %3629 = vadd.xlane.f32.xlu1 %v3628_v53 }
0x1538   : > { %3647 = vadd.xlane.f32.xlu1 %v3646_v9 }
0x153c   : > { %3641 = vadd.xlane.f32.xlu1 %v3640_v29 }
0x1555   : > { %v3864_v50 = vpop.xlane.xlu1 %3863 }
0x1556   : > { %v3882_v58 = vsub.f32 %v8564_v6, %v3864_v50 }
0x1558   : > { %v3892_v3 = vmul.f32 1.442695, %v3882_v58 }
0x1559   : > { %v3858_v48 = vpop.xlane.xlu1 %3857 }
0x155a   : > { %6855 = vpow2.f32 %v3892_v3  ;;  %v3880_v8 = vsub.f32 %v8568_v63, %v3858_v48 }
0x155b   : > { %v3861_v18 = vpop.xlane.xlu0 %3860 }
0x155c   : > { %v3888_v51 = vmul.f32 1.442695, %v3880_v8  ;;  %v3881_v59 = vsub.f32 %v8574_v45, %v3861_v18 }
0x155d   : > { %v3876_v52 = vpop.xlane.xlu1 %3875 }
0x155e   : > { %6857 = vpow2.f32 %v3888_v51  ;;  %v3886_v34 = vsub.f32 %v8578_v25, %v3876_v52  ;;  %v3890_v7 = vmul.f32 1.442695, %v3881_v59 }
0x155f   : > { %v3867_v19 = vpop.xlane.xlu0 %3866 }
0x1560   : > { %v3883_v0 = vsub.f32 %v8570_v39, %v3867_v19  ;;  %v3900_v37 = vmul.f32 1.442695, %v3886_v34 }
0x1561   : > { %v3870_v6 = vpop.xlane.xlu1 %3869 }
0x1562   : > { %v3894_v21 = vmul.f32 1.442695, %v3883_v0  ;;  %6859 = vpow2.f32 %v3900_v37  ;;  %v3884_v17 = vsub.f32 %v8582_v13, %v3870_v6 }
0x1563   : > { %v3873_v63 = vpop.xlane.xlu0 %3872 }
0x1564   : > { %6861 = vpow2.f32 %v3894_v21  ;;  %v3896_v16 = vmul.f32 1.442695, %v3884_v17  ;;  %v3885_v45 = vsub.f32 %v8590_v22, %v3873_v63 }
0x1565   : > { %6863 = vpow2.f32 %v3890_v7 }
0x1566   : > { %6865 = vpow2.f32 %v3896_v16  ;;  %v3898_v29 = vmul.f32 1.442695, %v3885_v45 }
0x1567   : > { %v8711_v38 = vpop.eup %6855  ;;  %v3879_v25 = vpop.xlane.xlu0 %3878 }
0x1568   : > { %v3910_v39 = vsel %vm1789_vm2, %v8711_v38, 0.0  ;;  %v3887_v44 = vsub.f32 %v8586_v43, %v3879_v25  ;;  %v4169_v53 = vpop.xlane.xlu1 %4168 }
0x1569   : > { %3911 = vadd.xlane.f32.xlu1 %v3910_v39  ;;  %v4187_v9 = vsub.f32 %v8594_v35, %v4169_v53 }
0x156a   : > { %v3902_v50 = vmul.f32 1.442695, %v3887_v44 }
0x156b   : > { %v8718_v13 = vpop.eup %6857  ;;  %v4197_v58 = vmul.f32 1.442695, %v4187_v9 }
0x156c   : > { %v3904_v3 = vsel %vm1789_vm2, %v8718_v13, 0.0  ;;  %6867 = vpow2.f32 %v3902_v50  ;;  %v4163_v22 = vpop.xlane.xlu1 %4162 }
0x156d   : > { %3905 = vadd.xlane.f32.xlu1 %v3904_v3  ;;  %6869 = vpow2.f32 %v4197_v58  ;;  %v4185_v48 = vsub.f32 %v8600_v4, %v4163_v22 }
0x156e   : > { %6871 = vpow2.f32 %v3898_v29  ;;  %v4166_v43 = vpop.xlane.xlu0 %4165 }
0x156f   : > { %v8723_v8 = vpop.eup %6859  ;;  %v4193_v18 = vmul.f32 1.442695, %v4185_v48  ;;  %v4186_v51 = vsub.f32 %v8608_v2, %v4166_v43 }
0x1570   : > { %v4181_v59 = vpop.xlane.xlu1 %4180  ;;  %v3922_v52 = vsel %vm1789_vm2, %v8723_v8, 0.0 }
0x1571   : > { %v8725_v35 = vpop.eup %6861  ;;  %6873 = vpow2.f32 %v4193_v18  ;;  %v4191_v34 = vsub.f32 %v8612_v20, %v4181_v59  ;;  %3923 = vadd.xlane.f32.xlu1 %v3922_v52  ;;  %v4195_v21 = vmul.f32 1.442695, %v4186_v51 }
0x1572   : > { %v3913_v4 = vsel %vm1789_vm2, %v8725_v35, 0.0  ;;  %v8733_v19 = vpop.eup %6863  ;;  %v4172_v0 = vpop.xlane.xlu0 %4171 }
0x1573   : > { %3914 = vadd.xlane.f32.xlu0 %v3913_v4  ;;  %v8735_v37 = vpop.eup %6865  ;;  %v4205_v7 = vmul.f32 1.442695, %v4191_v34  ;;  %v4188_v2 = vsub.f32 %v8604_v60, %v4172_v0  ;;  %v3907_v16 = vsel %vm1789_vm2, %v8733_v19, 0.0 }
0x1574   : > { %v4175_v6 = vpop.xlane.xlu1 %4174  ;;  %v3916_v17 = vsel %vm1789_vm2, %v8735_v37, 0.0 }
0x1575   : > { %6875 = vpow2.f32 %v4205_v7  ;;  %v4199_v20 = vmul.f32 1.442695, %v4188_v2  ;;  %v4189_v63 = vsub.f32 %v8616_v1, %v4175_v6  ;;  %3917 = vadd.xlane.f32.xlu1 %v3916_v17 }
0x1576   : > { %v4178_v45 = vpop.xlane.xlu0 %4177 }
0x1577   : > { %3908 = vadd.xlane.f32.xlu0 %v3907_v16  ;;  %6877 = vpow2.f32 %v4199_v20  ;;  %v4201_v25 = vmul.f32 1.442695, %v4189_v63  ;;  %v4190_v44 = vsub.f32 %v8624_v46, %v4178_v45 }
0x1578   : > { %6879 = vpow2.f32 %v4195_v21  ;;  %v4473_v39 = vpop.xlane.xlu1 %4472 }
0x1579   : > { %v8743_v60 = vpop.eup %6867  ;;  %6881 = vpow2.f32 %v4201_v25  ;;  %v4203_v22 = vmul.f32 1.442695, %v4190_v44  ;;  %v4491_v48 = vsub.f32 %v8629_v47, %v4473_v39 }
0x157a   : > { %v8746_v53 = vpop.eup %6869  ;;  %v4184_v9 = vpop.xlane.xlu0 %4183  ;;  %v3925_v1 = vsel %vm1789_vm2, %v8743_v60, 0.0 }
0x157b   : > { %v8750_v29 = vpop.eup %6871  ;;  %v4192_v50 = vsub.f32 %v8620_v31, %v4184_v9  ;;  %3926 = vadd.xlane.f32.xlu0 %v3925_v1  ;;  %v4215_v58 = vsel %vm1789_vm2, %v8746_v53, 0.0  ;;  %v4501_v52 = vmul.f32 1.442695, %v4491_v48 }
0x157c   : > { %4216 = vadd.xlane.f32.xlu1 %v4215_v58  ;;  %v4467_v3 = vpop.xlane.xlu1 %4466  ;;  %v3919_v51 = vsel %vm1789_vm2, %v8750_v29, 0.0 }
0x157d   : > { %v4207_v46 = vmul.f32 1.442695, %v4192_v50  ;;  %v4489_v34 = vsub.f32 %v8633_v27, %v4467_v3 }
0x157e   : > { %v8756_v43 = vpop.eup %6873  ;;  %v4470_v18 = vpop.xlane.xlu0 %4469 }
0x157f   : > { %6883 = vpow2.f32 %v4207_v46  ;;  %3920 = vadd.xlane.f32.xlu0 %v3919_v51  ;;  %v4209_v31 = vsel %vm1789_vm2, %v8756_v43, 0.0  ;;  %v4497_v21 = vmul.f32 1.442695, %v4489_v34  ;;  %v4490_v63 = vsub.f32 %v8642_v57, %v4470_v18 }
0x1580   : > { %4210 = vadd.xlane.f32.xlu1 %v4209_v31  ;;  %v8762_v59 = vpop.permute.xlu1 %3949  ;;  %6885 = vpow2.f32 %v4203_v22 }
0x1581   : > { %6468 = vmatprep.subr.msk.bf16.mxu1 %vm3684_vm8, %v8762_v59  ;;  %6887 = vpow2.f32 %v4501_v52 }
0x1582   : > { %v8767_v47 = vpop.eup %6875  ;;  %v4476_v4 = vpop.xlane.xlu0 %4475  ;;  %6889 = vpow2.f32 %v4497_v21 }
0x1583   : > { %v4227_v0 = vsel %vm1789_vm2, %v8767_v47, 0.0  ;;  %v4492_v6 = vsub.f32 %v8638_v12, %v4476_v4  ;;  %v4499_v12 = vmul.f32 1.442695, %v4490_v63 }
0x1584   : > { %v8771_v7 = vpop.eup %6877  ;;  %4228 = vadd.xlane.f32.xlu1 %v4227_v0 }
0x1585   : > { %v8773_v2 = vpop.eup %6879  ;;  %v4218_v27 = vsel %vm1789_vm2, %v8771_v7, 0.0  ;;  %v4503_v16 = vmul.f32 1.442695, %v4492_v6 }
0x1586   : > { %v8778_v17 = vpop.eup %6881  ;;  %4219 = vadd.xlane.f32.xlu0 %v4218_v27  ;;  %v4212_v45 = vsel %vm1789_vm2, %v8773_v2, 0.0  ;;  %v4488_v22 = vpop.xlane.xlu0 %4487 }
0x1587   : > { %v4221_v20 = vsel %vm1789_vm2, %v8778_v17, 0.0  ;;  %6891 = vpow2.f32 %v4503_v16 }
0x1588   : > { %4222 = vadd.xlane.f32.xlu1 %v4221_v20  ;;  %6893 = vpow2.f32 %v4499_v12  ;;  %v4496_v20 = vsub.f32 %v8654_v24, %v4488_v22 }
0x158a   : > { %4213 = vadd.xlane.f32.xlu0 %v4212_v45  ;;  %v4482_v18 = vpop.xlane.xlu0 %4481 }
0x158b   : > { %v4494_v31 = vsub.f32 %v8658_v36, %v4482_v18 }
0x158c   : > { %v8785_v25 = vpop.eup %6883 }
0x158d   : > { %v4230_v39 = vsel %vm1789_vm2, %v8785_v25, 0.0  ;;  %v8789_v44 = vpop.eup %6885  ;;  %v4507_v52 = vmul.f32 1.442695, %v4494_v31 }
0x158e   : > { %4231 = vadd.xlane.f32.xlu0 %v4230_v39  ;;  %v4224_v9 = vsel %vm1789_vm2, %v8789_v44, 0.0  ;;  %v8793_v57 = vpop.eup %6887  ;;  %v3639_v34 = vpop.xlane.xlu0 %3638  ;;  %v4511_v39 = vmul.f32 1.442695, %v4496_v20 }
0x158f   : > { %v4519_v1 = vsel %vm1789_vm2, %v8793_v57, 0.0  ;;  %v8797_v50 = vpop.eup %6889  ;;  %6895 = vpow2.f32 %v4507_v52 }
0x1590   : > { %v4513_v58 = vsel %vm1789_vm2, %v8797_v50, 0.0 }
0x1592   : > { %4225 = vadd.xlane.f32.xlu0 %v4224_v9  ;;  %v3633_v21 = vpop.xlane.xlu0 %3632 }
0x1593   : > { %6897 = vrcp.f32 %v3633_v21 }
0x1594   : > { %v8803_v3 = vpop.eup %6891 }
0x1595   : > { %v4522_v48 = vsel %vm1789_vm2, %v8803_v3, 0.0  ;;  %v8807_v46 = vpop.eup %6893 }
0x1596   : > { %4520 = vadd.xlane.f32.xlu0 %v4519_v1  ;;  %v4516_v51 = vsel %vm1789_vm2, %v8807_v46, 0.0  ;;  %v3651_v36 = vpop.xlane.xlu0 %3650 }
0x1599   : > { %4253 = vrot.lane.b32.xlu1 %v8558_v61, %s7334_s19  ;;  %s5669_s19 = sshll.u32 %s7636_s10, 6 }
0x159a   : > { %4514 = vadd.xlane.f32.xlu0 %v4513_v58 }
0x159c   : > { %v8815_v45 = vpop.eup %6895 }
0x159e   : > { %4523 = vadd.xlane.f32.xlu0 %v4522_v48 }
0x15a0   : > { %v6898_v58 = vpop.eup %6897 }
0x15a1   : > { %v3661_v21 = vmul.f32 %v6898_v58, %v8668_v10 }
0x15a2   : > { %4517 = vadd.xlane.f32.xlu0 %v4516_v51 }
0x15b1   : > { %v4485_v4 = vpop.xlane.xlu1 %4484 }
0x15b2   : > { %v4495_v0 = vsub.f32 %v8647_v40, %v4485_v4  ;;  %v4528_v40 = vsel %vm1789_vm2, %v8815_v45, 0.0 }
0x15b4   : > { %v4509_v63 = vmul.f32 1.442695, %v4495_v0 }
0x15b5   : > { %v4479_v6 = vpop.xlane.xlu1 %4478 }
0x15b6   : > { %v4493_v27 = vsub.f32 %v8649_v41, %v4479_v6  ;;  %v3645_v41 = vpop.xlane.xlu0 %3644 }
0x15b8   : > { %v4505_v16 = vmul.f32 1.442695, %v4493_v27 }
0x15b9   : > { %v3636_v12 = vpop.xlane.xlu1 %3635 }
0x15ba   : > { %6899 = vpow2.f32 %v4505_v16 }
0x15bb   : > { %6901 = vrcp.f32 %v3636_v12 }
0x15bc   : > { %6903 = vpow2.f32 %v4509_v63 }
0x15bd   : > { %6905 = vrcp.f32 %v3639_v34  ;;  %4529 = vadd.xlane.f32.xlu1 %v4528_v40  ;;  %v3630_v9 = vpop.xlane.xlu1 %3629 }
0x15be   : > { %6907 = vrcp.f32 %v3630_v9 }
0x15bf   : > { %6909 = vpow2.f32 %v4511_v39 }
0x15c1   : > { %v3648_v24 = vpop.xlane.xlu1 %3647 }
0x15c2   : > { %6911 = vrcp.f32 %v3648_v24 }
0x15c3   : > { %6913 = vrcp.f32 %v3645_v41 }
0x15c4   : > { %6915 = vrcp.f32 %v3651_v36  ;;  %v3964_v36 = vsel %vm3684_vm8, %v8762_v59, 0 }
0x15c5   : > { %v3642_v1 = vpop.xlane.xlu1 %3641 }
0x15c6   : > { %6917 = vrcp.f32 %v3642_v1 }
0x15c7   : > { %v8819_v22 = vpop.eup %6899 }
0x15c8   : > { %v6902_v48 = vpop.eup %6901  ;;  %v4525_v18 = vsel %vm1789_vm2, %v8819_v22, 0.0 }
0x15c9   : > { %v8823_v51 = vpop.eup %6903  ;;  %4526 = vadd.xlane.f32.xlu0 %v4525_v18  ;;  %v3662_v34 = vmul.f32 %v6902_v48, %v8689_v15 }
0x15ca   : > { %v6906_v31 = vpop.eup %6905  ;;  %v4531_v4 = vsel %vm1789_vm2, %v8823_v51, 0.0 }
0x15cb   : > { %v6908_v52 = vpop.eup %6907  ;;  %v3663_v27 = vmul.f32 %v6906_v31, %v8662_v5 }
0x15cc   : > { %v3660_v0 = vmul.f32 %v6908_v52, %v8693_v11  ;;  %v8830_v6 = vpop.eup %6909 }
0x15cd   : > { %4532 = vadd.xlane.f32.xlu0 %v4531_v4  ;;  %v3669_v63 = vpack.c.bf16 %v3663_v27, %v3662_v34  ;;  %v4534_v15 = vsel %vm1789_vm2, %v8830_v6, 0.0 }
0x15ce   : > { %v3668_v20 = vpack.c.bf16 %v3661_v21, %v3660_v0 }
0x15cf   : > { %v6912_v16 = vpop.eup %6911 }
0x15d0   : > { %6329 = vmatprep.mubr.msk.bf16.mxu1 %vm1789_vm2, %v3668_v20  ;;  %v6914_v12 = vpop.eup %6913  ;;  %v3666_v5 = vmul.f32 %v6912_v16, %v8697_v62 }
0x15d1   : > { %4535 = vadd.xlane.f32.xlu0 %v4534_v15  ;;  %6330 = vmatmul.mubr.msk.bf16.vlgmr.msra.gmra.mxu1 %vm1789_vm2, %v3669_v63  ;;  %v6916_v10 = vpop.eup %6915  ;;  %v3665_v40 = vmul.f32 %v6914_v12, %v8676_v26 }
0x15d2   : > { %6348 = vmatpush3.bf16.msra.mxu1 %v3964_v36  ;;  %v3667_v9 = vmul.f32 %v6916_v10, %v8672_v14 }
0x15d3   : > { %v6918_v11 = vpop.eup %6917 }
0x15d4   : > { %v3664_v39 = vmul.f32 %v6918_v11, %v8701_v55  ;;  %v3671_v24 = vpack.c.bf16 %v3667_v9, %v3666_v5 }
0x15d6   : > { %v3670_v41 = vpack.c.bf16 %v3665_v40, %v3664_v39 }
0x15d8   : > { %6333 = vmatprep.mubr.msk.bf16.mxu1 %vm1789_vm2, %v3670_v41 }
0x15d9   : > { %6334 = vmatmul.mubr.msk.bf16.gmra.mxu1 %vm1789_vm2, %v3671_v24 }
0x15e7   : > { %4557 = vrot.lane.b32.xlu0 %v8558_v61, %s7335_s24  ;;  %s9222_s24 = scalar_lea.vmem [#allocation18], %s5669_s19 }
0x15f2   : > { %v3912_v59 = vpop.xlane.xlu1 %3911 }
0x15f6   : > { %v3906_v1 = vpop.xlane.xlu1 %3905 }
0x15fa   : > { %v3924_v58 = vpop.xlane.xlu1 %3923 }
0x15fc   : > { %v3915_v48 = vpop.xlane.xlu0 %3914 }
0x15fd   : > { %6919 = vrcp.f32 %v3915_v48 }
0x15fe   : > { %6921 = vrcp.f32 %v3906_v1  ;;  %v3918_v26 = vpop.xlane.xlu1 %3917 }
0x15ff   : > { %6923 = vrcp.f32 %v3912_v59 }
0x1600   : > { %v3909_v62 = vpop.xlane.xlu0 %3908 }
0x1601   : > { %6925 = vrcp.f32 %v3909_v62 }
0x1604   : > { %v3927_v14 = vpop.xlane.xlu0 %3926 }
0x1605   : > { %v4217_v55 = vpop.xlane.xlu1 %4216  ;;  %6927 = vrcp.f32 %v3927_v14 }
0x1606   : > { %6929 = vrcp.f32 %v3918_v26 }
0x1607   : > { %6931 = vrcp.f32 %v3924_v58 }
0x1608   : > { %v3921_v18 = vpop.xlane.xlu0 %3920 }
0x1609   : > { %6933 = vrcp.f32 %v3921_v18  ;;  %v4211_v31 = vpop.xlane.xlu1 %4210 }
0x160a   : > { %v6920_v52 = vpop.eup %6919 }
0x160b   : > { %v6922_v61 = vpop.eup %6921  ;;  %v3939_v0 = vmul.f32 %v6920_v52, %v8725_v35 }
0x160c   : > { %v6924_v34 = vpop.eup %6923  ;;  %v3936_v27 = vmul.f32 %v6922_v61, %v8718_v13 }
0x160d   : > { %v4229_v21 = vpop.xlane.xlu1 %4228  ;;  %v3938_v63 = vmul.f32 %v6924_v34, %v8711_v38 }
0x160e   : > { %v6926_v4 = vpop.eup %6925 }
0x160f   : > { %v3937_v20 = vmul.f32 %v6926_v4, %v8733_v19  ;;  %v4220_v16 = vpop.xlane.xlu0 %4219  ;;  %v3945_v12 = vpack.c.bf16 %v3939_v0, %v3938_v63 }
0x1610   : > { %6935 = vrcp.f32 %v4220_v16 }
0x1611   : > { %v3944_v15 = vpack.c.bf16 %v3937_v20, %v3936_v27  ;;  %v4223_v36 = vpop.xlane.xlu1 %4222  ;;  %6937 = vrcp.f32 %v4211_v31 }
0x1612   : > { %v6928_v10 = vpop.eup %6927  ;;  %6939 = vrcp.f32 %v4217_v55 }
0x1613   : > { %6349 = vmatprep.mubr.msk.bf16.mxu1 %vm1789_vm2, %v3944_v15  ;;  %v4214_v11 = vpop.xlane.xlu0 %4213  ;;  %v6930_v35 = vpop.eup %6929  ;;  %v3943_v39 = vmul.f32 %v6928_v10, %v8743_v60 }
0x1614   : > { %6350 = vmatmul.mubr.msk.bf16.vlgmr.msra.gmra.mxu1 %vm1789_vm2, %v3945_v12  ;;  %6941 = vrcp.f32 %v4214_v11  ;;  %v6932_v13 = vpop.eup %6931  ;;  %v3940_v9 = vmul.f32 %v6930_v35, %v8735_v37 }
0x1615   : > { %v4254_v5 = vpop.permute.xlu1 %4253  ;;  %v3942_v24 = vmul.f32 %v6932_v13, %v8723_v8 }
0x1616   : > { %v6934_v19 = vpop.eup %6933  ;;  %v4268_v38 = vsel %vm3684_vm8, %v4254_v5, 0  ;;  %6470 = vmatprep.subr.msk.bf16.mxu1 %vm3684_vm8, %v4254_v5 }
0x1617   : > { %v4232_v40 = vpop.xlane.xlu0 %4231  ;;  %6368 = vmatpush3.bf16.msra.mxu1 %v4268_v38  ;;  %v3941_v41 = vmul.f32 %v6934_v19, %v8750_v29  ;;  %v3947_v1 = vpack.c.bf16 %v3943_v39, %v3942_v24 }
0x1618   : > { %6943 = vrcp.f32 %v4232_v40 }
0x1619   : > { %v3946_v59 = vpack.c.bf16 %v3941_v41, %v3940_v9  ;;  %6945 = vrcp.f32 %v4223_v36 }
0x161a   : > { %6947 = vrcp.f32 %v4229_v21 }
0x161b   : > { %v4226_v58 = vpop.xlane.xlu0 %4225  ;;  %6353 = vmatprep.mubr.msk.bf16.mxu1 %vm1789_vm2, %v3946_v59 }
0x161c   : > { %6949 = vrcp.f32 %v4226_v58  ;;  %6354 = vmatmul.mubr.msk.bf16.gmra.mxu1 %vm1789_vm2, %v3947_v1 }
0x161d   : > { %v6936_v60 = vpop.eup %6935 }
0x161e   : > { %v6938_v48 = vpop.eup %6937  ;;  %v4244_v29 = vmul.f32 %v6936_v60, %v8771_v7 }
0x161f   : > { %v4521_v62 = vpop.xlane.xlu0 %4520  ;;  %v6940_v26 = vpop.eup %6939  ;;  %v4241_v8 = vmul.f32 %v6938_v48, %v8756_v43 }
0x1620   : > { %v4243_v55 = vmul.f32 %v6940_v26, %v8746_v53 }
0x1621   : > { %v6942_v37 = vpop.eup %6941 }
0x1622   : > { %v4242_v14 = vmul.f32 %v6942_v37, %v8773_v2  ;;  %v4250_v52 = vpack.c.bf16 %v4244_v29, %v4243_v55 }
0x1623   : > { %v4515_v18 = vpop.xlane.xlu0 %4514 }
0x1624   : > { %v4249_v31 = vpack.c.bf16 %v4242_v14, %v4241_v8  ;;  %6951 = vrcp.f32 %v4515_v18 }
0x1625   : > { %v6944_v61 = vpop.eup %6943 }
0x1626   : > { %6369 = vmatprep.mubr.msk.bf16.mxu1 %vm1789_vm2, %v4249_v31  ;;  %v6946_v34 = vpop.eup %6945  ;;  %v4248_v7 = vmul.f32 %v6944_v61, %v8785_v25 }
0x1627   : > { %v4524_v4 = vpop.xlane.xlu0 %4523  ;;  %6370 = vmatmul.mubr.msk.bf16.vlgmr.msra.gmra.mxu1 %vm1789_vm2, %v4250_v52  ;;  %v6948_v0 = vpop.eup %6947  ;;  %v4245_v43 = vmul.f32 %v6946_v34, %v8778_v17 }
0x1628   : > { %v4247_v27 = vmul.f32 %v6948_v0, %v8767_v47 }
0x1629   : > { %v6950_v21 = vpop.eup %6949 }
0x162a   : > { %v4246_v2 = vmul.f32 %v6950_v21, %v8789_v44  ;;  %v4252_v63 = vpack.c.bf16 %v4248_v7, %v4247_v27  ;;  %v6644_v27 = vld [vmem:[#allocation17] sm:$0xff]  }
0x162b   : > { %v4518_v53 = vpop.xlane.xlu0 %4517 }
0x162c   : > { %6953 = vrcp.f32 %v4518_v53  ;;  %v4251_v20 = vpack.c.bf16 %v4246_v2, %v4245_v43  ;;  %v6643_v43 = vld [vmem:[#allocation17 + $0x8] sm:$0xff]  }
0x162d   : > { %6955 = vrcp.f32 %v4524_v4  ;;  %6397 = vmatprep.subr.bf16.mxu0 %v6643_v43 }
0x162e   : > { %6373 = vmatprep.mubr.msk.bf16.mxu1 %vm1789_vm2, %v4251_v20  ;;  %6957 = vrcp.f32 %v4521_v62  ;;  %6398 = vmatpush3.bf16.msra.mxu0 %v6643_v43 }
0x162f   : > { %6374 = vmatmul.mubr.msk.bf16.gmra.mxu1 %vm1789_vm2, %v4252_v63  ;;  %6399 = vmatprep.subr.bf16.mxu0 %v6644_v27 }
0x1631   : > { %v6952_v16 = vpop.eup %6951 }
0x1632   : > { %v4545_v12 = vmul.f32 %v6952_v16, %v8797_v50  ;;  %6400 = vmatpush3.bf16.msra.mxu0 %v6644_v27 }
0x1639   : > { %v6954_v15 = vpop.eup %6953 }
0x163a   : > { %v4546_v25 = vmul.f32 %v6954_v15, %v8807_v46  ;;  %v6956_v10 = vpop.eup %6955 }
0x163b   : > { %v6958_v35 = vpop.eup %6957  ;;  %v4548_v13 = vmul.f32 %v6956_v10, %v8803_v3 }
0x163c   : > { %v4553_v36 = vpack.c.bf16 %v4546_v25, %v4545_v12  ;;  %v4547_v46 = vmul.f32 %v6958_v35, %v8793_v57 }
0x163e   : > { %6389 = vmatprep.mubr.msk.bf16.mxu1 %vm1789_vm2, %v4553_v36  ;;  %v4554_v39 = vpack.c.bf16 %v4548_v13, %v4547_v46 }
0x1646   : > { %v4530_v17 = vpop.xlane.xlu1 %4529 }
0x1647   : > { %6959 = vrcp.f32 %v4530_v17 }
0x1652   : > { %v4527_v47 = vpop.xlane.xlu0 %4526 }
0x1653   : > { %6961 = vrcp.f32 %v4527_v47 }
0x1654   : > { %v6960_v50 = vpop.eup %6959 }
0x1655   : > { %v4550_v9 = vmul.f32 %v6960_v50, %v8815_v45 }
0x1656   : > { %v4533_v44 = vpop.xlane.xlu0 %4532 }
0x1657   : > { %6963 = vrcp.f32 %v4533_v44 }
0x165a   : > { %v4536_v11 = vpop.xlane.xlu0 %4535 }
0x165b   : > { %6965 = vrcp.f32 %v4536_v11 }
0x165e   : > { %v4558_v5 = vpop.permute.xlu0 %4557 }
0x165f   : > { %v4572_v19 = vsel %vm3684_vm8, %v4558_v5, 0  ;;  %6472 = vmatprep.subr.msk.bf16.mxu1 %vm3684_vm8, %v4558_v5 }
0x1660   : > { %v6962_v38 = vpop.eup %6961  ;;  %6388 = vmatpush3.bf16.msra.mxu1 %v4572_v19 }
0x1661   : > { %v4549_v40 = vmul.f32 %v6962_v38, %v8819_v22 }
0x1663   : > { %6390 = vmatmul.mubr.msk.bf16.vlgmr.msra.gmra.mxu1 %vm1789_vm2, %v4554_v39  ;;  %v4555_v41 = vpack.c.bf16 %v4550_v9, %v4549_v40 }
0x1664   : > { %v6964_v3 = vpop.eup %6963 }
0x1665   : > { %6393 = vmatprep.mubr.msk.bf16.mxu1 %vm1789_vm2, %v4555_v41  ;;  %v4551_v57 = vmul.f32 %v6964_v3, %v8823_v51 }
0x1668   : > { %v6966_v24 = vpop.eup %6965 }
0x1669   : > { %v4552_v59 = vmul.f32 %v6966_v24, %v8830_v6 }
0x166b   : > { %v4556_v1 = vpack.c.bf16 %v4552_v59, %v4551_v57 }
0x166d   : > { %6394 = vmatmul.mubr.msk.bf16.gmra.mxu1 %vm1789_vm2, %v4556_v1 }
0x166e   : > { %5011 = vmatprep.mubr.bf16.mxu1 %v7330_v56 }
0x1691   : > { %v6331_v58 = vpop.f32.mrf.mxu1 }
0x1692   : > { %3755 = vst.msk [vmem:[#allocation2 + $0x10] sm:$0xff] %vm1789_vm2, %v6331_v58 }
0x1693   : > { %v3722_v45 = vpop.f32.mrf.mxu1 }
0x1694   : > { %3753 = vst.msk [vmem:[#allocation2] sm:$0xff] %vm1789_vm2, %v3722_v45 }
0x1695   : > { %v6332_v22 = vpop.f32.mrf.mxu1 }
0x1696   : > { %3756 = vst.msk [vmem:[#allocation2 + $0x18] sm:$0xff] %vm1789_vm2, %v6332_v22 }
0x1697   : > { %v3725_v60 = vpop.f32.mrf.mxu1 }
0x1698   : > { %3754 = vst.msk [vmem:[#allocation2 + $0x8] sm:$0xff] %vm1789_vm2, %v3725_v60 }
0x1699   : > { %v6335_v51 = vpop.f32.mrf.mxu1 }
0x169a   : > { %3759 = vst.msk [vmem:[#allocation2 + $0x30] sm:$0xff] %vm1789_vm2, %v6335_v51 }
0x169b   : > { %v3738_v6 = vpop.f32.mrf.mxu1 }
0x169c   : > { %3757 = vst.msk [vmem:[#allocation2 + $0x20] sm:$0xff] %vm1789_vm2, %v3738_v6 }
0x169d   : > { %v6336_v48 = vpop.f32.mrf.mxu1 }
0x169e   : > { %3760 = vst.msk [vmem:[#allocation2 + $0x38] sm:$0xff] %vm1789_vm2, %v6336_v48 }
0x169f   : > { %v3741_v62 = vpop.f32.mrf.mxu1 }
0x16a0   : > { %3758 = vst.msk [vmem:[#allocation2 + $0x28] sm:$0xff] %vm1789_vm2, %v3741_v62 }
0x16d4   : > { %v6351_v26 = vpop.f32.mrf.mxu1 }
0x16d5   : > { %4043 = vrot.lane.b32.xlu0 %v6351_v26, %s7336_s6 }
0x16d6   : > { %v4000_v37 = vpop.f32.mrf.mxu1 }
0x16d8   : > { %v6352_v29 = vpop.f32.mrf.mxu1 }
0x16d9   : > { %4039 = vrot.lane.b32.xlu0 %v4000_v37, %s7336_s6 }
0x16da   : > { %v4003_v8 = vpop.f32.mrf.mxu1 }
0x16db   : > { %4041 = vrot.lane.b32.xlu1 %v4003_v8, %s7336_s6 }
0x16dc   : > { %v6355_v14 = vpop.f32.mrf.mxu1 }
0x16dd   : > { %4045 = vrot.lane.b32.xlu0 %v6352_v29, %s7336_s6 }
0x16de   : > { %v4016_v55 = vpop.f32.mrf.mxu1 }
0x16e0   : > { %v6356_v18 = vpop.f32.mrf.mxu1 }
0x16e1   : > { %4047 = vrot.lane.b32.xlu0 %v4016_v55, %s7336_s6 }
0x16e2   : > { %v4019_v31 = vpop.f32.mrf.mxu1 }
0x16e3   : > { %4049 = vrot.lane.b32.xlu1 %v4019_v31, %s7336_s6 }
0x16e7   : > { %v6371_v52 = vpop.f32.mrf.mxu1 }
0x16e8   : > { %4347 = vrot.lane.b32.xlu0 %v6371_v52, %s7337_s7  ;;  %v5800_v52 = vld [vmem:[#allocation6 + $0x6] ss:$0 sm:$0xff] }
0x16e9   : > { %v4304_v61 = vpop.f32.mrf.mxu1 }
0x16eb   : > { %v6372_v34 = vpop.f32.mrf.mxu1 }
0x16ec   : > { %4343 = vrot.lane.b32.xlu0 %v4304_v61, %s7337_s7  ;;  %4349 = vrot.lane.b32.xlu1 %v6372_v34, %s7337_s7 }
0x16ed   : > { %v4307_v4 = vpop.f32.mrf.mxu1 }
0x16ef   : > { %v6375_v0 = vpop.f32.mrf.mxu1 }
0x16f0   : > { %4345 = vrot.lane.b32.xlu0 %v4307_v4, %s7337_s7 }
0x16f1   : > { %v4320_v21 = vpop.f32.mrf.mxu1 }
0x16f3   : > { %v6376_v7 = vpop.f32.mrf.mxu1 }
0x16f5   : > { %v4323_v2 = vpop.f32.mrf.mxu1 }
0x1723   : > { %v6391_v53 = vpop.f32.mrf.mxu1 }
0x1724   : > { %4651 = vrot.lane.b32.xlu0 %v6391_v53, %s7338_s8 }
0x1725   : > { %v4608_v20 = vpop.f32.mrf.mxu1 }
0x1727   : > { %v6392_v63 = vpop.f32.mrf.mxu1 }
0x1728   : > { %4647 = vrot.lane.b32.xlu0 %v4608_v20, %s7338_s8  ;;  %4653 = vrot.lane.b32.xlu1 %v6392_v63, %s7338_s8 }
0x1729   : > { %v4611_v16 = vpop.f32.mrf.mxu1 }
0x172c   : > { %4051 = vrot.lane.b32.xlu0 %v6355_v14, %s7336_s6  ;;  %4649 = vrot.lane.b32.xlu1 %v4611_v16, %s7338_s8 }
0x172d   : > { %v6395_v15 = vpop.f32.mrf.mxu1 }
0x172f   : > { %v4624_v12 = vpop.f32.mrf.mxu1 }
0x1730   : > { %4351 = vrot.lane.b32.xlu0 %v4320_v21, %s7337_s7  ;;  %4053 = vrot.lane.b32.xlu1 %v6356_v18, %s7336_s6 }
0x1731   : > { %v6396_v25 = vpop.f32.mrf.mxu1 }
0x1733   : > { %v4627_v36 = vpop.f32.mrf.mxu1 }
0x1734   : > { %4355 = vrot.lane.b32.xlu0 %v6375_v0, %s7337_s7  ;;  %4353 = vrot.lane.b32.xlu1 %v4323_v2, %s7337_s7 }
0x1738   : > { %4357 = vrot.lane.b32.xlu1 %v6376_v7, %s7337_s7  ;;  %4655 = vrot.lane.b32.xlu0 %v4624_v12, %s7338_s8  ;;  %s5840_s7 = sshll.u32 %s7460_s1, 10  ;;  %s5472_s1 = scalar_lea.sflag [#allocation5], %s7636_s10 }
0x1739   : > { %s9246_s15 = scalar_lea.hbm %s9368_s13, %s5840_s7 }
0x173c   : > { %4659 = vrot.lane.b32.xlu0 %v6395_v15, %s7338_s8  ;;  %4657 = vrot.lane.b32.xlu1 %v4627_v36, %s7338_s8 }
0x1740   : > { %4661 = vrot.lane.b32.xlu1 %v6396_v25, %s7338_s8  ;;  %s5485_s8 = sshll.u32 %s9222_s24, 4  ;;  %s9250_s8 = int_to_ptr.vmem [resolvable:$true] %s5485_s8 }
0x1747   : > { %v4044_v17 = vpop.permute.xlu0 %4043 }
0x1748   : > { %4065 = vst.msk [vmem:[#allocation2 + $0x10] sm:$0xff] %vm2386_vm3, %v4044_v17 }
0x174b   : > { %v4040_v47 = vpop.permute.xlu0 %4039 }
0x174c   : > { %4063 = vst.msk [vmem:[#allocation2] sm:$0xff] %vm2386_vm3, %v4040_v47 }
0x174d   : > { %v4042_v44 = vpop.permute.xlu1 %4041 }
0x174e   : > { %4064 = vst.msk [vmem:[#allocation2 + $0x8] sm:$0xff] %vm2386_vm3, %v4042_v44 }
0x174f   : > { %v4046_v10 = vpop.permute.xlu0 %4045 }
0x1750   : > { %4066 = vst.msk [vmem:[#allocation2 + $0x18] sm:$0xff] %vm2386_vm3, %v4046_v10 }
0x1753   : > { %v4048_v11 = vpop.permute.xlu0 %4047 }
0x1754   : > { %4067 = vst.msk [vmem:[#allocation2 + $0x20] sm:$0xff] %vm2386_vm3, %v4048_v11 }
0x1755   : > { %v4050_v35 = vpop.permute.xlu1 %4049 }
0x1756   : > { %4068 = vst.msk [vmem:[#allocation2 + $0x28] sm:$0xff] %vm2386_vm3, %v4050_v35 }
0x175a   : > { %v4348_v13 = vpop.permute.xlu0 %4347 }
0x175b   : > { %4369 = vst.msk [vmem:[#allocation2 + $0x10] sm:$0xff] %vm2713_vm4, %v4348_v13 }
0x175e   : > { %v4344_v50 = vpop.permute.xlu0 %4343  ;;  %v4350_v5 = vpop.permute.xlu1 %4349 }
0x175f   : > { %4367 = vst.msk [vmem:[#allocation2] sm:$0xff] %vm2713_vm4, %v4344_v50  ;;  %4370 = vst.msk [vmem:[#allocation2 + $0x18] sm:$0xff] %vm2713_vm4, %v4350_v5 }
0x1762   : > { %v4346_v46 = vpop.permute.xlu0 %4345 }
0x1763   : > { %4368 = vst.msk [vmem:[#allocation2 + $0x8] sm:$0xff] %vm2713_vm4, %v4346_v46 }
0x1796   : > { %v4652_v19 = vpop.permute.xlu0 %4651 }
0x1797   : > { %4673 = vst.msk [vmem:[#allocation2 + $0x10] sm:$0xff] %vm3040_vm5, %v4652_v19 }
0x179a   : > { %v4648_v38 = vpop.permute.xlu0 %4647  ;;  %v4654_v39 = vpop.permute.xlu1 %4653 }
0x179b   : > { %4671 = vst.msk [vmem:[#allocation2] sm:$0xff] %vm3040_vm5, %v4648_v38  ;;  %4674 = vst.msk [vmem:[#allocation2 + $0x18] sm:$0xff] %vm3040_vm5, %v4654_v39 }
0x179e   : > { %v4052_v40 = vpop.permute.xlu0 %4051  ;;  %v4650_v9 = vpop.permute.xlu1 %4649  ;;  %v4681_v22 = vld [vmem:[#allocation2 + $0x10] sm:$0xff] }
0x179f   : > { %4069 = vst.msk [vmem:[#allocation2 + $0x30] sm:$0xff] %vm2386_vm3, %v4052_v40 }
0x17a0   : > { %4672 = vst.msk [vmem:[#allocation2 + $0x8] sm:$0xff] %vm3040_vm5, %v4650_v9 }
0x17a2   : > { %v4352_v41 = vpop.permute.xlu0 %4351  ;;  %v4054_v3 = vpop.permute.xlu1 %4053  ;;  %v4682_v24 = vld [vmem:[#allocation2 + $0x18] sm:$0xff]  ;;  %v4679_v1 = vld [vmem:[#allocation2] sm:$0xff] }
0x17a3   : > { %4371 = vst.msk [vmem:[#allocation2 + $0x20] sm:$0xff] %vm2713_vm4, %v4352_v41  ;;  %v4688_v60 = vpack.c.bf16 %v4682_v24, %v4681_v22 }
0x17a4   : > { %4070 = vst.msk [vmem:[#allocation2 + $0x38] sm:$0xff] %vm2386_vm3, %v4054_v3 }
0x17a6   : > { %v4356_v57 = vpop.permute.xlu0 %4355  ;;  %v4354_v59 = vpop.permute.xlu1 %4353 }
0x17a7   : > { %v4680_v58 = vld [vmem:[#allocation2 + $0x8] sm:$0xff]  ;;  %4373 = vst.msk [vmem:[#allocation2 + $0x30] sm:$0xff] %vm2713_vm4, %v4356_v57  ;;  %4372 = vst.msk [vmem:[#allocation2 + $0x28] sm:$0xff] %vm2713_vm4, %v4354_v59 }
0x17a8   : > { %v4687_v45 = vpack.c.bf16 %v4680_v58, %v4679_v1 }
0x17aa   : > { %6401 = vmatprep.mubr.msk.bf16.mxu0 %vm1386_vm1, %v4687_v45  ;;  %v4656_v51 = vpop.permute.xlu0 %4655  ;;  %v4358_v6 = vpop.permute.xlu1 %4357 }
0x17ab   : > { %6402 = vmatmul.mubr.msk.bf16.vlgmr.msra.gmra.mxu0 %vm1386_vm1, %v4688_v60  ;;  %4675 = vst.msk [vmem:[#allocation2 + $0x20] sm:$0xff] %vm3040_vm5, %v4656_v51 }
0x17ac   : > { %4374 = vst.msk [vmem:[#allocation2 + $0x38] sm:$0xff] %vm2713_vm4, %v4358_v6 }
0x17ae   : > { %v4660_v48 = vpop.permute.xlu0 %4659  ;;  %v4658_v62 = vpop.permute.xlu1 %4657 }
0x17af   : > { %4677 = vst.msk [vmem:[#allocation2 + $0x30] sm:$0xff] %vm3040_vm5, %v4660_v48  ;;  %4676 = vst.msk [vmem:[#allocation2 + $0x28] sm:$0xff] %vm3040_vm5, %v4658_v62 }
0x17b2   : > { %v4662_v26 = vpop.permute.xlu1 %4661  ;;  %v4683_v37 = vld [vmem:[#allocation2 + $0x20] sm:$0xff] }
0x17b3   : > { %4678 = vst.msk [vmem:[#allocation2 + $0x38] sm:$0xff] %vm3040_vm5, %v4662_v26 }
0x17b6   : > { %v4684_v29 = vld [vmem:[#allocation2 + $0x28] sm:$0xff]  ;;  %v4685_v14 = vld [vmem:[#allocation2 + $0x30] sm:$0xff] }
0x17b7   : > { %v4689_v8 = vpack.c.bf16 %v4684_v29, %v4683_v37 }
0x17b9   : > { %6405 = vmatprep.mubr.msk.bf16.mxu0 %vm1386_vm1, %v4689_v8 }
0x17ba   : > { %v4686_v55 = vld [vmem:[#allocation2 + $0x38] sm:$0xff] }
0x17bb   : > { %v4690_v18 = vpack.c.bf16 %v4686_v55, %v4685_v14 }
0x17bd   : > { %6406 = vmatmul.mubr.msk.bf16.gmra.mxu0 %vm1386_vm1, %v4690_v18 }
0x186b   : > { %v6403_v31 = vpop.f32.mrf.mxu0 }
0x186c   : > { %v4767_v34 = vadd.f32 %v6403_v31, %v5800_v52 }
0x186d   : > { %v4758_v61 = vpop.f32.mrf.mxu0 }
0x186e   : > { %v4759_v4 = vadd.f32 %v5800_v52, %v4758_v61  ;;  %v8952_v43 = vadd.f32 %v4767_v34, %v8375_v32 }
0x186f   : > { %v6404_v0 = vpop.f32.mrf.mxu0 }
0x1870   : > { %v8949_v21 = vadd.f32 %v4759_v4, %v8372_v49  ;;  %v4770_v2 = vadd.f32 %v6404_v0, %v5800_v52  ;;  %v4803_v16 = vsel %vm1386_vm1, %v8952_v43, 0.0 }
0x1871   : > { %v4761_v7 = vpop.f32.mrf.mxu0 }
0x1872   : > { %v4762_v53 = vadd.f32 %v5800_v52, %v4761_v7  ;;  %v4797_v27 = vsel %vm1386_vm1, %v8949_v21, 0.0  ;;  %v8960_v63 = vadd.f32 %v4770_v2, %v8383_v28 }
0x1873   : > { %4798 = vadd.xlane.f32.xlu0 %v4797_v27 }
0x1874   : > { %v8957_v20 = vadd.f32 %v4762_v53, %v8380_v23  ;;  %v4806_v32 = vsel %vm1386_vm1, %v8960_v63, 0.0 }
0x1876   : > { %v4800_v49 = vsel %vm1386_vm1, %v8957_v20, 0.0 }
0x1877   : > { %4801 = vadd.xlane.f32.xlu1 %v4800_v49  ;;  %4804 = vadd.xlane.f32.xlu0 %v4803_v16  ;;  %v6647_v49 = vld [vmem:[%s9310_s14 + $0x14] ss:$8 sps:$4 sm:$0xff]   ;;  %v6645_v16 = vld [vmem:[%s9310_s14 + $0x10] ss:$8 sps:$4 sm:$0xff]  }
0x1878   : > { %4991 = vmatprep.subr.bf16.mxu1 %v6647_v49 }
0x1879   : > { %4992 = vmatpush1.bf16.msra.mxu1 %v6645_v16 }
0x187b   : > { %4807 = vadd.xlane.f32.xlu0 %v4806_v32  ;;  %v6650_v32 = vld [vmem:[%s9310_s14 + $0x4] ss:$8 sps:$4 sm:$0xff]  }
0x187c   : > { %4993 = vmatprep.subr.bf16.mxu1 %v6650_v32 }
0x187d   : > { %v6407_v15 = vpop.f32.mrf.mxu0 }
0x187e   : > { %v4783_v25 = vadd.f32 %v6407_v15, %v5800_v52  ;;  %v6648_v15 = vld [vmem:[%s9310_s14] ss:$8 sps:$4 sm:$0xff]  }
0x187f   : > { %v4774_v12 = vpop.f32.mrf.mxu0  ;;  %4994 = vmatpush1.bf16.msra.mxu1 %v6648_v15 }
0x1880   : > { %v4775_v23 = vadd.f32 %v5800_v52, %v4774_v12  ;;  %v8972_v47 = vadd.f32 %v4783_v25, %v8395_v33 }
0x1881   : > { %v6408_v36 = vpop.f32.mrf.mxu0 }
0x1882   : > { %v8969_v28 = vadd.f32 %v4775_v23, %v8392_v42  ;;  %v4786_v44 = vadd.f32 %v6408_v36, %v5800_v52  ;;  %v4815_v50 = vsel %vm1386_vm1, %v8972_v47, 0.0 }
0x1883   : > { %v4777_v17 = vpop.f32.mrf.mxu0 }
0x1884   : > { %v4778_v10 = vadd.f32 %v5800_v52, %v4777_v17  ;;  %v4809_v11 = vsel %vm1386_vm1, %v8969_v28, 0.0  ;;  %v8980_v13 = vadd.f32 %v4786_v44, %v8403_v30 }
0x1885   : > { %4810 = vadd.xlane.f32.xlu1 %v4809_v11 }
0x1886   : > { %v8977_v35 = vadd.f32 %v4778_v10, %v8400_v54  ;;  %v4818_v33 = vsel %vm1386_vm1, %v8980_v13, 0.0 }
0x1888   : > { %v4812_v42 = vsel %vm1386_vm1, %v8977_v35, 0.0 }
0x1889   : > { %4813 = vadd.xlane.f32.xlu0 %v4812_v42  ;;  %4816 = vadd.xlane.f32.xlu1 %v4815_v50 }
0x188d   : > { %4819 = vadd.xlane.f32.xlu0 %v4818_v33 }
0x18fc   : > { %v4799_v5 = vpop.xlane.xlu0 %4798 }
0x18fd   : > { %v4821_v46 = vmul.f32 0.03125, %v4799_v5 }
0x18ff   : > { %v8989_v54 = vsub.f32 %v8949_v21, %v4821_v46 }
0x1900   : > { %v4805_v19 = vpop.xlane.xlu0 %4804  ;;  %v4802_v30 = vpop.xlane.xlu1 %4801 }
0x1901   : > { %v4823_v38 = vmul.f32 0.03125, %v4805_v19  ;;  %v4822_v39 = vmul.f32 0.03125, %v4802_v30  ;;  %v4837_v40 = vmul.f32 %v8989_v54, %v8989_v54 }
0x1903   : > { %v8994_v9 = vsub.f32 %v8952_v43, %v4823_v38  ;;  %v8997_v41 = vsub.f32 %v8957_v20, %v4822_v39  ;;  %v4845_v3 = vsel %vm1386_vm1, %v4837_v40, 0.0  ;;  %v5807_v38 = vld [vmem:[#allocation6 + $0x7] ss:$0 sm:$0xff] }
0x1904   : > { %v4808_v24 = vpop.xlane.xlu0 %4807  ;;  %4846 = vadd.xlane.f32.xlu1 %v4845_v3 }
0x1905   : > { %v4824_v57 = vmul.f32 0.03125, %v4808_v24  ;;  %v4839_v59 = vmul.f32 %v8994_v9, %v8994_v9  ;;  %v4838_v1 = vmul.f32 %v8997_v41, %v8997_v41 }
0x1907   : > { %v9005_v58 = vsub.f32 %v8960_v63, %v4824_v57  ;;  %v4851_v45 = vsel %vm1386_vm1, %v4839_v59, 0.0  ;;  %v4848_v22 = vsel %vm1386_vm1, %v4838_v1, 0.0 }
0x1908   : > { %4852 = vadd.xlane.f32.xlu1 %v4851_v45  ;;  %4849 = vadd.xlane.f32.xlu0 %v4848_v22 }
0x1909   : > { %v4840_v60 = vmul.f32 %v9005_v58, %v9005_v58 }
0x190b   : > { %v4854_v51 = vsel %vm1386_vm1, %v4840_v60, 0.0 }
0x190c   : > { %4855 = vadd.xlane.f32.xlu0 %v4854_v51  ;;  %v5808_v51 = vld [vmem:[#allocation6 + $0x8] ss:$0 sm:$0xff] }
0x190e   : > { %v4811_v6 = vpop.xlane.xlu1 %4810 }
0x190f   : > { %v4825_v48 = vmul.f32 0.03125, %v4811_v6 }
0x1911   : > { %v9013_v62 = vsub.f32 %v8969_v28, %v4825_v48 }
0x1912   : > { %v4814_v26 = vpop.xlane.xlu0 %4813  ;;  %v4817_v37 = vpop.xlane.xlu1 %4816 }
0x1913   : > { %v4826_v29 = vmul.f32 0.03125, %v4814_v26  ;;  %v4827_v8 = vmul.f32 0.03125, %v4817_v37  ;;  %v4841_v14 = vmul.f32 %v9013_v62, %v9013_v62 }
0x1915   : > { %v9018_v55 = vsub.f32 %v8977_v35, %v4826_v29  ;;  %v9021_v18 = vsub.f32 %v8972_v47, %v4827_v8  ;;  %v4857_v31 = vsel %vm1386_vm1, %v4841_v14, 0.0 }
0x1916   : > { %v4820_v52 = vpop.xlane.xlu0 %4819  ;;  %4858 = vadd.xlane.f32.xlu1 %v4857_v31 }
0x1917   : > { %v4828_v61 = vmul.f32 0.03125, %v4820_v52  ;;  %v4842_v34 = vmul.f32 %v9018_v55, %v9018_v55  ;;  %v4843_v4 = vmul.f32 %v9021_v18, %v9021_v18 }
0x1919   : > { %v9029_v0 = vsub.f32 %v8980_v13, %v4828_v61  ;;  %v4860_v7 = vsel %vm1386_vm1, %v4842_v34, 0.0  ;;  %v4863_v2 = vsel %vm1386_vm1, %v4843_v4, 0.0 }
0x191a   : > { %4861 = vadd.xlane.f32.xlu0 %v4860_v7  ;;  %4864 = vadd.xlane.f32.xlu1 %v4863_v2 }
0x191b   : > { %v4844_v53 = vmul.f32 %v9029_v0, %v9029_v0 }
0x191d   : > { %v4866_v27 = vsel %vm1386_vm1, %v4844_v53, 0.0 }
0x191e   : > { %4867 = vadd.xlane.f32.xlu0 %v4866_v27 }
0x198d   : > { %v4847_v12 = vpop.xlane.xlu1 %4846 }
0x198e   : > { %v4869_v25 = vmul.f32 0.03125, %v4847_v12 }
0x1990   : > { %v4877_v23 = vadd.f32 1e-05, %v4869_v25 }
0x1991   : > { %v4850_v36 = vpop.xlane.xlu0 %4849  ;;  %v4853_v17 = vpop.xlane.xlu1 %4852 }
0x1992   : > { %6967 = vrsqrt.f32 %v4877_v23  ;;  %v4870_v44 = vmul.f32 0.03125, %v4850_v36  ;;  %v4871_v10 = vmul.f32 0.03125, %v4853_v17 }
0x1994   : > { %v4878_v11 = vadd.f32 1e-05, %v4870_v44  ;;  %v4879_v42 = vadd.f32 1e-05, %v4871_v10 }
0x1995   : > { %v4856_v50 = vpop.xlane.xlu0 %4855 }
0x1996   : > { %6969 = vrsqrt.f32 %v4878_v11  ;;  %v4872_v33 = vmul.f32 0.03125, %v4856_v50  ;;  %v6654_v50 = vld [vmem:[%s9312_s16 + $0x20] sm:$0xff]  }
0x1997   : > { %6971 = vrsqrt.f32 %v4879_v42 }
0x1998   : > { %v4880_v5 = vadd.f32 1e-05, %v4872_v33  ;;  %v6655_v33 = vld [vmem:[%s9312_s16 + $0x18] sm:$0xff]  }
0x199a   : > { %6973 = vrsqrt.f32 %v4880_v5  ;;  %v6656_v5 = vld [vmem:[%s9312_s16 + $0x10] sm:$0xff]  }
0x199f   : > { %v6968_v46 = vpop.eup %6967  ;;  %v4859_v30 = vpop.xlane.xlu1 %4858 }
0x19a0   : > { %v4893_v19 = vmul.f32 %v6968_v46, %v8989_v54  ;;  %v4873_v39 = vmul.f32 0.03125, %v4859_v30  ;;  %v6657_v46 = vld [vmem:[%s9312_s16 + $0x8] sm:$0xff]   ;;  %v4937_v30 = vlaneseq }
0x19a2   : > { %v4881_v3 = vadd.f32 1e-05, %v4873_v39  ;;  %v4906_v24 = vmul.f32 %v5807_v38, %v4893_v19  ;;  %v6658_v19 = vld [vmem:[%s9312_s16] sm:$0xff]  }
0x19a3   : > { %v6970_v40 = vpop.eup %6969  ;;  %v4862_v59 = vpop.xlane.xlu0 %4861 }
0x19a4   : > { %v4894_v57 = vmul.f32 %v6970_v40, %v8997_v41  ;;  %v4865_v1 = vpop.xlane.xlu1 %4864  ;;  %v6972_v45 = vpop.eup %6971  ;;  %6975 = vrsqrt.f32 %v4881_v3  ;;  %v4874_v22 = vmul.f32 0.03125, %v4862_v59  ;;  %v4919_v29 = vadd.f32 %v5808_v51, %v4906_v24  ;;  %v4935_v40 = vld [vmem:[%s9366_s17] sm:$0x3]  ;;  %s7342_s17 = smov [#allocation18]  }
0x19a5   : > { %v4875_v60 = vmul.f32 0.03125, %v4865_v1  ;;  %v4895_v14 = vmul.f32 %v6972_v45, %v8994_v9  ;;  %s7239_s0 = sshll.u32 %s7342_s17, 4  ;;  %s7240_s0 = int_to_ptr.vmem [resolvable:$false] %s7239_s0 }
0x19a6   : > { %v4907_v6 = vmul.f32 %v5807_v38, %v4894_v57  ;;  %v4882_v26 = vadd.f32 1e-05, %v4874_v22  ;;  %s7241_s21 = scalar_lea.vmem %s7240_s0, 2048  ;;  %p7242_p1 = scmp.lt.s32.totalorder %s9250_s8, %s7240_s0 }
0x19a7   : > { %v6974_v48 = vpop.eup %6973  ;;  %v4883_v37 = vadd.f32 1e-05, %v4875_v60  ;;  %v4868_v54 = vpop.xlane.xlu0 %4867  ;;  %v4908_v4 = vmul.f32 %v5807_v38, %v4895_v14 }
0x19a8   : > { %v4920_v8 = vadd.f32 %v5808_v51, %v4907_v6  ;;  %v4896_v31 = vmul.f32 %v6974_v48, %v9005_v58  ;;  %6977 = vrsqrt.f32 %v4882_v26  ;;  %v4876_v41 = vmul.f32 0.03125, %v4868_v54 }
0x19a9   : > { %6979 = vrsqrt.f32 %v4883_v37  ;;  %v4921_v2 = vadd.f32 %v5808_v51, %v4908_v4 }
0x19aa   : > { %v4927_v52 = vpack.c.bf16 %v4920_v8, %v4919_v29  ;;  %v4909_v61 = vmul.f32 %v5807_v38, %v4896_v31  ;;  %v4884_v34 = vadd.f32 1e-05, %v4876_v41 }
0x19ac   : > { %5813 = vmatmul.mubr.msk.bf16.vlgmr.msra.gmra.mxu1 %vm1386_vm1, %v4927_v52  ;;  %6981 = vrsqrt.f32 %v4884_v34  ;;  %v4922_v7 = vadd.f32 %v5808_v51, %v4909_v61 }
0x19ad   : > { %5021 = vmatprep.mubr.bf16.mxu1 %v7330_v56 }
0x19ae   : > { %v4928_v27 = vpack.c.bf16 %v4922_v7, %v4921_v2 }
0x19b1   : > { %v6976_v53 = vpop.eup %6975 }
0x19b2   : > { %v4897_v9 = vmul.f32 %v6976_v53, %v9013_v62 }
0x19b4   : > { %5814 = vmatmul.mubr.msk.bf16.gmra.mxu1 %vm1386_vm1, %v4928_v27  ;;  %v4910_v16 = vmul.f32 %v5807_v38, %v4897_v9 }
0x19b5   : > { %5031 = vmatprep.mubr.bf16.mxu1 %v7330_v56  ;;  %v6978_v58 = vpop.eup %6977 }
0x19b6   : > { %v4898_v49 = vmul.f32 %v6978_v58, %v9018_v55  ;;  %v6980_v32 = vpop.eup %6979  ;;  %v4923_v36 = vadd.f32 %v5808_v51, %v4910_v16 }
0x19b7   : > { %v4899_v25 = vmul.f32 %v6980_v32, %v9021_v18  ;;  %v6651_v18 = vld [vmem:[%s9312_s16 + $0x38] sm:$0xff]  }
0x19b8   : > { %v4911_v15 = vmul.f32 %v5807_v38, %v4898_v49  ;;  %6409 = vmatprep.subr.bf16.mxu0 %v6651_v18 }
0x19b9   : > { %v6982_v12 = vpop.eup %6981  ;;  %v4912_v62 = vmul.f32 %v5807_v38, %v4899_v25  ;;  %6410 = vmatpush3.bf16.msra.mxu0 %v6651_v18 }
0x19ba   : > { %v4900_v23 = vmul.f32 %v6982_v12, %v9029_v0  ;;  %v4924_v17 = vadd.f32 %v5808_v51, %v4911_v15  ;;  %v6652_v0 = vld [vmem:[%s9312_s16 + $0x30] sm:$0xff]  }
0x19bb   : > { %v4925_v42 = vadd.f32 %v5808_v51, %v4912_v62  ;;  %6411 = vmatprep.subr.bf16.mxu0 %v6652_v0 }
0x19bc   : > { %v4929_v44 = vpack.c.bf16 %v4924_v17, %v4923_v36  ;;  %v4913_v10 = vmul.f32 %v5807_v38, %v4900_v23  ;;  %v4938_v38 = vshrl.u32 %v4937_v30, 7 }
0x19bd   : > { %6412 = vmatpush3.bf16.msra.mxu0 %v6652_v0 }
0x19be   : > { %5815 = vmatmul.mubr.msk.bf16.gmra.mxu1 %vm1386_vm1, %v4929_v44  ;;  %v4926_v11 = vadd.f32 %v5808_v51, %v4913_v10  ;;  %v4943_v39 = vsub.s32 1, %v4938_v38 }
0x19bf   : > { %5041 = vmatprep.mubr.bf16.mxu1 %v7330_v56  ;;  %v6653_v56 = vld [vmem:[%s9312_s16 + $0x28] sm:$0xff]  }
0x19c0   : > { %v4930_v55 = vpack.c.bf16 %v4926_v11, %v4925_v42  ;;  %6413 = vmatprep.subr.bf16.mxu0 %v6653_v56  ;;  %v9090_v3 = vrot.slane %v4935_v40, %v4943_v39  ;;  %v4939_v11 = vsub.s32 0, %v4938_v38 }
0x19c1   : > { %6414 = vmatpush3.bf16.msra.mxu0 %v6653_v56 }
0x19c2   : > { %6415 = vmatprep.subr.bf16.mxu0 %v6654_v50 }
0x19c5   : > { %6416 = vmatpush3.bf16.msra.mxu0 %v6654_v50 }
0x19c6   : > { %5816 = vmatmul.mubr.msk.bf16.gmra.mxu1 %vm1386_vm1, %v4930_v55  ;;  %6417 = vmatprep.subr.bf16.mxu0 %v6655_v33 }
0x19c9   : > { %6418 = vmatpush3.bf16.msra.mxu0 %v6655_v33 }
0x19ca   : > { %6419 = vmatprep.subr.bf16.mxu0 %v6656_v5 }
0x19cd   : > { %6420 = vmatpush3.bf16.msra.mxu0 %v6656_v5 }
0x19ce   : > { %6421 = vmatprep.subr.bf16.mxu0 %v6657_v46 }
0x19d1   : > { %6422 = vmatpush3.bf16.msra.mxu0 %v6657_v46 }
0x19d2   : > { %6423 = vmatprep.subr.bf16.mxu0 %v6658_v19 }
0x19d5   : > { %6424 = vmatpush3.bf16.msra.mxu0 %v6658_v19  ;;  %v9135_v19 = vrot.slane %v4935_v40, %v4939_v11 }
0x1a6c   : > { %v9092_v24 = vpop.f32.mrf.mxu1 }
0x1a6d   : > { %v5014_v40 = vadd.f32 %v9092_v24, %v9135_v19 }
0x1a6e   : > { %v5015_v57 = vpop.f32.mrf.mxu1 }
0x1a6f   : > { %v5016_v59 = vadd.f32 %v5015_v57, %v9090_v3 }
0x1a70   : > { %v9095_v1 = vpop.f32.mrf.mxu1 }
0x1a71   : > { %v5060_v45 = vmul.f32 0.044715, %v5016_v59  ;;  %v5052_v38 = vmul.f32 0.5, %v5016_v59 }
0x1a72   : > { %v5019_v22 = vpop.f32.mrf.mxu1 }
0x1a73   : > { %v5068_v60 = vmul.f32 %v5060_v45, %v5016_v59  ;;  %v5020_v51 = vadd.f32 %v5019_v22, %v9090_v3 }
0x1a74   : > { %v9098_v6 = vpop.f32.mrf.mxu1 }
0x1a75   : > { %v5076_v48 = vmul.f32 %v5068_v60, %v5016_v59  ;;  %v5061_v26 = vmul.f32 0.044715, %v5020_v51 }
0x1a76   : > { %v5025_v37 = vpop.f32.mrf.mxu1 }
0x1a77   : > { %v5084_v54 = vadd.f32 %v5076_v48, %v5016_v59  ;;  %v5069_v29 = vmul.f32 %v5061_v26, %v5020_v51  ;;  %v9101_v8 = vadd.f32 %v5025_v37, %v9090_v3  ;;  %v5053_v48 = vmul.f32 0.5, %v5020_v51 }
0x1a78   : > { %v9103_v14 = vpop.f32.mrf.mxu1  ;;  %v5018_v59 = vadd.f32 %v9095_v1, %v9135_v19 }
0x1a79   : > { %v5092_v31 = vmul.f32 0.7978846, %v5084_v54  ;;  %v5077_v41 = vmul.f32 %v5069_v29, %v5020_v51  ;;  %v5062_v52 = vmul.f32 0.044715, %v9101_v8 }
0x1a7a   : > { %v5029_v61 = vpop.f32.mrf.mxu1 }
0x1a7b   : > { %v5085_v34 = vadd.f32 %v5077_v41, %v5020_v51  ;;  %v5070_v4 = vmul.f32 %v5062_v52, %v9101_v8  ;;  %v9108_v7 = vadd.f32 %v5029_v61, %v9090_v3  ;;  %6983 = vtanh.f32 %v5092_v31 }
0x1a7d   : > { %v5093_v2 = vmul.f32 0.7978846, %v5085_v34  ;;  %v5078_v53 = vmul.f32 %v5070_v4, %v9101_v8  ;;  %v5063_v27 = vmul.f32 0.044715, %v9108_v7  ;;  %v5055_v1 = vmul.f32 0.5, %v9108_v7 }
0x1a7e   : > { %v9114_v49 = vpop.f32.mrf.mxu1 }
0x1a7f   : > { %v5086_v9 = vadd.f32 %v5078_v53, %v9101_v8  ;;  %v5071_v58 = vmul.f32 %v5063_v27, %v9108_v7  ;;  %6985 = vtanh.f32 %v5093_v2 }
0x1a80   : > { %v5035_v15 = vpop.f32.mrf.mxu1 }
0x1a81   : > { %v5094_v16 = vmul.f32 0.7978846, %v5086_v9  ;;  %v5079_v32 = vmul.f32 %v5071_v58, %v9108_v7  ;;  %v9118_v12 = vadd.f32 %v5035_v15, %v9090_v3 }
0x1a82   : > { %v9121_v23 = vpop.f32.mrf.mxu1 }
0x1a83   : > { %6987 = vtanh.f32 %v5094_v16  ;;  %v5087_v25 = vadd.f32 %v5079_v32, %v9108_v7  ;;  %v5064_v36 = vmul.f32 0.044715, %v9118_v12  ;;  %v5056_v7 = vmul.f32 0.5, %v9118_v12 }
0x1a84   : > { %v5039_v44 = vpop.f32.mrf.mxu1 }
0x1a85   : > { %v5095_v17 = vmul.f32 0.7978846, %v5087_v25  ;;  %v5072_v10 = vmul.f32 %v5064_v36, %v9118_v12  ;;  %v9126_v62 = vadd.f32 %v5039_v44, %v9090_v3  ;;  %v5028_v44 = vadd.f32 %v9103_v14, %v9135_v19 }
0x1a86   : > { %v9128_v42 = vpop.f32.mrf.mxu1  ;;  %v5038_v14 = vadd.f32 %v9121_v23, %v9135_v19 }
0x1a87   : > { %6989 = vtanh.f32 %v5095_v17  ;;  %v5080_v18 = vmul.f32 %v5072_v10, %v9118_v12  ;;  %v5065_v0 = vmul.f32 0.044715, %v9126_v62  ;;  %v5024_v17 = vadd.f32 %v9098_v6, %v9135_v19 }
0x1a88   : > { %v6984_v55 = vpop.eup %6983  ;;  %v5045_v56 = vpop.f32.mrf.mxu1  ;;  %v5034_v6 = vadd.f32 %v9114_v49, %v9135_v19 }
0x1a89   : > { %v5108_v50 = vadd.f32 1.0, %v6984_v55  ;;  %v5088_v33 = vadd.f32 %v5080_v18, %v9118_v12  ;;  %v5073_v5 = vmul.f32 %v5065_v0, %v9126_v62  ;;  %v5046_v46 = vadd.f32 %v5045_v56, %v9090_v3 }
0x1a8a   : > { %v9137_v30 = vpop.f32.mrf.mxu1 }
0x1a8b   : > { %v5096_v57 = vmul.f32 0.7978846, %v5088_v33  ;;  %v5081_v45 = vmul.f32 %v5073_v5, %v9126_v62  ;;  %v5066_v22 = vmul.f32 0.044715, %v5046_v46  ;;  %v5116_v37 = vmul.f32 %v5108_v50, %v5052_v38 }
0x1a8c   : > { %v6986_v39 = vpop.eup %6985  ;;  %v5049_v60 = vpop.f32.mrf.mxu1  ;;  %v5057_v33 = vmul.f32 0.5, %v9126_v62  ;;  %v5048_v49 = vadd.f32 %v9137_v30, %v9135_v19  ;;  %v5293_v30 = vld [vmem:[%s9365_s26 + $0x18] sm:$0xff] }
0x1a8d   : > { %v5109_v26 = vadd.f32 1.0, %v6986_v39  ;;  %v5089_v54 = vadd.f32 %v5081_v45, %v9126_v62  ;;  %v5074_v29 = vmul.f32 %v5066_v22, %v5046_v46  ;;  %v5050_v31 = vadd.f32 %v5049_v60, %v9090_v3 }
0x1a8e   : > { %6991 = vtanh.f32 %v5096_v57  ;;  %v5124_v2 = vmul.f32 %v5116_v37, %v5014_v40  ;;  %v5054_v3 = vmul.f32 0.5, %v9101_v8 }
0x1a8f   : > { %v5117_v41 = vmul.f32 %v5109_v26, %v5053_v48  ;;  %v5097_v61 = vmul.f32 0.7978846, %v5089_v54  ;;  %v5082_v34 = vmul.f32 %v5074_v29, %v5046_v46  ;;  %v5067_v4 = vmul.f32 0.044715, %v5050_v31 }
0x1a90   : > { %v6988_v52 = vpop.eup %6987  ;;  %v5058_v48 = vmul.f32 0.5, %v5046_v46  ;;  %v5059_v12 = vmul.f32 0.5, %v5050_v31  ;;  %v5044_v29 = vadd.f32 %v9128_v42, %v9135_v19  ;;  %v5291_v42 = vld [vmem:[%s9365_s26 + $0x8] sm:$0xff]  ;;  %v5292_v19 = vld [vmem:[%s9365_s26 + $0x10] sm:$0xff] }
0x1a91   : > { %v5110_v51 = vadd.f32 1.0, %v6988_v52  ;;  %v5125_v53 = vmul.f32 %v5117_v41, %v5018_v59  ;;  %v5090_v27 = vadd.f32 %v5082_v34, %v5046_v46  ;;  %v5075_v9 = vmul.f32 %v5067_v4, %v5050_v31  ;;  %v6659_v46 = vld [vmem:[%s9367_s2] sm:$0xff]   ;;  %v5295_v34 = vld [vmem:[%s9365_s26 + $0x28] sm:$0xff]  ;;  %v5296_v4 = vld [vmem:[%s9365_s26 + $0x30] sm:$0xff] }
0x1a92   : > { %6993 = vtanh.f32 %v5097_v61  ;;  %6441 = vmatprep.mubr.msk.bf16.mxu1 %vm1386_vm1, %v6659_v46  ;;  %v7341_v52 = vmov 2   ;;  %v5294_v61 = vld [vmem:[%s9365_s26 + $0x20] sm:$0xff] }
0x1a93   : > { %v5132_v58 = vpack.c.bf16 %v5125_v53, %v5124_v2  ;;  %v5098_v32 = vmul.f32 0.7978846, %v5090_v27  ;;  %v5083_v24 = vmul.f32 %v5075_v9, %v5050_v31  ;;  %v5118_v15 = vmul.f32 %v5110_v51, %v5054_v3  ;;  %6625 = vset.pattern.permute.xlu1 %v7341_v52  ;;  %6626 = vset.pattern.permute.xlu0 %v7341_v52  ;;  %v5297_v51 = vld [vmem:[%s9365_s26 + $0x38] sm:$0xff] }
0x1a94   : > { %v6990_v16 = vpop.eup %6989  ;;  %5305 = vperm.xlu0 %6626, %v5291_v42  }
0x1a95   : > { %v5111_v25 = vadd.f32 1.0, %v6990_v16  ;;  %6425 = vmatprep.mubr.bf16.mxu0 %v5132_v58  ;;  %6995 = vtanh.f32 %v5098_v32  ;;  %v5091_v36 = vadd.f32 %v5083_v24, %v5050_v31  ;;  %v5126_v8 = vmul.f32 %v5118_v15, %v5024_v17  ;;  %v5290_v31 = vld [vmem:[%s9365_s26] sm:$0xff]  ;;  %v5817_v58 = vld [vmem:[#allocation6 + $0x9] ss:$0 sm:$0xff] }
0x1a96   : > { %5300 = vperm.xlu1 %6625, %v5290_v31   ;;  %v5448_v31 = vld [vmem:[%s7667_s20 + $0x8] sm:$0xff] }
0x1a97   : > { %v5119_v10 = vmul.f32 %v5111_v25, %v5055_v1  ;;  %v5099_v11 = vmul.f32 0.7978846, %v5091_v36 }
0x1a99   : > { %v5127_v55 = vmul.f32 %v5119_v10, %v5028_v44  ;;  %6997 = vtanh.f32 %v5099_v11 }
0x1a9a   : > { %5310 = vperm.xlu1 %6625, %v5292_v19  }
0x1a9b   : > { %v6992_v18 = vpop.eup %6991  ;;  %v5133_v0 = vpack.c.bf16 %v5127_v55, %v5126_v8 }
0x1a9c   : > { %v5112_v56 = vadd.f32 1.0, %v6992_v18 }
0x1a9d   : > { %6426 = vmatmul.mubr.bf16.vlgmr.msra.gmra.mxu0 %v5133_v0 }
0x1a9e   : > { %v5120_v38 = vmul.f32 %v5112_v56, %v5056_v7  ;;  %5315 = vperm.xlu1 %6625, %v5293_v30   ;;  %v5453_v30 = vld [vmem:[%s7667_s20 + $0x30] sm:$0xff] }
0x1a9f   : > { %v6994_v50 = vpop.eup %6993 }
0x1aa0   : > { %v5113_v5 = vadd.f32 1.0, %v6994_v50  ;;  %v5128_v45 = vmul.f32 %v5120_v38, %v5034_v6 }
0x1aa2   : > { %v5121_v39 = vmul.f32 %v5113_v5, %v5057_v33  ;;  %v6996_v57 = vpop.eup %6995  ;;  %5320 = vperm.xlu1 %6625, %v5294_v61  }
0x1aa3   : > { %v5114_v60 = vadd.f32 1.0, %v6996_v57 }
0x1aa4   : > { %v5129_v22 = vmul.f32 %v5121_v39, %v5038_v14 }
0x1aa5   : > { %v5122_v62 = vmul.f32 %v5114_v60, %v5058_v48  ;;  %v5449_v48 = vld [vmem:[%s7667_s20 + $0x10] sm:$0xff] }
0x1aa6   : > { %v5134_v26 = vpack.c.bf16 %v5129_v22, %v5128_v45  ;;  %v6998_v37 = vpop.eup %6997  ;;  %5325 = vperm.xlu1 %6625, %v5295_v34  }
0x1aa7   : > { %v5115_v54 = vadd.f32 1.0, %v6998_v37  ;;  %v5130_v23 = vmul.f32 %v5122_v62, %v5044_v29 }
0x1aa8   : > { %6429 = vmatprep.mubr.bf16.mxu0 %v5134_v26 }
0x1aa9   : > { %v5123_v40 = vmul.f32 %v5115_v54, %v5059_v12  ;;  %v5447_v12 = vld [vmem:[%s7667_s20] sm:$0xff] }
0x1aaa   : > { %5330 = vperm.xlu1 %6625, %v5296_v4  }
0x1aab   : > { %v5131_v59 = vmul.f32 %v5123_v40, %v5048_v49  ;;  %v5450_v49 = vld [vmem:[%s7667_s20 + $0x18] sm:$0xff] }
0x1aad   : > { %v5135_v41 = vpack.c.bf16 %v5131_v59, %v5130_v23 }
0x1aae   : > { %5335 = vperm.xlu1 %6625, %v5297_v51   ;;  %v5451_v51 = vld [vmem:[%s7667_s20 + $0x20] sm:$0xff] }
0x1aaf   : > { %6430 = vmatmul.mubr.bf16.gmra.mxu0 %v5135_v41 }
0x1b0f   : > { %v5306_v40 = vpop.permute.xlu0 %5305 }
0x1b11   : > { %v5301_v14 = vpop.permute.xlu1 %5300 }
0x1b15   : > { %v5311_v39 = vpop.permute.xlu1 %5310 }
0x1b19   : > { %v5316_v57 = vpop.permute.xlu1 %5315 }
0x1b1d   : > { %v5321_v45 = vpop.permute.xlu1 %5320 }
0x1b21   : > { %v5326_v22 = vpop.permute.xlu1 %5325 }
0x1b25   : > { %v5331_v41 = vpop.permute.xlu1 %5330 }
0x1b5d   : > { %v6427_v2 = vpop.f32.mrf.mxu0 }
0x1b5e   : > { %v5248_v56 = vadd.f32 %v6427_v2, %v5817_v58 }
0x1b5f   : > { %v5239_v53 = vpop.f32.mrf.mxu0 }
0x1b61   : > { %v6428_v27 = vpop.f32.mrf.mxu0 }
0x1b62   : > { %v5251_v55 = vadd.f32 %v6428_v27, %v5817_v58  ;;  %v5336_v27 = vpop.permute.xlu1 %5335 }
0x1b63   : > { %v5242_v9 = vpop.f32.mrf.mxu0 }
0x1b64   : > { %v5243_v50 = vadd.f32 %v5817_v58, %v5242_v9 }
0x1b66   : > { %v5271_v33 = vadd.f32 %v5243_v50, %v8957_v20  ;;  %v6662_v20 = vld [vmem:[%s9367_s2 + $0x18] sm:$0xff]  }
0x1b6f   : > { %v6431_v3 = vpop.f32.mrf.mxu0 }
0x1b70   : > { %v5264_v32 = vadd.f32 %v6431_v3, %v5817_v58  ;;  %v5454_v3 = vld [vmem:[%s7667_s20 + $0x38] sm:$0xff] }
0x1b71   : > { %v5255_v16 = vpop.f32.mrf.mxu0 }
0x1b72   : > { %v5256_v15 = vadd.f32 %v5817_v58, %v5255_v16  ;;  %v5276_v36 = vadd.f32 %v5264_v32, %v8972_v47  ;;  %v5273_v47 = vadd.f32 %v5251_v55, %v8960_v63  ;;  %v6660_v63 = vld [vmem:[%s9367_s2 + $0x8] sm:$0xff]  }
0x1b73   : > { %v6432_v24 = vpop.f32.mrf.mxu0 }
0x1b74   : > { %v5267_v1 = vadd.f32 %v6432_v24, %v5817_v58  ;;  %v5274_v10 = vadd.f32 %v5256_v15, %v8969_v28  ;;  %v5452_v24 = vld [vmem:[%s7667_s20 + $0x28] sm:$0xff]  ;;  %s7235_s20 = scalar_lea.vmem %s9250_s8, 1024 }
0x1b75   : > { %v5258_v25 = vpop.f32.mrf.mxu0  ;;  %p7236_p5 = scmp.ne.s32.totalorder %s9250_s8, %s7235_s20  ;;  %p7243_p3 = scmp.lt.s32.totalorder %s7241_s21, %s7235_s20 }
0x1b76   : > { %v5277_v17 = vadd.f32 %v5267_v1, %v8980_v13  ;;  %v5259_v44 = vadd.f32 %v5817_v58, %v5258_v25  ;;  %v5272_v13 = vadd.f32 %v5248_v56, %v8952_v43 }
0x1b77   : > { %p7237_p12 = pnand %p7236_p5, %p9369_p9  ;;  %p7244_p4 = por %p7243_p3, %p7242_p1 }
0x1b78   : > { %v5289_v11 = vpack.c.bf16 %v5277_v17, %v5276_v36  ;;  %v5275_v8 = vadd.f32 %v5259_v44, %v8977_v35  ;;  %v5287_v7 = vpack.c.bf16 %v5273_v47, %v5272_v13  ;;  %v5240_v35 = vadd.f32 %v5817_v58, %v5239_v53 }
0x1b79   : > { %p7238_p13 = pneg %p7237_p12 }
0x1b7a   : > { %v5288_v18 = vpack.c.bf16 %v5275_v8, %v5274_v10  ;;  %6473 = vmatprep.subr.msk.bf16.mxu1 %vm1386_vm1, %v5289_v11  ;;  %v5380_v0 = vsel %vm1386_vm1, %v5289_v11, 0  ;;  %v5270_v5 = vadd.f32 %v5240_v35, %v8949_v21  ;;  %v5374_v6 = vsel %vm1386_vm1, %v5287_v7, 0  ;;  %v6661_v21 = vld [vmem:[%s9367_s2 + $0x10] sm:$0xff]  }
0x1b7b   : > { %6434 = vmatpush3.bf16.xpose.msra.mxu1 %v5380_v0  ;;  %p7245_p6 = pnand %p7244_p4, %p7238_p13 }
0x1b7c   : > { %6474 = vmatprep.subr.msk.bf16.mxu1 %vm1386_vm1, %v5288_v18  ;;  %v5377_v28 = vsel %vm1386_vm1, %v5288_v18, 0  ;;  %v5286_v38 = vpack.c.bf16 %v5271_v33, %v5270_v5 }
0x1b7e   : > { %v5371_v43 = vsel %vm1386_vm1, %v5286_v38, 0 }
0x1b83   : > { %6436 = vmatpush3.bf16.xpose.msra.mxu1 %v5377_v28 }
0x1b84   : > { %6475 = vmatprep.subr.msk.bf16.mxu1 %vm1386_vm1, %v5287_v7 }
0x1b8b   : > { %6438 = vmatpush3.bf16.xpose.msra.mxu1 %v5374_v6 }
0x1b8c   : > { %6476 = vmatprep.subr.msk.bf16.mxu1 %vm1386_vm1, %v5286_v38 }
0x1b93   : > { %6440 = vmatpush3.bf16.xpose.msra.mxu1 %v5371_v43 }
0x1b9a   : > { %6442 = vmatmul.mubr.msk.bf16.vlgmr.msra.gmra.mxu1 %vm1386_vm1, %v6660_v63 }
0x1b9b   : > { %6445 = vmatprep.mubr.msk.bf16.mxu1 %vm1386_vm1, %v6661_v21 }
0x1ba2   : > { %6446 = vmatmul.mubr.msk.bf16.gmra.mxu1 %vm1386_vm1, %v6662_v20 }
0x1c5a   : > { %v6443_v60 = vpop.f32.mrf.mxu1 }
0x1c5b   : > { %v5425_v26 = vadd.f32 %v6443_v60, %v5311_v39 }
0x1c5c   : > { %v5416_v37 = vpop.f32.mrf.mxu1 }
0x1c5d   : > { %v5457_v54 = vadd.f32 %v5449_v48, %v5425_v26  ;;  %v5417_v62 = vadd.f32 %v5416_v37, %v5301_v14 }
0x1c5e   : > { %v6444_v29 = vpop.f32.mrf.mxu1 }
0x1c5f   : > { %5465 = vst.msk [vmem:[%s9222_s24 + $0x10] sm:$0xff] %vm736_vm0, %v5457_v54  ;;  %v5455_v23 = vadd.f32 %v5447_v12, %v5417_v62  ;;  %v5428_v59 = vadd.f32 %v6444_v29, %v5316_v57 }
0x1c60   : > { %v5419_v46 = vpop.f32.mrf.mxu1 }
0x1c61   : > { %5463 = vst.msk [vmem:[%s9222_s24] sm:$0xff] %vm736_vm0, %v5455_v23  ;;  %v5458_v52 = vadd.f32 %v5450_v49, %v5428_v59  ;;  %v5420_v42 = vadd.f32 %v5419_v46, %v5306_v40 }
0x1c62   : > { %v6447_v19 = vpop.f32.mrf.mxu1 }
0x1c63   : > { %5466 = vst.msk [vmem:[%s9222_s24 + $0x18] sm:$0xff] %vm736_vm0, %v5458_v52  ;;  %v5441_v61 = vadd.f32 %v6447_v19, %v5331_v41  ;;  %v5456_v34 = vadd.f32 %v5448_v31, %v5420_v42 }
0x1c64   : > { %v5432_v4 = vpop.f32.mrf.mxu1 }
0x1c65   : > { %v5461_v2 = vadd.f32 %v5453_v30, %v5441_v61  ;;  %v5433_v53 = vadd.f32 %v5432_v4, %v5321_v45  ;;  %5464 = vst.msk [vmem:[%s9222_s24 + $0x8] sm:$0xff] %vm736_vm0, %v5456_v34 }
0x1c66   : > { %v6448_v9 = vpop.f32.mrf.mxu1 }
0x1c67   : > { %5469 = vst.msk [vmem:[%s9222_s24 + $0x30] sm:$0xff] %vm736_vm0, %v5461_v2  ;;  %v5459_v58 = vadd.f32 %v5451_v51, %v5433_v53  ;;  %v5444_v16 = vadd.f32 %v6448_v9, %v5336_v27 }
0x1c68   : > { %v5435_v32 = vpop.f32.mrf.mxu1 }
0x1c69   : > { %5467 = vst.msk [vmem:[%s9222_s24 + $0x20] sm:$0xff] %vm736_vm0, %v5459_v58  ;;  %v5462_v15 = vadd.f32 %v5454_v3, %v5444_v16  ;;  %v5436_v1 = vadd.f32 %v5435_v32, %v5326_v22 }
0x1c6b   : > { %5470 = vst.msk [vmem:[%s9222_s24 + $0x38] sm:$0xff] %vm736_vm0, %v5462_v15  ;;  %v5460_v25 = vadd.f32 %v5452_v24, %v5436_v1 }
0x1c6d   : > { %5468 = vst.msk [vmem:[%s9222_s24 + $0x28] sm:$0xff] %vm736_vm0, %v5460_v25 }
0x1c6e   : > { %7248 = shalt.err (!%p7245_p6)
}
0x1c6f   : > { %s7249_s19 = scalar_lea.hbm %s9246_s15, 1024  ;;  %s7253_s11 = scalar_lea.hbm %s9368_s13, 2048 }
0x1c70   : > { %p7250_p8 = scmp.ne.s32.totalorder %s9246_s15, %s7249_s19  ;;  %p7254_p11 = scmp.lt.s32.totalorder %s9246_s15, %s9368_s13 }
0x1c71   : > { %p7255_p2 = scmp.lt.s32.totalorder %s7253_s11, %s7249_s19 }
0x1c72   : > { %p7251_p10 = pnand %p7250_p8, %p9369_p9 }
0x1c73   : > { %p7256_p0 = por %p7255_p2, %p7254_p11 }
0x1c74   : > { %p7252_p7 = pneg %p7251_p10 }
0x1c76   : > { %p7257_p5 = pnand %p7256_p0, %p7252_p7 }
0x1c78   : > { %7260 = shalt.err (!%p7257_p5)
}
0x1c79   : > { %s7343_s20 = smov 128  }
0x1c7a   : > { %6511 = dma.vmem_to_hbm [thread:$0]  (%p9369_p9), %s9250_s8, 1024, %s9246_s15, %s5472_s1, %s7343_s20, %s7343_s20, %s7336_s6  }
0x1c7b PF: > { %s5500_s0 = sand.u32 1, %s7303_s27   ;;  %p9370_p12 = scmp.ne.s32.totalorder %s9351_s18, 0 }
0x1c7c   : > { %p9371_p13 = scmp.ge.s32.totalorder %s7315_s30, 2  ;;  %s5501_s21 = scalar_lea.sflag [#allocation5], %s5500_s0 }
0x1c7e   : > { %p6543_p1 = pnand %p9371_p13, %p9370_p12 }
0x1c80   : > { %p6544_p3 = pneg %p6543_p1 }
0x1c82   : > { %7298 = dma.done.wait (%p6544_p3), %s5501_s21, 1024  }
0x1c83   : > { %7300 = vsyncadd (%p6544_p3), %s5501_s21, 4294966272  ;;  %p35_p4 = scmp.ge.s32.totalorder %s7573_s25, 4   ;;  %s9372_s27 = smov %s7307_s28 }
0x1c84   : > { %s9373_s28 = smov %s7311_s29  ;;  %s9374_s29 = smov %s7584_s22 }
0x1c85   : > { %s9375_s30 = smov %s7573_s25  ;;  %37 = sbr.rel (!%p35_p4) target bundleno = 24 (0x18), region = 172 }
0x1c8a   :  { %5506 = vsyncpa [#allocation4], 1 }
0x1c8b   :  { %5508 = vsyncpa [#allocation4 + $0x1], 1 }
0x1c8c   :  { %5509 = vsyncpa [#allocation7], 1 }
0x1c8d   :  { %5510 = vsyncpa [#allocation10], 1 }
0x1c8e   :  { %5511 = vsyncpa [#allocation13], 1 }
0x1c8f   :  { %5512 = vsyncpa [#allocation16], 1 }
0x1c90   :  { %5513 = vsyncpa [#allocation5], 1 }
0x1c91   :  { %5515 = vsyncpa [#allocation5 + $0x1], 1 }

</bundles_post_ra>
